<compile_context>
chip_gen: v7x
topology: tpu7x:2x2x1
jax: 0.10.0
libtpu: 0.0.40
codegen_flags: <defaults>
</compile_context>

<pallas_src>
import jax
import jax.numpy as jnp
from jax.experimental import pallas as pl
from jax.experimental.pallas import tpu as pltpu


def maskblock_kernel(x_ref, h_ref, w1_ref, b1_ref, w2_ref, b2_ref,
                     w3_ref, gamma_ref, beta_ref, out_ref):
    # Activations stay bf16 for the MXU; accumulation and LN math are f32.
    x = x_ref[...]
    h = h_ref[...]

    # ---- mask_layer: Linear -> ReLU -> Linear (bf16 operands, f32 accum) ----
    t = jnp.dot(x, w1_ref[...], preferred_element_type=jnp.float32) + b1_ref[...]
    t = jnp.maximum(t, 0.0).astype(jnp.bfloat16)
    v_mask = jnp.dot(t, w2_ref[...], preferred_element_type=jnp.float32) + b2_ref[...]

    # ---- hidden_layer: Linear(no bias) -> LayerNorm -> ReLU ----
    z = (v_mask * h.astype(jnp.float32)).astype(jnp.bfloat16)
    y = jnp.dot(z, w3_ref[...], preferred_element_type=jnp.float32)

    # Two-pass LayerNorm statistics (y is resident in vregs, extra pass is cheap).
    mean = jnp.mean(y, axis=-1, keepdims=True)
    centered = y - mean
    var = jnp.mean(centered * centered, axis=-1, keepdims=True)
    y_ln = centered * jax.lax.rsqrt(var + 1e-5) * gamma_ref[...] + beta_ref[...]

    out_ref[...] = jnp.maximum(y_ln, 0.0).astype(out_ref.dtype)


def maskblock_forward(x, h, w1, b1, w2, b2, w3, gamma, beta, *, tile_b=4096):
    """x: [B, input_dim] (bf16), h: [B, hidden_dim] (bf16); weights are [in, out]."""
    B, input_dim = x.shape
    hidden_dim = h.shape[1]
    output_dim = w3.shape[1]

    def round_up(v, m):
        return ((v + m - 1) // m) * m

    # Tile selection: big tiles amortize the ~0.35us per-grid-step overhead
    # (tile_b=4096-8192 is the production sweet spot; ~2.5 KB/row footprint with
    # bf16 streams + f32 temporaries fits v7x's 64 MiB VMEM double-buffered).
    # Cap so the grid keeps >=4 steps when the batch allows: v7x's two
    # TensorCores each get >=2 steps to overlap DMA with compute.
    cap = max(512, round_up(pl.cdiv(B, 4), 8))
    tile_b = min(round_up(tile_b, 8), cap, round_up(B, 8))
    tile_b = max(tile_b, 8)
    grid = (pl.cdiv(B, tile_b),)

    # Weights/params are tiny and resident; one-time bf16 cast puts all three
    # matmuls on the native bf16 MXU path. Biases / LN params stay f32.
    w1 = w1.astype(jnp.bfloat16)
    w2 = w2.astype(jnp.bfloat16)
    w3 = w3.astype(jnp.bfloat16)
    b1 = b1.astype(jnp.float32)
    b2 = b2.astype(jnp.float32)
    gamma = gamma.astype(jnp.float32)
    beta = beta.astype(jnp.float32)

    def row_spec(d):
        return pl.BlockSpec((tile_b, d), lambda i: (i, 0))

    def resident(shape):
        return pl.BlockSpec(shape, lambda i: (0, 0))

    # TODO(synk): for MaskNet's N parallel MaskBlocks (hidden_dim=64 => 50% lane
    # utilization), fuse them into one kernel with lane-dense [T, N*hidden_dim]
    # intermediates and a [T, N*output_dim] output slab, reading X/H once.
    return pl.pallas_call(
        maskblock_kernel,
        out_shape=jax.ShapeDtypeStruct((B, output_dim), jnp.bfloat16),
        grid=grid,
        in_specs=[
            row_spec(input_dim),            # X  (streamed per batch tile, bf16)
            row_spec(hidden_dim),           # H  (streamed per batch tile, bf16)
            resident(w1.shape), resident(b1.shape),
            resident(w2.shape), resident(b2.shape),
            resident(w3.shape), resident(gamma.shape), resident(beta.shape),
        ],
        out_specs=pl.BlockSpec((tile_b, output_dim), lambda i: (i, 0)),
        compiler_params=pltpu.CompilerParams(
            dimension_semantics=("parallel",),
            vmem_limit_bytes=48 * 1024 * 1024),
    )(x, h, w1, b1, w2, b2, w3, gamma, beta)


if __name__ == "__main__":
    # Shapes consistent with MaskBlock(input_dim, hidden_dim, output_dim).
    # output_dim=128 keeps the output lane-dense; B is a non-multiple of the
    # tile so the last grid step exercises partial-block masking, and the
    # auto-capped tile gives a 4-step grid with large (1040-row) tiles.
    B = 4133
    input_dim = 64
    hidden_dim = 64
    output_dim = 128
    reduction_ratio = 1
    red_dim = int(hidden_dim * reduction_ratio)

    key = jax.random.PRNGKey(0)
    ks = jax.random.split(key, 9)

    # Inputs: the producer hands bf16 activations (cast fused upstream, not in
    # the kernel wrapper).
    x = jax.random.normal(ks[0], (B, input_dim), dtype=jnp.float32).astype(jnp.bfloat16)
    h = jax.random.normal(ks[1], (B, hidden_dim), dtype=jnp.float32).astype(jnp.bfloat16)

    # Parameters (deterministic synthetic init; weights stored as [in, out]).
    w1 = jax.random.normal(ks[2], (input_dim, red_dim), dtype=jnp.float32) * 0.1
    b1 = jax.random.normal(ks[3], (1, red_dim), dtype=jnp.float32) * 0.1
    w2 = jax.random.normal(ks[4], (red_dim, hidden_dim), dtype=jnp.float32) * 0.1
    b2 = jax.random.normal(ks[5], (1, hidden_dim), dtype=jnp.float32) * 0.1
    w3 = jax.random.normal(ks[6], (hidden_dim, output_dim), dtype=jnp.float32) * 0.1
    gamma = jnp.ones((1, output_dim), dtype=jnp.float32)
    beta = jnp.zeros((1, output_dim), dtype=jnp.float32)

    out = maskblock_forward(x, h, w1, b1, w2, b2, w3, gamma, beta)
    out = jax.block_until_ready(out)

    # Pure-JAX reference mirroring the kernel's declared mixed-precision recipe
    # (bf16 inputs / weights / intermediate round points), all math in f32.
    xf = x.astype(jnp.float32)
    hf = h.astype(jnp.float32)
    w1b = w1.astype(jnp.bfloat16).astype(jnp.float32)
    w2b = w2.astype(jnp.bfloat16).astype(jnp.float32)
    w3b = w3.astype(jnp.bfloat16).astype(jnp.float32)

    t_ref = jnp.maximum(xf @ w1b + b1, 0.0).astype(jnp.bfloat16).astype(jnp.float32)
    v_mask_ref = t_ref @ w2b + b2
    z_ref = (v_mask_ref * hf).astype(jnp.bfloat16).astype(jnp.float32)
    y_ref = z_ref @ w3b
    mu = jnp.mean(y_ref, axis=-1, keepdims=True)
    va = jnp.mean(jnp.square(y_ref - mu), axis=-1, keepdims=True)
    ref = jnp.maximum((y_ref - mu) / jnp.sqrt(va + 1e-5) * gamma + beta, 0.0)

    assert out.shape == (B, output_dim), f"bad shape {out.shape}"
    assert out.dtype == jnp.bfloat16, f"bad dtype {out.dtype}"
    # Tolerance covers the bf16 rounding of the stored output.
    assert jnp.allclose(out.astype(jnp.float32), ref, atol=2e-2, rtol=2e-2), \
        "mismatch vs reference"

    print("KERNEL_OK")
</pallas_src>

<mosaic_0001>
module attributes {stable_mosaic.version = 11 : i64} {
  func.func @maskblock_kernel(%arg0: i32, %arg1: memref<1040x64xbf16, #tpu.memory_space<vmem>>, %arg2: memref<1040x64xbf16, #tpu.memory_space<vmem>>, %arg3: memref<64x64xbf16, #tpu.memory_space<vmem>>, %arg4: memref<1x64xf32, #tpu.memory_space<vmem>>, %arg5: memref<64x64xbf16, #tpu.memory_space<vmem>>, %arg6: memref<1x64xf32, #tpu.memory_space<vmem>>, %arg7: memref<64x128xbf16, #tpu.memory_space<vmem>>, %arg8: memref<1x128xf32, #tpu.memory_space<vmem>>, %arg9: memref<1x128xf32, #tpu.memory_space<vmem>>, %arg10: memref<1040x128xbf16, #tpu.memory_space<vmem>>) attributes {dimension_semantics = [#tpu.dimension_semantics<parallel>], iteration_bounds = array<i64: 4>, scalar_prefetch = 0 : i64, scratch_operands = 0 : i64, tpu.core_type = #tpu.core_type<tc>, window_params = [{transform_indices = @transform_0, window_bounds = array<i64: 1040, 64>}, {transform_indices = @transform_1, window_bounds = array<i64: 1040, 64>}, {pipeline_mode = #tpu.pipeline_mode<synchronous>, transform_indices = @transform_2, window_bounds = array<i64: 64, 64>}, {pipeline_mode = #tpu.pipeline_mode<synchronous>, transform_indices = @transform_3, window_bounds = array<i64: 1, 64>}, {pipeline_mode = #tpu.pipeline_mode<synchronous>, transform_indices = @transform_4, window_bounds = array<i64: 64, 64>}, {pipeline_mode = #tpu.pipeline_mode<synchronous>, transform_indices = @transform_5, window_bounds = array<i64: 1, 64>}, {pipeline_mode = #tpu.pipeline_mode<synchronous>, transform_indices = @transform_6, window_bounds = array<i64: 64, 128>}, {pipeline_mode = #tpu.pipeline_mode<synchronous>, transform_indices = @transform_7, window_bounds = array<i64: 1, 128>}, {pipeline_mode = #tpu.pipeline_mode<synchronous>, transform_indices = @transform_8, window_bounds = array<i64: 1, 128>}, {transform_indices = @transform_9, window_bounds = array<i64: 1040, 128>}]} {
    %c0 = arith.constant 0 : index
    %c0_0 = arith.constant 0 : index
    %0 = vector.load %arg1[%c0, %c0_0] : memref<1040x64xbf16, #tpu.memory_space<vmem>>, vector<1040x64xbf16>
    %c0_1 = arith.constant 0 : index
    %c0_2 = arith.constant 0 : index
    %1 = vector.load %arg2[%c0_1, %c0_2] : memref<1040x64xbf16, #tpu.memory_space<vmem>>, vector<1040x64xbf16>
    %c0_3 = arith.constant 0 : index
    %c0_4 = arith.constant 0 : index
    %2 = vector.load %arg3[%c0_3, %c0_4] : memref<64x64xbf16, #tpu.memory_space<vmem>>, vector<64x64xbf16>
    %cst = arith.constant dense<0.000000e+00> : vector<1040x64xf32>
    %3 = tpu.matmul %0, %2, %cst {dimension_numbers = #tpu.dot_dimension_numbers<[1], [0], [0], [1], [0, 0, 1, 1], [], []>} : vector<1040x64xbf16>, vector<64x64xbf16>, vector<1040x64xf32> -> vector<1040x64xf32>
    %c0_5 = arith.constant 0 : index
    %c0_6 = arith.constant 0 : index
    %4 = vector.load %arg4[%c0_5, %c0_6] : memref<1x64xf32, #tpu.memory_space<vmem>>, vector<1x64xf32>
    %5 = vector.broadcast %4 : vector<1x64xf32> to vector<1040x64xf32>
    %6 = arith.addf %3, %5 : vector<1040x64xf32>
    %cst_7 = arith.constant 0.000000e+00 : f32
    %7 = vector.broadcast %cst_7 : f32 to vector<1040x64xf32>
    %8 = arith.maximumf %6, %7 : vector<1040x64xf32>
    %9 = arith.truncf %8 : vector<1040x64xf32> to vector<1040x64xbf16>
    %c0_8 = arith.constant 0 : index
    %c0_9 = arith.constant 0 : index
    %10 = vector.load %arg5[%c0_8, %c0_9] : memref<64x64xbf16, #tpu.memory_space<vmem>>, vector<64x64xbf16>
    %cst_10 = arith.constant dense<0.000000e+00> : vector<1040x64xf32>
    %11 = tpu.matmul %9, %10, %cst_10 {dimension_numbers = #tpu.dot_dimension_numbers<[1], [0], [0], [1], [0, 0, 1, 1], [], []>} : vector<1040x64xbf16>, vector<64x64xbf16>, vector<1040x64xf32> -> vector<1040x64xf32>
    %c0_11 = arith.constant 0 : index
    %c0_12 = arith.constant 0 : index
    %12 = vector.load %arg6[%c0_11, %c0_12] : memref<1x64xf32, #tpu.memory_space<vmem>>, vector<1x64xf32>
    %13 = vector.broadcast %12 : vector<1x64xf32> to vector<1040x64xf32>
    %14 = arith.addf %11, %13 : vector<1040x64xf32>
    %15 = arith.extf %1 : vector<1040x64xbf16> to vector<1040x64xf32>
    %16 = arith.mulf %14, %15 : vector<1040x64xf32>
    %17 = arith.truncf %16 : vector<1040x64xf32> to vector<1040x64xbf16>
    %c0_13 = arith.constant 0 : index
    %c0_14 = arith.constant 0 : index
    %18 = vector.load %arg7[%c0_13, %c0_14] : memref<64x128xbf16, #tpu.memory_space<vmem>>, vector<64x128xbf16>
    %cst_15 = arith.constant dense<0.000000e+00> : vector<1040x128xf32>
    %19 = tpu.matmul %17, %18, %cst_15 {dimension_numbers = #tpu.dot_dimension_numbers<[1], [0], [0], [1], [0, 0, 1, 1], [], []>} : vector<1040x64xbf16>, vector<64x128xbf16>, vector<1040x128xf32> -> vector<1040x128xf32>
    %cst_16 = arith.constant dense<0.000000e+00> : vector<1040xf32>
    %20 = vector.multi_reduction <add>, %19, %cst_16 [1] : vector<1040x128xf32> to vector<1040xf32>
    %21 = vector.shape_cast %20 : vector<1040xf32> to vector<1040x1xf32>
    %cst_17 = arith.constant 1.280000e+02 : f32
    %22 = vector.broadcast %cst_17 : f32 to vector<1040x1xf32>
    %23 = arith.divf %21, %22 : vector<1040x1xf32>
    %24 = vector.broadcast %23 : vector<1040x1xf32> to vector<1040x128xf32>
    %25 = arith.subf %19, %24 : vector<1040x128xf32>
    %26 = arith.mulf %25, %25 : vector<1040x128xf32>
    %cst_18 = arith.constant dense<0.000000e+00> : vector<1040xf32>
    %27 = vector.multi_reduction <add>, %26, %cst_18 [1] : vector<1040x128xf32> to vector<1040xf32>
    %28 = vector.shape_cast %27 : vector<1040xf32> to vector<1040x1xf32>
    %cst_19 = arith.constant 1.280000e+02 : f32
    %29 = vector.broadcast %cst_19 : f32 to vector<1040x1xf32>
    %30 = arith.divf %28, %29 : vector<1040x1xf32>
    %cst_20 = arith.constant 9.99999974E-6 : f32
    %31 = vector.broadcast %cst_20 : f32 to vector<1040x1xf32>
    %32 = arith.addf %30, %31 : vector<1040x1xf32>
    %33 = math.rsqrt %32 : vector<1040x1xf32>
    %34 = vector.broadcast %33 : vector<1040x1xf32> to vector<1040x128xf32>
    %35 = arith.mulf %25, %34 : vector<1040x128xf32>
    %c0_21 = arith.constant 0 : index
    %c0_22 = arith.constant 0 : index
    %36 = vector.load %arg8[%c0_21, %c0_22] : memref<1x128xf32, #tpu.memory_space<vmem>>, vector<1x128xf32>
    %37 = vector.broadcast %36 : vector<1x128xf32> to vector<1040x128xf32>
    %38 = arith.mulf %35, %37 : vector<1040x128xf32>
    %c0_23 = arith.constant 0 : index
    %c0_24 = arith.constant 0 : index
    %39 = vector.load %arg9[%c0_23, %c0_24] : memref<1x128xf32, #tpu.memory_space<vmem>>, vector<1x128xf32>
    %40 = vector.broadcast %39 : vector<1x128xf32> to vector<1040x128xf32>
    %41 = arith.addf %38, %40 : vector<1040x128xf32>
    %cst_25 = arith.constant 0.000000e+00 : f32
    %42 = vector.broadcast %cst_25 : f32 to vector<1040x128xf32>
    %43 = arith.maximumf %41, %42 : vector<1040x128xf32>
    %44 = arith.truncf %43 : vector<1040x128xf32> to vector<1040x128xbf16>
    %c0_26 = arith.constant 0 : index
    %c0_27 = arith.constant 0 : index
    %45 = vector.load %arg10[%c0_26, %c0_27] : memref<1040x128xbf16, #tpu.memory_space<vmem>>, vector<1040x128xbf16>
    tpu.vector_store %arg10[%c0_26, %c0_27], %44 {strides = array<i32>} : memref<1040x128xbf16, #tpu.memory_space<vmem>>, vector<1040x128xbf16>,
    return
  }
  func.func @transform_0(%arg0: i32) -> (i32, i32) {
    %c0_i32 = arith.constant 0 : i32
    %c0_i32_0 = arith.constant 0 : i32
    return %arg0, %c0_i32 : i32, i32
  }
  func.func @transform_1(%arg0: i32) -> (i32, i32) {
    %c0_i32 = arith.constant 0 : i32
    %c0_i32_0 = arith.constant 0 : i32
    return %arg0, %c0_i32 : i32, i32
  }
  func.func @transform_2(%arg0: i32) -> (i32, i32) {
    %c0_i32 = arith.constant 0 : i32
    %c0_i32_0 = arith.constant 0 : i32
    %c0_i32_1 = arith.constant 0 : i32
    return %c0_i32, %c0_i32_0 : i32, i32
  }
  func.func @transform_3(%arg0: i32) -> (i32, i32) {
    %c0_i32 = arith.constant 0 : i32
    %c0_i32_0 = arith.constant 0 : i32
    %c0_i32_1 = arith.constant 0 : i32
    return %c0_i32, %c0_i32_0 : i32, i32
  }
  func.func @transform_4(%arg0: i32) -> (i32, i32) {
    %c0_i32 = arith.constant 0 : i32
    %c0_i32_0 = arith.constant 0 : i32
    %c0_i32_1 = arith.constant 0 : i32
    return %c0_i32, %c0_i32_0 : i32, i32
  }
  func.func @transform_5(%arg0: i32) -> (i32, i32) {
    %c0_i32 = arith.constant 0 : i32
    %c0_i32_0 = arith.constant 0 : i32
    %c0_i32_1 = arith.constant 0 : i32
    return %c0_i32, %c0_i32_0 : i32, i32
  }
  func.func @transform_6(%arg0: i32) -> (i32, i32) {
    %c0_i32 = arith.constant 0 : i32
    %c0_i32_0 = arith.constant 0 : i32
    %c0_i32_1 = arith.constant 0 : i32
    return %c0_i32, %c0_i32_0 : i32, i32
  }
  func.func @transform_7(%arg0: i32) -> (i32, i32) {
    %c0_i32 = arith.constant 0 : i32
    %c0_i32_0 = arith.constant 0 : i32
    %c0_i32_1 = arith.constant 0 : i32
    return %c0_i32, %c0_i32_0 : i32, i32
  }
  func.func @transform_8(%arg0: i32) -> (i32, i32) {
    %c0_i32 = arith.constant 0 : i32
    %c0_i32_0 = arith.constant 0 : i32
    %c0_i32_1 = arith.constant 0 : i32
    return %c0_i32, %c0_i32_0 : i32, i32
  }
  func.func @transform_9(%arg0: i32) -> (i32, i32) {
    %c0_i32 = arith.constant 0 : i32
    %c0_i32_0 = arith.constant 0 : i32
    return %arg0, %c0_i32 : i32, i32
  }
}

</mosaic_0001>

<bundles_post_ra>
// kernel: tpu_custom_call.1
= control target key start
LH: loop header
LB: loop body
LE: loop exit
PB: predicated region body
PF: predicated region fallthrough
CT: control target
= control target key end

     0   :  { %14 = vsyncpa [#allocation3], 0  ;;  %s12153_s0 = inlined_call_operand.vmem [shape: bf16[4133,64], index: 0, kind: input, shape index: {}]   ;;  %s12154_s1 = inlined_call_operand.vmem [shape: bf16[4133,64], index: 1, kind: input, shape index: {}]   ;;  %s12155_s2 = inlined_call_operand.vmem [shape: bf16[64,64], index: 2, kind: input, shape index: {}]   ;;  %s12156_s3 = inlined_call_operand.vmem [shape: f32[1,64], index: 3, kind: input, shape index: {}]   ;;  %s12157_s4 = inlined_call_operand.vmem [shape: bf16[64,64], index: 4, kind: input, shape index: {}]   ;;  %s12158_s5 = inlined_call_operand.vmem [shape: f32[1,64], index: 5, kind: input, shape index: {}]   ;;  %s12159_s6 = inlined_call_operand.vmem [shape: bf16[64,128], index: 6, kind: input, shape index: {}]   ;;  %s12160_s7 = inlined_call_operand.vmem [shape: f32[1,128], index: 7, kind: input, shape index: {}]   ;;  %s12161_s8 = inlined_call_operand.vmem [shape: f32[1,128], index: 8, kind: input, shape index: {}]   ;;  %s12162_s9 = inlined_call_operand.hbm [shape: bf16[4133,128], index: 9, kind: output, shape index: {}]  }
   0x1   :  { %16 = vsyncpa [#allocation3 + $0x1], 0  ;;  %s9230_s30 = smov 0   ;;  %s9232_s10 = smov 0  }
   0x2   :  { %s9234_s11 = smov 0   ;;  %s9236_s12 = smov 0  }
   0x3 LB: > { %s9251_s13 = sadd.s32 4294967295, %s9173_s12   ;;  %s6440_s14 = sadd.s32 4294967294, %s9173_s12   ;;  %s9173_s12 = sphi %s9236_s12, %s12399_s12   ;;  %s9169_s11 = sphi %s9234_s11, %s12398_s11   ;;  %s9165_s10 = sphi %s9232_s10, %s12397_s10   ;;  %s9161_s30 = sphi %s9230_s30, %s12396_s30  }
   0x4   : > { %s9255_s15 = sadd.s32 1, %s9173_s12   ;;  %s228_s16 = sadd.s32 1, %s9169_s11 }
   0x5   : > { %s225_s17 = ssub.s32 %s9173_s12, %s9255_s15  ;;  %p238_p0 = scmp.ne.s32.totalorder %s9169_s11, %s9165_s10 }
   0x6   : > { %p226_p1 = scmp.eq.s32.totalorder %s225_s17, 0  ;;  %p239_p2 = scmp.eq.s32.totalorder %s9251_s13, 3 }
   0x7   : > { %p244_p3 = scmp.ne.s32.totalorder %s9165_s10, %s9161_s30  ;;  %p245_p4 = scmp.eq.s32.totalorder %s6440_s14, 3 }
   0x8   : > { %s9266_s18 = scalar_select %p226_p1, %s9169_s11, %s228_s16  }
   0x9   : > { %p9268_p5 = por %p239_p2, %p238_p0  ;;  %p9272_p6 = por %p245_p4, %p244_p3 }
   0xa   : > { %p6443_p7 = scmp.ge.s32.totalorder %s9173_s12, 1  ;;  %p318_p8 = scmp.lt.s32.totalorder %s9173_s12, 5 }
   0xc   : > { %p319_p9 = pnand %p6443_p7, %p318_p8 }
   0xe   : > { %322 = sbr.rel (%p319_p9) target bundleno = 1585 (0x631), region = 56 }
  0x15   : > { %v8765_v0 = vld [vmem:[%s12155_s2] sm:$0xff]   ;;  %v12163_v1 = vmov 0.0   ;;  %v8766_v2 = vld [vmem:[%s12155_s2 + $0x8] sm:$0xff]   ;;  %vm9176_vm0 = vmmov 0   ;;  %s9289_s25 = smul.u32 130, %s9251_s13  ;;  %v8767_v3 = vld [vmem:[%s12155_s2 + $0x10] sm:$0xff]  }
  0x16   : > { %8714 = vmatprep.subr.bf16.mxu1 %v12163_v1  ;;  %7910 = vmatprep.subr.bf16.mxu0 %v12163_v1  ;;  %v8768_v4 = vld [vmem:[%s12155_s2 + $0x18] sm:$0xff]   ;;  %vm1025_vm1 = vcmask 523264   ;;  %v8770_v6 = vld [vmem:[%s12157_s4] sm:$0xff]   ;;  %v8783_v8 = vld [vmem:[%s12157_s4 + $0x8] sm:$0xff]  }
  0x17   : > { %8718 = vmatpush3.bf16.msra.mxu1 %v8765_v0  ;;  %8050 = vmatprep.mubr.msk.bf16.mxu1 %vm9176_vm0, %v12163_v1  ;;  %p372_p10 = scmp.lt.s32.totalorder %s9289_s25, 516  ;;  %v8800_v15 = vld [vmem:[%s12157_s4 + $0x10] sm:$0xff]   ;;  %v8817_v26 = vld [vmem:[%s12157_s4 + $0x18] sm:$0xff]   ;;  %v8823_v33 = vld [vmem:[%s12159_s6] sm:$0xff]   ;;  %s6355_s24 = ssub.s32 (%p9268_p5), 517, %s9289_s25 }
  0x18   : > { %8715 = vmatprep.subr.bf16.mxu1 %v12163_v1  ;;  %7911 = vmatpush3.bf16.msra.mxu0 %v8765_v0  ;;  %v8837_v50 = vld [vmem:[%s12159_s6 + $0x8] sm:$0xff]   ;;  %p6356_p11 = scmp.lt.s32.totalorder (%p9268_p5), %s6355_s24, 130 }
  0x19   : > { %7912 = vmatprep.subr.bf16.mxu0 %v12163_v1  ;;  %7918 = vmatprep.mubr.msk.bf16.mxu0 %vm9176_vm0, %v12163_v1  ;;  %s9300_s28 = scalar_select %p372_p10, %s9289_s25, 516 }
  0x1b   : > { %8719 = vmatpush3.bf16.msra.mxu1 %v8766_v2  ;;  %s6444_s29 = sshll.u32 %s9300_s28, 2 }
  0x1c   : > { %8716 = vmatprep.subr.bf16.mxu1 %v12163_v1  ;;  %7913 = vmatpush3.bf16.msra.mxu0 %v8766_v2  ;;  %s9310_s17 = scalar_lea.vmem %s12153_s0, %s6444_s29  ;;  %v9556_v2 = vld [vmem:[%s12156_s3] ss:$0 sm:$0xff]  ;;  %s9978_s16 = scalar_lea.vmem %s12154_s1, %s6444_s29 }
  0x1d   : > { %7914 = vmatprep.subr.bf16.mxu0 %v12163_v1  ;;  %v8769_v5 = vld [vmem:[%s9310_s17 + $0x108] sm:$0xff]   ;;  %v8775_v7 = vld [vmem:[%s9310_s17] sm:$0xff]   ;;  %v8771_v9 = vld [vmem:[%s9310_s17 + $0x110] sm:$0xff]  }
  0x1e   : > { %v8777_v10 = vld [vmem:[%s9310_s17 + $0x8] sm:$0xff]   ;;  %v8772_v11 = vld [vmem:[%s9310_s17 + $0x118] sm:$0xff]   ;;  %v8779_v12 = vld [vmem:[%s9310_s17 + $0x10] sm:$0xff]  }
  0x1f   : > { %8720 = vmatpush3.bf16.msra.mxu1 %v8767_v3  ;;  %v8773_v13 = vld [vmem:[%s9310_s17 + $0x120] sm:$0xff]   ;;  %v8781_v14 = vld [vmem:[%s9310_s17 + $0x18] sm:$0xff]   ;;  %v8774_v16 = vld [vmem:[%s9310_s17 + $0x128] sm:$0xff]  }
  0x20   : > { %8717 = vmatprep.subr.bf16.mxu1 %v12163_v1  ;;  %7915 = vmatpush3.bf16.msra.mxu0 %v8767_v3  ;;  %v8784_v17 = vld [vmem:[%s9310_s17 + $0x20] sm:$0xff]   ;;  %v8776_v18 = vld [vmem:[%s9310_s17 + $0x130] sm:$0xff]   ;;  %v8786_v19 = vld [vmem:[%s9310_s17 + $0x28] sm:$0xff]  }
  0x21   : > { %7916 = vmatprep.subr.bf16.mxu0 %v12163_v1  ;;  %v8778_v20 = vld [vmem:[%s9310_s17 + $0x138] sm:$0xff]   ;;  %v8788_v21 = vld [vmem:[%s9310_s17 + $0x30] sm:$0xff]   ;;  %v8780_v22 = vld [vmem:[%s9310_s17 + $0x140] sm:$0xff]  }
  0x22   : > { %v8790_v23 = vld [vmem:[%s9310_s17 + $0x38] sm:$0xff]   ;;  %v8782_v24 = vld [vmem:[%s9310_s17 + $0x148] sm:$0xff]   ;;  %v8792_v25 = vld [vmem:[%s9310_s17 + $0x40] sm:$0xff]  }
  0x23   : > { %8721 = vmatpush3.bf16.msra.mxu1 %v8768_v4  ;;  %v8785_v27 = vld [vmem:[%s9310_s17 + $0x150] sm:$0xff]   ;;  %v8794_v28 = vld [vmem:[%s9310_s17 + $0x48] sm:$0xff]   ;;  %v8787_v29 = vld [vmem:[%s9310_s17 + $0x158] sm:$0xff]  }
  0x24   : > { %8178 = vmatprep.subr.bf16.mxu1 %v12163_v1  ;;  %7917 = vmatpush3.bf16.msra.mxu0 %v8768_v4  ;;  %v8796_v30 = vld [vmem:[%s9310_s17 + $0x50] sm:$0xff]   ;;  %v8789_v31 = vld [vmem:[%s9310_s17 + $0x160] sm:$0xff]   ;;  %v8798_v32 = vld [vmem:[%s9310_s17 + $0x58] sm:$0xff]  }
  0x25   : > { %8446 = vmatprep.subr.bf16.mxu0 %v12163_v1  ;;  %v8791_v34 = vld [vmem:[%s9310_s17 + $0x168] sm:$0xff]   ;;  %v8801_v35 = vld [vmem:[%s9310_s17 + $0x60] sm:$0xff]   ;;  %v8793_v36 = vld [vmem:[%s9310_s17 + $0x170] sm:$0xff]  }
  0x26   : > { %8051 = vmatmul.mubr.msk.bf16.vlgmr.msra.gmra.mrb[0].mxu1 %vm1025_vm1, %v8769_v5  ;;  %v8803_v37 = vld [vmem:[%s9310_s17 + $0x68] sm:$0xff]   ;;  %v8795_v38 = vld [vmem:[%s9310_s17 + $0x178] sm:$0xff]   ;;  %v8805_v39 = vld [vmem:[%s9310_s17 + $0x70] sm:$0xff]  }
  0x27   : > { %8179 = vmatpush3.bf16.msra.mxu1 %v8770_v6  ;;  %8054 = vmatprep.mubr.msk.bf16.mxu1 %vm9176_vm0, %v12163_v1  ;;  %v8797_v40 = vld [vmem:[%s9310_s17 + $0x180] sm:$0xff]   ;;  %v8807_v41 = vld [vmem:[%s9310_s17 + $0x78] sm:$0xff]   ;;  %v8799_v42 = vld [vmem:[%s9310_s17 + $0x188] sm:$0xff]  }
  0x28   : > { %7919 = vmatmul.mubr.msk.bf16.vlgmr.msra.gmra.mrb[0].mxu0 %vm1025_vm1, %v8775_v7  ;;  %8180 = vmatprep.subr.bf16.mxu1 %v12163_v1  ;;  %v8809_v43 = vld [vmem:[%s9310_s17 + $0x80] sm:$0xff]   ;;  %v8802_v44 = vld [vmem:[%s9310_s17 + $0x190] sm:$0xff]   ;;  %v8811_v45 = vld [vmem:[%s9310_s17 + $0x88] sm:$0xff]  }
  0x29   : > { %7922 = vmatprep.mubr.msk.bf16.mxu0 %vm9176_vm0, %v12163_v1  ;;  %8447 = vmatpush3.bf16.msra.mxu0 %v8823_v33  ;;  %v8804_v46 = vld [vmem:[%s9310_s17 + $0x198] sm:$0xff]   ;;  %v8813_v47 = vld [vmem:[%s9310_s17 + $0x90] sm:$0xff]   ;;  %v8806_v48 = vld [vmem:[%s9310_s17 + $0x1a0] sm:$0xff]  }
  0x2a   : > { %8448 = vmatprep.subr.bf16.mxu0 %v12163_v1  ;;  %v8815_v49 = vld [vmem:[%s9310_s17 + $0x98] sm:$0xff]   ;;  %v8808_v51 = vld [vmem:[%s9310_s17 + $0x1a8] sm:$0xff]   ;;  %v8818_v52 = vld [vmem:[%s9310_s17 + $0xa0] sm:$0xff]  }
  0x2b   : > { %8181 = vmatpush3.bf16.msra.mxu1 %v8783_v8  ;;  %v8810_v53 = vld [vmem:[%s9310_s17 + $0x1b0] sm:$0xff]   ;;  %v8820_v54 = vld [vmem:[%s9310_s17 + $0xa8] sm:$0xff]   ;;  %v8812_v55 = vld [vmem:[%s9310_s17 + $0x1b8] sm:$0xff]  }
  0x2c   : > { %8182 = vmatprep.subr.bf16.mxu1 %v12163_v1  ;;  %v8822_v56 = vld [vmem:[%s9310_s17 + $0xb0] sm:$0xff]   ;;  %v8814_v57 = vld [vmem:[%s9310_s17 + $0x1c0] sm:$0xff]   ;;  %v8825_v58 = vld [vmem:[%s9310_s17 + $0xb8] sm:$0xff]  }
  0x2d   : > { %8449 = vmatpush3.bf16.msra.mxu0 %v8837_v50  ;;  %v8816_v59 = vld [vmem:[%s9310_s17 + $0x1c8] sm:$0xff]   ;;  %v8827_v60 = vld [vmem:[%s9310_s17 + $0xc0] sm:$0xff]   ;;  %v8819_v61 = vld [vmem:[%s9310_s17 + $0x1d0] sm:$0xff]  }
  0x2e   : > { %8055 = vmatmul.mubr.msk.bf16.gmra.mrb[4].mxu1 %vm1025_vm1, %v8771_v9  ;;  %8450 = vmatprep.subr.bf16.mxu0 %v12163_v1  ;;  %v8829_v62 = vld [vmem:[%s9310_s17 + $0xc8] sm:$0xff]   ;;  %v8821_v63 = vld [vmem:[%s9310_s17 + $0x1d8] sm:$0xff]   ;;  %v8831_v0 = vld [vmem:[%s9310_s17 + $0xd0] sm:$0xff]  }
  0x2f   : > { %8058 = vmatprep.mubr.msk.bf16.mxu1 %vm9176_vm0, %v12163_v1  ;;  %8183 = vmatpush3.bf16.msra.mxu1 %v8800_v15  ;;  %v8824_v6 = vld [vmem:[%s9310_s17 + $0x1e0] sm:$0xff]  }
  0x30   : > { %7923 = vmatmul.mubr.msk.bf16.gmra.mrb[4].mxu0 %vm1025_vm1, %v8777_v10  ;;  %8184 = vmatprep.subr.bf16.mxu1 %v12163_v1 }
  0x31   : > { %7926 = vmatprep.mubr.msk.bf16.mxu0 %vm9176_vm0, %v12163_v1 }
  0x33   : > { %8185 = vmatpush3.bf16.msra.mxu1 %v8817_v26  ;;  %v8826_v26 = vld [vmem:[%s9310_s17 + $0x1e8] sm:$0xff]  }
  0x36   : > { %8059 = vmatmul.mubr.msk.bf16.gmra.mrb[8].mxu1 %vm1025_vm1, %v8772_v11 }
  0x37   : > { %8062 = vmatprep.mubr.msk.bf16.mxu1 %vm9176_vm0, %v12163_v1 }
  0x38   : > { %7927 = vmatmul.mubr.msk.bf16.gmra.mrb[8].mxu0 %vm1025_vm1, %v8779_v12 }
  0x39   : > { %7930 = vmatprep.mubr.msk.bf16.mxu0 %vm9176_vm0, %v12163_v1 }
  0x3e   : > { %8063 = vmatmul.mubr.msk.bf16.gmra.mrb[12].mxu1 %vm1025_vm1, %v8773_v13  ;;  %v8833_v13 = vld [vmem:[%s9310_s17 + $0xd8] sm:$0xff]  }
  0x3f   : > { %8066 = vmatprep.mubr.msk.bf16.mxu1 %vm9176_vm0, %v12163_v1 }
  0x40   : > { %7931 = vmatmul.mubr.msk.bf16.gmra.mrb[12].mxu0 %vm1025_vm1, %v8781_v14 }
  0x41   : > { %7934 = vmatprep.mubr.msk.bf16.mxu0 %vm9176_vm0, %v12163_v1 }
  0x46   : > { %8067 = vmatmul.mubr.msk.bf16.gmra.mrb[16].mxu1 %vm1025_vm1, %v8774_v16 }
  0x47   : > { %8070 = vmatprep.mubr.msk.bf16.mxu1 %vm9176_vm0, %v12163_v1 }
  0x48   : > { %7935 = vmatmul.mubr.msk.bf16.gmra.mrb[16].mxu0 %vm1025_vm1, %v8784_v17 }
  0x49   : > { %7938 = vmatprep.mubr.msk.bf16.mxu0 %vm9176_vm0, %v12163_v1 }
  0x4e   : > { %8071 = vmatmul.mubr.msk.bf16.gmra.mrb[20].mxu1 %vm1025_vm1, %v8776_v18 }
  0x4f   : > { %8074 = vmatprep.mubr.msk.bf16.mxu1 %vm9176_vm0, %v12163_v1 }
  0x50   : > { %7939 = vmatmul.mubr.msk.bf16.gmra.mrb[20].mxu0 %vm1025_vm1, %v8786_v19 }
  0x51   : > { %7942 = vmatprep.mubr.msk.bf16.mxu0 %vm9176_vm0, %v12163_v1 }
  0x56   : > { %8075 = vmatmul.mubr.msk.bf16.gmra.mrb[24].mxu1 %vm1025_vm1, %v8778_v20 }
  0x57   : > { %8078 = vmatprep.mubr.msk.bf16.mxu1 %vm9176_vm0, %v12163_v1 }
  0x58   : > { %7943 = vmatmul.mubr.msk.bf16.gmra.mrb[24].mxu0 %vm1025_vm1, %v8788_v21 }
  0x59   : > { %7946 = vmatprep.mubr.msk.bf16.mxu0 %vm9176_vm0, %v12163_v1 }
  0x5e   : > { %8079 = vmatmul.mubr.msk.bf16.gmra.mrb[28].mxu1 %vm1025_vm1, %v8780_v22  ;;  %v8840_v22 = vld [vmem:[%s12159_s6 + $0x10] sm:$0xff]  }
  0x5f   : > { %8082 = vmatprep.mubr.msk.bf16.mxu1 %vm9176_vm0, %v12163_v1  ;;  %8451 = vmatpush3.bf16.msra.mxu0 %v8840_v22 }
  0x60   : > { %7947 = vmatmul.mubr.msk.bf16.gmra.mrb[28].mxu0 %vm1025_vm1, %v8790_v23  ;;  %8452 = vmatprep.subr.bf16.mxu0 %v12163_v1 }
  0x61   : > { %7950 = vmatprep.mubr.msk.bf16.mxu0 %vm9176_vm0, %v12163_v1 }
  0x66   : > { %8083 = vmatmul.mubr.msk.bf16.gmra.mrb[32].mxu1 %vm1025_vm1, %v8782_v24 }
  0x67   : > { %8086 = vmatprep.mubr.msk.bf16.mxu1 %vm9176_vm0, %v12163_v1 }
  0x68   : > { %7951 = vmatmul.mubr.msk.bf16.gmra.mrb[32].mxu0 %vm1025_vm1, %v8792_v25 }
  0x69   : > { %7954 = vmatprep.mubr.msk.bf16.mxu0 %vm9176_vm0, %v12163_v1 }
  0x6e   : > { %8087 = vmatmul.mubr.msk.bf16.gmra.mrb[36].mxu1 %vm1025_vm1, %v8785_v27 }
  0x6f   : > { %8090 = vmatprep.mubr.msk.bf16.mxu1 %vm9176_vm0, %v12163_v1 }
  0x70   : > { %7955 = vmatmul.mubr.msk.bf16.gmra.mrb[36].mxu0 %vm1025_vm1, %v8794_v28 }
  0x71   : > { %7958 = vmatprep.mubr.msk.bf16.mxu0 %vm9176_vm0, %v12163_v1 }
  0x76   : > { %8091 = vmatmul.mubr.msk.bf16.gmra.mrb[40].mxu1 %vm1025_vm1, %v8787_v29 }
  0x77   : > { %8094 = vmatprep.mubr.msk.bf16.mxu1 %vm9176_vm0, %v12163_v1 }
  0x78   : > { %7959 = vmatmul.mubr.msk.bf16.gmra.mrb[40].mxu0 %vm1025_vm1, %v8796_v30 }
  0x79   : > { %7962 = vmatprep.mubr.msk.bf16.mxu0 %vm9176_vm0, %v12163_v1 }
  0x7e   : > { %8095 = vmatmul.mubr.msk.bf16.gmra.mrb[44].mxu1 %vm1025_vm1, %v8789_v31 }
  0x7f   : > { %8098 = vmatprep.mubr.msk.bf16.mxu1 %vm9176_vm0, %v12163_v1 }
  0x80   : > { %7963 = vmatmul.mubr.msk.bf16.gmra.mrb[44].mxu0 %vm1025_vm1, %v8798_v32 }
  0x81   : > { %7966 = vmatprep.mubr.msk.bf16.mxu0 %vm9176_vm0, %v12163_v1 }
  0x86   : > { %8099 = vmatmul.mubr.msk.bf16.gmra.mrb[48].mxu1 %vm1025_vm1, %v8791_v34  ;;  %v8834_v34 = vld [vmem:[%s9310_s17 + $0xe0] sm:$0xff]  }
  0x87   : > { %8102 = vmatprep.mubr.msk.bf16.mxu1 %vm9176_vm0, %v12163_v1 }
  0x88   : > { %7967 = vmatmul.mubr.msk.bf16.gmra.mrb[48].mxu0 %vm1025_vm1, %v8801_v35 }
  0x89   : > { %7970 = vmatprep.mubr.msk.bf16.mxu0 %vm9176_vm0, %v12163_v1 }
  0x8e   : > { %8103 = vmatmul.mubr.msk.bf16.gmra.mrb[52].mxu1 %vm1025_vm1, %v8793_v36 }
  0x8f   : > { %8106 = vmatprep.mubr.msk.bf16.mxu1 %vm9176_vm0, %v12163_v1 }
  0x90   : > { %7971 = vmatmul.mubr.msk.bf16.gmra.mrb[52].mxu0 %vm1025_vm1, %v8803_v37 }
  0x91   : > { %7974 = vmatprep.mubr.msk.bf16.mxu0 %vm9176_vm0, %v12163_v1 }
  0x96   : > { %8107 = vmatmul.mubr.msk.bf16.gmra.mrb[56].mxu1 %vm1025_vm1, %v8795_v38 }
  0x97   : > { %8110 = vmatprep.mubr.msk.bf16.mxu1 %vm9176_vm0, %v12163_v1 }
  0x98   : > { %7975 = vmatmul.mubr.msk.bf16.gmra.mrb[56].mxu0 %vm1025_vm1, %v8805_v39 }
  0x99   : > { %7978 = vmatprep.mubr.msk.bf16.mxu0 %vm9176_vm0, %v12163_v1 }
  0x9e   : > { %8111 = vmatmul.mubr.msk.bf16.gmra.mrb[60].mxu1 %vm1025_vm1, %v8797_v40 }
  0x9f   : > { %8114 = vmatprep.mubr.msk.bf16.mxu1 %vm9176_vm0, %v12163_v1 }
  0xa0   : > { %7979 = vmatmul.mubr.msk.bf16.gmra.mrb[60].mxu0 %vm1025_vm1, %v8807_v41 }
  0xa1   : > { %7982 = vmatprep.mubr.msk.bf16.mxu0 %vm9176_vm0, %v12163_v1 }
  0xa6   : > { %8115 = vmatmul.mubr.msk.bf16.gmra.mrb[64].mxu1 %vm1025_vm1, %v8799_v42 }
  0xa7   : > { %8118 = vmatprep.mubr.msk.bf16.mxu1 %vm9176_vm0, %v12163_v1 }
  0xa8   : > { %7983 = vmatmul.mubr.msk.bf16.gmra.mrb[64].mxu0 %vm1025_vm1, %v8809_v43 }
  0xa9   : > { %7986 = vmatprep.mubr.msk.bf16.mxu0 %vm9176_vm0, %v12163_v1 }
  0xae   : > { %8119 = vmatmul.mubr.msk.bf16.gmra.mrb[68].mxu1 %vm1025_vm1, %v8802_v44 }
  0xaf   : > { %8122 = vmatprep.mubr.msk.bf16.mxu1 %vm9176_vm0, %v12163_v1 }
  0xb0   : > { %7987 = vmatmul.mubr.msk.bf16.gmra.mrb[68].mxu0 %vm1025_vm1, %v8811_v45 }
  0xb1   : > { %7990 = vmatprep.mubr.msk.bf16.mxu0 %vm9176_vm0, %v12163_v1 }
  0xb6   : > { %8123 = vmatmul.mubr.msk.bf16.gmra.mrb[72].mxu1 %vm1025_vm1, %v8804_v46  ;;  %v8828_v46 = vld [vmem:[%s9310_s17 + $0x1f0] sm:$0xff]  }
  0xb7   : > { %8126 = vmatprep.mubr.msk.bf16.mxu1 %vm9176_vm0, %v12163_v1 }
  0xb8   : > { %7991 = vmatmul.mubr.msk.bf16.gmra.mrb[72].mxu0 %vm1025_vm1, %v8813_v47 }
  0xb9   : > { %7994 = vmatprep.mubr.msk.bf16.mxu0 %vm9176_vm0, %v12163_v1 }
  0xbe   : > { %8127 = vmatmul.mubr.msk.bf16.gmra.mrb[76].mxu1 %vm1025_vm1, %v8806_v48 }
  0xbf   : > { %8130 = vmatprep.mubr.msk.bf16.mxu1 %vm9176_vm0, %v12163_v1 }
  0xc0   : > { %7995 = vmatmul.mubr.msk.bf16.gmra.mrb[76].mxu0 %vm1025_vm1, %v8815_v49 }
  0xc1   : > { %7998 = vmatprep.mubr.msk.bf16.mxu0 %vm9176_vm0, %v12163_v1 }
  0xc6   : > { %8131 = vmatmul.mubr.msk.bf16.gmra.mrb[80].mxu1 %vm1025_vm1, %v8808_v51 }
  0xc7   : > { %8134 = vmatprep.mubr.msk.bf16.mxu1 %vm9176_vm0, %v12163_v1 }
  0xc8   : > { %7999 = vmatmul.mubr.msk.bf16.gmra.mrb[80].mxu0 %vm1025_vm1, %v8818_v52 }
  0xc9   : > { %8002 = vmatprep.mubr.msk.bf16.mxu0 %vm9176_vm0, %v12163_v1 }
  0xce   : > { %8135 = vmatmul.mubr.msk.bf16.gmra.mrb[84].mxu1 %vm1025_vm1, %v8810_v53 }
  0xcf   : > { %8138 = vmatprep.mubr.msk.bf16.mxu1 %vm9176_vm0, %v12163_v1 }
  0xd0   : > { %8003 = vmatmul.mubr.msk.bf16.gmra.mrb[84].mxu0 %vm1025_vm1, %v8820_v54  ;;  %v8835_v54 = vld [vmem:[%s9310_s17 + $0xe8] sm:$0xff]  }
  0xd1   : > { %8006 = vmatprep.mubr.msk.bf16.mxu0 %vm9176_vm0, %v12163_v1 }
  0xd6   : > { %8139 = vmatmul.mubr.msk.bf16.gmra.mrb[88].mxu1 %vm1025_vm1, %v8812_v55 }
  0xd7   : > { %8142 = vmatprep.mubr.msk.bf16.mxu1 %vm9176_vm0, %v12163_v1 }
  0xd8   : > { %8007 = vmatmul.mubr.msk.bf16.gmra.mrb[88].mxu0 %vm1025_vm1, %v8822_v56 }
  0xd9   : > { %8010 = vmatprep.mubr.msk.bf16.mxu0 %vm9176_vm0, %v12163_v1 }
  0xde   : > { %8143 = vmatmul.mubr.msk.bf16.gmra.mrb[92].mxu1 %vm1025_vm1, %v8814_v57 }
  0xdf   : > { %8146 = vmatprep.mubr.msk.bf16.mxu1 %vm9176_vm0, %v12163_v1 }
  0xe0   : > { %8011 = vmatmul.mubr.msk.bf16.gmra.mrb[92].mxu0 %vm1025_vm1, %v8825_v58 }
  0xe1   : > { %8014 = vmatprep.mubr.msk.bf16.mxu0 %vm9176_vm0, %v12163_v1 }
  0xe6   : > { %8147 = vmatmul.mubr.msk.bf16.gmra.mrb[96].mxu1 %vm1025_vm1, %v8816_v59 }
  0xe7   : > { %8150 = vmatprep.mubr.msk.bf16.mxu1 %vm9176_vm0, %v12163_v1 }
  0xe8   : > { %8015 = vmatmul.mubr.msk.bf16.gmra.mrb[96].mxu0 %vm1025_vm1, %v8827_v60 }
  0xe9   : > { %8018 = vmatprep.mubr.msk.bf16.mxu0 %vm9176_vm0, %v12163_v1 }
  0xee   : > { %8151 = vmatmul.mubr.msk.bf16.gmra.mrb[100].mxu1 %vm1025_vm1, %v8819_v61 }
  0xef   : > { %8154 = vmatprep.mubr.msk.bf16.mxu1 %vm9176_vm0, %v12163_v1 }
  0xf0   : > { %8019 = vmatmul.mubr.msk.bf16.gmra.mrb[100].mxu0 %vm1025_vm1, %v8829_v62 }
  0xf1   : > { %8022 = vmatprep.mubr.msk.bf16.mxu0 %vm9176_vm0, %v12163_v1 }
  0xf6   : > { %8155 = vmatmul.mubr.msk.bf16.gmra.mrb[104].mxu1 %vm1025_vm1, %v8821_v63 }
  0xf7   : > { %8158 = vmatprep.mubr.msk.bf16.mxu1 %vm9176_vm0, %v12163_v1 }
  0xf8   : > { %8023 = vmatmul.mubr.msk.bf16.gmra.mrb[104].mxu0 %vm1025_vm1, %v8831_v0 }
  0xf9   : > { %v1519_v3 = vpop.f32.mrb[0].mxu1  ;;  %8026 = vmatprep.mubr.msk.bf16.mxu0 %vm9176_vm0, %v12163_v1 }
  0xfa   : > { %v1520_v4 = vadd.f32 %v9556_v2, %v1519_v3  ;;  %v8052_v5 = vpop.f32.mrb[1].mxu1 }
  0xfb   : > { %v1522_v7 = vpop.f32.mrb[2].mxu1  ;;  %v1255_v8 = vpop.f32.mrb[0].mxu0 }
  0xfc   : > { %v1523_v9 = vadd.f32 %v9556_v2, %v1522_v7  ;;  %v8053_v10 = vpop.f32.mrb[3].mxu1  ;;  %v1256_v11 = vadd.f32 %v9556_v2, %v1255_v8  ;;  %v7920_v12 = vpop.f32.mrb[1].mxu0  ;;  %v1840_v15 = vmax.f32 %v1520_v4, 0.0  ;;  %v8830_v4 = vld [vmem:[%s9310_s17 + $0x1f8] sm:$0xff]  }
  0xfd   : > { %v1258_v14 = vpop.f32.mrb[2].mxu0  ;;  %v8836_v12 = vld [vmem:[%s9310_s17 + $0xf0] sm:$0xff]  }
  0xfe   : > { %v1841_v16 = vmax.f32 %v1523_v9, 0.0  ;;  %8159 = vmatmul.mubr.msk.bf16.gmra.mrb[108].mxu1 %vm1025_vm1, %v8824_v6  ;;  %v1774_v17 = vmax.f32 %v1256_v11, 0.0  ;;  %v1259_v18 = vadd.f32 %v9556_v2, %v1258_v14  ;;  %v7921_v19 = vpop.f32.mrb[3].mxu0 }
  0xff   : > { %8162 = vmatprep.mubr.msk.bf16.mxu1 %vm9176_vm0, %v12163_v1 }
 0x100   : > { %v9572_v20 = vpack.c.bf16 %v1841_v16, %v1840_v15  ;;  %v1775_v21 = vmax.f32 %v1259_v18, 0.0  ;;  %8027 = vmatmul.mubr.msk.bf16.gmra.mrb[108].mxu0 %vm1025_vm1, %v8833_v13 }
 0x101   : > { %v1527_v23 = vpop.f32.mrb[4].mxu1  ;;  %8030 = vmatprep.mubr.msk.bf16.mxu0 %vm9176_vm0, %v12163_v1 }
 0x102   : > { %v1528_v24 = vadd.f32 %v9556_v2, %v1527_v23  ;;  %v8056_v25 = vpop.f32.mrb[5].mxu1  ;;  %v9582_v27 = vpack.c.bf16 %v1775_v21, %v1774_v17 }
 0x103   : > { %v1530_v28 = vpop.f32.mrb[6].mxu1  ;;  %v1263_v29 = vpop.f32.mrb[4].mxu0  ;;  %v8832_v25 = vld [vmem:[%s9310_s17 + $0x200] sm:$0xff]  }
 0x104   : > { %v1531_v30 = vadd.f32 %v9556_v2, %v1530_v28  ;;  %v8057_v31 = vpop.f32.mrb[7].mxu1  ;;  %v1264_v32 = vadd.f32 %v9556_v2, %v1263_v29  ;;  %v7924_v33 = vpop.f32.mrb[5].mxu0  ;;  %v1842_v36 = vmax.f32 %v1528_v24, 0.0 }
 0x105   : > { %v1266_v35 = vpop.f32.mrb[6].mxu0 }
 0x106   : > { %v1843_v37 = vmax.f32 %v1531_v30, 0.0  ;;  %8163 = vmatmul.mubr.msk.bf16.gmra.mrb[112].mxu1 %vm1025_vm1, %v8826_v26  ;;  %v1776_v38 = vmax.f32 %v1264_v32, 0.0  ;;  %v1267_v39 = vadd.f32 %v9556_v2, %v1266_v35  ;;  %v7925_v40 = vpop.f32.mrb[7].mxu0 }
 0x107   : > { %8166 = vmatprep.mubr.msk.bf16.mxu1 %vm9176_vm0, %v12163_v1 }
 0x108   : > { %v9592_v41 = vpack.c.bf16 %v1843_v37, %v1842_v36  ;;  %v1777_v42 = vmax.f32 %v1267_v39, 0.0  ;;  %8031 = vmatmul.mubr.msk.bf16.gmra.mrb[112].mxu0 %vm1025_vm1, %v8834_v34  ;;  %v8838_v34 = vld [vmem:[%s9310_s17 + $0xf8] sm:$0xff]  }
 0x109   : > { %v1535_v43 = vpop.f32.mrb[8].mxu1  ;;  %8034 = vmatprep.mubr.msk.bf16.mxu0 %vm9176_vm0, %v12163_v1 }
 0x10a   : > { %v1536_v44 = vadd.f32 %v9556_v2, %v1535_v43  ;;  %v8060_v45 = vpop.f32.mrb[9].mxu1  ;;  %v9599_v47 = vpack.c.bf16 %v1777_v42, %v1776_v38 }
 0x10b   : > { %v1538_v48 = vpop.f32.mrb[10].mxu1  ;;  %v1271_v49 = vpop.f32.mrb[8].mxu0 }
 0x10c   : > { %v1539_v50 = vadd.f32 %v9556_v2, %v1538_v48  ;;  %v8061_v51 = vpop.f32.mrb[11].mxu1  ;;  %v1272_v52 = vadd.f32 %v9556_v2, %v1271_v49  ;;  %v7928_v53 = vpop.f32.mrb[9].mxu0  ;;  %v1844_v56 = vmax.f32 %v1536_v44, 0.0 }
 0x10d   : > { %v1274_v55 = vpop.f32.mrb[10].mxu0 }
 0x10e   : > { %v1845_v57 = vmax.f32 %v1539_v50, 0.0  ;;  %8167 = vmatmul.mubr.msk.bf16.gmra.mrb[116].mxu1 %vm1025_vm1, %v8828_v46  ;;  %v1778_v58 = vmax.f32 %v1272_v52, 0.0  ;;  %v1275_v59 = vadd.f32 %v9556_v2, %v1274_v55  ;;  %v7929_v60 = vpop.f32.mrb[11].mxu0  ;;  %v8839_v55 = vld [vmem:[%s9310_s17 + $0x100] sm:$0xff]  }
 0x10f   : > { %8170 = vmatprep.mubr.msk.bf16.mxu1 %vm9176_vm0, %v12163_v1 }
 0x110   : > { %v9608_v61 = vpack.c.bf16 %v1845_v57, %v1844_v56  ;;  %v1779_v62 = vmax.f32 %v1275_v59, 0.0  ;;  %8035 = vmatmul.mubr.msk.bf16.gmra.mrb[116].mxu0 %vm1025_vm1, %v8835_v54 }
 0x111   : > { %v1543_v63 = vpop.f32.mrb[12].mxu1  ;;  %8038 = vmatprep.mubr.msk.bf16.mxu0 %vm9176_vm0, %v12163_v1 }
 0x112   : > { %v1544_v0 = vadd.f32 %v9556_v2, %v1543_v63  ;;  %v8064_v3 = vpop.f32.mrb[13].mxu1  ;;  %v9615_v5 = vpack.c.bf16 %v1779_v62, %v1778_v58 }
 0x113   : > { %v1546_v6 = vpop.f32.mrb[14].mxu1  ;;  %v1279_v7 = vpop.f32.mrb[12].mxu0 }
 0x114   : > { %v1547_v8 = vadd.f32 %v9556_v2, %v1546_v6  ;;  %v8065_v9 = vpop.f32.mrb[15].mxu1  ;;  %v1280_v10 = vadd.f32 %v9556_v2, %v1279_v7  ;;  %v7932_v11 = vpop.f32.mrb[13].mxu0  ;;  %v1846_v14 = vmax.f32 %v1544_v0, 0.0 }
 0x115   : > { %v1282_v13 = vpop.f32.mrb[14].mxu0 }
 0x116   : > { %v1847_v15 = vmax.f32 %v1547_v8, 0.0  ;;  %8171 = vmatmul.mubr.msk.bf16.gmra.mrb[120].mxu1 %vm1025_vm1, %v8830_v4  ;;  %v1780_v16 = vmax.f32 %v1280_v10, 0.0  ;;  %v1283_v17 = vadd.f32 %v9556_v2, %v1282_v13  ;;  %v7933_v18 = vpop.f32.mrb[15].mxu0 }
 0x117   : > { %8174 = vmatprep.mubr.msk.bf16.mxu1 %vm9176_vm0, %v12163_v1 }
 0x118   : > { %v9624_v19 = vpack.c.bf16 %v1847_v15, %v1846_v14  ;;  %v1781_v21 = vmax.f32 %v1283_v17, 0.0  ;;  %8039 = vmatmul.mubr.msk.bf16.gmra.mrb[120].mxu0 %vm1025_vm1, %v8836_v12 }
 0x119   : > { %v1551_v22 = vpop.f32.mrb[16].mxu1  ;;  %8042 = vmatprep.mubr.msk.bf16.mxu0 %vm9176_vm0, %v12163_v1 }
 0x11a   : > { %v1552_v23 = vadd.f32 %v9556_v2, %v1551_v22  ;;  %v8068_v24 = vpop.f32.mrb[17].mxu1  ;;  %v9631_v26 = vpack.c.bf16 %v1781_v21, %v1780_v16 }
 0x11b   : > { %v1554_v28 = vpop.f32.mrb[18].mxu1  ;;  %v1287_v29 = vpop.f32.mrb[16].mxu0 }
 0x11c   : > { %v1555_v30 = vadd.f32 %v9556_v2, %v1554_v28  ;;  %v8069_v31 = vpop.f32.mrb[19].mxu1  ;;  %v1288_v32 = vadd.f32 %v9556_v2, %v1287_v29  ;;  %v7936_v33 = vpop.f32.mrb[17].mxu0  ;;  %v1848_v36 = vmax.f32 %v1552_v23, 0.0 }
 0x11d   : > { %v1290_v35 = vpop.f32.mrb[18].mxu0 }
 0x11e   : > { %v1849_v37 = vmax.f32 %v1555_v30, 0.0  ;;  %8175 = vmatmul.mubr.msk.bf16.gmra.mrb[124].mxu1 %vm1025_vm1, %v8832_v25  ;;  %v1782_v38 = vmax.f32 %v1288_v32, 0.0  ;;  %v1291_v39 = vadd.f32 %v9556_v2, %v1290_v35  ;;  %v7937_v40 = vpop.f32.mrb[19].mxu0 }
 0x11f   : > { %8186 = vmatprep.mubr.msk.bf16.mxu1 %vm9176_vm0, %v12163_v1 }
 0x120   : > { %v9640_v42 = vpack.c.bf16 %v1849_v37, %v1848_v36  ;;  %v1783_v43 = vmax.f32 %v1291_v39, 0.0  ;;  %8043 = vmatmul.mubr.msk.bf16.gmra.mrb[124].mxu0 %vm1025_vm1, %v8838_v34 }
 0x121   : > { %v1559_v44 = vpop.f32.mrb[20].mxu1  ;;  %8046 = vmatprep.mubr.msk.bf16.mxu0 %vm9176_vm0, %v12163_v1 }
 0x122   : > { %v1560_v45 = vadd.f32 %v9556_v2, %v1559_v44  ;;  %v8072_v46 = vpop.f32.mrb[21].mxu1  ;;  %v9646_v48 = vpack.c.bf16 %v1783_v43, %v1782_v38 }
 0x123   : > { %v1562_v49 = vpop.f32.mrb[22].mxu1  ;;  %v1295_v50 = vpop.f32.mrb[20].mxu0 }
 0x124   : > { %v1563_v51 = vadd.f32 %v9556_v2, %v1562_v49  ;;  %v8073_v52 = vpop.f32.mrb[23].mxu1  ;;  %v1296_v53 = vadd.f32 %v9556_v2, %v1295_v50  ;;  %v7940_v54 = vpop.f32.mrb[21].mxu0  ;;  %v1850_v57 = vmax.f32 %v1560_v45, 0.0 }
 0x125   : > { %v1298_v56 = vpop.f32.mrb[22].mxu0 }
 0x126   : > { %v1851_v58 = vmax.f32 %v1563_v51, 0.0  ;;  %8187 = vmatmul.mubr.msk.bf16.vlgmr.msra.gmra.mrb[128].mxu1 %vm1025_vm1, %v9582_v27  ;;  %v1784_v59 = vmax.f32 %v1296_v53, 0.0  ;;  %v1299_v60 = vadd.f32 %v9556_v2, %v1298_v56  ;;  %v7941_v62 = vpop.f32.mrb[23].mxu0 }
 0x127   : > { %8190 = vmatprep.mubr.msk.bf16.mxu1 %vm9176_vm0, %v12163_v1 }
 0x128   : > { %v9656_v63 = vpack.c.bf16 %v1851_v58, %v1850_v57  ;;  %v1785_v0 = vmax.f32 %v1299_v60, 0.0  ;;  %8047 = vmatmul.mubr.msk.bf16.gmra.mrb[128].mxu0 %vm1025_vm1, %v8839_v55 }
 0x129   : > { %v1567_v3 = vpop.f32.mrb[24].mxu1  ;;  %8454 = vmatprep.mubr.msk.bf16.mxu0 %vm9176_vm0, %v12163_v1 }
 0x12a   : > { %v1568_v4 = vadd.f32 %v9556_v2, %v1567_v3  ;;  %v8076_v6 = vpop.f32.mrb[25].mxu1  ;;  %v9662_v27 = vpack.c.bf16 %v1785_v0, %v1784_v59 }
 0x12b   : > { %v1570_v7 = vpop.f32.mrb[26].mxu1  ;;  %v1303_v8 = vpop.f32.mrb[24].mxu0 }
 0x12c   : > { %v1571_v9 = vadd.f32 %v9556_v2, %v1570_v7  ;;  %v8077_v10 = vpop.f32.mrb[27].mxu1  ;;  %v1304_v11 = vadd.f32 %v9556_v2, %v1303_v8  ;;  %v7944_v12 = vpop.f32.mrb[25].mxu0  ;;  %v1852_v14 = vmax.f32 %v1568_v4, 0.0 }
 0x12d   : > { %v1306_v13 = vpop.f32.mrb[26].mxu0 }
 0x12e   : > { %v1853_v15 = vmax.f32 %v1571_v9, 0.0  ;;  %8191 = vmatmul.mubr.msk.bf16.gmra.mrb[132].mxu1 %vm1025_vm1, %v9599_v47  ;;  %v1786_v16 = vmax.f32 %v1304_v11, 0.0  ;;  %v1307_v17 = vadd.f32 %v9556_v2, %v1306_v13  ;;  %v7945_v18 = vpop.f32.mrb[27].mxu0  ;;  %v8841_v13 = vld [vmem:[%s12159_s6 + $0x18] sm:$0xff]  }
 0x12f   : > { %8194 = vmatprep.mubr.msk.bf16.mxu1 %vm9176_vm0, %v12163_v1  ;;  %8453 = vmatpush3.bf16.msra.mxu0 %v8841_v13 }
 0x130   : > { %v9671_v21 = vpack.c.bf16 %v1853_v15, %v1852_v14  ;;  %v1787_v22 = vmax.f32 %v1307_v17, 0.0 }
 0x131   : > { %v1575_v23 = vpop.f32.mrb[28].mxu1 }
 0x132   : > { %v1576_v24 = vadd.f32 %v9556_v2, %v1575_v23  ;;  %v8080_v25 = vpop.f32.mrb[29].mxu1  ;;  %v9674_v28 = vpack.c.bf16 %v1787_v22, %v1786_v16 }
 0x133   : > { %v1578_v29 = vpop.f32.mrb[30].mxu1  ;;  %v1311_v30 = vpop.f32.mrb[28].mxu0 }
 0x134   : > { %v1579_v47 = vadd.f32 %v9556_v2, %v1578_v29  ;;  %v8081_v31 = vpop.f32.mrb[31].mxu1  ;;  %v1312_v32 = vadd.f32 %v9556_v2, %v1311_v30  ;;  %v7948_v33 = vpop.f32.mrb[29].mxu0  ;;  %v1854_v35 = vmax.f32 %v1576_v24, 0.0 }
 0x135   : > { %v1314_v34 = vpop.f32.mrb[30].mxu0 }
 0x136   : > { %v1855_v36 = vmax.f32 %v1579_v47, 0.0  ;;  %8195 = vmatmul.mubr.msk.bf16.gmra.mrb[136].mxu1 %vm1025_vm1, %v9615_v5  ;;  %v1788_v37 = vmax.f32 %v1312_v32, 0.0  ;;  %v1315_v38 = vadd.f32 %v9556_v2, %v1314_v34  ;;  %v7949_v39 = vpop.f32.mrb[31].mxu0 }
 0x137   : > { %8198 = vmatprep.mubr.msk.bf16.mxu1 %vm9176_vm0, %v12163_v1 }
 0x138   : > { %v9683_v40 = vpack.c.bf16 %v1855_v36, %v1854_v35  ;;  %v1789_v43 = vmax.f32 %v1315_v38, 0.0 }
 0x139   : > { %v1583_v44 = vpop.f32.mrb[32].mxu1 }
 0x13a   : > { %v1584_v45 = vadd.f32 %v9556_v2, %v1583_v44  ;;  %v8084_v46 = vpop.f32.mrb[33].mxu1  ;;  %v9686_v49 = vpack.c.bf16 %v1789_v43, %v1788_v37 }
 0x13b   : > { %v1586_v50 = vpop.f32.mrb[34].mxu1  ;;  %v1319_v51 = vpop.f32.mrb[32].mxu0 }
 0x13c   : > { %v1587_v5 = vadd.f32 %v9556_v2, %v1586_v50  ;;  %v8085_v52 = vpop.f32.mrb[35].mxu1  ;;  %v1320_v53 = vadd.f32 %v9556_v2, %v1319_v51  ;;  %v7952_v54 = vpop.f32.mrb[33].mxu0  ;;  %v1856_v56 = vmax.f32 %v1584_v45, 0.0 }
 0x13d   : > { %v1322_v55 = vpop.f32.mrb[34].mxu0 }
 0x13e   : > { %v1857_v57 = vmax.f32 %v1587_v5, 0.0  ;;  %8199 = vmatmul.mubr.msk.bf16.gmra.mrb[140].mxu1 %vm1025_vm1, %v9631_v26  ;;  %v1790_v58 = vmax.f32 %v1320_v53, 0.0  ;;  %v1323_v59 = vadd.f32 %v9556_v2, %v1322_v55  ;;  %v7953_v60 = vpop.f32.mrb[35].mxu0 }
 0x13f   : > { %8202 = vmatprep.mubr.msk.bf16.mxu1 %vm9176_vm0, %v12163_v1 }
 0x140   : > { %v9695_v62 = vpack.c.bf16 %v1857_v57, %v1856_v56  ;;  %v1791_v0 = vmax.f32 %v1323_v59, 0.0 }
 0x141   : > { %v1591_v3 = vpop.f32.mrb[36].mxu1 }
 0x142   : > { %v1592_v4 = vadd.f32 %v9556_v2, %v1591_v3  ;;  %v8088_v6 = vpop.f32.mrb[37].mxu1  ;;  %v9698_v7 = vpack.c.bf16 %v1791_v0, %v1790_v58 }
 0x143   : > { %v1594_v8 = vpop.f32.mrb[38].mxu1  ;;  %v1327_v9 = vpop.f32.mrb[36].mxu0 }
 0x144   : > { %v1595_v26 = vadd.f32 %v9556_v2, %v1594_v8  ;;  %v8089_v10 = vpop.f32.mrb[39].mxu1  ;;  %v1328_v11 = vadd.f32 %v9556_v2, %v1327_v9  ;;  %v7956_v12 = vpop.f32.mrb[37].mxu0  ;;  %v1858_v15 = vmax.f32 %v1592_v4, 0.0 }
 0x145   : > { %v1330_v14 = vpop.f32.mrb[38].mxu0 }
 0x146   : > { %v1859_v16 = vmax.f32 %v1595_v26, 0.0  ;;  %8203 = vmatmul.mubr.msk.bf16.gmra.mrb[144].mxu1 %vm1025_vm1, %v9646_v48  ;;  %v1792_v17 = vmax.f32 %v1328_v11, 0.0  ;;  %v1331_v18 = vadd.f32 %v9556_v2, %v1330_v14  ;;  %v7957_v22 = vpop.f32.mrb[39].mxu0 }
 0x147   : > { %8206 = vmatprep.mubr.msk.bf16.mxu1 %vm9176_vm0, %v12163_v1 }
 0x148   : > { %v9710_v23 = vpack.c.bf16 %v1859_v16, %v1858_v15  ;;  %v1793_v24 = vmax.f32 %v1331_v18, 0.0 }
 0x149   : > { %v1599_v25 = vpop.f32.mrb[40].mxu1 }
 0x14a   : > { %v1600_v29 = vadd.f32 %v9556_v2, %v1599_v25  ;;  %v8092_v30 = vpop.f32.mrb[41].mxu1  ;;  %v9713_v47 = vpack.c.bf16 %v1793_v24, %v1792_v17 }
 0x14b   : > { %v1602_v31 = vpop.f32.mrb[42].mxu1  ;;  %v1335_v32 = vpop.f32.mrb[40].mxu0 }
 0x14c   : > { %v1603_v48 = vadd.f32 %v9556_v2, %v1602_v31  ;;  %v8093_v33 = vpop.f32.mrb[43].mxu1  ;;  %v1336_v34 = vadd.f32 %v9556_v2, %v1335_v32  ;;  %v7960_v35 = vpop.f32.mrb[41].mxu0  ;;  %v1860_v37 = vmax.f32 %v1600_v29, 0.0 }
 0x14d   : > { %v1338_v36 = vpop.f32.mrb[42].mxu0 }
 0x14e   : > { %v1861_v38 = vmax.f32 %v1603_v48, 0.0  ;;  %8207 = vmatmul.mubr.msk.bf16.gmra.mrb[148].mxu1 %vm1025_vm1, %v9662_v27  ;;  %v1794_v39 = vmax.f32 %v1336_v34, 0.0  ;;  %v1339_v43 = vadd.f32 %v9556_v2, %v1338_v36  ;;  %v7961_v44 = vpop.f32.mrb[43].mxu0 }
 0x14f   : > { %8210 = vmatprep.mubr.msk.bf16.mxu1 %vm9176_vm0, %v12163_v1 }
 0x150   : > { %v9722_v45 = vpack.c.bf16 %v1861_v38, %v1860_v37  ;;  %v1795_v46 = vmax.f32 %v1339_v43, 0.0 }
 0x151   : > { %v1607_v50 = vpop.f32.mrb[44].mxu1 }
 0x152   : > { %v1608_v51 = vadd.f32 %v9556_v2, %v1607_v50  ;;  %v8096_v5 = vpop.f32.mrb[45].mxu1  ;;  %v9725_v52 = vpack.c.bf16 %v1795_v46, %v1794_v39 }
 0x153   : > { %v1610_v53 = vpop.f32.mrb[46].mxu1  ;;  %v1343_v54 = vpop.f32.mrb[44].mxu0 }
 0x154   : > { %v1611_v27 = vadd.f32 %v9556_v2, %v1610_v53  ;;  %v8097_v55 = vpop.f32.mrb[47].mxu1  ;;  %v1344_v56 = vadd.f32 %v9556_v2, %v1343_v54  ;;  %v7964_v57 = vpop.f32.mrb[45].mxu0  ;;  %v1862_v59 = vmax.f32 %v1608_v51, 0.0 }
 0x155   : > { %v1346_v58 = vpop.f32.mrb[46].mxu0 }
 0x156   : > { %v1863_v60 = vmax.f32 %v1611_v27, 0.0  ;;  %8211 = vmatmul.mubr.msk.bf16.gmra.mrb[152].mxu1 %vm1025_vm1, %v9674_v28  ;;  %v1796_v0 = vmax.f32 %v1344_v56, 0.0  ;;  %v1347_v3 = vadd.f32 %v9556_v2, %v1346_v58  ;;  %v7965_v4 = vpop.f32.mrb[47].mxu0 }
 0x157   : > { %8214 = vmatprep.mubr.msk.bf16.mxu1 %vm9176_vm0, %v12163_v1 }
 0x158   : > { %v9734_v6 = vpack.c.bf16 %v1863_v60, %v1862_v59  ;;  %v1797_v8 = vmax.f32 %v1347_v3, 0.0 }
 0x159   : > { %v1615_v9 = vpop.f32.mrb[48].mxu1 }
 0x15a   : > { %v1616_v26 = vadd.f32 %v9556_v2, %v1615_v9  ;;  %v8100_v10 = vpop.f32.mrb[49].mxu1  ;;  %v9737_v11 = vpack.c.bf16 %v1797_v8, %v1796_v0 }
 0x15b   : > { %v1618_v12 = vpop.f32.mrb[50].mxu1  ;;  %v1351_v13 = vpop.f32.mrb[48].mxu0 }
 0x15c   : > { %v1619_v28 = vadd.f32 %v9556_v2, %v1618_v12  ;;  %v8101_v14 = vpop.f32.mrb[51].mxu1  ;;  %v1352_v15 = vadd.f32 %v9556_v2, %v1351_v13  ;;  %v7968_v16 = vpop.f32.mrb[49].mxu0  ;;  %v1864_v18 = vmax.f32 %v1616_v26, 0.0 }
 0x15d   : > { %v1354_v17 = vpop.f32.mrb[50].mxu0 }
 0x15e   : > { %v1865_v22 = vmax.f32 %v1619_v28, 0.0  ;;  %8215 = vmatmul.mubr.msk.bf16.gmra.mrb[156].mxu1 %vm1025_vm1, %v9686_v49  ;;  %v1798_v24 = vmax.f32 %v1352_v15, 0.0  ;;  %v1355_v25 = vadd.f32 %v9556_v2, %v1354_v17  ;;  %v7969_v29 = vpop.f32.mrb[51].mxu0 }
 0x15f   : > { %8218 = vmatprep.mubr.msk.bf16.mxu1 %vm9176_vm0, %v12163_v1 }
 0x160   : > { %v9746_v30 = vpack.c.bf16 %v1865_v22, %v1864_v18  ;;  %v1799_v31 = vmax.f32 %v1355_v25, 0.0 }
 0x161   : > { %v1623_v32 = vpop.f32.mrb[52].mxu1 }
 0x162   : > { %v1624_v48 = vadd.f32 %v9556_v2, %v1623_v32  ;;  %v8104_v33 = vpop.f32.mrb[53].mxu1  ;;  %v9749_v34 = vpack.c.bf16 %v1799_v31, %v1798_v24 }
 0x163   : > { %v1626_v35 = vpop.f32.mrb[54].mxu1  ;;  %v1359_v36 = vpop.f32.mrb[52].mxu0 }
 0x164   : > { %v1627_v49 = vadd.f32 %v9556_v2, %v1626_v35  ;;  %v8105_v37 = vpop.f32.mrb[55].mxu1  ;;  %v1360_v38 = vadd.f32 %v9556_v2, %v1359_v36  ;;  %v7972_v39 = vpop.f32.mrb[53].mxu0  ;;  %v1866_v44 = vmax.f32 %v1624_v48, 0.0 }
 0x165   : > { %v1362_v43 = vpop.f32.mrb[54].mxu0 }
 0x166   : > { %v1867_v46 = vmax.f32 %v1627_v49, 0.0  ;;  %8219 = vmatmul.mubr.msk.bf16.gmra.mrb[160].mxu1 %vm1025_vm1, %v9698_v7  ;;  %v1800_v50 = vmax.f32 %v1360_v38, 0.0  ;;  %v1363_v51 = vadd.f32 %v9556_v2, %v1362_v43  ;;  %v7973_v5 = vpop.f32.mrb[55].mxu0 }
 0x167   : > { %8222 = vmatprep.mubr.msk.bf16.mxu1 %vm9176_vm0, %v12163_v1 }
 0x168   : > { %v9758_v53 = vpack.c.bf16 %v1867_v46, %v1866_v44  ;;  %v1801_v54 = vmax.f32 %v1363_v51, 0.0 }
 0x169   : > { %v1631_v27 = vpop.f32.mrb[56].mxu1 }
 0x16a   : > { %v1632_v55 = vadd.f32 %v9556_v2, %v1631_v27  ;;  %v8108_v56 = vpop.f32.mrb[57].mxu1  ;;  %v9761_v57 = vpack.c.bf16 %v1801_v54, %v1800_v50 }
 0x16b   : > { %v1634_v58 = vpop.f32.mrb[58].mxu1  ;;  %v1367_v59 = vpop.f32.mrb[56].mxu0 }
 0x16c   : > { %v1635_v7 = vadd.f32 %v9556_v2, %v1634_v58  ;;  %v8109_v60 = vpop.f32.mrb[59].mxu1  ;;  %v1368_v0 = vadd.f32 %v9556_v2, %v1367_v59  ;;  %v7976_v3 = vpop.f32.mrb[57].mxu0  ;;  %v1868_v8 = vmax.f32 %v1632_v55, 0.0 }
 0x16d   : > { %v1370_v4 = vpop.f32.mrb[58].mxu0 }
 0x16e   : > { %v1869_v9 = vmax.f32 %v1635_v7, 0.0  ;;  %8223 = vmatmul.mubr.msk.bf16.gmra.mrb[164].mxu1 %vm1025_vm1, %v9713_v47  ;;  %v1802_v26 = vmax.f32 %v1368_v0, 0.0  ;;  %v1371_v10 = vadd.f32 %v9556_v2, %v1370_v4  ;;  %v7977_v12 = vpop.f32.mrb[59].mxu0 }
 0x16f   : > { %8226 = vmatprep.mubr.msk.bf16.mxu1 %vm9176_vm0, %v12163_v1 }
 0x170   : > { %v9770_v13 = vpack.c.bf16 %v1869_v9, %v1868_v8  ;;  %v1803_v28 = vmax.f32 %v1371_v10, 0.0 }
 0x171   : > { %v1639_v14 = vpop.f32.mrb[60].mxu1 }
 0x172   : > { %v1640_v15 = vadd.f32 %v9556_v2, %v1639_v14  ;;  %v8112_v16 = vpop.f32.mrb[61].mxu1  ;;  %v9773_v17 = vpack.c.bf16 %v1803_v28, %v1802_v26 }
 0x173   : > { %v1642_v18 = vpop.f32.mrb[62].mxu1  ;;  %v1375_v22 = vpop.f32.mrb[60].mxu0 }
 0x174   : > { %v1643_v47 = vadd.f32 %v9556_v2, %v1642_v18  ;;  %v8113_v24 = vpop.f32.mrb[63].mxu1  ;;  %v1376_v25 = vadd.f32 %v9556_v2, %v1375_v22  ;;  %v7980_v29 = vpop.f32.mrb[61].mxu0  ;;  %v1870_v32 = vmax.f32 %v1640_v15, 0.0 }
 0x175   : > { %v1378_v31 = vpop.f32.mrb[62].mxu0 }
 0x176   : > { %v1871_v48 = vmax.f32 %v1643_v47, 0.0  ;;  %8227 = vmatmul.mubr.msk.bf16.gmra.mrb[168].mxu1 %vm1025_vm1, %v9725_v52  ;;  %v1804_v33 = vmax.f32 %v1376_v25, 0.0  ;;  %v1379_v35 = vadd.f32 %v9556_v2, %v1378_v31  ;;  %v7981_v36 = vpop.f32.mrb[63].mxu0 }
 0x177   : > { %8230 = vmatprep.mubr.msk.bf16.mxu1 %vm9176_vm0, %v12163_v1 }
 0x178   : > { %v9782_v49 = vpack.c.bf16 %v1871_v48, %v1870_v32  ;;  %v1805_v37 = vmax.f32 %v1379_v35, 0.0 }
 0x179   : > { %v1647_v38 = vpop.f32.mrb[64].mxu1 }
 0x17a   : > { %v1648_v39 = vadd.f32 %v9556_v2, %v1647_v38  ;;  %v8116_v43 = vpop.f32.mrb[65].mxu1  ;;  %v9785_v44 = vpack.c.bf16 %v1805_v37, %v1804_v33 }
 0x17b   : > { %v1650_v46 = vpop.f32.mrb[66].mxu1  ;;  %v1383_v50 = vpop.f32.mrb[64].mxu0 }
 0x17c   : > { %v1651_v52 = vadd.f32 %v9556_v2, %v1650_v46  ;;  %v8117_v51 = vpop.f32.mrb[67].mxu1  ;;  %v1384_v5 = vadd.f32 %v9556_v2, %v1383_v50  ;;  %v7984_v54 = vpop.f32.mrb[65].mxu0  ;;  %v1872_v55 = vmax.f32 %v1648_v39, 0.0 }
 0x17d   : > { %v1386_v27 = vpop.f32.mrb[66].mxu0 }
 0x17e   : > { %v1873_v56 = vmax.f32 %v1651_v52, 0.0  ;;  %8231 = vmatmul.mubr.msk.bf16.gmra.mrb[172].mxu1 %vm1025_vm1, %v9737_v11  ;;  %v1806_v58 = vmax.f32 %v1384_v5, 0.0  ;;  %v1387_v59 = vadd.f32 %v9556_v2, %v1386_v27  ;;  %v7985_v7 = vpop.f32.mrb[67].mxu0 }
 0x17f   : > { %8234 = vmatprep.mubr.msk.bf16.mxu1 %vm9176_vm0, %v12163_v1 }
 0x180   : > { %v9794_v60 = vpack.c.bf16 %v1873_v56, %v1872_v55  ;;  %v1807_v0 = vmax.f32 %v1387_v59, 0.0 }
 0x181   : > { %v1655_v3 = vpop.f32.mrb[68].mxu1 }
 0x182   : > { %v1656_v4 = vadd.f32 %v9556_v2, %v1655_v3  ;;  %v8120_v8 = vpop.f32.mrb[69].mxu1  ;;  %v9797_v9 = vpack.c.bf16 %v1807_v0, %v1806_v58 }
 0x183   : > { %v1658_v26 = vpop.f32.mrb[70].mxu1  ;;  %v1391_v10 = vpop.f32.mrb[68].mxu0 }
 0x184   : > { %v1659_v11 = vadd.f32 %v9556_v2, %v1658_v26  ;;  %v8121_v12 = vpop.f32.mrb[71].mxu1  ;;  %v1392_v28 = vadd.f32 %v9556_v2, %v1391_v10  ;;  %v7988_v14 = vpop.f32.mrb[69].mxu0  ;;  %v1874_v16 = vmax.f32 %v1656_v4, 0.0 }
 0x185   : > { %v1394_v15 = vpop.f32.mrb[70].mxu0 }
 0x186   : > { %v1875_v18 = vmax.f32 %v1659_v11, 0.0  ;;  %8235 = vmatmul.mubr.msk.bf16.gmra.mrb[176].mxu1 %vm1025_vm1, %v9749_v34  ;;  %v1808_v22 = vmax.f32 %v1392_v28, 0.0  ;;  %v1395_v47 = vadd.f32 %v9556_v2, %v1394_v15  ;;  %v7989_v24 = vpop.f32.mrb[71].mxu0 }
 0x187   : > { %8238 = vmatprep.mubr.msk.bf16.mxu1 %vm9176_vm0, %v12163_v1 }
 0x188   : > { %v9806_v25 = vpack.c.bf16 %v1875_v18, %v1874_v16  ;;  %v1809_v29 = vmax.f32 %v1395_v47, 0.0 }
 0x189   : > { %v1663_v31 = vpop.f32.mrb[72].mxu1 }
 0x18a   : > { %v1664_v32 = vadd.f32 %v9556_v2, %v1663_v31  ;;  %v8124_v48 = vpop.f32.mrb[73].mxu1  ;;  %v9809_v33 = vpack.c.bf16 %v1809_v29, %v1808_v22 }
 0x18b   : > { %v1666_v35 = vpop.f32.mrb[74].mxu1  ;;  %v1399_v36 = vpop.f32.mrb[72].mxu0 }
 0x18c   : > { %v1667_v34 = vadd.f32 %v9556_v2, %v1666_v35  ;;  %v8125_v37 = vpop.f32.mrb[75].mxu1  ;;  %v1400_v38 = vadd.f32 %v9556_v2, %v1399_v36  ;;  %v7992_v39 = vpop.f32.mrb[73].mxu0  ;;  %v1876_v46 = vmax.f32 %v1664_v32, 0.0 }
 0x18d   : > { %v1402_v43 = vpop.f32.mrb[74].mxu0 }
 0x18e   : > { %v1877_v50 = vmax.f32 %v1667_v34, 0.0  ;;  %8239 = vmatmul.mubr.msk.bf16.gmra.mrb[180].mxu1 %vm1025_vm1, %v9761_v57  ;;  %v1810_v52 = vmax.f32 %v1400_v38, 0.0  ;;  %v1403_v51 = vadd.f32 %v9556_v2, %v1402_v43  ;;  %v7993_v5 = vpop.f32.mrb[75].mxu0 }
 0x18f   : > { %8242 = vmatprep.mubr.msk.bf16.mxu1 %vm9176_vm0, %v12163_v1 }
 0x190   : > { %v9818_v54 = vpack.c.bf16 %v1877_v50, %v1876_v46  ;;  %v1811_v27 = vmax.f32 %v1403_v51, 0.0 }
 0x191   : > { %v1671_v55 = vpop.f32.mrb[76].mxu1 }
 0x192   : > { %v1672_v56 = vadd.f32 %v9556_v2, %v1671_v55  ;;  %v8128_v58 = vpop.f32.mrb[77].mxu1  ;;  %v9821_v59 = vpack.c.bf16 %v1811_v27, %v1810_v52 }
 0x193   : > { %v1674_v7 = vpop.f32.mrb[78].mxu1  ;;  %v1407_v0 = vpop.f32.mrb[76].mxu0 }
 0x194   : > { %v1675_v57 = vadd.f32 %v9556_v2, %v1674_v7  ;;  %v8129_v3 = vpop.f32.mrb[79].mxu1  ;;  %v1408_v4 = vadd.f32 %v9556_v2, %v1407_v0  ;;  %v7996_v8 = vpop.f32.mrb[77].mxu0  ;;  %v1878_v10 = vmax.f32 %v1672_v56, 0.0 }
 0x195   : > { %v1410_v26 = vpop.f32.mrb[78].mxu0 }
 0x196   : > { %v1879_v11 = vmax.f32 %v1675_v57, 0.0  ;;  %8243 = vmatmul.mubr.msk.bf16.gmra.mrb[184].mxu1 %vm1025_vm1, %v9773_v17  ;;  %v1812_v12 = vmax.f32 %v1408_v4, 0.0  ;;  %v1411_v28 = vadd.f32 %v9556_v2, %v1410_v26  ;;  %v7997_v14 = vpop.f32.mrb[79].mxu0 }
 0x197   : > { %8246 = vmatprep.mubr.msk.bf16.mxu1 %vm9176_vm0, %v12163_v1 }
 0x198   : > { %v9830_v15 = vpack.c.bf16 %v1879_v11, %v1878_v10  ;;  %v1813_v16 = vmax.f32 %v1411_v28, 0.0 }
 0x199   : > { %v1679_v18 = vpop.f32.mrb[80].mxu1 }
 0x19a   : > { %v1680_v22 = vadd.f32 %v9556_v2, %v1679_v18  ;;  %v8132_v47 = vpop.f32.mrb[81].mxu1  ;;  %v9833_v24 = vpack.c.bf16 %v1813_v16, %v1812_v12 }
 0x19b   : > { %v1682_v29 = vpop.f32.mrb[82].mxu1  ;;  %v1415_v31 = vpop.f32.mrb[80].mxu0 }
 0x19c   : > { %v1683_v17 = vadd.f32 %v9556_v2, %v1682_v29  ;;  %v8133_v32 = vpop.f32.mrb[83].mxu1  ;;  %v1416_v48 = vadd.f32 %v9556_v2, %v1415_v31  ;;  %v8000_v35 = vpop.f32.mrb[81].mxu0  ;;  %v1880_v34 = vmax.f32 %v1680_v22, 0.0 }
 0x19d   : > { %v1418_v36 = vpop.f32.mrb[82].mxu0 }
 0x19e   : > { %v1881_v37 = vmax.f32 %v1683_v17, 0.0  ;;  %8247 = vmatmul.mubr.msk.bf16.gmra.mrb[188].mxu1 %vm1025_vm1, %v9785_v44  ;;  %v1814_v38 = vmax.f32 %v1416_v48, 0.0  ;;  %v1419_v39 = vadd.f32 %v9556_v2, %v1418_v36  ;;  %v8001_v43 = vpop.f32.mrb[83].mxu0 }
 0x19f   : > { %8250 = vmatprep.mubr.msk.bf16.mxu1 %vm9176_vm0, %v12163_v1 }
 0x1a0   : > { %v9842_v46 = vpack.c.bf16 %v1881_v37, %v1880_v34  ;;  %v1815_v50 = vmax.f32 %v1419_v39, 0.0 }
 0x1a1   : > { %v1687_v52 = vpop.f32.mrb[84].mxu1 }
 0x1a2   : > { %v1688_v51 = vadd.f32 %v9556_v2, %v1687_v52  ;;  %v8136_v5 = vpop.f32.mrb[85].mxu1  ;;  %v9845_v27 = vpack.c.bf16 %v1815_v50, %v1814_v38 }
 0x1a3   : > { %v1690_v55 = vpop.f32.mrb[86].mxu1  ;;  %v1423_v56 = vpop.f32.mrb[84].mxu0 }
 0x1a4   : > { %v1691_v44 = vadd.f32 %v9556_v2, %v1690_v55  ;;  %v8137_v58 = vpop.f32.mrb[87].mxu1  ;;  %v1424_v7 = vadd.f32 %v9556_v2, %v1423_v56  ;;  %v8004_v0 = vpop.f32.mrb[85].mxu0  ;;  %v1882_v3 = vmax.f32 %v1688_v51, 0.0 }
 0x1a5   : > { %v1426_v57 = vpop.f32.mrb[86].mxu0 }
 0x1a6   : > { %v1883_v4 = vmax.f32 %v1691_v44, 0.0  ;;  %8251 = vmatmul.mubr.msk.bf16.gmra.mrb[192].mxu1 %vm1025_vm1, %v9797_v9  ;;  %v1816_v8 = vmax.f32 %v1424_v7, 0.0  ;;  %v1427_v26 = vadd.f32 %v9556_v2, %v1426_v57  ;;  %v8005_v10 = vpop.f32.mrb[87].mxu0 }
 0x1a7   : > { %8254 = vmatprep.mubr.msk.bf16.mxu1 %vm9176_vm0, %v12163_v1 }
 0x1a8   : > { %v9854_v11 = vpack.c.bf16 %v1883_v4, %v1882_v3  ;;  %v1817_v12 = vmax.f32 %v1427_v26, 0.0 }
 0x1a9   : > { %v1695_v28 = vpop.f32.mrb[88].mxu1 }
 0x1aa   : > { %v1696_v14 = vadd.f32 %v9556_v2, %v1695_v28  ;;  %v8140_v16 = vpop.f32.mrb[89].mxu1  ;;  %v9857_v18 = vpack.c.bf16 %v1817_v12, %v1816_v8  ;;  %v9883_v28 = vld [vmem:[%s12156_s3] ss:$0 sm:$0xff] }
 0x1ab   : > { %v1698_v22 = vpop.f32.mrb[90].mxu1  ;;  %v1431_v47 = vpop.f32.mrb[88].mxu0 }
 0x1ac   : > { %v1699_v9 = vadd.f32 %v9556_v2, %v1698_v22  ;;  %v8141_v29 = vpop.f32.mrb[91].mxu1  ;;  %v1432_v31 = vadd.f32 %v9556_v2, %v1431_v47  ;;  %v8008_v17 = vpop.f32.mrb[89].mxu0  ;;  %v1884_v48 = vmax.f32 %v1696_v14, 0.0 }
 0x1ad   : > { %v1434_v32 = vpop.f32.mrb[90].mxu0 }
 0x1ae   : > { %v1885_v35 = vmax.f32 %v1699_v9, 0.0  ;;  %8255 = vmatmul.mubr.msk.bf16.gmra.mrb[196].mxu1 %vm1025_vm1, %v9809_v33  ;;  %v1818_v36 = vmax.f32 %v1432_v31, 0.0  ;;  %v1435_v34 = vadd.f32 %v9556_v2, %v1434_v32  ;;  %v8009_v37 = vpop.f32.mrb[91].mxu0 }
 0x1af   : > { %8258 = vmatprep.mubr.msk.bf16.mxu1 %vm9176_vm0, %v12163_v1 }
 0x1b0   : > { %v9866_v38 = vpack.c.bf16 %v1885_v35, %v1884_v48  ;;  %v1819_v39 = vmax.f32 %v1435_v34, 0.0 }
 0x1b1   : > { %v1703_v43 = vpop.f32.mrb[92].mxu1 }
 0x1b2   : > { %v1704_v50 = vadd.f32 %v9556_v2, %v1703_v43  ;;  %v8144_v52 = vpop.f32.mrb[93].mxu1  ;;  %v9869_v51 = vpack.c.bf16 %v1819_v39, %v1818_v36 }
 0x1b3   : > { %v1706_v5 = vpop.f32.mrb[94].mxu1  ;;  %v1439_v55 = vpop.f32.mrb[92].mxu0 }
 0x1b4   : > { %v1707_v33 = vadd.f32 %v9556_v2, %v1706_v5  ;;  %v8145_v56 = vpop.f32.mrb[95].mxu1  ;;  %v1440_v44 = vadd.f32 %v9556_v2, %v1439_v55  ;;  %v8012_v58 = vpop.f32.mrb[93].mxu0  ;;  %v1886_v0 = vmax.f32 %v1704_v50, 0.0 }
 0x1b5   : > { %v1442_v7 = vpop.f32.mrb[94].mxu0 }
 0x1b6   : > { %v1887_v57 = vmax.f32 %v1707_v33, 0.0  ;;  %8259 = vmatmul.mubr.msk.bf16.gmra.mrb[200].mxu1 %vm1025_vm1, %v9821_v59  ;;  %v1820_v3 = vmax.f32 %v1440_v44, 0.0  ;;  %v1443_v4 = vadd.f32 %v9556_v2, %v1442_v7  ;;  %v8013_v8 = vpop.f32.mrb[95].mxu0 }
 0x1b7   : > { %8262 = vmatprep.mubr.msk.bf16.mxu1 %vm9176_vm0, %v12163_v1 }
 0x1b8   : > { %v9878_v26 = vpack.c.bf16 %v1887_v57, %v1886_v0  ;;  %v1821_v10 = vmax.f32 %v1443_v4, 0.0 }
 0x1b9   : > { %v1711_v12 = vpop.f32.mrb[96].mxu1 }
 0x1ba   : > { %v1712_v14 = vadd.f32 %v9883_v28, %v1711_v12  ;;  %v8148_v16 = vpop.f32.mrb[97].mxu1  ;;  %v9886_v59 = vpack.c.bf16 %v1821_v10, %v1820_v3 }
 0x1bb   : > { %v1714_v22 = vpop.f32.mrb[98].mxu1  ;;  %v1447_v2 = vpop.f32.mrb[96].mxu0 }
 0x1bc   : > { %v1715_v47 = vadd.f32 %v9883_v28, %v1714_v22  ;;  %v8149_v9 = vpop.f32.mrb[99].mxu1  ;;  %v1448_v29 = vadd.f32 %v9883_v28, %v1447_v2  ;;  %v8016_v31 = vpop.f32.mrb[97].mxu0  ;;  %v1888_v32 = vmax.f32 %v1712_v14, 0.0 }
 0x1bd   : > { %v1450_v17 = vpop.f32.mrb[98].mxu0 }
 0x1be   : > { %v1889_v48 = vmax.f32 %v1715_v47, 0.0  ;;  %8263 = vmatmul.mubr.msk.bf16.gmra.mrb[204].mxu1 %vm1025_vm1, %v9833_v24  ;;  %v1822_v35 = vmax.f32 %v1448_v29, 0.0  ;;  %v1451_v36 = vadd.f32 %v9883_v28, %v1450_v17  ;;  %v8017_v34 = vpop.f32.mrb[99].mxu0 }
 0x1bf   : > { %8266 = vmatprep.mubr.msk.bf16.mxu1 %vm9176_vm0, %v12163_v1 }
 0x1c0   : > { %v9895_v37 = vpack.c.bf16 %v1889_v48, %v1888_v32  ;;  %v1823_v39 = vmax.f32 %v1451_v36, 0.0 }
 0x1c1   : > { %v1719_v43 = vpop.f32.mrb[100].mxu1 }
 0x1c2   : > { %v1720_v50 = vadd.f32 %v9883_v28, %v1719_v43  ;;  %v8152_v52 = vpop.f32.mrb[101].mxu1  ;;  %v9898_v5 = vpack.c.bf16 %v1823_v39, %v1822_v35 }
 0x1c3   : > { %v1722_v55 = vpop.f32.mrb[102].mxu1  ;;  %v1455_v33 = vpop.f32.mrb[100].mxu0 }
 0x1c4   : > { %v1723_v24 = vadd.f32 %v9883_v28, %v1722_v55  ;;  %v8153_v56 = vpop.f32.mrb[103].mxu1  ;;  %v1456_v44 = vadd.f32 %v9883_v28, %v1455_v33  ;;  %v8020_v58 = vpop.f32.mrb[101].mxu0  ;;  %v1890_v0 = vmax.f32 %v1720_v50, 0.0 }
 0x1c5   : > { %v1458_v7 = vpop.f32.mrb[102].mxu0 }
 0x1c6   : > { %v1891_v57 = vmax.f32 %v1723_v24, 0.0  ;;  %8267 = vmatmul.mubr.msk.bf16.gmra.mrb[208].mxu1 %vm1025_vm1, %v9845_v27  ;;  %v1824_v3 = vmax.f32 %v1456_v44, 0.0  ;;  %v1459_v4 = vadd.f32 %v9883_v28, %v1458_v7  ;;  %v8021_v8 = vpop.f32.mrb[103].mxu0 }
 0x1c7   : > { %8270 = vmatprep.mubr.msk.bf16.mxu1 %vm9176_vm0, %v12163_v1 }
 0x1c8   : > { %v9907_v10 = vpack.c.bf16 %v1891_v57, %v1890_v0  ;;  %v1825_v12 = vmax.f32 %v1459_v4, 0.0 }
 0x1c9   : > { %v1727_v14 = vpop.f32.mrb[104].mxu1 }
 0x1ca   : > { %v1728_v16 = vadd.f32 %v9883_v28, %v1727_v14  ;;  %v8156_v22 = vpop.f32.mrb[105].mxu1  ;;  %v9910_v2 = vpack.c.bf16 %v1825_v12, %v1824_v3 }
 0x1cb   : > { %v1730_v47 = vpop.f32.mrb[106].mxu1  ;;  %v1463_v9 = vpop.f32.mrb[104].mxu0 }
 0x1cc   : > { %v1731_v27 = vadd.f32 %v9883_v28, %v1730_v47  ;;  %v8157_v29 = vpop.f32.mrb[107].mxu1  ;;  %v1464_v31 = vadd.f32 %v9883_v28, %v1463_v9  ;;  %v8024_v17 = vpop.f32.mrb[105].mxu0  ;;  %v1892_v48 = vmax.f32 %v1728_v16, 0.0 }
 0x1cd   : > { %v1466_v32 = vpop.f32.mrb[106].mxu0 }
 0x1ce   : > { %v1893_v35 = vmax.f32 %v1731_v27, 0.0  ;;  %8271 = vmatmul.mubr.msk.bf16.gmra.mrb[212].mxu1 %vm1025_vm1, %v9857_v18  ;;  %v1826_v36 = vmax.f32 %v1464_v31, 0.0  ;;  %v1467_v34 = vadd.f32 %v9883_v28, %v1466_v32  ;;  %v8025_v39 = vpop.f32.mrb[107].mxu0 }
 0x1cf   : > { %8274 = vmatprep.mubr.msk.bf16.mxu1 %vm9176_vm0, %v12163_v1 }
 0x1d0   : > { %v9919_v43 = vpack.c.bf16 %v1893_v35, %v1892_v48  ;;  %v1827_v50 = vmax.f32 %v1467_v34, 0.0 }
 0x1d1   : > { %v1735_v52 = vpop.f32.mrb[108].mxu1 }
 0x1d2   : > { %v1736_v55 = vadd.f32 %v9883_v28, %v1735_v52  ;;  %v8160_v33 = vpop.f32.mrb[109].mxu1  ;;  %v9922_v24 = vpack.c.bf16 %v1827_v50, %v1826_v36 }
 0x1d3   : > { %v1738_v56 = vpop.f32.mrb[110].mxu1  ;;  %v1471_v44 = vpop.f32.mrb[108].mxu0 }
 0x1d4   : > { %v1739_v18 = vadd.f32 %v9883_v28, %v1738_v56  ;;  %v8161_v58 = vpop.f32.mrb[111].mxu1  ;;  %v1472_v7 = vadd.f32 %v9883_v28, %v1471_v44  ;;  %v8028_v0 = vpop.f32.mrb[109].mxu0  ;;  %v1894_v3 = vmax.f32 %v1736_v55, 0.0 }
 0x1d5   : > { %v1474_v57 = vpop.f32.mrb[110].mxu0 }
 0x1d6   : > { %v1895_v4 = vmax.f32 %v1739_v18, 0.0  ;;  %8275 = vmatmul.mubr.msk.bf16.gmra.mrb[216].mxu1 %vm1025_vm1, %v9869_v51  ;;  %v1828_v8 = vmax.f32 %v1472_v7, 0.0  ;;  %v1475_v12 = vadd.f32 %v9883_v28, %v1474_v57  ;;  %v8029_v14 = vpop.f32.mrb[111].mxu0 }
 0x1d7   : > { %8278 = vmatprep.mubr.msk.bf16.mxu1 %vm9176_vm0, %v12163_v1 }
 0x1d8   : > { %v9931_v16 = vpack.c.bf16 %v1895_v4, %v1894_v3  ;;  %v1829_v22 = vmax.f32 %v1475_v12, 0.0 }
 0x1d9   : > { %v1743_v47 = vpop.f32.mrb[112].mxu1 }
 0x1da   : > { %v1744_v9 = vadd.f32 %v9883_v28, %v1743_v47  ;;  %v8164_v27 = vpop.f32.mrb[113].mxu1  ;;  %v9934_v29 = vpack.c.bf16 %v1829_v22, %v1828_v8 }
 0x1db   : > { %v1746_v31 = vpop.f32.mrb[114].mxu1  ;;  %v1479_v17 = vpop.f32.mrb[112].mxu0 }
 0x1dc   : > { %v1747_v51 = vadd.f32 %v9883_v28, %v1746_v31  ;;  %v8165_v32 = vpop.f32.mrb[115].mxu1  ;;  %v1480_v48 = vadd.f32 %v9883_v28, %v1479_v17  ;;  %v8032_v35 = vpop.f32.mrb[113].mxu0  ;;  %v1896_v34 = vmax.f32 %v1744_v9, 0.0 }
 0x1dd   : > { %v1482_v36 = vpop.f32.mrb[114].mxu0 }
 0x1de   : > { %v1897_v39 = vmax.f32 %v1747_v51, 0.0  ;;  %8279 = vmatmul.mubr.msk.bf16.gmra.mrb[220].mxu1 %vm1025_vm1, %v9886_v59  ;;  %v1830_v50 = vmax.f32 %v1480_v48, 0.0  ;;  %v1483_v52 = vadd.f32 %v9883_v28, %v1482_v36  ;;  %v8033_v55 = vpop.f32.mrb[115].mxu0 }
 0x1df   : > { %8282 = vmatprep.mubr.msk.bf16.mxu1 %vm9176_vm0, %v12163_v1 }
 0x1e0   : > { %v9943_v33 = vpack.c.bf16 %v1897_v39, %v1896_v34  ;;  %v1831_v56 = vmax.f32 %v1483_v52, 0.0 }
 0x1e1   : > { %v1751_v44 = vpop.f32.mrb[116].mxu1 }
 0x1e2   : > { %v1752_v18 = vadd.f32 %v9883_v28, %v1751_v44  ;;  %v8168_v58 = vpop.f32.mrb[117].mxu1  ;;  %v9946_v7 = vpack.c.bf16 %v1831_v56, %v1830_v50 }
 0x1e3   : > { %v1754_v0 = vpop.f32.mrb[118].mxu1  ;;  %v1487_v57 = vpop.f32.mrb[116].mxu0 }
 0x1e4   : > { %v1755_v59 = vadd.f32 %v9883_v28, %v1754_v0  ;;  %v8169_v3 = vpop.f32.mrb[119].mxu1  ;;  %v1488_v4 = vadd.f32 %v9883_v28, %v1487_v57  ;;  %v8036_v8 = vpop.f32.mrb[117].mxu0  ;;  %v1898_v14 = vmax.f32 %v1752_v18, 0.0 }
 0x1e5   : > { %v1490_v12 = vpop.f32.mrb[118].mxu0 }
 0x1e6   : > { %v1899_v22 = vmax.f32 %v1755_v59, 0.0  ;;  %8283 = vmatmul.mubr.msk.bf16.gmra.mrb[224].mxu1 %vm1025_vm1, %v9898_v5  ;;  %v1832_v47 = vmax.f32 %v1488_v4, 0.0  ;;  %v1491_v9 = vadd.f32 %v9883_v28, %v1490_v12  ;;  %v8037_v27 = vpop.f32.mrb[119].mxu0 }
 0x1e7   : > { %8286 = vmatprep.mubr.msk.bf16.mxu1 %vm9176_vm0, %v12163_v1 }
 0x1e8   : > { %v9955_v31 = vpack.c.bf16 %v1899_v22, %v1898_v14  ;;  %v1833_v17 = vmax.f32 %v1491_v9, 0.0 }
 0x1e9   : > { %v1759_v51 = vpop.f32.mrb[120].mxu1 }
 0x1ea   : > { %v1760_v32 = vadd.f32 %v9883_v28, %v1759_v51  ;;  %v8172_v48 = vpop.f32.mrb[121].mxu1  ;;  %v9958_v35 = vpack.c.bf16 %v1833_v17, %v1832_v47 }
 0x1eb   : > { %v1762_v36 = vpop.f32.mrb[122].mxu1  ;;  %v1495_v34 = vpop.f32.mrb[120].mxu0 }
 0x1ec   : > { %v1763_v5 = vadd.f32 %v9883_v28, %v1762_v36  ;;  %v8173_v39 = vpop.f32.mrb[123].mxu1  ;;  %v1496_v50 = vadd.f32 %v9883_v28, %v1495_v34  ;;  %v8040_v52 = vpop.f32.mrb[121].mxu0  ;;  %v1900_v56 = vmax.f32 %v1760_v32, 0.0 }
 0x1ed   : > { %v1498_v55 = vpop.f32.mrb[122].mxu0  ;;  %v9988_v39 = vld [vmem:[%s12158_s5] ss:$0 sm:$0xff] }
 0x1ee   : > { %v1901_v44 = vmax.f32 %v1763_v5, 0.0  ;;  %8287 = vmatmul.mubr.msk.bf16.gmra.mrb[228].mxu1 %vm1025_vm1, %v9910_v2  ;;  %v1834_v18 = vmax.f32 %v1496_v50, 0.0  ;;  %v1499_v58 = vadd.f32 %v9883_v28, %v1498_v55  ;;  %v8041_v0 = vpop.f32.mrb[123].mxu0  ;;  %v6991_v5 = vld [vmem:[%s9978_s16] sm:$0xff]  }
 0x1ef   : > { %8290 = vmatprep.mubr.msk.bf16.mxu1 %vm9176_vm0, %v12163_v1 }
 0x1f0   : > { %v9967_v57 = vpack.c.bf16 %v1901_v44, %v1900_v56  ;;  %v1835_v59 = vmax.f32 %v1499_v58, 0.0  ;;  %v6992_v56 = vunpack.c.l.bf16 %v6991_v5 }
 0x1f1   : > { %v1767_v3 = vpop.f32.mrb[124].mxu1 }
 0x1f2   : > { %v1768_v4 = vadd.f32 %v9883_v28, %v1767_v3  ;;  %v8176_v8 = vpop.f32.mrb[125].mxu1  ;;  %v9970_v12 = vpack.c.bf16 %v1835_v59, %v1834_v18  ;;  %v6993_v18 = vunpack.c.h.bf16 %v6991_v5 }
 0x1f3   : > { %v1770_v14 = vpop.f32.mrb[126].mxu1  ;;  %v1503_v22 = vpop.f32.mrb[124].mxu0 }
 0x1f4   : > { %v1771_v2 = vadd.f32 %v9883_v28, %v1770_v14  ;;  %v8177_v47 = vpop.f32.mrb[127].mxu1  ;;  %v1504_v9 = vadd.f32 %v9883_v28, %v1503_v22  ;;  %v8044_v27 = vpop.f32.mrb[125].mxu0  ;;  %v1902_v51 = vmax.f32 %v1768_v4, 0.0 }
 0x1f5   : > { %v1506_v17 = vpop.f32.mrb[126].mxu0 }
 0x1f6   : > { %v1903_v32 = vmax.f32 %v1771_v2, 0.0  ;;  %8291 = vmatmul.mubr.msk.bf16.gmra.mrb[232].mxu1 %vm1025_vm1, %v9922_v24  ;;  %v1836_v48 = vmax.f32 %v1504_v9, 0.0  ;;  %v1507_v36 = vadd.f32 %v9883_v28, %v1506_v17  ;;  %v8045_v34 = vpop.f32.mrb[127].mxu0 }
 0x1f7   : > { %8294 = vmatprep.mubr.msk.bf16.mxu1 %vm9176_vm0, %v12163_v1 }
 0x1f8   : > { %v9992_v50 = vpack.c.bf16 %v1903_v32, %v1902_v51  ;;  %v1837_v52 = vmax.f32 %v1507_v36, 0.0  ;;  %v7575_v51 = vld [vmem:[%s9978_s16 + $0x8] sm:$0xff]  }
 0x1f9   : > { %v2237_v55 = vpop.f32.mrb[128].mxu1  ;;  %v6996_v34 = vunpack.c.l.bf16 %v7575_v51 }
 0x1fa   : > { %v2238_v24 = vadd.f32 %v9988_v39, %v2237_v55  ;;  %v8188_v44 = vpop.f32.mrb[129].mxu1  ;;  %v9995_v58 = vpack.c.bf16 %v1837_v52, %v1836_v48  ;;  %v6997_v55 = vunpack.c.h.bf16 %v7575_v51 }
 0x1fb   : > { %v2240_v0 = vpop.f32.mrb[130].mxu1  ;;  %v1511_v59 = vpop.f32.mrb[128].mxu0 }
 0x1fc   : > { %v2241_v3 = vadd.f32 %v9988_v39, %v2240_v0  ;;  %v8189_v4 = vpop.f32.mrb[131].mxu1  ;;  %v1512_v8 = vadd.f32 %v9883_v28, %v1511_v59  ;;  %v8048_v14 = vpop.f32.mrb[129].mxu0  ;;  %v2886_v2 = vmul.f32 %v6992_v56, %v2238_v24  ;;  %v7576_v0 = vld [vmem:[%s9978_s16 + $0x10] sm:$0xff]  }
 0x1fd   : > { %v1514_v22 = vpop.f32.mrb[130].mxu0  ;;  %v7000_v4 = vunpack.c.l.bf16 %v7576_v0 }
 0x1fe   : > { %v2887_v47 = vmul.f32 %v6993_v18, %v2241_v3  ;;  %8295 = vmatmul.mubr.msk.bf16.gmra.mrb[236].mxu1 %vm1025_vm1, %v9934_v29  ;;  %v1838_v9 = vmax.f32 %v1512_v8, 0.0  ;;  %v1515_v27 = vadd.f32 %v9883_v28, %v1514_v22  ;;  %v8049_v17 = vpop.f32.mrb[131].mxu0  ;;  %v7001_v22 = vunpack.c.h.bf16 %v7576_v0 }
 0x1ff   : > { %8298 = vmatprep.mubr.msk.bf16.mxu1 %vm9176_vm0, %v12163_v1  ;;  %v7577_v17 = vld [vmem:[%s9978_s16 + $0x18] sm:$0xff]  }
 0x200   : > { %v3016_v32 = vpack.c.bf16 %v2887_v47, %v2886_v2  ;;  %v1839_v48 = vmax.f32 %v1515_v27, 0.0 }
 0x201   : > { %v2245_v36 = vpop.f32.mrb[132].mxu1 }
 0x202   : > { %v2246_v5 = vadd.f32 %v9988_v39, %v2245_v36  ;;  %v8192_v52 = vpop.f32.mrb[133].mxu1  ;;  %8455 = vmatmul.mubr.msk.bf16.vlgmr.msra.gmra.mrb[132].mxu0 %vm1025_vm1, %v3016_v32  ;;  %v10007_v29 = vpack.c.bf16 %v1839_v48, %v1838_v9  ;;  %v7004_v48 = vunpack.c.l.bf16 %v7577_v17 }
 0x203   : > { %v2248_v56 = vpop.f32.mrb[134].mxu1  ;;  %8458 = vmatprep.mubr.msk.bf16.mxu0 %vm9176_vm0, %v12163_v1 }
 0x204   : > { %v2249_v28 = vadd.f32 %v9988_v39, %v2248_v56  ;;  %v8193_v24 = vpop.f32.mrb[135].mxu1  ;;  %v2888_v44 = vmul.f32 %v6996_v34, %v2246_v5  ;;  %v7005_v5 = vunpack.c.h.bf16 %v7577_v17 }
 0x205   : > { %v7578_v24 = vld [vmem:[%s9978_s16 + $0x20] sm:$0xff]  }
 0x206   : > { %v2889_v18 = vmul.f32 %v6997_v55, %v2249_v28  ;;  %8299 = vmatmul.mubr.msk.bf16.gmra.mrb[240].mxu1 %vm1025_vm1, %v9946_v7  ;;  %v7008_v0 = vunpack.c.l.bf16 %v7578_v24 }
 0x207   : > { %8302 = vmatprep.mubr.msk.bf16.mxu1 %vm9176_vm0, %v12163_v1 }
 0x208   : > { %v3017_v59 = vpack.c.bf16 %v2889_v18, %v2888_v44 }
 0x209   : > { %v2253_v3 = vpop.f32.mrb[136].mxu1 }
 0x20a   : > { %v2254_v8 = vadd.f32 %v9988_v39, %v2253_v3  ;;  %v8196_v14 = vpop.f32.mrb[137].mxu1  ;;  %8459 = vmatmul.mubr.msk.bf16.gmra.mrb[136].mxu0 %vm1025_vm1, %v3017_v59 }
 0x20b   : > { %v2256_v2 = vpop.f32.mrb[138].mxu1  ;;  %8462 = vmatprep.mubr.msk.bf16.mxu0 %vm9176_vm0, %v12163_v1 }
 0x20c   : > { %v2257_v7 = vadd.f32 %v9988_v39, %v2256_v2  ;;  %v8197_v47 = vpop.f32.mrb[139].mxu1  ;;  %v2890_v9 = vmul.f32 %v7000_v4, %v2254_v8  ;;  %v7009_v4 = vunpack.c.h.bf16 %v7578_v24 }
 0x20e   : > { %v2891_v27 = vmul.f32 %v7001_v22, %v2257_v7  ;;  %8303 = vmatmul.mubr.msk.bf16.gmra.mrb[244].mxu1 %vm1025_vm1, %v9958_v35  ;;  %v7579_v7 = vld [vmem:[%s9978_s16 + $0x28] sm:$0xff]  }
 0x20f   : > { %8306 = vmatprep.mubr.msk.bf16.mxu1 %vm9176_vm0, %v12163_v1 }
 0x210   : > { %v3018_v51 = vpack.c.bf16 %v2891_v27, %v2890_v9  ;;  %v7012_v27 = vunpack.c.l.bf16 %v7579_v7 }
 0x211   : > { %v2261_v32 = vpop.f32.mrb[140].mxu1 }
 0x212   : > { %v2262_v36 = vadd.f32 %v9988_v39, %v2261_v32  ;;  %v8200_v34 = vpop.f32.mrb[141].mxu1  ;;  %8463 = vmatmul.mubr.msk.bf16.gmra.mrb[140].mxu0 %vm1025_vm1, %v3018_v51  ;;  %v7013_v32 = vunpack.c.h.bf16 %v7579_v7 }
 0x213   : > { %v2264_v52 = vpop.f32.mrb[142].mxu1  ;;  %8466 = vmatprep.mubr.msk.bf16.mxu0 %vm9176_vm0, %v12163_v1 }
 0x214   : > { %v2265_v35 = vadd.f32 %v9988_v39, %v2264_v52  ;;  %v8201_v55 = vpop.f32.mrb[143].mxu1  ;;  %v2892_v56 = vmul.f32 %v7004_v48, %v2262_v36  ;;  %v7580_v52 = vld [vmem:[%s9978_s16 + $0x30] sm:$0xff]  }
 0x216   : > { %v2893_v28 = vmul.f32 %v7005_v5, %v2265_v35  ;;  %8307 = vmatmul.mubr.msk.bf16.gmra.mrb[248].mxu1 %vm1025_vm1, %v9970_v12 }
 0x217   : > { %8310 = vmatprep.mubr.msk.bf16.mxu1 %vm9176_vm0, %v12163_v1 }
 0x218   : > { %v3019_v44 = vpack.c.bf16 %v2893_v28, %v2892_v56  ;;  %v7016_v56 = vunpack.c.l.bf16 %v7580_v52 }
 0x219   : > { %v2269_v18 = vpop.f32.mrb[144].mxu1 }
 0x21a   : > { %v2270_v59 = vadd.f32 %v9988_v39, %v2269_v18  ;;  %v8204_v3 = vpop.f32.mrb[145].mxu1  ;;  %8467 = vmatmul.mubr.msk.bf16.gmra.mrb[144].mxu0 %vm1025_vm1, %v3019_v44  ;;  %v7017_v44 = vunpack.c.h.bf16 %v7580_v52 }
 0x21b   : > { %v2272_v8 = vpop.f32.mrb[146].mxu1  ;;  %8470 = vmatprep.mubr.msk.bf16.mxu0 %vm9176_vm0, %v12163_v1 }
 0x21c   : > { %v2273_v12 = vadd.f32 %v9988_v39, %v2272_v8  ;;  %v8205_v14 = vpop.f32.mrb[147].mxu1  ;;  %v2894_v22 = vmul.f32 %v7008_v0, %v2270_v59 }
 0x21e   : > { %v2895_v2 = vmul.f32 %v7009_v4, %v2273_v12  ;;  %8311 = vmatmul.mubr.msk.bf16.gmra.mrb[252].mxu1 %vm1025_vm1, %v9995_v58  ;;  %v7581_v4 = vld [vmem:[%s9978_s16 + $0x38] sm:$0xff]  }
 0x21f   : > { %8314 = vmatprep.mubr.msk.bf16.mxu1 %vm9176_vm0, %v12163_v1  ;;  %v7020_v14 = vunpack.c.l.bf16 %v7581_v4  ;;  %v7021_v7 = vunpack.c.h.bf16 %v7581_v4 }
 0x220   : > { %v3020_v47 = vpack.c.bf16 %v2895_v2, %v2894_v22 }
 0x221   : > { %v2277_v9 = vpop.f32.mrb[148].mxu1 }
 0x222   : > { %v2278_v17 = vadd.f32 %v9988_v39, %v2277_v9  ;;  %v8208_v51 = vpop.f32.mrb[149].mxu1  ;;  %8471 = vmatmul.mubr.msk.bf16.gmra.mrb[148].mxu0 %vm1025_vm1, %v3020_v47 }
 0x223   : > { %v2280_v48 = vpop.f32.mrb[150].mxu1  ;;  %8474 = vmatprep.mubr.msk.bf16.mxu0 %vm9176_vm0, %v12163_v1  ;;  %v7582_v51 = vld [vmem:[%s9978_s16 + $0x40] sm:$0xff]  }
 0x224   : > { %v2281_v58 = vadd.f32 %v9988_v39, %v2280_v48  ;;  %v8209_v36 = vpop.f32.mrb[151].mxu1  ;;  %v2896_v34 = vmul.f32 %v7012_v27, %v2278_v17 }
 0x226   : > { %v2897_v5 = vmul.f32 %v7013_v32, %v2281_v58  ;;  %8315 = vmatmul.mubr.msk.bf16.gmra.mrb[0].mxu1 %vm1025_vm1, %v10007_v29  ;;  %v7024_v58 = vunpack.c.l.bf16 %v7582_v51 }
 0x227   : > { %8318 = vmatprep.mubr.msk.bf16.mxu1 %vm9176_vm0, %v12163_v1 }
 0x228   : > { %v3021_v35 = vpack.c.bf16 %v2897_v5, %v2896_v34  ;;  %v7025_v5 = vunpack.c.h.bf16 %v7582_v51 }
 0x229   : > { %v2285_v55 = vpop.f32.mrb[152].mxu1 }
 0x22a   : > { %v2286_v28 = vadd.f32 %v9988_v39, %v2285_v55  ;;  %v8212_v24 = vpop.f32.mrb[153].mxu1  ;;  %8475 = vmatmul.mubr.msk.bf16.gmra.mrb[152].mxu0 %vm1025_vm1, %v3021_v35 }
 0x22b   : > { %v2288_v18 = vpop.f32.mrb[154].mxu1  ;;  %8478 = vmatprep.mubr.msk.bf16.mxu0 %vm9176_vm0, %v12163_v1 }
 0x22c   : > { %v2289_v29 = vadd.f32 %v9988_v39, %v2288_v18  ;;  %v8213_v0 = vpop.f32.mrb[155].mxu1  ;;  %v2898_v59 = vmul.f32 %v7016_v56, %v2286_v28  ;;  %v7583_v28 = vld [vmem:[%s9978_s16 + $0x48] sm:$0xff]  }
 0x22d   : > { %v7028_v18 = vunpack.c.l.bf16 %v7583_v28 }
 0x22e   : > { %v2899_v3 = vmul.f32 %v7017_v44, %v2289_v29  ;;  %8319 = vmatmul.mubr.msk.bf16.gmra.mrb[4].mxu1 %vm1025_vm1, %v9572_v20 }
 0x22f   : > { %8322 = vmatprep.mubr.msk.bf16.mxu1 %vm9176_vm0, %v12163_v1 }
 0x230   : > { %v3022_v8 = vpack.c.bf16 %v2899_v3, %v2898_v59  ;;  %v7029_v59 = vunpack.c.h.bf16 %v7583_v28 }
 0x231   : > { %v2293_v12 = vpop.f32.mrb[156].mxu1 }
 0x232   : > { %v2294_v22 = vadd.f32 %v9988_v39, %v2293_v12  ;;  %v8216_v2 = vpop.f32.mrb[157].mxu1  ;;  %8479 = vmatmul.mubr.msk.bf16.gmra.mrb[156].mxu0 %vm1025_vm1, %v3022_v8 }
 0x233   : > { %v2296_v47 = vpop.f32.mrb[158].mxu1  ;;  %8482 = vmatprep.mubr.msk.bf16.mxu0 %vm9176_vm0, %v12163_v1 }
 0x234   : > { %v2297_v20 = vadd.f32 %v9988_v39, %v2296_v47  ;;  %v8217_v9 = vpop.f32.mrb[159].mxu1  ;;  %v2900_v27 = vmul.f32 %v7020_v14, %v2294_v22  ;;  %v7584_v14 = vld [vmem:[%s9978_s16 + $0x50] sm:$0xff]  }
 0x235   : > { %v7033_v9 = vunpack.c.h.bf16 %v7584_v14 }
 0x236   : > { %v2901_v17 = vmul.f32 %v7021_v7, %v2297_v20  ;;  %8323 = vmatmul.mubr.msk.bf16.gmra.mrb[8].mxu1 %vm1025_vm1, %v9592_v41  ;;  %v7032_v7 = vunpack.c.l.bf16 %v7584_v14  ;;  %v7587_v14 = vld [vmem:[%s9978_s16 + $0x68] sm:$0xff]  }
 0x237   : > { %8326 = vmatprep.mubr.msk.bf16.mxu1 %vm9176_vm0, %v12163_v1 }
 0x238   : > { %v3023_v32 = vpack.c.bf16 %v2901_v17, %v2900_v27 }
 0x239   : > { %v2301_v48 = vpop.f32.mrb[160].mxu1 }
 0x23a   : > { %v2302_v36 = vadd.f32 %v9988_v39, %v2301_v48  ;;  %v8220_v34 = vpop.f32.mrb[161].mxu1  ;;  %8483 = vmatmul.mubr.msk.bf16.gmra.mrb[160].mxu0 %vm1025_vm1, %v3023_v32  ;;  %v7585_v48 = vld [vmem:[%s9978_s16 + $0x58] sm:$0xff]  }
 0x23b   : > { %v2304_v52 = vpop.f32.mrb[162].mxu1  ;;  %8486 = vmatprep.mubr.msk.bf16.mxu0 %vm9176_vm0, %v12163_v1  ;;  %v7036_v34 = vunpack.c.l.bf16 %v7585_v48 }
 0x23c   : > { %v2305_v41 = vadd.f32 %v9988_v39, %v2304_v52  ;;  %v8221_v35 = vpop.f32.mrb[163].mxu1  ;;  %v2902_v55 = vmul.f32 %v7024_v58, %v2302_v36 }
 0x23e   : > { %v2903_v56 = vmul.f32 %v7025_v5, %v2305_v41  ;;  %8327 = vmatmul.mubr.msk.bf16.gmra.mrb[12].mxu1 %vm1025_vm1, %v9608_v61  ;;  %v7037_v41 = vunpack.c.h.bf16 %v7585_v48 }
 0x23f   : > { %8330 = vmatprep.mubr.msk.bf16.mxu1 %vm9176_vm0, %v12163_v1 }
 0x240   : > { %v3024_v24 = vpack.c.bf16 %v2903_v56, %v2902_v55 }
 0x241   : > { %v2309_v44 = vpop.f32.mrb[164].mxu1 }
 0x242   : > { %v2310_v29 = vadd.f32 %v9988_v39, %v2309_v44  ;;  %v8224_v0 = vpop.f32.mrb[165].mxu1  ;;  %8487 = vmatmul.mubr.msk.bf16.gmra.mrb[164].mxu0 %vm1025_vm1, %v3024_v24  ;;  %v7586_v24 = vld [vmem:[%s9978_s16 + $0x60] sm:$0xff]  }
 0x243   : > { %v2312_v3 = vpop.f32.mrb[166].mxu1  ;;  %8490 = vmatprep.mubr.msk.bf16.mxu0 %vm9176_vm0, %v12163_v1 }
 0x244   : > { %v2313_v61 = vadd.f32 %v9988_v39, %v2312_v3  ;;  %v8225_v4 = vpop.f32.mrb[167].mxu1  ;;  %v2904_v8 = vmul.f32 %v7028_v18, %v2310_v29  ;;  %v7040_v29 = vunpack.c.l.bf16 %v7586_v24  ;;  %v7041_v3 = vunpack.c.h.bf16 %v7586_v24 }
 0x246   : > { %v2905_v12 = vmul.f32 %v7029_v59, %v2313_v61  ;;  %8331 = vmatmul.mubr.msk.bf16.gmra.mrb[16].mxu1 %vm1025_vm1, %v9624_v19 }
 0x247   : > { %8334 = vmatprep.mubr.msk.bf16.mxu1 %vm9176_vm0, %v12163_v1 }
 0x248   : > { %v3025_v22 = vpack.c.bf16 %v2905_v12, %v2904_v8 }
 0x249   : > { %v2317_v2 = vpop.f32.mrb[168].mxu1 }
 0x24a   : > { %v2318_v47 = vadd.f32 %v9988_v39, %v2317_v2  ;;  %v8228_v20 = vpop.f32.mrb[169].mxu1  ;;  %8491 = vmatmul.mubr.msk.bf16.gmra.mrb[168].mxu0 %vm1025_vm1, %v3025_v22 }
 0x24b   : > { %v2320_v27 = vpop.f32.mrb[170].mxu1  ;;  %8494 = vmatprep.mubr.msk.bf16.mxu0 %vm9176_vm0, %v12163_v1 }
 0x24c   : > { %v2321_v19 = vadd.f32 %v9988_v39, %v2320_v27  ;;  %v8229_v17 = vpop.f32.mrb[171].mxu1  ;;  %v2906_v51 = vmul.f32 %v7032_v7, %v2318_v47  ;;  %v7044_v7 = vunpack.c.l.bf16 %v7587_v14 }
 0x24e   : > { %v2907_v32 = vmul.f32 %v7033_v9, %v2321_v19  ;;  %8335 = vmatmul.mubr.msk.bf16.gmra.mrb[20].mxu1 %vm1025_vm1, %v9640_v42  ;;  %v7045_v9 = vunpack.c.h.bf16 %v7587_v14 }
 0x24f   : > { %8338 = vmatprep.mubr.msk.bf16.mxu1 %vm9176_vm0, %v12163_v1 }
 0x250   : > { %v3026_v58 = vpack.c.bf16 %v2907_v32, %v2906_v51  ;;  %v7588_v32 = vld [vmem:[%s9978_s16 + $0x70] sm:$0xff]  }
 0x251   : > { %v2325_v36 = vpop.f32.mrb[172].mxu1 }
 0x252   : > { %v2326_v5 = vadd.f32 %v9988_v39, %v2325_v36  ;;  %v8232_v52 = vpop.f32.mrb[173].mxu1  ;;  %8495 = vmatmul.mubr.msk.bf16.gmra.mrb[172].mxu0 %vm1025_vm1, %v3026_v58  ;;  %v7048_v36 = vunpack.c.l.bf16 %v7588_v32 }
 0x253   : > { %v2328_v35 = vpop.f32.mrb[174].mxu1  ;;  %8498 = vmatprep.mubr.msk.bf16.mxu0 %vm9176_vm0, %v12163_v1  ;;  %v7049_v52 = vunpack.c.h.bf16 %v7588_v32 }
 0x254   : > { %v2329_v42 = vadd.f32 %v9988_v39, %v2328_v35  ;;  %v8233_v55 = vpop.f32.mrb[175].mxu1  ;;  %v2908_v56 = vmul.f32 %v7036_v34, %v2326_v5 }
 0x256   : > { %v2909_v28 = vmul.f32 %v7037_v41, %v2329_v42  ;;  %8339 = vmatmul.mubr.msk.bf16.gmra.mrb[24].mxu1 %vm1025_vm1, %v9656_v63 }
 0x257   : > { %8342 = vmatprep.mubr.msk.bf16.mxu1 %vm9176_vm0, %v12163_v1 }
 0x258   : > { %v3027_v44 = vpack.c.bf16 %v2909_v28, %v2908_v56  ;;  %v7589_v56 = vld [vmem:[%s9978_s16 + $0x78] sm:$0xff]  }
 0x259   : > { %v2333_v18 = vpop.f32.mrb[176].mxu1 }
 0x25a   : > { %v2334_v0 = vadd.f32 %v9988_v39, %v2333_v18  ;;  %v8236_v59 = vpop.f32.mrb[177].mxu1  ;;  %8499 = vmatmul.mubr.msk.bf16.gmra.mrb[176].mxu0 %vm1025_vm1, %v3027_v44  ;;  %v7052_v44 = vunpack.c.l.bf16 %v7589_v56 }
 0x25b   : > { %v2336_v61 = vpop.f32.mrb[178].mxu1  ;;  %8502 = vmatprep.mubr.msk.bf16.mxu0 %vm9176_vm0, %v12163_v1 }
 0x25c   : > { %v2337_v63 = vadd.f32 %v9988_v39, %v2336_v61  ;;  %v8237_v4 = vpop.f32.mrb[179].mxu1  ;;  %v2910_v8 = vmul.f32 %v7040_v29, %v2334_v0  ;;  %v7053_v0 = vunpack.c.h.bf16 %v7589_v56 }
 0x25d   : > { %v7590_v4 = vld [vmem:[%s9978_s16 + $0x80] sm:$0xff]  }
 0x25e   : > { %v2911_v12 = vmul.f32 %v7041_v3, %v2337_v63  ;;  %8343 = vmatmul.mubr.msk.bf16.gmra.mrb[28].mxu1 %vm1025_vm1, %v9671_v21  ;;  %v7056_v14 = vunpack.c.l.bf16 %v7590_v4 }
 0x25f   : > { %8346 = vmatprep.mubr.msk.bf16.mxu1 %vm9176_vm0, %v12163_v1 }
 0x260   : > { %v3028_v22 = vpack.c.bf16 %v2911_v12, %v2910_v8 }
 0x261   : > { %v2341_v2 = vpop.f32.mrb[180].mxu1 }
 0x262   : > { %v2342_v47 = vadd.f32 %v9988_v39, %v2341_v2  ;;  %v8240_v20 = vpop.f32.mrb[181].mxu1  ;;  %8503 = vmatmul.mubr.msk.bf16.gmra.mrb[180].mxu0 %vm1025_vm1, %v3028_v22 }
 0x263   : > { %v2344_v27 = vpop.f32.mrb[182].mxu1  ;;  %8506 = vmatprep.mubr.msk.bf16.mxu0 %vm9176_vm0, %v12163_v1 }
 0x264   : > { %v2345_v21 = vadd.f32 %v9988_v39, %v2344_v27  ;;  %v8241_v19 = vpop.f32.mrb[183].mxu1  ;;  %v2912_v17 = vmul.f32 %v7044_v7, %v2342_v47  ;;  %v7057_v7 = vunpack.c.h.bf16 %v7590_v4 }
 0x266   : > { %v2913_v51 = vmul.f32 %v7045_v9, %v2345_v21  ;;  %8347 = vmatmul.mubr.msk.bf16.gmra.mrb[32].mxu1 %vm1025_vm1, %v9683_v40  ;;  %v7591_v21 = vld [vmem:[%s9978_s16 + $0x88] sm:$0xff]  }
 0x267   : > { %8350 = vmatprep.mubr.msk.bf16.mxu1 %vm9176_vm0, %v12163_v1 }
 0x268   : > { %v3029_v48 = vpack.c.bf16 %v2913_v51, %v2912_v17  ;;  %v7060_v51 = vunpack.c.l.bf16 %v7591_v21 }
 0x269   : > { %v2349_v58 = vpop.f32.mrb[184].mxu1 }
 0x26a   : > { %v2350_v34 = vadd.f32 %v9988_v39, %v2349_v58  ;;  %v8244_v5 = vpop.f32.mrb[185].mxu1  ;;  %8507 = vmatmul.mubr.msk.bf16.gmra.mrb[184].mxu0 %vm1025_vm1, %v3029_v48  ;;  %v7061_v58 = vunpack.c.h.bf16 %v7591_v21 }
 0x26b   : > { %v2352_v41 = vpop.f32.mrb[186].mxu1  ;;  %8510 = vmatprep.mubr.msk.bf16.mxu0 %vm9176_vm0, %v12163_v1 }
 0x26c   : > { %v2353_v40 = vadd.f32 %v9988_v39, %v2352_v41  ;;  %v8245_v35 = vpop.f32.mrb[187].mxu1  ;;  %v2914_v42 = vmul.f32 %v7048_v36, %v2350_v34  ;;  %v7592_v41 = vld [vmem:[%s9978_s16 + $0x90] sm:$0xff]  }
 0x26e   : > { %v2915_v55 = vmul.f32 %v7049_v52, %v2353_v40  ;;  %8351 = vmatmul.mubr.msk.bf16.gmra.mrb[36].mxu1 %vm1025_vm1, %v9695_v62 }
 0x26f   : > { %8354 = vmatprep.mubr.msk.bf16.mxu1 %vm9176_vm0, %v12163_v1 }
 0x270   : > { %v3030_v28 = vpack.c.bf16 %v2915_v55, %v2914_v42  ;;  %v7064_v42 = vunpack.c.l.bf16 %v7592_v41 }
 0x271   : > { %v2357_v24 = vpop.f32.mrb[188].mxu1 }
 0x272   : > { %v2358_v18 = vadd.f32 %v9988_v39, %v2357_v24  ;;  %v8248_v29 = vpop.f32.mrb[189].mxu1  ;;  %8511 = vmatmul.mubr.msk.bf16.gmra.mrb[188].mxu0 %vm1025_vm1, %v3030_v28  ;;  %v7065_v28 = vunpack.c.h.bf16 %v7592_v41 }
 0x273   : > { %v2360_v59 = vpop.f32.mrb[190].mxu1  ;;  %8514 = vmatprep.mubr.msk.bf16.mxu0 %vm9176_vm0, %v12163_v1 }
 0x274   : > { %v2361_v62 = vadd.f32 %v9988_v39, %v2360_v59  ;;  %v8249_v3 = vpop.f32.mrb[191].mxu1  ;;  %v2916_v61 = vmul.f32 %v7052_v44, %v2358_v18 }
 0x276   : > { %v2917_v63 = vmul.f32 %v7053_v0, %v2361_v62  ;;  %8355 = vmatmul.mubr.msk.bf16.gmra.mrb[40].mxu1 %vm1025_vm1, %v9710_v23  ;;  %v7593_v0 = vld [vmem:[%s9978_s16 + $0x98] sm:$0xff]  }
 0x277   : > { %8358 = vmatprep.mubr.msk.bf16.mxu1 %vm9176_vm0, %v12163_v1  ;;  %v7068_v3 = vunpack.c.l.bf16 %v7593_v0  ;;  %v7069_v4 = vunpack.c.h.bf16 %v7593_v0 }
 0x278   : > { %v3031_v8 = vpack.c.bf16 %v2917_v63, %v2916_v61 }
 0x279   : > { %v2365_v12 = vpop.f32.mrb[192].mxu1 }
 0x27a   : > { %v2366_v22 = vadd.f32 %v9988_v39, %v2365_v12  ;;  %v8252_v2 = vpop.f32.mrb[193].mxu1  ;;  %8515 = vmatmul.mubr.msk.bf16.gmra.mrb[192].mxu0 %vm1025_vm1, %v3031_v8 }
 0x27b   : > { %v2368_v47 = vpop.f32.mrb[194].mxu1  ;;  %8518 = vmatprep.mubr.msk.bf16.mxu0 %vm9176_vm0, %v12163_v1  ;;  %v7594_v2 = vld [vmem:[%s9978_s16 + $0xa0] sm:$0xff]  }
 0x27c   : > { %v2369_v23 = vadd.f32 %v9988_v39, %v2368_v47  ;;  %v8253_v20 = vpop.f32.mrb[195].mxu1  ;;  %v2918_v9 = vmul.f32 %v7056_v14, %v2366_v22 }
 0x27e   : > { %v2919_v27 = vmul.f32 %v7057_v7, %v2369_v23  ;;  %8359 = vmatmul.mubr.msk.bf16.gmra.mrb[44].mxu1 %vm1025_vm1, %v9722_v45  ;;  %v7072_v23 = vunpack.c.l.bf16 %v7594_v2 }
 0x27f   : > { %8362 = vmatprep.mubr.msk.bf16.mxu1 %vm9176_vm0, %v12163_v1 }
 0x280   : > { %v3032_v19 = vpack.c.bf16 %v2919_v27, %v2918_v9  ;;  %v7073_v27 = vunpack.c.h.bf16 %v7594_v2 }
 0x281   : > { %v2373_v17 = vpop.f32.mrb[196].mxu1 }
 0x282   : > { %v2374_v32 = vadd.f32 %v9988_v39, %v2373_v17  ;;  %v8256_v48 = vpop.f32.mrb[197].mxu1  ;;  %8519 = vmatmul.mubr.msk.bf16.gmra.mrb[196].mxu0 %vm1025_vm1, %v3032_v19 }
 0x283   : > { %v2376_v36 = vpop.f32.mrb[198].mxu1  ;;  %8522 = vmatprep.mubr.msk.bf16.mxu0 %vm9176_vm0, %v12163_v1 }
 0x284   : > { %v2377_v45 = vadd.f32 %v9988_v39, %v2376_v36  ;;  %v8257_v34 = vpop.f32.mrb[199].mxu1  ;;  %v2920_v5 = vmul.f32 %v7060_v51, %v2374_v32  ;;  %v7595_v32 = vld [vmem:[%s9978_s16 + $0xa8] sm:$0xff]  }
 0x285   : > { %v7076_v36 = vunpack.c.l.bf16 %v7595_v32 }
 0x286   : > { %v2921_v52 = vmul.f32 %v7061_v58, %v2377_v45  ;;  %8363 = vmatmul.mubr.msk.bf16.gmra.mrb[48].mxu1 %vm1025_vm1, %v9734_v6 }
 0x287   : > { %8366 = vmatprep.mubr.msk.bf16.mxu1 %vm9176_vm0, %v12163_v1 }
 0x288   : > { %v3033_v40 = vpack.c.bf16 %v2921_v52, %v2920_v5  ;;  %v7077_v5 = vunpack.c.h.bf16 %v7595_v32  ;;  %v7599_v32 = vld [vmem:[%s9978_s16 + $0xc8] sm:$0xff]  }
 0x289   : > { %v2381_v35 = vpop.f32.mrb[200].mxu1 }
 0x28a   : > { %v2382_v55 = vadd.f32 %v9988_v39, %v2381_v35  ;;  %v8260_v56 = vpop.f32.mrb[201].mxu1  ;;  %8523 = vmatmul.mubr.msk.bf16.gmra.mrb[200].mxu0 %vm1025_vm1, %v3033_v40 }
 0x28b   : > { %v2384_v24 = vpop.f32.mrb[202].mxu1  ;;  %8526 = vmatprep.mubr.msk.bf16.mxu0 %vm9176_vm0, %v12163_v1 }
 0x28c   : > { %v2385_v6 = vadd.f32 %v9988_v39, %v2384_v24  ;;  %v8261_v44 = vpop.f32.mrb[203].mxu1  ;;  %v2922_v18 = vmul.f32 %v7064_v42, %v2382_v55  ;;  %v7596_v42 = vld [vmem:[%s9978_s16 + $0xb0] sm:$0xff]  }
 0x28d   : > { %v7081_v44 = vunpack.c.h.bf16 %v7596_v42 }
 0x28e   : > { %v2923_v29 = vmul.f32 %v7065_v28, %v2385_v6  ;;  %8367 = vmatmul.mubr.msk.bf16.gmra.mrb[52].mxu1 %vm1025_vm1, %v9746_v30  ;;  %v7080_v28 = vunpack.c.l.bf16 %v7596_v42 }
 0x28f   : > { %8370 = vmatprep.mubr.msk.bf16.mxu1 %vm9176_vm0, %v12163_v1 }
 0x290   : > { %v3034_v59 = vpack.c.bf16 %v2923_v29, %v2922_v18 }
 0x291   : > { %v2389_v62 = vpop.f32.mrb[204].mxu1 }
 0x292   : > { %v2390_v61 = vadd.f32 %v9988_v39, %v2389_v62  ;;  %v8264_v63 = vpop.f32.mrb[205].mxu1  ;;  %8527 = vmatmul.mubr.msk.bf16.gmra.mrb[204].mxu0 %vm1025_vm1, %v3034_v59  ;;  %v7597_v62 = vld [vmem:[%s9978_s16 + $0xb8] sm:$0xff]  }
 0x293   : > { %v2392_v8 = vpop.f32.mrb[206].mxu1  ;;  %8530 = vmatprep.mubr.msk.bf16.mxu0 %vm9176_vm0, %v12163_v1  ;;  %v7084_v63 = vunpack.c.l.bf16 %v7597_v62 }
 0x294   : > { %v2393_v30 = vadd.f32 %v9988_v39, %v2392_v8  ;;  %v8265_v12 = vpop.f32.mrb[207].mxu1  ;;  %v2924_v14 = vmul.f32 %v7068_v3, %v2390_v61 }
 0x296   : > { %v2925_v22 = vmul.f32 %v7069_v4, %v2393_v30  ;;  %8371 = vmatmul.mubr.msk.bf16.gmra.mrb[56].mxu1 %vm1025_vm1, %v9758_v53  ;;  %v7085_v30 = vunpack.c.h.bf16 %v7597_v62 }
 0x297   : > { %8374 = vmatprep.mubr.msk.bf16.mxu1 %vm9176_vm0, %v12163_v1 }
 0x298   : > { %v3035_v7 = vpack.c.bf16 %v2925_v22, %v2924_v14 }
 0x299   : > { %v2397_v47 = vpop.f32.mrb[208].mxu1 }
 0x29a   : > { %v2398_v20 = vadd.f32 %v9988_v39, %v2397_v47  ;;  %v8268_v9 = vpop.f32.mrb[209].mxu1  ;;  %8531 = vmatmul.mubr.msk.bf16.gmra.mrb[208].mxu0 %vm1025_vm1, %v3035_v7  ;;  %v7598_v7 = vld [vmem:[%s9978_s16 + $0xc0] sm:$0xff]  }
 0x29b   : > { %v2400_v21 = vpop.f32.mrb[210].mxu1  ;;  %8534 = vmatprep.mubr.msk.bf16.mxu0 %vm9176_vm0, %v12163_v1 }
 0x29c   : > { %v2401_v53 = vadd.f32 %v9988_v39, %v2400_v21  ;;  %v8269_v19 = vpop.f32.mrb[211].mxu1  ;;  %v2926_v17 = vmul.f32 %v7072_v23, %v2398_v20  ;;  %v7088_v20 = vunpack.c.l.bf16 %v7598_v7  ;;  %v7089_v21 = vunpack.c.h.bf16 %v7598_v7  ;;  %v7602_v7 = vld [vmem:[%s9978_s16 + $0xe0] sm:$0xff]  }
 0x29e   : > { %v2927_v51 = vmul.f32 %v7073_v27, %v2401_v53  ;;  %8375 = vmatmul.mubr.msk.bf16.gmra.mrb[60].mxu1 %vm1025_vm1, %v9770_v13 }
 0x29f   : > { %8378 = vmatprep.mubr.msk.bf16.mxu1 %vm9176_vm0, %v12163_v1 }
 0x2a0   : > { %v3036_v48 = vpack.c.bf16 %v2927_v51, %v2926_v17 }
 0x2a1   : > { %v2405_v58 = vpop.f32.mrb[212].mxu1 }
 0x2a2   : > { %v2406_v45 = vadd.f32 %v9988_v39, %v2405_v58  ;;  %v8272_v34 = vpop.f32.mrb[213].mxu1  ;;  %8535 = vmatmul.mubr.msk.bf16.gmra.mrb[212].mxu0 %vm1025_vm1, %v3036_v48 }
 0x2a3   : > { %v2408_v52 = vpop.f32.mrb[214].mxu1  ;;  %8538 = vmatprep.mubr.msk.bf16.mxu0 %vm9176_vm0, %v12163_v1 }
 0x2a4   : > { %v2409_v13 = vadd.f32 %v9988_v39, %v2408_v52  ;;  %v8273_v41 = vpop.f32.mrb[215].mxu1  ;;  %v2928_v40 = vmul.f32 %v7076_v36, %v2406_v45  ;;  %v7092_v36 = vunpack.c.l.bf16 %v7599_v32 }
 0x2a6   : > { %v2929_v35 = vmul.f32 %v7077_v5, %v2409_v13  ;;  %8379 = vmatmul.mubr.msk.bf16.gmra.mrb[64].mxu1 %vm1025_vm1, %v9782_v49  ;;  %v7093_v5 = vunpack.c.h.bf16 %v7599_v32 }
 0x2a7   : > { %8382 = vmatprep.mubr.msk.bf16.mxu1 %vm9176_vm0, %v12163_v1 }
 0x2a8   : > { %v3037_v55 = vpack.c.bf16 %v2929_v35, %v2928_v40  ;;  %v7600_v35 = vld [vmem:[%s9978_s16 + $0xd0] sm:$0xff]  }
 0x2a9   : > { %v2413_v56 = vpop.f32.mrb[216].mxu1 }
 0x2aa   : > { %v2414_v24 = vadd.f32 %v9988_v39, %v2413_v56  ;;  %v8276_v6 = vpop.f32.mrb[217].mxu1  ;;  %8539 = vmatmul.mubr.msk.bf16.gmra.mrb[216].mxu0 %vm1025_vm1, %v3037_v55  ;;  %v7096_v56 = vunpack.c.l.bf16 %v7600_v35 }
 0x2ab   : > { %v2416_v18 = vpop.f32.mrb[218].mxu1  ;;  %8542 = vmatprep.mubr.msk.bf16.mxu0 %vm9176_vm0, %v12163_v1  ;;  %v7097_v6 = vunpack.c.h.bf16 %v7600_v35 }
 0x2ac   : > { %v2417_v49 = vadd.f32 %v9988_v39, %v2416_v18  ;;  %v8277_v29 = vpop.f32.mrb[219].mxu1  ;;  %v2930_v0 = vmul.f32 %v7080_v28, %v2414_v24 }
 0x2ae   : > { %v2931_v59 = vmul.f32 %v7081_v44, %v2417_v49  ;;  %8383 = vmatmul.mubr.msk.bf16.gmra.mrb[68].mxu1 %vm1025_vm1, %v9794_v60 }
 0x2af   : > { %8386 = vmatprep.mubr.msk.bf16.mxu1 %vm9176_vm0, %v12163_v1 }
 0x2b0   : > { %v3038_v3 = vpack.c.bf16 %v2931_v59, %v2930_v0  ;;  %v7601_v0 = vld [vmem:[%s9978_s16 + $0xd8] sm:$0xff]  }
 0x2b1   : > { %v2421_v61 = vpop.f32.mrb[220].mxu1 }
 0x2b2   : > { %v2422_v4 = vadd.f32 %v9988_v39, %v2421_v61  ;;  %v8280_v8 = vpop.f32.mrb[221].mxu1  ;;  %8543 = vmatmul.mubr.msk.bf16.gmra.mrb[220].mxu0 %vm1025_vm1, %v3038_v3  ;;  %v7100_v3 = vunpack.c.l.bf16 %v7601_v0 }
 0x2b3   : > { %v2424_v12 = vpop.f32.mrb[222].mxu1  ;;  %8546 = vmatprep.mubr.msk.bf16.mxu0 %vm9176_vm0, %v12163_v1 }
 0x2b4   : > { %v2425_v60 = vadd.f32 %v9988_v39, %v2424_v12  ;;  %v8281_v14 = vpop.f32.mrb[223].mxu1  ;;  %v2932_v22 = vmul.f32 %v7084_v63, %v2422_v4  ;;  %v7101_v4 = vunpack.c.h.bf16 %v7601_v0 }
 0x2b6   : > { %v2933_v2 = vmul.f32 %v7085_v30, %v2425_v60  ;;  %8387 = vmatmul.mubr.msk.bf16.gmra.mrb[72].mxu1 %vm1025_vm1, %v9806_v25 }
 0x2b7   : > { %8390 = vmatprep.mubr.msk.bf16.mxu1 %vm9176_vm0, %v12163_v1 }
 0x2b8   : > { %v3039_v47 = vpack.c.bf16 %v2933_v2, %v2932_v22 }
 0x2b9   : > { %v2429_v23 = vpop.f32.mrb[224].mxu1 }
 0x2ba   : > { %v2430_v9 = vadd.f32 %v9988_v39, %v2429_v23  ;;  %v8284_v27 = vpop.f32.mrb[225].mxu1  ;;  %8547 = vmatmul.mubr.msk.bf16.gmra.mrb[224].mxu0 %vm1025_vm1, %v3039_v47 }
 0x2bb   : > { %v2432_v53 = vpop.f32.mrb[226].mxu1  ;;  %8550 = vmatprep.mubr.msk.bf16.mxu0 %vm9176_vm0, %v12163_v1 }
 0x2bc   : > { %v2433_v25 = vadd.f32 %v9988_v39, %v2432_v53  ;;  %v8285_v19 = vpop.f32.mrb[227].mxu1  ;;  %v2934_v17 = vmul.f32 %v7088_v20, %v2430_v9  ;;  %v7104_v9 = vunpack.c.l.bf16 %v7602_v7 }
 0x2be   : > { %v2935_v51 = vmul.f32 %v7089_v21, %v2433_v25  ;;  %8391 = vmatmul.mubr.msk.bf16.gmra.mrb[76].mxu1 %vm1025_vm1, %v9818_v54 }
 0x2bf   : > { %8394 = vmatprep.mubr.msk.bf16.mxu1 %vm9176_vm0, %v12163_v1 }
 0x2c0   : > { %v3040_v48 = vpack.c.bf16 %v2935_v51, %v2934_v17 }
 0x2c1   : > { %v2437_v58 = vpop.f32.mrb[228].mxu1 }
 0x2c2   : > { %v2438_v45 = vadd.f32 %v9988_v39, %v2437_v58  ;;  %v8288_v34 = vpop.f32.mrb[229].mxu1  ;;  %8551 = vmatmul.mubr.msk.bf16.gmra.mrb[228].mxu0 %vm1025_vm1, %v3040_v48 }
 0x2c3   : > { %v2440_v52 = vpop.f32.mrb[230].mxu1  ;;  %8554 = vmatprep.mubr.msk.bf16.mxu0 %vm9176_vm0, %v12163_v1 }
 0x2c4   : > { %v2441_v54 = vadd.f32 %v9988_v39, %v2440_v52  ;;  %v8289_v13 = vpop.f32.mrb[231].mxu1  ;;  %v2936_v41 = vmul.f32 %v7092_v36, %v2438_v45  ;;  %v7603_v36 = vld [vmem:[%s9978_s16 + $0xe8] sm:$0xff]  }
 0x2c5   : > { %v7108_v52 = vunpack.c.l.bf16 %v7603_v36 }
 0x2c6   : > { %v2937_v40 = vmul.f32 %v7093_v5, %v2441_v54  ;;  %8395 = vmatmul.mubr.msk.bf16.gmra.mrb[80].mxu1 %vm1025_vm1, %v9830_v15 }
 0x2c7   : > { %8398 = vmatprep.mubr.msk.bf16.mxu1 %vm9176_vm0, %v12163_v1 }
 0x2c8   : > { %v3041_v42 = vpack.c.bf16 %v2937_v40, %v2936_v41 }
 0x2c9   : > { %v2445_v55 = vpop.f32.mrb[232].mxu1 }
 0x2ca   : > { %v2446_v28 = vadd.f32 %v9988_v39, %v2445_v55  ;;  %v8292_v24 = vpop.f32.mrb[233].mxu1  ;;  %8555 = vmatmul.mubr.msk.bf16.gmra.mrb[232].mxu0 %vm1025_vm1, %v3041_v42 }
 0x2cb   : > { %v2448_v44 = vpop.f32.mrb[234].mxu1  ;;  %8558 = vmatprep.mubr.msk.bf16.mxu0 %vm9176_vm0, %v12163_v1 }
 0x2cc   : > { %v2449_v15 = vadd.f32 %v9988_v39, %v2448_v44  ;;  %v8293_v18 = vpop.f32.mrb[235].mxu1  ;;  %v2938_v49 = vmul.f32 %v7096_v56, %v2446_v28 }
 0x2ce   : > { %v2939_v29 = vmul.f32 %v7097_v6, %v2449_v15  ;;  %8399 = vmatmul.mubr.msk.bf16.gmra.mrb[84].mxu1 %vm1025_vm1, %v9842_v46  ;;  %v7604_v6 = vld [vmem:[%s9978_s16 + $0xf0] sm:$0xff]  }
 0x2cf   : > { %8402 = vmatprep.mubr.msk.bf16.mxu1 %vm9176_vm0, %v12163_v1  ;;  %v7112_v18 = vunpack.c.l.bf16 %v7604_v6  ;;  %v7113_v0 = vunpack.c.h.bf16 %v7604_v6 }
 0x2d0   : > { %v3042_v59 = vpack.c.bf16 %v2939_v29, %v2938_v49  ;;  %v10318_v49 = vld [vmem:[%s12158_s5] ss:$0 sm:$0xff] }
 0x2d1   : > { %v2453_v62 = vpop.f32.mrb[236].mxu1 }
 0x2d2   : > { %v2454_v61 = vadd.f32 %v9988_v39, %v2453_v62  ;;  %v8296_v63 = vpop.f32.mrb[237].mxu1  ;;  %8559 = vmatmul.mubr.msk.bf16.gmra.mrb[236].mxu0 %vm1025_vm1, %v3042_v59 }
 0x2d3   : > { %v2456_v8 = vpop.f32.mrb[238].mxu1  ;;  %8562 = vmatprep.mubr.msk.bf16.mxu0 %vm9176_vm0, %v12163_v1 }
 0x2d4   : > { %v2457_v46 = vadd.f32 %v9988_v39, %v2456_v8  ;;  %v8297_v30 = vpop.f32.mrb[239].mxu1  ;;  %v2940_v60 = vmul.f32 %v7100_v3, %v2454_v61 }
 0x2d5   : > { %v10272_v12 = vpop.f32.mrb[132].mxu0  ;;  %v7605_v30 = vld [vmem:[%s9978_s16 + $0xf8] sm:$0xff]  }
 0x2d6   : > { %v2941_v14 = vmul.f32 %v7101_v4, %v2457_v46  ;;  %8403 = vmatmul.mubr.msk.bf16.gmra.mrb[88].mxu1 %vm1025_vm1, %v9854_v11  ;;  %3861 = vadd.xlane.f32.xlu0 %v10272_v12  ;;  %v8456_v22 = vpop.f32.mrb[133].mxu0  ;;  %v7105_v11 = vunpack.c.h.bf16 %v7602_v7  ;;  %v7116_v7 = vunpack.c.l.bf16 %v7605_v30 }
 0x2d7   : > { %v10277_v2 = vpop.f32.mrb[134].mxu0  ;;  %8406 = vmatprep.mubr.msk.bf16.mxu1 %vm9176_vm0, %v12163_v1 }
 0x2d8   : > { %v3043_v47 = vpack.c.bf16 %v2941_v14, %v2940_v60  ;;  %v8457_v23 = vpop.f32.mrb[135].mxu0 }
 0x2d9   : > { %v2461_v20 = vpop.f32.mrb[240].mxu1 }
 0x2da   : > { %v2462_v27 = vadd.f32 %v9988_v39, %v2461_v20  ;;  %v8300_v21 = vpop.f32.mrb[241].mxu1  ;;  %8563 = vmatmul.mubr.msk.bf16.gmra.mrb[240].mxu0 %vm1025_vm1, %v3043_v47  ;;  %3863 = vadd.xlane.f32.xlu0 %v10277_v2 }
 0x2db   : > { %v2464_v53 = vpop.f32.mrb[242].mxu1  ;;  %8566 = vmatprep.mubr.msk.bf16.mxu0 %vm9176_vm0, %v12163_v1 }
 0x2dc   : > { %v2465_v25 = vadd.f32 %v9988_v39, %v2464_v53  ;;  %v8301_v19 = vpop.f32.mrb[243].mxu1  ;;  %v2942_v51 = vmul.f32 %v7104_v9, %v2462_v27 }
 0x2dd   : > { %v10288_v17 = vpop.f32.mrb[136].mxu0 }
 0x2de   : > { %v2943_v32 = vmul.f32 %v7105_v11, %v2465_v25  ;;  %8407 = vmatmul.mubr.msk.bf16.gmra.mrb[92].mxu1 %vm1025_vm1, %v9866_v38  ;;  %3865 = vadd.xlane.f32.xlu1 %v10288_v17  ;;  %v8460_v48 = vpop.f32.mrb[137].mxu0  ;;  %v7109_v38 = vunpack.c.h.bf16 %v7603_v36 }
 0x2df   : > { %v10293_v58 = vpop.f32.mrb[138].mxu0  ;;  %8410 = vmatprep.mubr.msk.bf16.mxu1 %vm9176_vm0, %v12163_v1 }
 0x2e0   : > { %v3044_v45 = vpack.c.bf16 %v2943_v32, %v2942_v51  ;;  %v8461_v34 = vpop.f32.mrb[139].mxu0  ;;  %v7606_v51 = vld [vmem:[%s9978_s16 + $0x100] sm:$0xff]  }
 0x2e1   : > { %v2469_v5 = vpop.f32.mrb[244].mxu1 }
 0x2e2   : > { %v2470_v54 = vadd.f32 %v9988_v39, %v2469_v5  ;;  %v8304_v13 = vpop.f32.mrb[245].mxu1  ;;  %8567 = vmatmul.mubr.msk.bf16.gmra.mrb[244].mxu0 %vm1025_vm1, %v3044_v45  ;;  %3867 = vadd.xlane.f32.xlu1 %v10293_v58  ;;  %v7120_v45 = vunpack.c.l.bf16 %v7606_v51 }
 0x2e3   : > { %v2472_v41 = vpop.f32.mrb[246].mxu1  ;;  %8570 = vmatprep.mubr.msk.bf16.mxu0 %vm9176_vm0, %v12163_v1 }
 0x2e4   : > { %v2473_v40 = vadd.f32 %v9988_v39, %v2472_v41  ;;  %v8305_v35 = vpop.f32.mrb[247].mxu1  ;;  %v2944_v55 = vmul.f32 %v7108_v52, %v2470_v54 }
 0x2e5   : > { %v10304_v42 = vpop.f32.mrb[140].mxu0 }
 0x2e6   : > { %v2945_v56 = vmul.f32 %v7109_v38, %v2473_v40  ;;  %8411 = vmatmul.mubr.msk.bf16.gmra.mrb[96].mxu1 %vm1025_vm1, %v9878_v26  ;;  %3869 = vadd.xlane.f32.xlu0 %v10304_v42  ;;  %v8464_v28 = vpop.f32.mrb[141].mxu0 }
 0x2e7   : > { %v10309_v24 = vpop.f32.mrb[142].mxu0  ;;  %8414 = vmatprep.mubr.msk.bf16.mxu1 %vm9176_vm0, %v12163_v1 }
 0x2e8   : > { %v3045_v44 = vpack.c.bf16 %v2945_v56, %v2944_v55  ;;  %3871 = vadd.xlane.f32.xlu1 %v10309_v24  ;;  %v8465_v39 = vpop.f32.mrb[143].mxu0  ;;  %v7607_v56 = vld [vmem:[%s9978_s16 + $0x108] sm:$0xff]  }
 0x2e9   : > { %v2477_v15 = vpop.f32.mrb[248].mxu1  ;;  %v7124_v39 = vunpack.c.l.bf16 %v7607_v56 }
 0x2ea   : > { %v2478_v26 = vadd.f32 %v10318_v49, %v2477_v15  ;;  %v8308_v29 = vpop.f32.mrb[249].mxu1  ;;  %8571 = vmatmul.mubr.msk.bf16.gmra.mrb[248].mxu0 %vm1025_vm1, %v3045_v44 }
 0x2eb   : > { %v2480_v59 = vpop.f32.mrb[250].mxu1  ;;  %8574 = vmatprep.mubr.msk.bf16.mxu0 %vm9176_vm0, %v12163_v1 }
 0x2ec   : > { %v2481_v62 = vadd.f32 %v10318_v49, %v2480_v59  ;;  %v8309_v3 = vpop.f32.mrb[251].mxu1  ;;  %v2946_v63 = vmul.f32 %v7112_v18, %v2478_v26 }
 0x2ed   : > { %v10325_v61 = vpop.f32.mrb[144].mxu0 }
 0x2ee   : > { %v2947_v4 = vmul.f32 %v7113_v0, %v2481_v62  ;;  %8415 = vmatmul.mubr.msk.bf16.gmra.mrb[100].mxu1 %vm1025_vm1, %v9895_v37  ;;  %3873 = vadd.xlane.f32.xlu0 %v10325_v61  ;;  %v8468_v8 = vpop.f32.mrb[145].mxu0  ;;  %v7117_v37 = vunpack.c.h.bf16 %v7605_v30 }
 0x2ef   : > { %v10330_v46 = vpop.f32.mrb[146].mxu0  ;;  %8418 = vmatprep.mubr.msk.bf16.mxu1 %vm9176_vm0, %v12163_v1  ;;  %v7608_v8 = vld [vmem:[%s9978_s16 + $0x110] sm:$0xff]  }
 0x2f0   : > { %v3046_v60 = vpack.c.bf16 %v2947_v4, %v2946_v63  ;;  %3875 = vadd.xlane.f32.xlu1 %v10330_v46  ;;  %v8469_v14 = vpop.f32.mrb[147].mxu0 }
 0x2f1   : > { %v2485_v22 = vpop.f32.mrb[252].mxu1 }
 0x2f2   : > { %v2486_v47 = vadd.f32 %v10318_v49, %v2485_v22  ;;  %v8312_v23 = vpop.f32.mrb[253].mxu1  ;;  %8575 = vmatmul.mubr.msk.bf16.gmra.mrb[252].mxu0 %vm1025_vm1, %v3046_v60  ;;  %v7128_v22 = vunpack.c.l.bf16 %v7608_v8 }
 0x2f3   : > { %v2488_v20 = vpop.f32.mrb[254].mxu1  ;;  %8578 = vmatprep.mubr.msk.bf16.mxu0 %vm9176_vm0, %v12163_v1 }
 0x2f4   : > { %v2489_v9 = vadd.f32 %v10318_v49, %v2488_v20  ;;  %v8313_v27 = vpop.f32.mrb[255].mxu1  ;;  %v2948_v11 = vmul.f32 %v7116_v7, %v2486_v47 }
 0x2f5   : > { %v10341_v21 = vpop.f32.mrb[148].mxu0 }
 0x2f6   : > { %v2949_v53 = vmul.f32 %v7117_v37, %v2489_v9  ;;  %8419 = vmatmul.mubr.msk.bf16.gmra.mrb[104].mxu1 %vm1025_vm1, %v9907_v10  ;;  %3877 = vadd.xlane.f32.xlu0 %v10341_v21  ;;  %v8472_v25 = vpop.f32.mrb[149].mxu0  ;;  %v7121_v10 = vunpack.c.h.bf16 %v7606_v51  ;;  %v7609_v51 = vld [vmem:[%s9978_s16 + $0x118] sm:$0xff]  }
 0x2f7   : > { %v10346_v19 = vpop.f32.mrb[150].mxu0  ;;  %8422 = vmatprep.mubr.msk.bf16.mxu1 %vm9176_vm0, %v12163_v1 }
 0x2f8   : > { %v3047_v32 = vpack.c.bf16 %v2949_v53, %v2948_v11  ;;  %3879 = vadd.xlane.f32.xlu1 %v10346_v19  ;;  %v8473_v48 = vpop.f32.mrb[151].mxu0 }
 0x2f9   : > { %v2493_v36 = vpop.f32.mrb[0].mxu1 }
 0x2fa   : > { %v2494_v34 = vadd.f32 %v10318_v49, %v2493_v36  ;;  %v8316_v5 = vpop.f32.mrb[1].mxu1  ;;  %8579 = vmatmul.mubr.msk.bf16.gmra.mrb[0].mxu0 %vm1025_vm1, %v3047_v32 }
 0x2fb   : > { %v2496_v52 = vpop.f32.mrb[2].mxu1  ;;  %8582 = vmatprep.mubr.msk.bf16.mxu0 %vm9176_vm0, %v12163_v1 }
 0x2fc   : > { %v2497_v54 = vadd.f32 %v10318_v49, %v2496_v52  ;;  %v8317_v13 = vpop.f32.mrb[3].mxu1  ;;  %v2950_v41 = vmul.f32 %v7120_v45, %v2494_v34  ;;  %v7132_v45 = vunpack.c.l.bf16 %v7609_v51 }
 0x2fd   : > { %v10357_v38 = vpop.f32.mrb[152].mxu0 }
 0x2fe   : > { %v2951_v40 = vmul.f32 %v7121_v10, %v2497_v54  ;;  %8423 = vmatmul.mubr.msk.bf16.gmra.mrb[108].mxu1 %vm1025_vm1, %v9919_v43  ;;  %3881 = vadd.xlane.f32.xlu0 %v10357_v38  ;;  %v8476_v35 = vpop.f32.mrb[153].mxu0  ;;  %v7125_v43 = vunpack.c.h.bf16 %v7607_v56 }
 0x2ff   : > { %v10362_v55 = vpop.f32.mrb[154].mxu0  ;;  %8426 = vmatprep.mubr.msk.bf16.mxu1 %vm9176_vm0, %v12163_v1 }
 0x300   : > { %v3048_v28 = vpack.c.bf16 %v2951_v40, %v2950_v41  ;;  %3883 = vadd.xlane.f32.xlu1 %v10362_v55  ;;  %v8477_v6 = vpop.f32.mrb[155].mxu0 }
 0x301   : > { %v2501_v44 = vpop.f32.mrb[4].mxu1 }
 0x302   : > { %v2502_v15 = vadd.f32 %v10318_v49, %v2501_v44  ;;  %v8320_v18 = vpop.f32.mrb[5].mxu1  ;;  %8583 = vmatmul.mubr.msk.bf16.gmra.mrb[4].mxu0 %vm1025_vm1, %v3048_v28  ;;  %v7610_v28 = vld [vmem:[%s9978_s16 + $0x120] sm:$0xff]  }
 0x303   : > { %v2504_v26 = vpop.f32.mrb[6].mxu1  ;;  %8586 = vmatprep.mubr.msk.bf16.mxu0 %vm9176_vm0, %v12163_v1 }
 0x304   : > { %v2505_v29 = vadd.f32 %v10318_v49, %v2504_v26  ;;  %v8321_v0 = vpop.f32.mrb[7].mxu1  ;;  %v2952_v62 = vmul.f32 %v7124_v39, %v2502_v15  ;;  %v7136_v15 = vunpack.c.l.bf16 %v7610_v28 }
 0x305   : > { %v10373_v59 = vpop.f32.mrb[156].mxu0 }
 0x306   : > { %v2953_v3 = vmul.f32 %v7125_v43, %v2505_v29  ;;  %8427 = vmatmul.mubr.msk.bf16.gmra.mrb[112].mxu1 %vm1025_vm1, %v9931_v16  ;;  %3885 = vadd.xlane.f32.xlu0 %v10373_v59  ;;  %v8480_v63 = vpop.f32.mrb[157].mxu0  ;;  %v7129_v16 = vunpack.c.h.bf16 %v7608_v8 }
 0x307   : > { %v10378_v4 = vpop.f32.mrb[158].mxu0  ;;  %8430 = vmatprep.mubr.msk.bf16.mxu1 %vm9176_vm0, %v12163_v1 }
 0x308   : > { %v3049_v30 = vpack.c.bf16 %v2953_v3, %v2952_v62  ;;  %3887 = vadd.xlane.f32.xlu1 %v10378_v4  ;;  %v8481_v60 = vpop.f32.mrb[159].mxu0 }
 0x309   : > { %v2509_v14 = vpop.f32.mrb[8].mxu1  ;;  %v7611_v60 = vld [vmem:[%s9978_s16 + $0x128] sm:$0xff]  }
 0x30a   : > { %v2510_v7 = vadd.f32 %v10318_v49, %v2509_v14  ;;  %v8324_v47 = vpop.f32.mrb[9].mxu1  ;;  %8587 = vmatmul.mubr.msk.bf16.gmra.mrb[8].mxu0 %vm1025_vm1, %v3049_v30 }
 0x30b   : > { %v2512_v23 = vpop.f32.mrb[10].mxu1  ;;  %8590 = vmatprep.mubr.msk.bf16.mxu0 %vm9176_vm0, %v12163_v1  ;;  %v7140_v47 = vunpack.c.l.bf16 %v7611_v60 }
 0x30c   : > { %v2513_v37 = vadd.f32 %v10318_v49, %v2512_v23  ;;  %v8325_v20 = vpop.f32.mrb[11].mxu1  ;;  %v2954_v27 = vmul.f32 %v7128_v22, %v2510_v7 }
 0x30d   : > { %v10389_v9 = vpop.f32.mrb[160].mxu0 }
 0x30e   : > { %v2955_v11 = vmul.f32 %v7129_v16, %v2513_v37  ;;  %8431 = vmatmul.mubr.msk.bf16.gmra.mrb[116].mxu1 %vm1025_vm1, %v9943_v33  ;;  %3889 = vadd.xlane.f32.xlu0 %v10389_v9  ;;  %v8484_v53 = vpop.f32.mrb[161].mxu0  ;;  %v7133_v33 = vunpack.c.h.bf16 %v7609_v51 }
 0x30f   : > { %v10394_v25 = vpop.f32.mrb[162].mxu0  ;;  %8434 = vmatprep.mubr.msk.bf16.mxu1 %vm9176_vm0, %v12163_v1 }
 0x310   : > { %v3050_v32 = vpack.c.bf16 %v2955_v11, %v2954_v27  ;;  %3891 = vadd.xlane.f32.xlu1 %v10394_v25  ;;  %v8485_v48 = vpop.f32.mrb[163].mxu0 }
 0x311   : > { %v2517_v36 = vpop.f32.mrb[12].mxu1 }
 0x312   : > { %v2518_v34 = vadd.f32 %v10318_v49, %v2517_v36  ;;  %v8328_v5 = vpop.f32.mrb[13].mxu1  ;;  %8591 = vmatmul.mubr.msk.bf16.gmra.mrb[12].mxu0 %vm1025_vm1, %v3050_v32  ;;  %v7612_v36 = vld [vmem:[%s9978_s16 + $0x130] sm:$0xff]  }
 0x313   : > { %v2520_v10 = vpop.f32.mrb[14].mxu1  ;;  %8594 = vmatprep.mubr.msk.bf16.mxu0 %vm9176_vm0, %v12163_v1 }
 0x314   : > { %v2521_v52 = vadd.f32 %v10318_v49, %v2520_v10  ;;  %v8329_v54 = vpop.f32.mrb[15].mxu1  ;;  %v2956_v41 = vmul.f32 %v7132_v45, %v2518_v34 }
 0x315   : > { %v10405_v13 = vpop.f32.mrb[164].mxu0  ;;  %v7145_v54 = vunpack.c.h.bf16 %v7612_v36 }
 0x316   : > { %v2957_v40 = vmul.f32 %v7133_v33, %v2521_v52  ;;  %8435 = vmatmul.mubr.msk.bf16.gmra.mrb[120].mxu1 %vm1025_vm1, %v9955_v31  ;;  %3893 = vadd.xlane.f32.xlu0 %v10405_v13  ;;  %v8488_v35 = vpop.f32.mrb[165].mxu0  ;;  %v7137_v31 = vunpack.c.h.bf16 %v7610_v28  ;;  %v7144_v33 = vunpack.c.l.bf16 %v7612_v36 }
 0x317   : > { %v10410_v56 = vpop.f32.mrb[166].mxu0  ;;  %8438 = vmatprep.mubr.msk.bf16.mxu1 %vm9176_vm0, %v12163_v1 }
 0x318   : > { %v3051_v6 = vpack.c.bf16 %v2957_v40, %v2956_v41  ;;  %3895 = vadd.xlane.f32.xlu1 %v10410_v56  ;;  %v8489_v44 = vpop.f32.mrb[167].mxu0 }
 0x319   : > { %v2525_v39 = vpop.f32.mrb[16].mxu1 }
 0x31a   : > { %v2526_v18 = vadd.f32 %v10318_v49, %v2525_v39  ;;  %v8332_v43 = vpop.f32.mrb[17].mxu1  ;;  %8595 = vmatmul.mubr.msk.bf16.gmra.mrb[16].mxu0 %vm1025_vm1, %v3051_v6 }
 0x31b   : > { %v2528_v26 = vpop.f32.mrb[18].mxu1  ;;  %8598 = vmatprep.mubr.msk.bf16.mxu0 %vm9176_vm0, %v12163_v1 }
 0x31c   : > { %v2529_v29 = vadd.f32 %v10318_v49, %v2528_v26  ;;  %v8333_v0 = vpop.f32.mrb[19].mxu1  ;;  %v2958_v3 = vmul.f32 %v7136_v15, %v2526_v18  ;;  %v7613_v15 = vld [vmem:[%s9978_s16 + $0x138] sm:$0xff]  }
 0x31d   : > { %v10421_v62 = vpop.f32.mrb[168].mxu0  ;;  %v7148_v26 = vunpack.c.l.bf16 %v7613_v15 }
 0x31e   : > { %v2959_v63 = vmul.f32 %v7137_v31, %v2529_v29  ;;  %8439 = vmatmul.mubr.msk.bf16.gmra.mrb[124].mxu1 %vm1025_vm1, %v9967_v57  ;;  %3897 = vadd.xlane.f32.xlu0 %v10421_v62  ;;  %v8492_v8 = vpop.f32.mrb[169].mxu0  ;;  %v7141_v57 = vunpack.c.h.bf16 %v7611_v60 }
 0x31f   : > { %v10426_v30 = vpop.f32.mrb[170].mxu0  ;;  %8442 = vmatprep.mubr.msk.bf16.mxu1 %vm9176_vm0, %v12163_v1 }
 0x320   : > { %v3052_v14 = vpack.c.bf16 %v2959_v63, %v2958_v3  ;;  %3899 = vadd.xlane.f32.xlu1 %v10426_v30  ;;  %v8493_v22 = vpop.f32.mrb[171].mxu0  ;;  %v7149_v3 = vunpack.c.h.bf16 %v7613_v15 }
 0x321   : > { %v2533_v7 = vpop.f32.mrb[20].mxu1 }
 0x322   : > { %v2534_v16 = vadd.f32 %v10318_v49, %v2533_v7  ;;  %v8336_v23 = vpop.f32.mrb[21].mxu1  ;;  %8599 = vmatmul.mubr.msk.bf16.gmra.mrb[20].mxu0 %vm1025_vm1, %v3052_v14 }
 0x323   : > { %v2536_v37 = vpop.f32.mrb[22].mxu1  ;;  %8602 = vmatprep.mubr.msk.bf16.mxu0 %vm9176_vm0, %v12163_v1  ;;  %v7614_v23 = vld [vmem:[%s9978_s16 + $0x140] sm:$0xff]  }
 0x324   : > { %v2537_v20 = vadd.f32 %v10318_v49, %v2536_v37  ;;  %v8337_v27 = vpop.f32.mrb[23].mxu1  ;;  %v2960_v53 = vmul.f32 %v7140_v47, %v2534_v16 }
 0x325   : > { %v10437_v11 = vpop.f32.mrb[172].mxu0  ;;  %v7152_v27 = vunpack.c.l.bf16 %v7614_v23 }
 0x326   : > { %v2961_v51 = vmul.f32 %v7141_v57, %v2537_v20  ;;  %8443 = vmatmul.mubr.msk.bf16.gmra.mrb[128].mxu1 %vm1025_vm1, %v9992_v50  ;;  %3901 = vadd.xlane.f32.xlu0 %v10437_v11  ;;  %v8496_v32 = vpop.f32.mrb[173].mxu0 }
 0x327   : > { %v10442_v48 = vpop.f32.mrb[174].mxu0  ;;  %v7153_v32 = vunpack.c.h.bf16 %v7614_v23 }
 0x328   : > { %v3053_v45 = vpack.c.bf16 %v2961_v51, %v2960_v53  ;;  %3903 = vadd.xlane.f32.xlu1 %v10442_v48  ;;  %v8497_v34 = vpop.f32.mrb[175].mxu0 }
 0x329   : > { %v2541_v5 = vpop.f32.mrb[24].mxu1 }
 0x32a   : > { %v2542_v10 = vadd.f32 %v10318_v49, %v2541_v5  ;;  %v8340_v52 = vpop.f32.mrb[25].mxu1  ;;  %8603 = vmatmul.mubr.msk.bf16.gmra.mrb[24].mxu0 %vm1025_vm1, %v3053_v45 }
 0x32b   : > { %v2544_v50 = vpop.f32.mrb[26].mxu1  ;;  %8606 = vmatprep.mubr.msk.bf16.mxu0 %vm9176_vm0, %v12163_v1 }
 0x32c   : > { %v2545_v41 = vadd.f32 %v10318_v49, %v2544_v50  ;;  %v8341_v40 = vpop.f32.mrb[27].mxu1  ;;  %v2962_v28 = vmul.f32 %v7144_v33, %v2542_v10  ;;  %v7615_v50 = vld [vmem:[%s9978_s16 + $0x148] sm:$0xff]  }
 0x32d   : > { %v10451_v35 = vpop.f32.mrb[176].mxu0 }
 0x32e   : > { %v2963_v6 = vmul.f32 %v7145_v54, %v2545_v41  ;;  %3905 = vadd.xlane.f32.xlu0 %v10451_v35  ;;  %v8500_v44 = vpop.f32.mrb[177].mxu0 }
 0x32f   : > { %v10454_v39 = vpop.f32.mrb[178].mxu0 }
 0x330   : > { %v3054_v18 = vpack.c.bf16 %v2963_v6, %v2962_v28  ;;  %3907 = vadd.xlane.f32.xlu1 %v10454_v39  ;;  %v8501_v43 = vpop.f32.mrb[179].mxu0  ;;  %v7156_v6 = vunpack.c.l.bf16 %v7615_v50 }
 0x331   : > { %v2549_v31 = vpop.f32.mrb[28].mxu1 }
 0x332   : > { %v2550_v29 = vadd.f32 %v10318_v49, %v2549_v31  ;;  %v8344_v0 = vpop.f32.mrb[29].mxu1  ;;  %8607 = vmatmul.mubr.msk.bf16.gmra.mrb[28].mxu0 %vm1025_vm1, %v3054_v18  ;;  %v7157_v18 = vunpack.c.h.bf16 %v7615_v50 }
 0x333   : > { %v2552_v63 = vpop.f32.mrb[30].mxu1  ;;  %8610 = vmatprep.mubr.msk.bf16.mxu0 %vm9176_vm0, %v12163_v1 }
 0x334   : > { %v2553_v8 = vadd.f32 %v10318_v49, %v2552_v63  ;;  %v8345_v60 = vpop.f32.mrb[31].mxu1  ;;  %v2964_v22 = vmul.f32 %v7148_v26, %v2550_v29 }
 0x335   : > { %v10463_v14 = vpop.f32.mrb[180].mxu0  ;;  %v7616_v60 = vld [vmem:[%s9978_s16 + $0x150] sm:$0xff]  }
 0x336   : > { %v2965_v7 = vmul.f32 %v7149_v3, %v2553_v8  ;;  %3909 = vadd.xlane.f32.xlu0 %v10463_v14  ;;  %v8504_v47 = vpop.f32.mrb[181].mxu0  ;;  %v7160_v23 = vunpack.c.l.bf16 %v7616_v60 }
 0x337   : > { %v10466_v16 = vpop.f32.mrb[182].mxu0 }
 0x338   : > { %v3055_v57 = vpack.c.bf16 %v2965_v7, %v2964_v22  ;;  %3911 = vadd.xlane.f32.xlu1 %v10466_v16  ;;  %v8505_v37 = vpop.f32.mrb[183].mxu0 }
 0x339   : > { %v2557_v20 = vpop.f32.mrb[32].mxu1 }
 0x33a   : > { %v2558_v53 = vadd.f32 %v10318_v49, %v2557_v20  ;;  %v8348_v51 = vpop.f32.mrb[33].mxu1  ;;  %8611 = vmatmul.mubr.msk.bf16.gmra.mrb[32].mxu0 %vm1025_vm1, %v3055_v57  ;;  %v7161_v20 = vunpack.c.h.bf16 %v7616_v60  ;;  %v7618_v60 = vld [vmem:[%s9978_s16 + $0x160] sm:$0xff]  }
 0x33b   : > { %v2560_v36 = vpop.f32.mrb[34].mxu1  ;;  %8614 = vmatprep.mubr.msk.bf16.mxu0 %vm9176_vm0, %v12163_v1 }
 0x33c   : > { %v2561_v45 = vadd.f32 %v10318_v49, %v2560_v36  ;;  %v8349_v34 = vpop.f32.mrb[35].mxu1  ;;  %v2966_v33 = vmul.f32 %v7152_v27, %v2558_v53 }
 0x33d   : > { %v10475_v5 = vpop.f32.mrb[184].mxu0 }
 0x33e   : > { %v2967_v10 = vmul.f32 %v7153_v32, %v2561_v45  ;;  %3913 = vadd.xlane.f32.xlu0 %v10475_v5  ;;  %v8508_v52 = vpop.f32.mrb[185].mxu0 }
 0x33f   : > { %v10478_v54 = vpop.f32.mrb[186].mxu0 }
 0x340   : > { %v3056_v41 = vpack.c.bf16 %v2967_v10, %v2966_v33  ;;  %3915 = vadd.xlane.f32.xlu1 %v10478_v54  ;;  %v8509_v40 = vpop.f32.mrb[187].mxu0  ;;  %v7617_v10 = vld [vmem:[%s9978_s16 + $0x158] sm:$0xff]  }
 0x341   : > { %v2565_v28 = vpop.f32.mrb[36].mxu1  ;;  %v7164_v40 = vunpack.c.l.bf16 %v7617_v10 }
 0x342   : > { %v2566_v44 = vadd.f32 %v10318_v49, %v2565_v28  ;;  %v8352_v15 = vpop.f32.mrb[37].mxu1  ;;  %8615 = vmatmul.mubr.msk.bf16.gmra.mrb[36].mxu0 %vm1025_vm1, %v3056_v41 }
 0x343   : > { %v2568_v43 = vpop.f32.mrb[38].mxu1  ;;  %8618 = vmatprep.mubr.msk.bf16.mxu0 %vm9176_vm0, %v12163_v1 }
 0x344   : > { %v2569_v31 = vadd.f32 %v10318_v49, %v2568_v43  ;;  %v8353_v26 = vpop.f32.mrb[39].mxu1  ;;  %v2968_v0 = vmul.f32 %v7156_v6, %v2566_v44  ;;  %v7165_v44 = vunpack.c.h.bf16 %v7617_v10 }
 0x345   : > { %v10487_v29 = vpop.f32.mrb[188].mxu0 }
 0x346   : > { %v2969_v3 = vmul.f32 %v7157_v18, %v2569_v31  ;;  %3917 = vadd.xlane.f32.xlu0 %v10487_v29  ;;  %v8512_v63 = vpop.f32.mrb[189].mxu0 }
 0x347   : > { %v10490_v8 = vpop.f32.mrb[190].mxu0 }
 0x348   : > { %v3057_v22 = vpack.c.bf16 %v2969_v3, %v2968_v0  ;;  %3919 = vadd.xlane.f32.xlu1 %v10490_v8  ;;  %v8513_v7 = vpop.f32.mrb[191].mxu0 }
 0x349   : > { %v2573_v47 = vpop.f32.mrb[40].mxu1 }
 0x34a   : > { %v2574_v57 = vadd.f32 %v10318_v49, %v2573_v47  ;;  %v8356_v37 = vpop.f32.mrb[41].mxu1  ;;  %8619 = vmatmul.mubr.msk.bf16.gmra.mrb[40].mxu0 %vm1025_vm1, %v3057_v22 }
 0x34b   : > { %v2576_v27 = vpop.f32.mrb[42].mxu1  ;;  %8622 = vmatprep.mubr.msk.bf16.mxu0 %vm9176_vm0, %v12163_v1 }
 0x34c   : > { %v2577_v53 = vadd.f32 %v10318_v49, %v2576_v27  ;;  %v8357_v51 = vpop.f32.mrb[43].mxu1  ;;  %v2970_v36 = vmul.f32 %v7160_v23, %v2574_v57  ;;  %v7168_v23 = vunpack.c.l.bf16 %v7618_v60 }
 0x34d   : > { %v10499_v32 = vpop.f32.mrb[192].mxu0 }
 0x34e   : > { %v2971_v45 = vmul.f32 %v7161_v20, %v2577_v53  ;;  %3921 = vadd.xlane.f32.xlu0 %v10499_v32  ;;  %v8516_v34 = vpop.f32.mrb[193].mxu0  ;;  %v7169_v20 = vunpack.c.h.bf16 %v7618_v60 }
 0x34f   : > { %v10502_v33 = vpop.f32.mrb[194].mxu0 }
 0x350   : > { %v3058_v52 = vpack.c.bf16 %v2971_v45, %v2970_v36  ;;  %3923 = vadd.xlane.f32.xlu1 %v10502_v33  ;;  %v8517_v50 = vpop.f32.mrb[195].mxu0 }
 0x351   : > { %v2581_v41 = vpop.f32.mrb[44].mxu1  ;;  %v7619_v50 = vld [vmem:[%s9978_s16 + $0x168] sm:$0xff]  }
 0x352   : > { %v2582_v28 = vadd.f32 %v10318_v49, %v2581_v41  ;;  %v8360_v6 = vpop.f32.mrb[45].mxu1  ;;  %8623 = vmatmul.mubr.msk.bf16.gmra.mrb[44].mxu0 %vm1025_vm1, %v3058_v52 }
 0x353   : > { %v2584_v15 = vpop.f32.mrb[46].mxu1  ;;  %8626 = vmatprep.mubr.msk.bf16.mxu0 %vm9176_vm0, %v12163_v1  ;;  %v7172_v6 = vunpack.c.l.bf16 %v7619_v50 }
 0x354   : > { %v2585_v18 = vadd.f32 %v10318_v49, %v2584_v15  ;;  %v8361_v43 = vpop.f32.mrb[47].mxu1  ;;  %v2972_v26 = vmul.f32 %v7164_v40, %v2582_v28 }
 0x355   : > { %v10511_v31 = vpop.f32.mrb[196].mxu0 }
 0x356   : > { %v2973_v0 = vmul.f32 %v7165_v44, %v2585_v18  ;;  %3925 = vadd.xlane.f32.xlu0 %v10511_v31  ;;  %v8520_v3 = vpop.f32.mrb[197].mxu0  ;;  %v7173_v18 = vunpack.c.h.bf16 %v7619_v50 }
 0x357   : > { %v10514_v63 = vpop.f32.mrb[198].mxu0 }
 0x358   : > { %v3059_v22 = vpack.c.bf16 %v2973_v0, %v2972_v26  ;;  %3927 = vadd.xlane.f32.xlu1 %v10514_v63  ;;  %v8521_v7 = vpop.f32.mrb[199].mxu0 }
 0x359   : > { %v2589_v47 = vpop.f32.mrb[48].mxu1 }
 0x35a   : > { %v2590_v57 = vadd.f32 %v10318_v49, %v2589_v47  ;;  %v8364_v37 = vpop.f32.mrb[49].mxu1  ;;  %8627 = vmatmul.mubr.msk.bf16.gmra.mrb[48].mxu0 %vm1025_vm1, %v3059_v22 }
 0x35b   : > { %v2592_v27 = vpop.f32.mrb[50].mxu1  ;;  %8630 = vmatprep.mubr.msk.bf16.mxu0 %vm9176_vm0, %v12163_v1 }
 0x35c   : > { %v2593_v53 = vadd.f32 %v10318_v49, %v2592_v27  ;;  %v8365_v51 = vpop.f32.mrb[51].mxu1  ;;  %v2974_v45 = vmul.f32 %v7168_v23, %v2590_v57  ;;  %v7620_v27 = vld [vmem:[%s9978_s16 + $0x170] sm:$0xff]  }
 0x35d   : > { %v10523_v36 = vpop.f32.mrb[200].mxu0  ;;  %v7176_v50 = vunpack.c.l.bf16 %v7620_v27 }
 0x35e   : > { %v2975_v34 = vmul.f32 %v7169_v20, %v2593_v53  ;;  %3929 = vadd.xlane.f32.xlu0 %v10523_v36  ;;  %v8524_v10 = vpop.f32.mrb[201].mxu0 }
 0x35f   : > { %v10526_v52 = vpop.f32.mrb[202].mxu0 }
 0x360   : > { %v3060_v41 = vpack.c.bf16 %v2975_v34, %v2974_v45  ;;  %3931 = vadd.xlane.f32.xlu1 %v10526_v52  ;;  %v8525_v40 = vpop.f32.mrb[203].mxu0 }
 0x361   : > { %v2597_v28 = vpop.f32.mrb[52].mxu1 }
 0x362   : > { %v2598_v44 = vadd.f32 %v10318_v49, %v2597_v28  ;;  %v8368_v15 = vpop.f32.mrb[53].mxu1  ;;  %8631 = vmatmul.mubr.msk.bf16.gmra.mrb[52].mxu0 %vm1025_vm1, %v3060_v41 }
 0x363   : > { %v2600_v43 = vpop.f32.mrb[54].mxu1  ;;  %v3862_v26 = vpop.xlane.xlu0 %3861  ;;  %8634 = vmatprep.mubr.msk.bf16.mxu0 %vm9176_vm0, %v12163_v1 }
 0x364   : > { %v2601_v0 = vadd.f32 %v10318_v49, %v2600_v43  ;;  %v4122_v3 = vmul.f32 0.0078125, %v3862_v26  ;;  %v8369_v60 = vpop.f32.mrb[55].mxu1  ;;  %v2976_v7 = vmul.f32 %v7172_v6, %v2598_v44 }
 0x365   : > { %v10535_v22 = vpop.f32.mrb[204].mxu0 }
 0x366   : > { %v2977_v47 = vmul.f32 %v7173_v18, %v2601_v0  ;;  %3933 = vadd.xlane.f32.xlu0 %v10535_v22  ;;  %v8528_v23 = vpop.f32.mrb[205].mxu0  ;;  %v10539_v57 = vsub.f32 %v10272_v12, %v4122_v3  ;;  %v7177_v12 = vunpack.c.h.bf16 %v7620_v27 }
 0x367   : > { %v3864_v37 = vpop.xlane.xlu0 %3863  ;;  %v10541_v20 = vpop.f32.mrb[206].mxu0 }
 0x368   : > { %v3061_v53 = vpack.c.bf16 %v2977_v47, %v2976_v7  ;;  %v4123_v51 = vmul.f32 0.0078125, %v3864_v37  ;;  %3935 = vadd.xlane.f32.xlu1 %v10541_v20  ;;  %v8529_v45 = vpop.f32.mrb[207].mxu0  ;;  %v4382_v34 = vmul.f32 %v10539_v57, %v10539_v57  ;;  %v7621_v37 = vld [vmem:[%s9978_s16 + $0x178] sm:$0xff]  }
 0x369   : > { %v2605_v10 = vpop.f32.mrb[56].mxu1 }
 0x36a   : > { %v2606_v41 = vadd.f32 %v10318_v49, %v2605_v10  ;;  %v8372_v40 = vpop.f32.mrb[57].mxu1  ;;  %8635 = vmatmul.mubr.msk.bf16.gmra.mrb[56].mxu0 %vm1025_vm1, %v3061_v53  ;;  %4512 = vadd.xlane.f32.xlu0 %v4382_v34  ;;  %v10550_v28 = vsub.f32 %v10277_v2, %v4123_v51  ;;  %v7180_v10 = vunpack.c.l.bf16 %v7621_v37 }
 0x36b   : > { %v2608_v6 = vpop.f32.mrb[58].mxu1  ;;  %v3866_v44 = vpop.xlane.xlu1 %3865  ;;  %8638 = vmatprep.mubr.msk.bf16.mxu0 %vm9176_vm0, %v12163_v1 }
 0x36c   : > { %v2609_v15 = vadd.f32 %v10318_v49, %v2608_v6  ;;  %v4124_v18 = vmul.f32 0.0078125, %v3866_v44  ;;  %v8373_v43 = vpop.f32.mrb[59].mxu1  ;;  %v4383_v26 = vmul.f32 %v10550_v28, %v10550_v28  ;;  %v2978_v3 = vmul.f32 %v7176_v50, %v2606_v41 }
 0x36d   : > { %v10557_v0 = vpop.f32.mrb[208].mxu0 }
 0x36e   : > { %v2979_v60 = vmul.f32 %v7177_v12, %v2609_v15  ;;  %4514 = vadd.xlane.f32.xlu1 %v4383_v26  ;;  %3937 = vadd.xlane.f32.xlu0 %v10557_v0  ;;  %v8532_v2 = vpop.f32.mrb[209].mxu0  ;;  %v10561_v7 = vsub.f32 %v10288_v17, %v4124_v18  ;;  %v7181_v17 = vunpack.c.h.bf16 %v7621_v37 }
 0x36f   : > { %v3868_v47 = vpop.xlane.xlu1 %3867  ;;  %v10563_v23 = vpop.f32.mrb[210].mxu0 }
 0x370   : > { %v3062_v27 = vpack.c.bf16 %v2979_v60, %v2978_v3  ;;  %v4125_v53 = vmul.f32 0.0078125, %v3868_v47  ;;  %v8533_v51 = vpop.f32.mrb[211].mxu0  ;;  %v4384_v45 = vmul.f32 %v10561_v7, %v10561_v7 }
 0x371   : > { %v2613_v34 = vpop.f32.mrb[60].mxu1 }
 0x372   : > { %v2614_v50 = vadd.f32 %v10318_v49, %v2613_v34  ;;  %v8376_v41 = vpop.f32.mrb[61].mxu1  ;;  %8639 = vmatmul.mubr.msk.bf16.gmra.mrb[60].mxu0 %vm1025_vm1, %v3062_v27  ;;  %4516 = vadd.xlane.f32.xlu0 %v4384_v45  ;;  %v10571_v40 = vsub.f32 %v10293_v58, %v4125_v53  ;;  %v7622_v53 = vld [vmem:[%s9978_s16 + $0x180] sm:$0xff]  }
 0x373   : > { %3939 = vadd.xlane.f32.xlu1 %v10563_v23  ;;  %v2616_v12 = vpop.f32.mrb[62].mxu1  ;;  %v3870_v6 = vpop.xlane.xlu0 %3869  ;;  %8642 = vmatprep.mubr.msk.bf16.mxu0 %vm9176_vm0, %v12163_v1 }
 0x374   : > { %v2617_v44 = vadd.f32 %v10318_v49, %v2616_v12  ;;  %v4126_v15 = vmul.f32 0.0078125, %v3870_v6  ;;  %v8377_v18 = vpop.f32.mrb[63].mxu1  ;;  %v4385_v43 = vmul.f32 %v10571_v40, %v10571_v40  ;;  %v2980_v58 = vmul.f32 %v7180_v10, %v2614_v50 }
 0x375   : > { %v3872_v26 = vpop.xlane.xlu1 %3871  ;;  %v10579_v3 = vpop.f32.mrb[212].mxu0  ;;  %v7184_v50 = vunpack.c.l.bf16 %v7622_v53 }
 0x376   : > { %v2981_v60 = vmul.f32 %v7181_v17, %v2617_v44  ;;  %v4127_v2 = vmul.f32 0.0078125, %v3872_v26  ;;  %3941 = vadd.xlane.f32.xlu0 %v10579_v3  ;;  %v8536_v47 = vpop.f32.mrb[213].mxu0  ;;  %v10583_v37 = vsub.f32 %v10304_v42, %v4126_v15  ;;  %v7185_v42 = vunpack.c.h.bf16 %v7622_v53 }
 0x377   : > { %4518 = vadd.xlane.f32.xlu1 %v4385_v43  ;;  %v10585_v27 = vpop.f32.mrb[214].mxu0 }
 0x378   : > { %v3063_v51 = vpack.c.bf16 %v2981_v60, %v2980_v58  ;;  %v8537_v45 = vpop.f32.mrb[215].mxu0  ;;  %v4386_v34 = vmul.f32 %v10583_v37, %v10583_v37  ;;  %v10591_v10 = vsub.f32 %v10309_v24, %v4127_v2 }
 0x379   : > { %v2621_v41 = vpop.f32.mrb[64].mxu1 }
 0x37a   : > { %v2622_v17 = vadd.f32 %v10318_v49, %v2621_v41  ;;  %v8380_v12 = vpop.f32.mrb[65].mxu1  ;;  %8643 = vmatmul.mubr.msk.bf16.gmra.mrb[64].mxu0 %vm1025_vm1, %v3063_v51  ;;  %4520 = vadd.xlane.f32.xlu0 %v4386_v34  ;;  %v4387_v58 = vmul.f32 %v10591_v10, %v10591_v10  ;;  %v7623_v34 = vld [vmem:[%s9978_s16 + $0x188] sm:$0xff]  }
 0x37b   : > { %3943 = vadd.xlane.f32.xlu1 %v10585_v27  ;;  %v2624_v6 = vpop.f32.mrb[66].mxu1  ;;  %v3874_v44 = vpop.xlane.xlu0 %3873  ;;  %8646 = vmatprep.mubr.msk.bf16.mxu0 %vm9176_vm0, %v12163_v1 }
 0x37c   : > { %v2625_v15 = vadd.f32 %v10318_v49, %v2624_v6  ;;  %v4128_v24 = vmul.f32 0.0078125, %v3874_v44  ;;  %v8381_v18 = vpop.f32.mrb[67].mxu1  ;;  %v2982_v60 = vmul.f32 %v7184_v50, %v2622_v17  ;;  %v7188_v17 = vunpack.c.l.bf16 %v7623_v34 }
 0x37d   : > { %v3876_v43 = vpop.xlane.xlu1 %3875  ;;  %v10599_v26 = vpop.f32.mrb[216].mxu0 }
 0x37e   : > { %v2983_v2 = vmul.f32 %v7185_v42, %v2625_v15  ;;  %v4129_v47 = vmul.f32 0.0078125, %v3876_v43  ;;  %3945 = vadd.xlane.f32.xlu0 %v10599_v26  ;;  %v8540_v53 = vpop.f32.mrb[217].mxu0  ;;  %v10605_v51 = vsub.f32 %v10325_v61, %v4128_v24  ;;  %v7189_v61 = vunpack.c.h.bf16 %v7623_v34 }
 0x37f   : > { %4522 = vadd.xlane.f32.xlu1 %v4387_v58  ;;  %v10607_v45 = vpop.f32.mrb[218].mxu0 }
 0x380   : > { %12243 = vst [vmem:[#allocation5_spill] sm:$0xff] %v10605_v51  ;;  %v3064_v41 = vpack.c.bf16 %v2983_v2, %v2982_v60  ;;  %v8541_v12 = vpop.f32.mrb[219].mxu0  ;;  %v4388_v6 = vmul.f32 %v10605_v51, %v10605_v51  ;;  %v10613_v50 = vsub.f32 %v10330_v46, %v4129_v47 }
 0x381   : > { %v2629_v44 = vpop.f32.mrb[68].mxu1 }
 0x382   : > { %12244 = vst [vmem:[#allocation6_spill] sm:$0xff] %v10613_v50  ;;  %v2630_v42 = vadd.f32 %v10318_v49, %v2629_v44  ;;  %v8384_v15 = vpop.f32.mrb[69].mxu1  ;;  %8647 = vmatmul.mubr.msk.bf16.gmra.mrb[68].mxu0 %vm1025_vm1, %v3064_v41  ;;  %4524 = vadd.xlane.f32.xlu0 %v4388_v6  ;;  %v4389_v47 = vmul.f32 %v10613_v50, %v10613_v50 }
 0x383   : > { %3947 = vadd.xlane.f32.xlu1 %v10607_v45  ;;  %v2632_v24 = vpop.f32.mrb[70].mxu1  ;;  %v3878_v18 = vpop.xlane.xlu0 %3877  ;;  %8650 = vmatprep.mubr.msk.bf16.mxu0 %vm9176_vm0, %v12163_v1  ;;  %v7624_v15 = vld [vmem:[%s9978_s16 + $0x190] sm:$0xff]  }
 0x384   : > { %v2633_v43 = vadd.f32 %v10318_v49, %v2632_v24  ;;  %v4130_v46 = vmul.f32 0.0078125, %v3878_v18  ;;  %v8385_v58 = vpop.f32.mrb[71].mxu1  ;;  %v2984_v53 = vmul.f32 %v7188_v17, %v2630_v42  ;;  %v7192_v42 = vunpack.c.l.bf16 %v7624_v15 }
 0x385   : > { %v3880_v60 = vpop.xlane.xlu1 %3879  ;;  %v10621_v2 = vpop.f32.mrb[220].mxu0 }
 0x386   : > { %v2985_v34 = vmul.f32 %v7189_v61, %v2633_v43  ;;  %v4131_v41 = vmul.f32 0.0078125, %v3880_v60  ;;  %3949 = vadd.xlane.f32.xlu0 %v10621_v2  ;;  %v8544_v12 = vpop.f32.mrb[221].mxu0  ;;  %v10627_v6 = vsub.f32 %v10341_v21, %v4130_v46  ;;  %v7193_v21 = vunpack.c.h.bf16 %v7624_v15 }
 0x387   : > { %4526 = vadd.xlane.f32.xlu1 %v4389_v47  ;;  %v10629_v44 = vpop.f32.mrb[222].mxu0  ;;  %v12247_v47 = vmov 0.0  }
 0x388   : > { %12245 = vst [vmem:[#allocation7_spill] sm:$0xff] %v10627_v6  ;;  %v3065_v24 = vpack.c.bf16 %v2985_v34, %v2984_v53  ;;  %v8545_v18 = vpop.f32.mrb[223].mxu0  ;;  %v4390_v58 = vmul.f32 %v10627_v6, %v10627_v6  ;;  %v10635_v17 = vsub.f32 %v10346_v19, %v4131_v41 }
 0x389   : > { %v2637_v1 = vpop.f32.mrb[72].mxu1 }
 0x38a   : > { %12246 = vst [vmem:[#allocation8_spill] sm:$0xff] %v10635_v17  ;;  %v2638_v61 = vadd.f32 %v10318_v49, %v2637_v1  ;;  %v8388_v43 = vpop.f32.mrb[73].mxu1  ;;  %8651 = vmatmul.mubr.msk.bf16.gmra.mrb[72].mxu0 %vm1025_vm1, %v3065_v24  ;;  %4528 = vadd.xlane.f32.xlu0 %v4390_v58  ;;  %v4391_v1 = vmul.f32 %v10635_v17, %v10635_v17 }
 0x38b   : > { %3951 = vadd.xlane.f32.xlu1 %v10629_v44  ;;  %v2640_v46 = vpop.f32.mrb[74].mxu1  ;;  %v3882_v60 = vpop.xlane.xlu0 %3881  ;;  %8654 = vmatprep.mubr.msk.bf16.mxu0 %vm9176_vm0, %v12247_v47 }
 0x38c   : > { %v2641_v53 = vadd.f32 %v10318_v49, %v2640_v46  ;;  %v4132_v19 = vmul.f32 0.0078125, %v3882_v60  ;;  %v8389_v34 = vpop.f32.mrb[75].mxu1  ;;  %v2986_v24 = vmul.f32 %v7192_v42, %v2638_v61  ;;  %v7625_v46 = vld [vmem:[%s9978_s16 + $0x198] sm:$0xff]  }
 0x38d   : > { %v3884_v41 = vpop.xlane.xlu1 %3883  ;;  %v10643_v12 = vpop.f32.mrb[224].mxu0  ;;  %v7196_v61 = vunpack.c.l.bf16 %v7625_v46 }
 0x38e   : > { %v2987_v15 = vmul.f32 %v7193_v21, %v2641_v53  ;;  %v4133_v18 = vmul.f32 0.0078125, %v3884_v41  ;;  %3953 = vadd.xlane.f32.xlu0 %v10643_v12  ;;  %v8548_v58 = vpop.f32.mrb[225].mxu0  ;;  %v10649_v43 = vsub.f32 %v10357_v38, %v4132_v19  ;;  %v7197_v38 = vunpack.c.h.bf16 %v7625_v46 }
 0x38f   : > { %4530 = vadd.xlane.f32.xlu1 %v4391_v1  ;;  %v10651_v6 = vpop.f32.mrb[226].mxu0 }
 0x390   : > { %12248 = vst [vmem:[#allocation9_spill] sm:$0xff] %v10649_v43  ;;  %v3066_v60 = vpack.c.bf16 %v2987_v15, %v2986_v24  ;;  %v8549_v34 = vpop.f32.mrb[227].mxu0  ;;  %v4392_v50 = vmul.f32 %v10649_v43, %v10649_v43  ;;  %v10657_v42 = vsub.f32 %v10362_v55, %v4133_v18 }
 0x391   : > { %v2645_v51 = vpop.f32.mrb[76].mxu1 }
 0x392   : > { %12249 = vst [vmem:[#allocation10_spill] sm:$0xff] %v10657_v42  ;;  %v2646_v21 = vadd.f32 %v10318_v49, %v2645_v51  ;;  %v8392_v53 = vpop.f32.mrb[77].mxu1  ;;  %8655 = vmatmul.mubr.msk.bf16.gmra.mrb[76].mxu0 %vm1025_vm1, %v3066_v60  ;;  %4532 = vadd.xlane.f32.xlu0 %v4392_v50  ;;  %v4393_v51 = vmul.f32 %v10657_v42, %v10657_v42 }
 0x393   : > { %3955 = vadd.xlane.f32.xlu1 %v10651_v6  ;;  %v2648_v19 = vpop.f32.mrb[78].mxu1  ;;  %v3886_v41 = vpop.xlane.xlu0 %3885  ;;  %8658 = vmatprep.mubr.msk.bf16.mxu0 %vm9176_vm0, %v12247_v47 }
 0x394   : > { %v2649_v1 = vadd.f32 %v10318_v49, %v2648_v19  ;;  %v4134_v55 = vmul.f32 0.0078125, %v3886_v41  ;;  %v8393_v24 = vpop.f32.mrb[79].mxu1  ;;  %v2988_v50 = vmul.f32 %v7196_v61, %v2646_v21  ;;  %v7626_v49 = vld [vmem:[%s9978_s16 + $0x1a0] sm:$0xff]  }
 0x395   : > { %v3888_v15 = vpop.xlane.xlu1 %3887  ;;  %v10665_v18 = vpop.f32.mrb[228].mxu0  ;;  %v7200_v21 = vunpack.c.l.bf16 %v7626_v49 }
 0x396   : > { %v2989_v58 = vmul.f32 %v7197_v38, %v2649_v1  ;;  %v4135_v46 = vmul.f32 0.0078125, %v3888_v15  ;;  %3957 = vadd.xlane.f32.xlu0 %v10665_v18  ;;  %v8552_v60 = vpop.f32.mrb[229].mxu0  ;;  %v10671_v34 = vsub.f32 %v10373_v59, %v4134_v55  ;;  %v10684_v38 = vld [vmem:[%s12158_s5] ss:$0 sm:$0xff]  ;;  %v7201_v55 = vunpack.c.h.bf16 %v7626_v49 }
 0x397   : > { %4534 = vadd.xlane.f32.xlu1 %v4393_v51  ;;  %v10673_v53 = vpop.f32.mrb[230].mxu0 }
 0x398   : > { %12250 = vst [vmem:[#allocation11_spill] sm:$0xff] %v10671_v34  ;;  %v3067_v19 = vpack.c.bf16 %v2989_v58, %v2988_v50  ;;  %v8553_v41 = vpop.f32.mrb[231].mxu0  ;;  %v4394_v24 = vmul.f32 %v10671_v34, %v10671_v34  ;;  %v10679_v61 = vsub.f32 %v10378_v4, %v4135_v46 }
 0x399   : > { %v2653_v43 = vpop.f32.mrb[80].mxu1 }
 0x39a   : > { %12251 = vst [vmem:[#allocation12_spill] sm:$0xff] %v10679_v61  ;;  %v2654_v59 = vadd.f32 %v10684_v38, %v2653_v43  ;;  %v8396_v1 = vpop.f32.mrb[81].mxu1  ;;  %8659 = vmatmul.mubr.msk.bf16.gmra.mrb[80].mxu0 %vm1025_vm1, %v3067_v19  ;;  %4536 = vadd.xlane.f32.xlu0 %v4394_v24  ;;  %v4395_v43 = vmul.f32 %v10679_v61, %v10679_v61 }
 0x39b   : > { %3959 = vadd.xlane.f32.xlu1 %v10673_v53  ;;  %v2656_v15 = vpop.f32.mrb[82].mxu1  ;;  %v3890_v51 = vpop.xlane.xlu0 %3889  ;;  %8662 = vmatprep.mubr.msk.bf16.mxu0 %vm9176_vm0, %v12247_v47 }
 0x39c   : > { %v2657_v4 = vadd.f32 %v10684_v38, %v2656_v15  ;;  %v4136_v50 = vmul.f32 0.0078125, %v3890_v51  ;;  %v8397_v58 = vpop.f32.mrb[83].mxu1  ;;  %v2990_v19 = vmul.f32 %v7200_v21, %v2654_v59  ;;  %v7627_v15 = vld [vmem:[%s9978_s16 + $0x1a8] sm:$0xff]  }
 0x39d   : > { %v3892_v46 = vpop.xlane.xlu1 %3891  ;;  %v10692_v60 = vpop.f32.mrb[232].mxu0  ;;  %v7204_v59 = vunpack.c.l.bf16 %v7627_v15 }
 0x39e   : > { %v2991_v49 = vmul.f32 %v7201_v55, %v2657_v4  ;;  %v4137_v41 = vmul.f32 0.0078125, %v3892_v46  ;;  %3961 = vadd.xlane.f32.xlu0 %v10692_v60  ;;  %v8556_v24 = vpop.f32.mrb[233].mxu0  ;;  %v10698_v1 = vsub.f32 %v10389_v9, %v4136_v50  ;;  %v7205_v9 = vunpack.c.h.bf16 %v7627_v15 }
 0x39f   : > { %4538 = vadd.xlane.f32.xlu1 %v4395_v43  ;;  %v10700_v34 = vpop.f32.mrb[234].mxu0 }
 0x3a0   : > { %12252 = vst [vmem:[#allocation13_spill] sm:$0xff] %v10698_v1  ;;  %v3068_v51 = vpack.c.bf16 %v2991_v49, %v2990_v19  ;;  %v8557_v58 = vpop.f32.mrb[235].mxu0  ;;  %v4396_v42 = vmul.f32 %v10698_v1, %v10698_v1  ;;  %v10706_v21 = vsub.f32 %v10394_v25, %v4137_v41 }
 0x3a1   : > { %v2661_v17 = vpop.f32.mrb[84].mxu1 }
 0x3a2   : > { %12253 = vst [vmem:[#allocation14_spill] sm:$0xff] %v10706_v21  ;;  %v2662_v55 = vadd.f32 %v10684_v38, %v2661_v17  ;;  %v8400_v4 = vpop.f32.mrb[85].mxu1  ;;  %8663 = vmatmul.mubr.msk.bf16.gmra.mrb[84].mxu0 %vm1025_vm1, %v3068_v51  ;;  %4540 = vadd.xlane.f32.xlu0 %v4396_v42  ;;  %v4397_v17 = vmul.f32 %v10706_v21, %v10706_v21 }
 0x3a3   : > { %3963 = vadd.xlane.f32.xlu1 %v10700_v34  ;;  %v2664_v50 = vpop.f32.mrb[86].mxu1  ;;  %v3894_v46 = vpop.xlane.xlu0 %3893  ;;  %8666 = vmatprep.mubr.msk.bf16.mxu0 %vm9176_vm0, %v12247_v47 }
 0x3a4   : > { %v2665_v43 = vadd.f32 %v10684_v38, %v2664_v50  ;;  %v4138_v25 = vmul.f32 0.0078125, %v3894_v46  ;;  %v8401_v19 = vpop.f32.mrb[87].mxu1  ;;  %v2992_v42 = vmul.f32 %v7204_v59, %v2662_v55  ;;  %v7628_v50 = vld [vmem:[%s9978_s16 + $0x1b0] sm:$0xff]  }
 0x3a5   : > { %v3896_v49 = vpop.xlane.xlu1 %3895  ;;  %v10714_v41 = vpop.f32.mrb[236].mxu0  ;;  %v7208_v55 = vunpack.c.l.bf16 %v7628_v50 }
 0x3a6   : > { %v2993_v24 = vmul.f32 %v7205_v9, %v2665_v43  ;;  %v4139_v15 = vmul.f32 0.0078125, %v3896_v49  ;;  %3965 = vadd.xlane.f32.xlu0 %v10714_v41  ;;  %v8560_v51 = vpop.f32.mrb[237].mxu0  ;;  %v10720_v58 = vsub.f32 %v10405_v13, %v4138_v25  ;;  %v7209_v13 = vunpack.c.h.bf16 %v7628_v50 }
 0x3a7   : > { %4542 = vadd.xlane.f32.xlu1 %v4397_v17  ;;  %v10722_v4 = vpop.f32.mrb[238].mxu0 }
 0x3a8   : > { %12254 = vst [vmem:[#allocation15_spill] sm:$0xff] %v10720_v58  ;;  %v3069_v46 = vpack.c.bf16 %v2993_v24, %v2992_v42  ;;  %v8561_v19 = vpop.f32.mrb[239].mxu0  ;;  %v4398_v1 = vmul.f32 %v10720_v58, %v10720_v58  ;;  %v10728_v59 = vsub.f32 %v10410_v56, %v4139_v15 }
 0x3a9   : > { %v2669_v61 = vpop.f32.mrb[88].mxu1 }
 0x3aa   : > { %12255 = vst [vmem:[#allocation16_spill] sm:$0xff] %v10728_v59  ;;  %v2670_v9 = vadd.f32 %v10684_v38, %v2669_v61  ;;  %v8404_v43 = vpop.f32.mrb[89].mxu1  ;;  %8667 = vmatmul.mubr.msk.bf16.gmra.mrb[88].mxu0 %vm1025_vm1, %v3069_v46  ;;  %4544 = vadd.xlane.f32.xlu0 %v4398_v1  ;;  %v4399_v61 = vmul.f32 %v10728_v59, %v10728_v59 }
 0x3ab   : > { %3967 = vadd.xlane.f32.xlu1 %v10722_v4  ;;  %v2672_v25 = vpop.f32.mrb[90].mxu1  ;;  %v3898_v49 = vpop.xlane.xlu0 %3897  ;;  %8670 = vmatprep.mubr.msk.bf16.mxu0 %vm9176_vm0, %v12247_v47 }
 0x3ac   : > { %v2673_v17 = vadd.f32 %v10684_v38, %v2672_v25  ;;  %v4140_v56 = vmul.f32 0.0078125, %v3898_v49  ;;  %v8405_v42 = vpop.f32.mrb[91].mxu1  ;;  %v2994_v1 = vmul.f32 %v7208_v55, %v2670_v9  ;;  %v7629_v25 = vld [vmem:[%s9978_s16 + $0x1b8] sm:$0xff]  }
 0x3ad   : > { %v3900_v24 = vpop.xlane.xlu1 %3899  ;;  %v10736_v15 = vpop.f32.mrb[240].mxu0  ;;  %v7212_v9 = vunpack.c.l.bf16 %v7629_v25 }
 0x3ae   : > { %v2995_v51 = vmul.f32 %v7209_v13, %v2673_v17  ;;  %v4141_v50 = vmul.f32 0.0078125, %v3900_v24  ;;  %3969 = vadd.xlane.f32.xlu0 %v10736_v15  ;;  %v8564_v46 = vpop.f32.mrb[241].mxu0  ;;  %v10742_v19 = vsub.f32 %v10421_v62, %v4140_v56  ;;  %v7213_v62 = vunpack.c.h.bf16 %v7629_v25 }
 0x3af   : > { %4546 = vadd.xlane.f32.xlu1 %v4399_v61  ;;  %v10744_v43 = vpop.f32.mrb[242].mxu0 }
 0x3b0   : > { %12256 = vst [vmem:[#allocation17_spill] sm:$0xff] %v10742_v19  ;;  %v3070_v49 = vpack.c.bf16 %v2995_v51, %v2994_v1  ;;  %v8565_v42 = vpop.f32.mrb[243].mxu0  ;;  %v4400_v58 = vmul.f32 %v10742_v19, %v10742_v19  ;;  %v10750_v55 = vsub.f32 %v10426_v30, %v4141_v50 }
 0x3b1   : > { %v2677_v21 = vpop.f32.mrb[92].mxu1 }
 0x3b2   : > { %12257 = vst [vmem:[#allocation18_spill] sm:$0xff] %v10750_v55  ;;  %v2678_v13 = vadd.f32 %v10684_v38, %v2677_v21  ;;  %v8408_v17 = vpop.f32.mrb[93].mxu1  ;;  %8671 = vmatmul.mubr.msk.bf16.gmra.mrb[92].mxu0 %vm1025_vm1, %v3070_v49  ;;  %4548 = vadd.xlane.f32.xlu0 %v4400_v58  ;;  %v4401_v21 = vmul.f32 %v10750_v55, %v10750_v55 }
 0x3b3   : > { %3971 = vadd.xlane.f32.xlu1 %v10744_v43  ;;  %v2680_v56 = vpop.f32.mrb[94].mxu1  ;;  %v3902_v24 = vpop.xlane.xlu0 %3901  ;;  %8674 = vmatprep.mubr.msk.bf16.mxu0 %vm9176_vm0, %v12247_v47 }
 0x3b4   : > { %v2681_v61 = vadd.f32 %v10684_v38, %v2680_v56  ;;  %v4142_v30 = vmul.f32 0.0078125, %v3902_v24  ;;  %v8409_v1 = vpop.f32.mrb[95].mxu1  ;;  %v2996_v58 = vmul.f32 %v7212_v9, %v2678_v13  ;;  %v7630_v56 = vld [vmem:[%s9978_s16 + $0x1c0] sm:$0xff]  }
 0x3b5   : > { %v3904_v51 = vpop.xlane.xlu1 %3903  ;;  %v10758_v50 = vpop.f32.mrb[244].mxu0  ;;  %v7216_v13 = vunpack.c.l.bf16 %v7630_v56 }
 0x3b6   : > { %v2997_v46 = vmul.f32 %v7213_v62, %v2681_v61  ;;  %v4143_v25 = vmul.f32 0.0078125, %v3904_v51  ;;  %3973 = vadd.xlane.f32.xlu0 %v10758_v50  ;;  %v8568_v49 = vpop.f32.mrb[245].mxu0  ;;  %v10764_v42 = vsub.f32 %v10437_v11, %v4142_v30  ;;  %v7217_v11 = vunpack.c.h.bf16 %v7630_v56 }
 0x3b7   : > { %4550 = vadd.xlane.f32.xlu1 %v4401_v21  ;;  %v10766_v17 = vpop.f32.mrb[246].mxu0 }
 0x3b8   : > { %12258 = vst [vmem:[#allocation19_spill] sm:$0xff] %v10764_v42  ;;  %v3071_v24 = vpack.c.bf16 %v2997_v46, %v2996_v58  ;;  %v8569_v1 = vpop.f32.mrb[247].mxu0  ;;  %v4402_v19 = vmul.f32 %v10764_v42, %v10764_v42  ;;  %v10772_v9 = vsub.f32 %v10442_v48, %v4143_v25 }
 0x3b9   : > { %v2685_v59 = vpop.f32.mrb[96].mxu1 }
 0x3ba   : > { %12259 = vst [vmem:[#allocation20_spill] sm:$0xff] %v10772_v9  ;;  %v2686_v62 = vadd.f32 %v10684_v38, %v2685_v59  ;;  %v8412_v61 = vpop.f32.mrb[97].mxu1  ;;  %8675 = vmatmul.mubr.msk.bf16.gmra.mrb[96].mxu0 %vm1025_vm1, %v3071_v24  ;;  %4552 = vadd.xlane.f32.xlu0 %v4402_v19  ;;  %v4403_v59 = vmul.f32 %v10772_v9, %v10772_v9 }
 0x3bb   : > { %3975 = vadd.xlane.f32.xlu1 %v10766_v17  ;;  %v2688_v30 = vpop.f32.mrb[98].mxu1  ;;  %v3906_v51 = vpop.xlane.xlu0 %3905  ;;  %8678 = vmatprep.mubr.msk.bf16.mxu0 %vm9176_vm0, %v12247_v47 }
 0x3bc   : > { %v2689_v21 = vadd.f32 %v10684_v38, %v2688_v30  ;;  %v4144_v48 = vmul.f32 0.0078125, %v3906_v51  ;;  %v8413_v58 = vpop.f32.mrb[99].mxu1  ;;  %v2998_v19 = vmul.f32 %v7216_v13, %v2686_v62  ;;  %v7631_v30 = vld [vmem:[%s9978_s16 + $0x1c8] sm:$0xff]  }
 0x3bd   : > { %v3908_v46 = vpop.xlane.xlu1 %3907  ;;  %v10780_v25 = vpop.f32.mrb[248].mxu0  ;;  %v7220_v62 = vunpack.c.l.bf16 %v7631_v30 }
 0x3be   : > { %v2999_v49 = vmul.f32 %v7217_v11, %v2689_v21  ;;  %v4145_v56 = vmul.f32 0.0078125, %v3908_v46  ;;  %3977 = vadd.xlane.f32.xlu0 %v10780_v25  ;;  %v8572_v24 = vpop.f32.mrb[249].mxu0  ;;  %v10786_v1 = vsub.f32 %v10451_v35, %v4144_v48  ;;  %v7221_v35 = vunpack.c.h.bf16 %v7631_v30 }
 0x3bf   : > { %4554 = vadd.xlane.f32.xlu1 %v4403_v59  ;;  %v10788_v61 = vpop.f32.mrb[250].mxu0 }
 0x3c0   : > { %12260 = vst [vmem:[#allocation21_spill] sm:$0xff] %v10786_v1  ;;  %v3072_v51 = vpack.c.bf16 %v2999_v49, %v2998_v19  ;;  %v8573_v58 = vpop.f32.mrb[251].mxu0  ;;  %v4404_v42 = vmul.f32 %v10786_v1, %v10786_v1  ;;  %v10794_v13 = vsub.f32 %v10454_v39, %v4145_v56 }
 0x3c1   : > { %v2693_v55 = vpop.f32.mrb[100].mxu1 }
 0x3c2   : > { %12261 = vst [vmem:[#allocation22_spill] sm:$0xff] %v10794_v13  ;;  %v2694_v11 = vadd.f32 %v10684_v38, %v2693_v55  ;;  %v8416_v21 = vpop.f32.mrb[101].mxu1  ;;  %8679 = vmatmul.mubr.msk.bf16.gmra.mrb[100].mxu0 %vm1025_vm1, %v3072_v51  ;;  %4556 = vadd.xlane.f32.xlu0 %v4404_v42  ;;  %v4405_v55 = vmul.f32 %v10794_v13, %v10794_v13 }
 0x3c3   : > { %3979 = vadd.xlane.f32.xlu1 %v10788_v61  ;;  %v2696_v48 = vpop.f32.mrb[102].mxu1  ;;  %v3910_v46 = vpop.xlane.xlu0 %3909  ;;  %8682 = vmatprep.mubr.msk.bf16.mxu0 %vm9176_vm0, %v12247_v47 }
 0x3c4   : > { %v2697_v59 = vadd.f32 %v10684_v38, %v2696_v48  ;;  %v4146_v39 = vmul.f32 0.0078125, %v3910_v46  ;;  %v8417_v19 = vpop.f32.mrb[103].mxu1  ;;  %v3000_v42 = vmul.f32 %v7220_v62, %v2694_v11  ;;  %v7632_v48 = vld [vmem:[%s9978_s16 + $0x1d0] sm:$0xff]  }
 0x3c5   : > { %v3912_v49 = vpop.xlane.xlu1 %3911  ;;  %v10802_v56 = vpop.f32.mrb[252].mxu0  ;;  %v7224_v11 = vunpack.c.l.bf16 %v7632_v48 }
 0x3c6   : > { %v3001_v24 = vmul.f32 %v7221_v35, %v2697_v59  ;;  %v4147_v30 = vmul.f32 0.0078125, %v3912_v49  ;;  %3981 = vadd.xlane.f32.xlu0 %v10802_v56  ;;  %v8576_v51 = vpop.f32.mrb[253].mxu0  ;;  %v10808_v58 = vsub.f32 %v10463_v14, %v4146_v39  ;;  %v7225_v14 = vunpack.c.h.bf16 %v7632_v48 }
 0x3c7   : > { %4558 = vadd.xlane.f32.xlu1 %v4405_v55  ;;  %v10810_v21 = vpop.f32.mrb[254].mxu0 }
 0x3c8   : > { %12262 = vst [vmem:[#allocation23_spill] sm:$0xff] %v10808_v58  ;;  %v3073_v46 = vpack.c.bf16 %v3001_v24, %v3000_v42  ;;  %v8577_v19 = vpop.f32.mrb[255].mxu0  ;;  %v4406_v1 = vmul.f32 %v10808_v58, %v10808_v58  ;;  %v10816_v62 = vsub.f32 %v10466_v16, %v4147_v30 }
 0x3c9   : > { %v2701_v9 = vpop.f32.mrb[104].mxu1 }
 0x3ca   : > { %12263 = vst [vmem:[#allocation24_spill] sm:$0xff] %v10816_v62  ;;  %v2702_v35 = vadd.f32 %v10684_v38, %v2701_v9  ;;  %v8420_v59 = vpop.f32.mrb[105].mxu1  ;;  %8683 = vmatmul.mubr.msk.bf16.gmra.mrb[104].mxu0 %vm1025_vm1, %v3073_v46  ;;  %4560 = vadd.xlane.f32.xlu0 %v4406_v1  ;;  %v4407_v9 = vmul.f32 %v10816_v62, %v10816_v62 }
 0x3cb   : > { %3983 = vadd.xlane.f32.xlu1 %v10810_v21  ;;  %v2704_v39 = vpop.f32.mrb[106].mxu1  ;;  %v3914_v49 = vpop.xlane.xlu0 %3913  ;;  %8686 = vmatprep.mubr.msk.bf16.mxu0 %vm9176_vm0, %v12247_v47 }
 0x3cc   : > { %v2705_v55 = vadd.f32 %v10684_v38, %v2704_v39  ;;  %v4148_v16 = vmul.f32 0.0078125, %v3914_v49  ;;  %v8421_v42 = vpop.f32.mrb[107].mxu1  ;;  %v3002_v1 = vmul.f32 %v7224_v11, %v2702_v35  ;;  %v7633_v39 = vld [vmem:[%s9978_s16 + $0x1d8] sm:$0xff]  }
 0x3cd   : > { %v3916_v24 = vpop.xlane.xlu1 %3915  ;;  %v10824_v30 = vpop.f32.mrb[0].mxu0  ;;  %v7228_v35 = vunpack.c.l.bf16 %v7633_v39 }
 0x3ce   : > { %v3003_v51 = vmul.f32 %v7225_v14, %v2705_v55  ;;  %v4149_v48 = vmul.f32 0.0078125, %v3916_v24  ;;  %3985 = vadd.xlane.f32.xlu0 %v10824_v30  ;;  %v8580_v46 = vpop.f32.mrb[1].mxu0  ;;  %v10830_v19 = vsub.f32 %v10475_v5, %v4148_v16  ;;  %v7229_v5 = vunpack.c.h.bf16 %v7633_v39 }
 0x3cf   : > { %4562 = vadd.xlane.f32.xlu1 %v4407_v9  ;;  %v10832_v59 = vpop.f32.mrb[2].mxu0 }
 0x3d0   : > { %12264 = vst [vmem:[#allocation25_spill] sm:$0xff] %v10830_v19  ;;  %v3074_v49 = vpack.c.bf16 %v3003_v51, %v3002_v1  ;;  %v8581_v42 = vpop.f32.mrb[3].mxu0  ;;  %v4408_v58 = vmul.f32 %v10830_v19, %v10830_v19  ;;  %v10838_v11 = vsub.f32 %v10478_v54, %v4149_v48 }
 0x3d1   : > { %v2709_v13 = vpop.f32.mrb[108].mxu1 }
 0x3d2   : > { %v2710_v14 = vadd.f32 %v10684_v38, %v2709_v13  ;;  %v8424_v55 = vpop.f32.mrb[109].mxu1  ;;  %8687 = vmatmul.mubr.msk.bf16.gmra.mrb[108].mxu0 %vm1025_vm1, %v3074_v49  ;;  %4564 = vadd.xlane.f32.xlu0 %v4408_v58  ;;  %v4409_v13 = vmul.f32 %v10838_v11, %v10838_v11 }
 0x3d3   : > { %3987 = vadd.xlane.f32.xlu1 %v10832_v59  ;;  %v2712_v16 = vpop.f32.mrb[110].mxu1  ;;  %v3918_v24 = vpop.xlane.xlu0 %3917  ;;  %8690 = vmatprep.mubr.msk.bf16.mxu0 %vm9176_vm0, %v12247_v47 }
 0x3d4   : > { %v2713_v9 = vadd.f32 %v10684_v38, %v2712_v16  ;;  %v4150_v54 = vmul.f32 0.0078125, %v3918_v24  ;;  %v8425_v1 = vpop.f32.mrb[111].mxu1  ;;  %v3004_v58 = vmul.f32 %v7228_v35, %v2710_v14  ;;  %v7634_v16 = vld [vmem:[%s9978_s16 + $0x1e0] sm:$0xff]  }
 0x3d5   : > { %v3920_v51 = vpop.xlane.xlu1 %3919  ;;  %v10846_v48 = vpop.f32.mrb[4].mxu0  ;;  %v7232_v14 = vunpack.c.l.bf16 %v7634_v16 }
 0x3d6   : > { %v3005_v46 = vmul.f32 %v7229_v5, %v2713_v9  ;;  %v4151_v39 = vmul.f32 0.0078125, %v3920_v51  ;;  %3989 = vadd.xlane.f32.xlu0 %v10846_v48  ;;  %v8584_v49 = vpop.f32.mrb[5].mxu0  ;;  %v10852_v42 = vsub.f32 %v10487_v29, %v4150_v54  ;;  %v7233_v29 = vunpack.c.h.bf16 %v7634_v16 }
 0x3d7   : > { %4566 = vadd.xlane.f32.xlu1 %v4409_v13  ;;  %v10854_v55 = vpop.f32.mrb[6].mxu0 }
 0x3d8   : > { %12265 = vst [vmem:[#allocation26_spill] sm:$0xff] %v10852_v42  ;;  %v3075_v24 = vpack.c.bf16 %v3005_v46, %v3004_v58  ;;  %v8585_v1 = vpop.f32.mrb[7].mxu0  ;;  %v4410_v19 = vmul.f32 %v10852_v42, %v10852_v42  ;;  %v10860_v35 = vsub.f32 %v10490_v8, %v4151_v39 }
 0x3d9   : > { %v2717_v62 = vpop.f32.mrb[112].mxu1 }
 0x3da   : > { %12266 = vst [vmem:[#allocation27_spill] sm:$0xff] %v10860_v35  ;;  %v2718_v5 = vadd.f32 %v10684_v38, %v2717_v62  ;;  %v8428_v9 = vpop.f32.mrb[113].mxu1  ;;  %8691 = vmatmul.mubr.msk.bf16.gmra.mrb[112].mxu0 %vm1025_vm1, %v3075_v24  ;;  %4568 = vadd.xlane.f32.xlu0 %v4410_v19  ;;  %v4411_v62 = vmul.f32 %v10860_v35, %v10860_v35 }
 0x3db   : > { %3991 = vadd.xlane.f32.xlu1 %v10854_v55  ;;  %v2720_v54 = vpop.f32.mrb[114].mxu1  ;;  %v3922_v51 = vpop.xlane.xlu0 %3921  ;;  %8694 = vmatprep.mubr.msk.bf16.mxu0 %vm9176_vm0, %v12247_v47 }
 0x3dc   : > { %v2721_v13 = vadd.f32 %v10684_v38, %v2720_v54  ;;  %v4152_v8 = vmul.f32 0.0078125, %v3922_v51  ;;  %v8429_v58 = vpop.f32.mrb[115].mxu1  ;;  %v3006_v19 = vmul.f32 %v7232_v14, %v2718_v5  ;;  %v7635_v54 = vld [vmem:[%s9978_s16 + $0x1e8] sm:$0xff]  }
 0x3dd   : > { %v3924_v46 = vpop.xlane.xlu1 %3923  ;;  %v10868_v39 = vpop.f32.mrb[8].mxu0  ;;  %v7236_v5 = vunpack.c.l.bf16 %v7635_v54 }
 0x3de   : > { %v3007_v49 = vmul.f32 %v7233_v29, %v2721_v13  ;;  %v10873_v16 = vsub.f32 %v10499_v32, %v4152_v8  ;;  %v4153_v24 = vmul.f32 0.0078125, %v3924_v46  ;;  %3993 = vadd.xlane.f32.xlu0 %v10868_v39  ;;  %v8588_v1 = vpop.f32.mrb[9].mxu0  ;;  %v7237_v13 = vunpack.c.h.bf16 %v7635_v54 }
 0x3df   : > { %4570 = vadd.xlane.f32.xlu1 %v4411_v62  ;;  %v10876_v9 = vpop.f32.mrb[10].mxu0 }
 0x3e0   : > { %12267 = vst [vmem:[#allocation28_spill] sm:$0xff] %v10873_v16  ;;  %v3076_v51 = vpack.c.bf16 %v3007_v49, %v3006_v19  ;;  %v8589_v58 = vpop.f32.mrb[11].mxu0  ;;  %v4412_v42 = vmul.f32 %v10873_v16, %v10873_v16  ;;  %v10882_v35 = vsub.f32 %v10502_v33, %v4153_v24 }
 0x3e1   : > { %v2725_v14 = vpop.f32.mrb[116].mxu1 }
 0x3e2   : > { %12268 = vst [vmem:[#allocation29_spill] sm:$0xff] %v10882_v35  ;;  %v2726_v32 = vadd.f32 %v10684_v38, %v2725_v14  ;;  %v8432_v29 = vpop.f32.mrb[117].mxu1  ;;  %8695 = vmatmul.mubr.msk.bf16.gmra.mrb[116].mxu0 %vm1025_vm1, %v3076_v51  ;;  %4572 = vadd.xlane.f32.xlu0 %v4412_v42  ;;  %v4413_v1 = vmul.f32 %v10882_v35, %v10882_v35 }
 0x3e3   : > { %3995 = vadd.xlane.f32.xlu1 %v10876_v9  ;;  %v2728_v8 = vpop.f32.mrb[118].mxu1  ;;  %v3926_v46 = vpop.xlane.xlu0 %3925  ;;  %8698 = vmatprep.mubr.msk.bf16.mxu0 %vm9176_vm0, %v12247_v47 }
 0x3e4   : > { %v2729_v33 = vadd.f32 %v10684_v38, %v2728_v8  ;;  %v4154_v62 = vmul.f32 0.0078125, %v3926_v46  ;;  %v8433_v19 = vpop.f32.mrb[119].mxu1  ;;  %v3008_v42 = vmul.f32 %v7236_v5, %v2726_v32  ;;  %v7636_v8 = vld [vmem:[%s9978_s16 + $0x1f0] sm:$0xff]  }
 0x3e5   : > { %v3928_v49 = vpop.xlane.xlu1 %3927  ;;  %v10890_v24 = vpop.f32.mrb[12].mxu0  ;;  %v7240_v32 = vunpack.c.l.bf16 %v7636_v8 }
 0x3e6   : > { %v3009_v54 = vmul.f32 %v7237_v13, %v2729_v33  ;;  %v10895_v51 = vsub.f32 %v10511_v31, %v4154_v62  ;;  %v4155_v58 = vmul.f32 0.0078125, %v3928_v49  ;;  %3997 = vadd.xlane.f32.xlu0 %v10890_v24  ;;  %v8592_v14 = vpop.f32.mrb[13].mxu0  ;;  %v7241_v33 = vunpack.c.h.bf16 %v7636_v8 }
 0x3e7   : > { %4574 = vadd.xlane.f32.xlu1 %v4413_v1  ;;  %v10898_v29 = vpop.f32.mrb[14].mxu0 }
 0x3e8   : > { %12269 = vst [vmem:[#allocation30_spill] sm:$0xff] %v10895_v51  ;;  %v3077_v46 = vpack.c.bf16 %v3009_v54, %v3008_v42  ;;  %v8593_v19 = vpop.f32.mrb[15].mxu0  ;;  %v4414_v16 = vmul.f32 %v10895_v51, %v10895_v51  ;;  %v10904_v35 = vsub.f32 %v10514_v63, %v4155_v58 }
 0x3e9   : > { %v2733_v5 = vpop.f32.mrb[120].mxu1 }
 0x3ea   : > { %12270 = vst [vmem:[#allocation31_spill] sm:$0xff] %v10904_v35  ;;  %v2734_v31 = vadd.f32 %v10684_v38, %v2733_v5  ;;  %v8436_v13 = vpop.f32.mrb[121].mxu1  ;;  %8699 = vmatmul.mubr.msk.bf16.gmra.mrb[120].mxu0 %vm1025_vm1, %v3077_v46  ;;  %4576 = vadd.xlane.f32.xlu0 %v4414_v16  ;;  %v4415_v14 = vmul.f32 %v10904_v35, %v10904_v35 }
 0x3eb   : > { %3999 = vadd.xlane.f32.xlu1 %v10898_v29  ;;  %v2736_v62 = vpop.f32.mrb[122].mxu1  ;;  %v3930_v49 = vpop.xlane.xlu0 %3929  ;;  %8702 = vmatprep.mubr.msk.bf16.mxu0 %vm9176_vm0, %v12247_v47 }
 0x3ec   : > { %v2737_v63 = vadd.f32 %v10684_v38, %v2736_v62  ;;  %v4156_v1 = vmul.f32 0.0078125, %v3930_v49  ;;  %v8437_v42 = vpop.f32.mrb[123].mxu1  ;;  %v3010_v16 = vmul.f32 %v7240_v32, %v2734_v31  ;;  %v7637_v62 = vld [vmem:[%s9978_s16 + $0x1f8] sm:$0xff]  }
 0x3ed   : > { %v3932_v54 = vpop.xlane.xlu1 %3931  ;;  %v10912_v58 = vpop.f32.mrb[16].mxu0  ;;  %v7244_v31 = vunpack.c.l.bf16 %v7637_v62 }
 0x3ee   : > { %v3011_v8 = vmul.f32 %v7241_v33, %v2737_v63  ;;  %v10917_v46 = vsub.f32 %v10523_v36, %v4156_v1  ;;  %v4157_v19 = vmul.f32 0.0078125, %v3932_v54  ;;  %4001 = vadd.xlane.f32.xlu0 %v10912_v58  ;;  %v8596_v5 = vpop.f32.mrb[17].mxu0  ;;  %v7245_v63 = vunpack.c.h.bf16 %v7637_v62 }
 0x3ef   : > { %4578 = vadd.xlane.f32.xlu1 %v4415_v14  ;;  %v10920_v13 = vpop.f32.mrb[18].mxu0 }
 0x3f0   : > { %12271 = vst [vmem:[#allocation32_spill] sm:$0xff] %v10917_v46  ;;  %12272 = vst [vmem:[#allocation33_spill] sm:$0xff] %v10920_v13  ;;  %v3078_v49 = vpack.c.bf16 %v3011_v8, %v3010_v16  ;;  %v8597_v42 = vpop.f32.mrb[19].mxu0  ;;  %v4416_v51 = vmul.f32 %v10917_v46, %v10917_v46  ;;  %v10926_v35 = vsub.f32 %v10526_v52, %v4157_v19 }
 0x3f1   : > { %v2741_v32 = vpop.f32.mrb[124].mxu1 }
 0x3f2   : > { %12273 = vst [vmem:[#allocation34_spill] sm:$0xff] %v10926_v35  ;;  %v2742_v36 = vadd.f32 %v10684_v38, %v2741_v32  ;;  %v8440_v33 = vpop.f32.mrb[125].mxu1  ;;  %8703 = vmatmul.mubr.msk.bf16.gmra.mrb[124].mxu0 %vm1025_vm1, %v3078_v49  ;;  %4580 = vadd.xlane.f32.xlu0 %v4416_v51  ;;  %v4417_v5 = vmul.f32 %v10926_v35, %v10926_v35 }
 0x3f3   : > { %4003 = vadd.xlane.f32.xlu1 %v10920_v13  ;;  %v2744_v1 = vpop.f32.mrb[126].mxu1  ;;  %v3934_v54 = vpop.xlane.xlu0 %3933  ;;  %8706 = vmatprep.mubr.msk.bf16.mxu0 %vm9176_vm0, %v12247_v47 }
 0x3f4   : > { %v2745_v52 = vadd.f32 %v10684_v38, %v2744_v1  ;;  %v4158_v14 = vmul.f32 0.0078125, %v3934_v54  ;;  %v8441_v16 = vpop.f32.mrb[127].mxu1  ;;  %v3012_v51 = vmul.f32 %v7244_v31, %v2742_v36  ;;  %v7638_v54 = vld [vmem:[%s9978_s16 + $0x200] sm:$0xff]   ;;  %s364_s16 = sand.u32 1, %s9165_s10  }
 0x3f5   : > { %v3936_v8 = vpop.xlane.xlu1 %3935  ;;  %v10934_v19 = vpop.f32.mrb[20].mxu0  ;;  %s11009_s28 = smul.u32 520, %s364_s16  ;;  %s12092_s23 = scalar_lea.sflag [#allocation3], %s364_s16 }
 0x3f6   : > { %v3013_v62 = vmul.f32 %v7245_v63, %v2745_v52  ;;  %v10939_v49 = vsub.f32 %v10535_v22, %v4158_v14  ;;  %v4159_v42 = vmul.f32 0.0078125, %v3936_v8  ;;  %4005 = vadd.xlane.f32.xlu0 %v10934_v19  ;;  %v8600_v32 = vpop.f32.mrb[21].mxu0  ;;  %v7248_v63 = vunpack.c.l.bf16 %v7638_v54 }
 0x3f7   : > { %4582 = vadd.xlane.f32.xlu1 %v4417_v5  ;;  %v4513_v33 = vpop.xlane.xlu0 %4512  ;;  %v10942_v1 = vpop.f32.mrb[22].mxu0  ;;  %v7249_v8 = vunpack.c.h.bf16 %v7638_v54  ;;  %s11030_s21 = scalar_lea.vmem [#allocation2], %s11009_s28 }
 0x3f8   : > { %v3079_v16 = vpack.c.bf16 %v3013_v62, %v3012_v51  ;;  %v4772_v46 = vmul.f32 0.0078125, %v4513_v33  ;;  %v8601_v13 = vpop.f32.mrb[23].mxu0  ;;  %v4418_v35 = vmul.f32 %v10939_v49, %v10939_v49  ;;  %v10948_v31 = vsub.f32 %v10541_v20, %v4159_v42 }
 0x3f9   : > { %v2749_v22 = vpop.f32.mrb[128].mxu1 }
 0x3fa   : > { %v4902_v36 = vadd.f32 1e-05, %v4772_v46  ;;  %v2750_v52 = vadd.f32 %v10684_v38, %v2749_v22  ;;  %v8444_v14 = vpop.f32.mrb[129].mxu1  ;;  %8707 = vmatmul.mubr.msk.bf16.gmra.mrb[128].mxu0 %vm1025_vm1, %v3079_v16  ;;  %4584 = vadd.xlane.f32.xlu0 %v4418_v35  ;;  %v4419_v35 = vmul.f32 %v10948_v31, %v10948_v31 }
 0x3fb   : > { %4007 = vadd.xlane.f32.xlu1 %v10942_v1  ;;  %v2752_v5 = vpop.f32.mrb[130].mxu1  ;;  %v4515_v13 = vpop.xlane.xlu1 %4514  ;;  %8710 = vmatprep.mubr.msk.bf16.mxu0 %vm9176_vm0, %v12247_v47 }
 0x3fc   : > { %8842 = vrsqrt.f32 %v4902_v36  ;;  %v2753_v20 = vadd.f32 %v10684_v38, %v2752_v5  ;;  %v4773_v51 = vmul.f32 0.0078125, %v4515_v13  ;;  %v3938_v46 = vpop.xlane.xlu0 %3937  ;;  %v8445_v62 = vpop.f32.mrb[131].mxu1  ;;  %v3014_v33 = vmul.f32 %v7248_v63, %v2750_v52 }
 0x3fd   : > { %v4160_v42 = vmul.f32 0.0078125, %v3938_v46  ;;  %v10956_v32 = vpop.f32.mrb[24].mxu0 }
 0x3fe   : > { %v3015_v54 = vmul.f32 %v7249_v8, %v2753_v20  ;;  %v4903_v16 = vadd.f32 1e-05, %v4773_v51  ;;  %4009 = vadd.xlane.f32.xlu0 %v10956_v32  ;;  %v8604_v22 = vpop.f32.mrb[25].mxu0 }
 0x3ff   : > { %v10962_v47 = vsub.f32 %v10557_v0, %v4160_v42  ;;  %4586 = vadd.xlane.f32.xlu1 %v4419_v35  ;;  %v10964_v38 = vpop.f32.mrb[26].mxu0 }
 0x400   : > { %v3080_v36 = vpack.c.bf16 %v3015_v54, %v3014_v33  ;;  %8844 = vrsqrt.f32 %v4903_v16  ;;  %v4517_v14 = vpop.xlane.xlu0 %4516  ;;  %v3940_v5 = vpop.xlane.xlu1 %3939  ;;  %v10980_v16 = vld [vmem:[%s12160_s7] ss:$0 sm:$0xff] }
 0x401   : > { %v4774_v13 = vmul.f32 0.0078125, %v4517_v14  ;;  %v4161_v46 = vmul.f32 0.0078125, %v3940_v5  ;;  %v8605_v62 = vpop.f32.mrb[27].mxu0  ;;  %v4420_v63 = vmul.f32 %v10962_v47, %v10962_v47 }
 0x402   : > { %8711 = vmatmul.mubr.msk.bf16.gmra.mrb[132].mxu0 %vm1025_vm1, %v3080_v36  ;;  %v10992_v62 = vld [vmem:[%s12161_s8] ss:$0 sm:$0xff] }
 0x403   : > { %v4904_v52 = vadd.f32 1e-05, %v4774_v13  ;;  %v10970_v8 = vsub.f32 %v10563_v23, %v4161_v46  ;;  %4588 = vadd.xlane.f32.xlu0 %v4420_v63  ;;  %4011 = vadd.xlane.f32.xlu1 %v10964_v38 }
 0x404   : > { %v4519_v0 = vpop.xlane.xlu1 %4518  ;;  %v3942_v20 = vpop.xlane.xlu0 %3941 }
 0x405   : > { %8846 = vrsqrt.f32 %v4904_v52  ;;  %v4775_v51 = vmul.f32 0.0078125, %v4519_v0  ;;  %v4162_v42 = vmul.f32 0.0078125, %v3942_v20  ;;  %v10973_v35 = vpop.f32.mrb[28].mxu0  ;;  %v4421_v33 = vmul.f32 %v10970_v8, %v10970_v8 }
 0x406   : > { %v8843_v54 = vpop.eup %8842  ;;  %v8608_v23 = vpop.f32.mrb[29].mxu0 }
 0x407   : > { %v5162_v22 = vmul.f32 %v8843_v54, %v10539_v57  ;;  %v4905_v36 = vadd.f32 1e-05, %v4775_v51  ;;  %v10984_v14 = vsub.f32 %v10579_v3, %v4162_v42  ;;  %4590 = vadd.xlane.f32.xlu1 %v4421_v33  ;;  %4013 = vadd.xlane.f32.xlu0 %v10973_v35  ;;  %v10987_v5 = vpop.f32.mrb[30].mxu0 }
 0x408   : > { %v4521_v13 = vpop.xlane.xlu0 %4520  ;;  %v3944_v46 = vpop.xlane.xlu1 %3943 }
 0x409   : > { %12274 = vst [vmem:[#allocation35_spill] sm:$0xff] %v10984_v14  ;;  %v5299_v63 = vmul.f32 %v10980_v16, %v5162_v22  ;;  %8848 = vrsqrt.f32 %v4905_v36  ;;  %v4776_v57 = vmul.f32 0.0078125, %v4521_v13  ;;  %v4163_v52 = vmul.f32 0.0078125, %v3944_v46  ;;  %v8609_v0 = vpop.f32.mrb[31].mxu0 }
 0x40a   : > { %v8845_v3 = vpop.eup %8844  ;;  %v4422_v20 = vmul.f32 %v10984_v14, %v10984_v14 }
 0x40b   : > { %v5163_v51 = vmul.f32 %v8845_v3, %v10550_v28  ;;  %v4906_v42 = vadd.f32 1e-05, %v4776_v57  ;;  %v11000_v33 = vsub.f32 %v10585_v27, %v4163_v52  ;;  %4015 = vadd.xlane.f32.xlu1 %v10987_v5  ;;  %v5436_v54 = vadd.f32 %v10992_v62, %v5299_v63 }
 0x40c   : > { %4592 = vadd.xlane.f32.xlu0 %v4422_v20  ;;  %v4523_v23 = vpop.xlane.xlu1 %4522  ;;  %v3946_v22 = vpop.xlane.xlu0 %3945 }
 0x40d   : > { %12275 = vst [vmem:[#allocation36_spill] sm:$0xff] %v11000_v33  ;;  %v5300_v36 = vmul.f32 %v10980_v16, %v5163_v51  ;;  %8850 = vrsqrt.f32 %v4906_v42  ;;  %v4777_v13 = vmul.f32 0.0078125, %v4523_v23  ;;  %v11005_v46 = vpop.f32.mrb[32].mxu0  ;;  %v4164_v28 = vmul.f32 0.0078125, %v3946_v22 }
 0x40e   : > { %v4423_v27 = vmul.f32 %v11000_v33, %v11000_v33  ;;  %v8612_v57 = vpop.f32.mrb[33].mxu0  ;;  %v5566_v20 = vmax.f32 %v5436_v54, 0.0 }
 0x40f   : > { %v8847_v52 = vpop.eup %8846  ;;  %v5437_v63 = vadd.f32 %v10992_v62, %v5300_v36  ;;  %v4907_v0 = vadd.f32 1e-05, %v4777_v13  ;;  %v11014_v3 = vpop.f32.mrb[34].mxu0  ;;  %v11018_v42 = vsub.f32 %v10599_v26, %v4164_v28 }
 0x410   : > { %v5164_v51 = vmul.f32 %v8847_v52, %v10561_v7  ;;  %4594 = vadd.xlane.f32.xlu1 %v4423_v27  ;;  %4017 = vadd.xlane.f32.xlu0 %v11005_v46  ;;  %v4525_v23 = vpop.xlane.xlu0 %4524  ;;  %v3948_v22 = vpop.xlane.xlu1 %3947 }
 0x411   : > { %v5567_v14 = vmax.f32 %v5437_v63, 0.0  ;;  %8852 = vrsqrt.f32 %v4907_v0  ;;  %v4778_v57 = vmul.f32 0.0078125, %v4525_v23  ;;  %v4165_v33 = vmul.f32 0.0078125, %v3948_v22  ;;  %v8613_v36 = vpop.f32.mrb[35].mxu0 }
 0x412   : > { %v5301_v13 = vmul.f32 %v10980_v16, %v5164_v51  ;;  %v4424_v54 = vmul.f32 %v11018_v42, %v11018_v42 }
 0x413   : > { %v8849_v7 = vpop.eup %8848  ;;  %v7253_v52 = vpack.c.bf16 %v5567_v14, %v5566_v20  ;;  %v4908_v26 = vadd.f32 1e-05, %v4778_v57  ;;  %v11025_v28 = vsub.f32 %v10607_v45, %v4165_v33 }
 0x414   : > { %v5165_v27 = vmul.f32 %v8849_v7, %v10571_v40  ;;  %4596 = vadd.xlane.f32.xlu0 %v4424_v54  ;;  %4019 = vadd.xlane.f32.xlu1 %v11014_v3  ;;  %v4527_v63 = vpop.xlane.xlu1 %4526  ;;  %v3950_v0 = vpop.xlane.xlu0 %3949  ;;  %v5438_v14 = vadd.f32 %v10992_v62, %v5301_v13 }
 0x415   : > { %12276 = vst [vmem:[#allocation37_spill] sm:$0xff] %v11025_v28  ;;  %7254 = vst [vmem:[%s11030_s21] sm:$0xff] %v7253_v52   ;;  %8854 = vrsqrt.f32 %v4908_v26  ;;  %v4779_v51 = vmul.f32 0.0078125, %v4527_v63  ;;  %v4166_v23 = vmul.f32 0.0078125, %v3950_v0  ;;  %v11033_v22 = vpop.f32.mrb[36].mxu0  ;;  %v4425_v45 = vmul.f32 %v11025_v28, %v11025_v28 }
 0x416   : > { %v5302_v40 = vmul.f32 %v10980_v16, %v5165_v27  ;;  %v8616_v33 = vpop.f32.mrb[37].mxu0 }
 0x417   : > { %v8851_v20 = vpop.eup %8850  ;;  %v4909_v57 = vadd.f32 1e-05, %v4779_v51  ;;  %v11040_v36 = vsub.f32 %v10621_v2, %v4166_v23  ;;  %v11042_v54 = vpop.f32.mrb[38].mxu0  ;;  %v5568_v2 = vmax.f32 %v5438_v14, 0.0 }
 0x418   : > { %v5439_v7 = vadd.f32 %v10992_v62, %v5302_v40  ;;  %v5166_v52 = vmul.f32 %v8851_v20, %v10583_v37  ;;  %4598 = vadd.xlane.f32.xlu1 %v4425_v45  ;;  %4021 = vadd.xlane.f32.xlu0 %v11033_v22  ;;  %v4529_v26 = vpop.xlane.xlu0 %4528  ;;  %v3952_v63 = vpop.xlane.xlu1 %3951 }
 0x419   : > { %12277 = vst [vmem:[#allocation38_spill] sm:$0xff] %v11040_v36  ;;  %8856 = vrsqrt.f32 %v4909_v57  ;;  %v4780_v13 = vmul.f32 0.0078125, %v4529_v26  ;;  %v4167_v27 = vmul.f32 0.0078125, %v3952_v63  ;;  %v8617_v0 = vpop.f32.mrb[39].mxu0  ;;  %v4426_v51 = vmul.f32 %v11040_v36, %v11040_v36 }
 0x41a   : > { %v5569_v23 = vmax.f32 %v5439_v7, 0.0  ;;  %v5303_v33 = vmul.f32 %v10980_v16, %v5166_v52 }
 0x41b   : > { %v8853_v40 = vpop.eup %8852  ;;  %v4910_v28 = vadd.f32 1e-05, %v4780_v13  ;;  %v11051_v37 = vsub.f32 %v10629_v44, %v4167_v27 }
 0x41c   : > { %v7258_v45 = vpack.c.bf16 %v5569_v23, %v5568_v2  ;;  %v5167_v20 = vmul.f32 %v8853_v40, %v10591_v10  ;;  %4600 = vadd.xlane.f32.xlu0 %v4426_v51  ;;  %4023 = vadd.xlane.f32.xlu1 %v11042_v54  ;;  %v4531_v57 = vpop.xlane.xlu1 %4530  ;;  %v3954_v26 = vpop.xlane.xlu0 %3953  ;;  %v5440_v44 = vadd.f32 %v10992_v62, %v5303_v33  ;;  %v12280_v23 = vld [vmem:[#allocation5_spill] sm:$0xff] }
 0x41d   : > { %12278 = vst [vmem:[#allocation39_spill] sm:$0xff] %v11051_v37  ;;  %8858 = vrsqrt.f32 %v4910_v28  ;;  %v4781_v63 = vmul.f32 0.0078125, %v4531_v57  ;;  %v4168_v14 = vmul.f32 0.0078125, %v3954_v26  ;;  %v11055_v7 = vpop.f32.mrb[40].mxu0  ;;  %v4427_v52 = vmul.f32 %v11051_v37, %v11051_v37 }
 0x41e   : > { %7639 = vst [vmem:[%s11030_s21 + $0x8] sm:$0xff] %v7258_v45   ;;  %v5304_v13 = vmul.f32 %v10980_v16, %v5167_v20  ;;  %v8620_v27 = vpop.f32.mrb[41].mxu0 }
 0x41f   : > { %v8855_v10 = vpop.eup %8854  ;;  %v4911_v0 = vadd.f32 1e-05, %v4781_v63  ;;  %v11063_v51 = vsub.f32 %v10643_v12, %v4168_v14  ;;  %v11065_v2 = vpop.f32.mrb[42].mxu0  ;;  %v5570_v12 = vmax.f32 %v5440_v44, 0.0 }
 0x420   : > { %v5441_v28 = vadd.f32 %v10992_v62, %v5304_v13  ;;  %v5168_v40 = vmul.f32 %v8855_v10, %v12280_v23  ;;  %4602 = vadd.xlane.f32.xlu1 %v4427_v52  ;;  %4025 = vadd.xlane.f32.xlu0 %v11055_v7  ;;  %v4533_v45 = vpop.xlane.xlu0 %4532  ;;  %v3956_v57 = vpop.xlane.xlu1 %3955  ;;  %v12282_v23 = vld [vmem:[#allocation6_spill] sm:$0xff] }
 0x421   : > { %12279 = vst [vmem:[#allocation40_spill] sm:$0xff] %v11063_v51  ;;  %8860 = vrsqrt.f32 %v4911_v0  ;;  %v4782_v33 = vmul.f32 0.0078125, %v4533_v45  ;;  %v4169_v20 = vmul.f32 0.0078125, %v3956_v57  ;;  %v8621_v26 = vpop.f32.mrb[43].mxu0  ;;  %v4428_v63 = vmul.f32 %v11063_v51, %v11063_v51 }
 0x422   : > { %v5571_v14 = vmax.f32 %v5441_v28, 0.0  ;;  %v5305_v27 = vmul.f32 %v10980_v16, %v5168_v40 }
 0x423   : > { %v8857_v13 = vpop.eup %8856  ;;  %v4912_v37 = vadd.f32 1e-05, %v4782_v33  ;;  %v11074_v52 = vsub.f32 %v10651_v6, %v4169_v20 }
 0x424   : > { %v7263_v10 = vpack.c.bf16 %v5571_v14, %v5570_v12  ;;  %v5169_v36 = vmul.f32 %v8857_v13, %v12282_v23  ;;  %4604 = vadd.xlane.f32.xlu0 %v4428_v63  ;;  %4027 = vadd.xlane.f32.xlu1 %v11065_v2  ;;  %v4535_v0 = vpop.xlane.xlu1 %4534  ;;  %v3958_v45 = vpop.xlane.xlu0 %3957  ;;  %v5442_v6 = vadd.f32 %v10992_v62, %v5305_v27  ;;  %v12284_v13 = vld [vmem:[#allocation7_spill] sm:$0xff] }
 0x425   : > { %12281 = vst [vmem:[#allocation5_spill] sm:$0xff] %v11074_v52  ;;  %8862 = vrsqrt.f32 %v4912_v37  ;;  %v4783_v57 = vmul.f32 0.0078125, %v4535_v0  ;;  %v4170_v44 = vmul.f32 0.0078125, %v3958_v45  ;;  %v11078_v28 = vpop.f32.mrb[44].mxu0  ;;  %v4429_v40 = vmul.f32 %v11074_v52, %v11074_v52 }
 0x426   : > { %7640 = vst [vmem:[%s11030_s21 + $0x10] sm:$0xff] %v7263_v10   ;;  %v5306_v33 = vmul.f32 %v10980_v16, %v5169_v36  ;;  %v8624_v20 = vpop.f32.mrb[45].mxu0 }
 0x427   : > { %v8859_v26 = vpop.eup %8858  ;;  %v4913_v63 = vadd.f32 1e-05, %v4783_v57  ;;  %v11086_v12 = vsub.f32 %v10665_v18, %v4170_v44  ;;  %v11088_v14 = vpop.f32.mrb[46].mxu0  ;;  %v5572_v18 = vmax.f32 %v5442_v6, 0.0 }
 0x428   : > { %v5443_v37 = vadd.f32 %v10992_v62, %v5306_v33  ;;  %v5170_v23 = vmul.f32 %v8859_v26, %v12284_v13  ;;  %4606 = vadd.xlane.f32.xlu1 %v4429_v40  ;;  %4029 = vadd.xlane.f32.xlu0 %v11078_v28  ;;  %v4537_v10 = vpop.xlane.xlu0 %4536  ;;  %v3960_v0 = vpop.xlane.xlu1 %3959  ;;  %v12286_v13 = vld [vmem:[#allocation8_spill] sm:$0xff] }
 0x429   : > { %12283 = vst [vmem:[#allocation6_spill] sm:$0xff] %v11086_v12  ;;  %8864 = vrsqrt.f32 %v4913_v63  ;;  %v4784_v27 = vmul.f32 0.0078125, %v4537_v10  ;;  %v4171_v36 = vmul.f32 0.0078125, %v3960_v0  ;;  %v8625_v45 = vpop.f32.mrb[47].mxu0  ;;  %v4430_v57 = vmul.f32 %v11086_v12, %v11086_v12 }
 0x42a   : > { %v5573_v44 = vmax.f32 %v5443_v37, 0.0  ;;  %v5307_v20 = vmul.f32 %v10980_v16, %v5170_v23 }
 0x42b   : > { %v8861_v33 = vpop.eup %8860  ;;  %v4914_v52 = vadd.f32 1e-05, %v4784_v27  ;;  %v11097_v40 = vsub.f32 %v10673_v53, %v4171_v36 }
 0x42c   : > { %v7268_v26 = vpack.c.bf16 %v5573_v44, %v5572_v18  ;;  %v5171_v51 = vmul.f32 %v8861_v33, %v12286_v13  ;;  %4608 = vadd.xlane.f32.xlu0 %v4430_v57  ;;  %4031 = vadd.xlane.f32.xlu1 %v11088_v14  ;;  %v4539_v63 = vpop.xlane.xlu1 %4538  ;;  %v3962_v10 = vpop.xlane.xlu0 %3961  ;;  %v5444_v53 = vadd.f32 %v10992_v62, %v5307_v20  ;;  %v12288_v33 = vld [vmem:[#allocation9_spill] sm:$0xff] }
 0x42d   : > { %12285 = vst [vmem:[#allocation7_spill] sm:$0xff] %v11097_v40  ;;  %8866 = vrsqrt.f32 %v4914_v52  ;;  %v4785_v0 = vmul.f32 0.0078125, %v4539_v63  ;;  %v4172_v6 = vmul.f32 0.0078125, %v3962_v10  ;;  %v11101_v37 = vpop.f32.mrb[48].mxu0  ;;  %v4431_v23 = vmul.f32 %v11097_v40, %v11097_v40 }
 0x42e   : > { %7641 = vst [vmem:[%s11030_s21 + $0x18] sm:$0xff] %v7268_v26   ;;  %v5308_v27 = vmul.f32 %v10980_v16, %v5171_v51  ;;  %v8628_v36 = vpop.f32.mrb[49].mxu0 }
 0x42f   : > { %v8863_v45 = vpop.eup %8862  ;;  %v4915_v57 = vadd.f32 1e-05, %v4785_v0  ;;  %v11109_v18 = vsub.f32 %v10692_v60, %v4172_v6  ;;  %v11111_v44 = vpop.f32.mrb[50].mxu0  ;;  %v5574_v60 = vmax.f32 %v5444_v53, 0.0 }
 0x430   : > { %v5445_v52 = vadd.f32 %v10992_v62, %v5308_v27  ;;  %v5172_v13 = vmul.f32 %v8863_v45, %v12288_v33  ;;  %4610 = vadd.xlane.f32.xlu1 %v4431_v23  ;;  %4033 = vadd.xlane.f32.xlu0 %v11101_v37  ;;  %v4541_v26 = vpop.xlane.xlu0 %4540  ;;  %v3964_v63 = vpop.xlane.xlu1 %3963  ;;  %v12290_v33 = vld [vmem:[#allocation10_spill] sm:$0xff] }
 0x431   : > { %12287 = vst [vmem:[#allocation8_spill] sm:$0xff] %v11109_v18  ;;  %8868 = vrsqrt.f32 %v4915_v57  ;;  %v4786_v20 = vmul.f32 0.0078125, %v4541_v26  ;;  %v4173_v51 = vmul.f32 0.0078125, %v3964_v63  ;;  %v8629_v10 = vpop.f32.mrb[51].mxu0  ;;  %v4432_v0 = vmul.f32 %v11109_v18, %v11109_v18 }
 0x432   : > { %v5575_v6 = vmax.f32 %v5445_v52, 0.0  ;;  %v5309_v36 = vmul.f32 %v10980_v16, %v5172_v13 }
 0x433   : > { %v8865_v27 = vpop.eup %8864  ;;  %v4916_v40 = vadd.f32 1e-05, %v4786_v20  ;;  %v11120_v23 = vsub.f32 %v10700_v34, %v4173_v51 }
 0x434   : > { %v7273_v45 = vpack.c.bf16 %v5575_v6, %v5574_v60  ;;  %v5173_v12 = vmul.f32 %v8865_v27, %v12290_v33  ;;  %4612 = vadd.xlane.f32.xlu0 %v4432_v0  ;;  %4035 = vadd.xlane.f32.xlu1 %v11111_v44  ;;  %v4543_v57 = vpop.xlane.xlu1 %4542  ;;  %v3966_v26 = vpop.xlane.xlu0 %3965  ;;  %v5446_v34 = vadd.f32 %v10992_v62, %v5309_v36  ;;  %v12292_v27 = vld [vmem:[#allocation11_spill] sm:$0xff] }
 0x435   : > { %12289 = vst [vmem:[#allocation9_spill] sm:$0xff] %v11120_v23  ;;  %8870 = vrsqrt.f32 %v4916_v40  ;;  %v4787_v63 = vmul.f32 0.0078125, %v4543_v57  ;;  %v4174_v53 = vmul.f32 0.0078125, %v3966_v26  ;;  %v11124_v52 = vpop.f32.mrb[52].mxu0  ;;  %v4433_v13 = vmul.f32 %v11120_v23, %v11120_v23 }
 0x436   : > { %7642 = vst [vmem:[%s11030_s21 + $0x20] sm:$0xff] %v7273_v45   ;;  %v5310_v20 = vmul.f32 %v10980_v16, %v5173_v12  ;;  %v8632_v51 = vpop.f32.mrb[53].mxu0 }
 0x437   : > { %v8867_v10 = vpop.eup %8866  ;;  %v4917_v0 = vadd.f32 1e-05, %v4787_v63  ;;  %v11132_v60 = vsub.f32 %v10714_v41, %v4174_v53  ;;  %v11134_v6 = vpop.f32.mrb[54].mxu0  ;;  %v5576_v41 = vmax.f32 %v5446_v34, 0.0 }
 0x438   : > { %v5447_v40 = vadd.f32 %v10992_v62, %v5310_v20  ;;  %v5174_v33 = vmul.f32 %v8867_v10, %v12292_v27  ;;  %4614 = vadd.xlane.f32.xlu1 %v4433_v13  ;;  %4037 = vadd.xlane.f32.xlu0 %v11124_v52  ;;  %v4545_v45 = vpop.xlane.xlu0 %4544  ;;  %v3968_v57 = vpop.xlane.xlu1 %3967  ;;  %v12294_v27 = vld [vmem:[#allocation12_spill] sm:$0xff] }
 0x439   : > { %12291 = vst [vmem:[#allocation10_spill] sm:$0xff] %v11132_v60  ;;  %8872 = vrsqrt.f32 %v4917_v0  ;;  %v4788_v36 = vmul.f32 0.0078125, %v4545_v45  ;;  %v4175_v12 = vmul.f32 0.0078125, %v3968_v57  ;;  %v8633_v26 = vpop.f32.mrb[55].mxu0  ;;  %v4434_v63 = vmul.f32 %v11132_v60, %v11132_v60 }
 0x43a   : > { %v5577_v53 = vmax.f32 %v5447_v40, 0.0  ;;  %v5311_v51 = vmul.f32 %v10980_v16, %v5174_v33 }
 0x43b   : > { %v8869_v20 = vpop.eup %8868  ;;  %v4918_v23 = vadd.f32 1e-05, %v4788_v36  ;;  %v11143_v13 = vsub.f32 %v10722_v4, %v4175_v12 }
 0x43c   : > { %v7278_v10 = vpack.c.bf16 %v5577_v53, %v5576_v41  ;;  %v5175_v18 = vmul.f32 %v8869_v20, %v12294_v27  ;;  %4616 = vadd.xlane.f32.xlu0 %v4434_v63  ;;  %4039 = vadd.xlane.f32.xlu1 %v11134_v6  ;;  %v4547_v0 = vpop.xlane.xlu1 %4546  ;;  %v3970_v45 = vpop.xlane.xlu0 %3969  ;;  %v5448_v4 = vadd.f32 %v10992_v62, %v5311_v51  ;;  %v12296_v20 = vld [vmem:[#allocation13_spill] sm:$0xff] }
 0x43d   : > { %12293 = vst [vmem:[#allocation11_spill] sm:$0xff] %v11143_v13  ;;  %8874 = vrsqrt.f32 %v4918_v23  ;;  %v4789_v57 = vmul.f32 0.0078125, %v4547_v0  ;;  %v4176_v34 = vmul.f32 0.0078125, %v3970_v45  ;;  %v11147_v40 = vpop.f32.mrb[56].mxu0  ;;  %v4435_v33 = vmul.f32 %v11143_v13, %v11143_v13 }
 0x43e   : > { %7643 = vst [vmem:[%s11030_s21 + $0x28] sm:$0xff] %v7278_v10   ;;  %v5312_v36 = vmul.f32 %v10980_v16, %v5175_v18  ;;  %v8636_v12 = vpop.f32.mrb[57].mxu0 }
 0x43f   : > { %v8871_v26 = vpop.eup %8870  ;;  %v4919_v63 = vadd.f32 1e-05, %v4789_v57  ;;  %v11155_v41 = vsub.f32 %v10736_v15, %v4176_v34  ;;  %v11157_v53 = vpop.f32.mrb[58].mxu0  ;;  %v5578_v15 = vmax.f32 %v5448_v4, 0.0 }
 0x440   : > { %v5449_v23 = vadd.f32 %v10992_v62, %v5312_v36  ;;  %v5176_v27 = vmul.f32 %v8871_v26, %v12296_v20  ;;  %4618 = vadd.xlane.f32.xlu1 %v4435_v33  ;;  %4041 = vadd.xlane.f32.xlu0 %v11147_v40  ;;  %v4549_v10 = vpop.xlane.xlu0 %4548  ;;  %v3972_v0 = vpop.xlane.xlu1 %3971  ;;  %v12298_v20 = vld [vmem:[#allocation14_spill] sm:$0xff] }
 0x441   : > { %12295 = vst [vmem:[#allocation12_spill] sm:$0xff] %v11155_v41  ;;  %8876 = vrsqrt.f32 %v4919_v63  ;;  %v4790_v51 = vmul.f32 0.0078125, %v4549_v10  ;;  %v4177_v18 = vmul.f32 0.0078125, %v3972_v0  ;;  %v8637_v45 = vpop.f32.mrb[59].mxu0  ;;  %v4436_v57 = vmul.f32 %v11155_v41, %v11155_v41 }
 0x442   : > { %v5579_v34 = vmax.f32 %v5449_v23, 0.0  ;;  %v5313_v12 = vmul.f32 %v10980_v16, %v5176_v27 }
 0x443   : > { %v8873_v36 = vpop.eup %8872  ;;  %v4920_v13 = vadd.f32 1e-05, %v4790_v51  ;;  %v11166_v33 = vsub.f32 %v10744_v43, %v4177_v18 }
 0x444   : > { %v7283_v26 = vpack.c.bf16 %v5579_v34, %v5578_v15  ;;  %v5177_v60 = vmul.f32 %v8873_v36, %v12298_v20  ;;  %4620 = vadd.xlane.f32.xlu0 %v4436_v57  ;;  %4043 = vadd.xlane.f32.xlu1 %v11157_v53  ;;  %v4551_v63 = vpop.xlane.xlu1 %4550  ;;  %v3974_v10 = vpop.xlane.xlu0 %3973  ;;  %v5450_v43 = vadd.f32 %v10992_v62, %v5313_v12  ;;  %v12300_v36 = vld [vmem:[#allocation15_spill] sm:$0xff] }
 0x445   : > { %12297 = vst [vmem:[#allocation13_spill] sm:$0xff] %v11166_v33  ;;  %8878 = vrsqrt.f32 %v4920_v13  ;;  %v4791_v0 = vmul.f32 0.0078125, %v4551_v63  ;;  %v4178_v4 = vmul.f32 0.0078125, %v3974_v10  ;;  %v11170_v23 = vpop.f32.mrb[60].mxu0  ;;  %v4437_v27 = vmul.f32 %v11166_v33, %v11166_v33 }
 0x446   : > { %7644 = vst [vmem:[%s11030_s21 + $0x30] sm:$0xff] %v7283_v26   ;;  %v5314_v51 = vmul.f32 %v10980_v16, %v5177_v60  ;;  %v8640_v18 = vpop.f32.mrb[61].mxu0 }
 0x447   : > { %v8875_v45 = vpop.eup %8874  ;;  %v4921_v57 = vadd.f32 1e-05, %v4791_v0  ;;  %v11178_v15 = vsub.f32 %v10758_v50, %v4178_v4  ;;  %v11180_v34 = vpop.f32.mrb[62].mxu0  ;;  %v5580_v50 = vmax.f32 %v5450_v43, 0.0 }
 0x448   : > { %v5451_v13 = vadd.f32 %v10992_v62, %v5314_v51  ;;  %v5178_v20 = vmul.f32 %v8875_v45, %v12300_v36  ;;  %4622 = vadd.xlane.f32.xlu1 %v4437_v27  ;;  %4045 = vadd.xlane.f32.xlu0 %v11170_v23  ;;  %v4553_v26 = vpop.xlane.xlu0 %4552  ;;  %v3976_v63 = vpop.xlane.xlu1 %3975  ;;  %v12302_v36 = vld [vmem:[#allocation16_spill] sm:$0xff] }
 0x449   : > { %12299 = vst [vmem:[#allocation14_spill] sm:$0xff] %v11178_v15  ;;  %8880 = vrsqrt.f32 %v4921_v57  ;;  %v4792_v12 = vmul.f32 0.0078125, %v4553_v26  ;;  %v4179_v60 = vmul.f32 0.0078125, %v3976_v63  ;;  %v8641_v10 = vpop.f32.mrb[63].mxu0  ;;  %v4438_v0 = vmul.f32 %v11178_v15, %v11178_v15 }
 0x44a   : > { %v5581_v4 = vmax.f32 %v5451_v13, 0.0  ;;  %v5315_v18 = vmul.f32 %v10980_v16, %v5178_v20 }
 0x44b   : > { %v8877_v51 = vpop.eup %8876  ;;  %v4922_v33 = vadd.f32 1e-05, %v4792_v12  ;;  %v11189_v27 = vsub.f32 %v10766_v17, %v4179_v60 }
 0x44c   : > { %v7288_v45 = vpack.c.bf16 %v5581_v4, %v5580_v50  ;;  %v5179_v41 = vmul.f32 %v8877_v51, %v12302_v36  ;;  %4624 = vadd.xlane.f32.xlu0 %v4438_v0  ;;  %4047 = vadd.xlane.f32.xlu1 %v11180_v34  ;;  %v4555_v57 = vpop.xlane.xlu1 %4554  ;;  %v3978_v26 = vpop.xlane.xlu0 %3977  ;;  %v5452_v17 = vadd.f32 %v10992_v62, %v5315_v18  ;;  %v12304_v51 = vld [vmem:[#allocation17_spill] sm:$0xff] }
 0x44d   : > { %12301 = vst [vmem:[#allocation15_spill] sm:$0xff] %v11189_v27  ;;  %8882 = vrsqrt.f32 %v4922_v33  ;;  %v4793_v63 = vmul.f32 0.0078125, %v4555_v57  ;;  %v4180_v43 = vmul.f32 0.0078125, %v3978_v26  ;;  %v11193_v13 = vpop.f32.mrb[64].mxu0  ;;  %v4439_v20 = vmul.f32 %v11189_v27, %v11189_v27 }
 0x44e   : > { %7645 = vst [vmem:[%s11030_s21 + $0x38] sm:$0xff] %v7288_v45   ;;  %v5316_v12 = vmul.f32 %v10980_v16, %v5179_v41  ;;  %v8644_v60 = vpop.f32.mrb[65].mxu0 }
 0x44f   : > { %v8879_v10 = vpop.eup %8878  ;;  %v4923_v0 = vadd.f32 1e-05, %v4793_v63  ;;  %v11201_v50 = vsub.f32 %v10780_v25, %v4180_v43  ;;  %v11203_v4 = vpop.f32.mrb[66].mxu0  ;;  %v5582_v25 = vmax.f32 %v5452_v17, 0.0 }
 0x450   : > { %v5453_v33 = vadd.f32 %v10992_v62, %v5316_v12  ;;  %v5180_v36 = vmul.f32 %v8879_v10, %v12304_v51  ;;  %4626 = vadd.xlane.f32.xlu1 %v4439_v20  ;;  %4049 = vadd.xlane.f32.xlu0 %v11193_v13  ;;  %v4557_v45 = vpop.xlane.xlu0 %4556  ;;  %v3980_v57 = vpop.xlane.xlu1 %3979  ;;  %v12306_v51 = vld [vmem:[#allocation18_spill] sm:$0xff] }
 0x451   : > { %12303 = vst [vmem:[#allocation16_spill] sm:$0xff] %v11201_v50  ;;  %8884 = vrsqrt.f32 %v4923_v0  ;;  %v4794_v18 = vmul.f32 0.0078125, %v4557_v45  ;;  %v4181_v41 = vmul.f32 0.0078125, %v3980_v57  ;;  %v8645_v26 = vpop.f32.mrb[67].mxu0  ;;  %v4440_v63 = vmul.f32 %v11201_v50, %v11201_v50 }
 0x452   : > { %v5583_v43 = vmax.f32 %v5453_v33, 0.0  ;;  %v5317_v60 = vmul.f32 %v10980_v16, %v5180_v36 }
 0x453   : > { %v8881_v12 = vpop.eup %8880  ;;  %v4924_v27 = vadd.f32 1e-05, %v4794_v18  ;;  %v11212_v20 = vsub.f32 %v10788_v61, %v4181_v41 }
 0x454   : > { %v7293_v10 = vpack.c.bf16 %v5583_v43, %v5582_v25  ;;  %v5181_v15 = vmul.f32 %v8881_v12, %v12306_v51  ;;  %4628 = vadd.xlane.f32.xlu0 %v4440_v63  ;;  %4051 = vadd.xlane.f32.xlu1 %v11203_v4  ;;  %v4559_v0 = vpop.xlane.xlu1 %4558  ;;  %v3982_v45 = vpop.xlane.xlu0 %3981  ;;  %v5454_v61 = vadd.f32 %v10992_v62, %v5317_v60  ;;  %v12308_v12 = vld [vmem:[#allocation19_spill] sm:$0xff] }
 0x455   : > { %12305 = vst [vmem:[#allocation17_spill] sm:$0xff] %v11212_v20  ;;  %8886 = vrsqrt.f32 %v4924_v27  ;;  %v4795_v57 = vmul.f32 0.0078125, %v4559_v0  ;;  %v4182_v17 = vmul.f32 0.0078125, %v3982_v45  ;;  %v11216_v33 = vpop.f32.mrb[68].mxu0  ;;  %v4441_v36 = vmul.f32 %v11212_v20, %v11212_v20 }
 0x456   : > { %7646 = vst [vmem:[%s11030_s21 + $0x40] sm:$0xff] %v7293_v10   ;;  %v5318_v18 = vmul.f32 %v10980_v16, %v5181_v15  ;;  %v8648_v41 = vpop.f32.mrb[69].mxu0 }
 0x457   : > { %v8883_v26 = vpop.eup %8882  ;;  %v4925_v63 = vadd.f32 1e-05, %v4795_v57  ;;  %v11224_v25 = vsub.f32 %v10802_v56, %v4182_v17  ;;  %v11226_v43 = vpop.f32.mrb[70].mxu0  ;;  %v5584_v56 = vmax.f32 %v5454_v61, 0.0 }
 0x458   : > { %v5455_v27 = vadd.f32 %v10992_v62, %v5318_v18  ;;  %v5182_v51 = vmul.f32 %v8883_v26, %v12308_v12  ;;  %4630 = vadd.xlane.f32.xlu1 %v4441_v36  ;;  %4053 = vadd.xlane.f32.xlu0 %v11216_v33  ;;  %v4561_v10 = vpop.xlane.xlu0 %4560  ;;  %v3984_v0 = vpop.xlane.xlu1 %3983  ;;  %v12310_v12 = vld [vmem:[#allocation20_spill] sm:$0xff] }
 0x459   : > { %12307 = vst [vmem:[#allocation18_spill] sm:$0xff] %v11224_v25  ;;  %8888 = vrsqrt.f32 %v4925_v63  ;;  %v4796_v60 = vmul.f32 0.0078125, %v4561_v10  ;;  %v4183_v15 = vmul.f32 0.0078125, %v3984_v0  ;;  %v8649_v45 = vpop.f32.mrb[71].mxu0  ;;  %v4442_v57 = vmul.f32 %v11224_v25, %v11224_v25 }
 0x45a   : > { %v5585_v17 = vmax.f32 %v5455_v27, 0.0  ;;  %v5319_v41 = vmul.f32 %v10980_v16, %v5182_v51 }
 0x45b   : > { %v8885_v18 = vpop.eup %8884  ;;  %v4926_v20 = vadd.f32 1e-05, %v4796_v60  ;;  %v11235_v36 = vsub.f32 %v10810_v21, %v4183_v15 }
 0x45c   : > { %v7298_v26 = vpack.c.bf16 %v5585_v17, %v5584_v56  ;;  %v5183_v50 = vmul.f32 %v8885_v18, %v12310_v12  ;;  %4632 = vadd.xlane.f32.xlu0 %v4442_v57  ;;  %4055 = vadd.xlane.f32.xlu1 %v11226_v43  ;;  %v4563_v63 = vpop.xlane.xlu1 %4562  ;;  %v3986_v10 = vpop.xlane.xlu0 %3985  ;;  %v5456_v21 = vadd.f32 %v10992_v62, %v5319_v41  ;;  %v12312_v18 = vld [vmem:[#allocation21_spill] sm:$0xff] }
 0x45d   : > { %12309 = vst [vmem:[#allocation19_spill] sm:$0xff] %v11235_v36  ;;  %8890 = vrsqrt.f32 %v4926_v20  ;;  %v4797_v0 = vmul.f32 0.0078125, %v4563_v63  ;;  %v4184_v61 = vmul.f32 0.0078125, %v3986_v10  ;;  %v11239_v27 = vpop.f32.mrb[72].mxu0  ;;  %v4443_v51 = vmul.f32 %v11235_v36, %v11235_v36 }
 0x45e   : > { %7647 = vst [vmem:[%s11030_s21 + $0x48] sm:$0xff] %v7298_v26   ;;  %v5320_v60 = vmul.f32 %v10980_v16, %v5183_v50  ;;  %v8652_v15 = vpop.f32.mrb[73].mxu0 }
 0x45f   : > { %v8887_v45 = vpop.eup %8886  ;;  %v4927_v57 = vadd.f32 1e-05, %v4797_v0  ;;  %v11247_v56 = vsub.f32 %v10824_v30, %v4184_v61  ;;  %v11249_v17 = vpop.f32.mrb[74].mxu0  ;;  %v5586_v30 = vmax.f32 %v5456_v21, 0.0 }
 0x460   : > { %v5457_v20 = vadd.f32 %v10992_v62, %v5320_v60  ;;  %v5184_v12 = vmul.f32 %v8887_v45, %v12312_v18  ;;  %4634 = vadd.xlane.f32.xlu1 %v4443_v51  ;;  %4057 = vadd.xlane.f32.xlu0 %v11239_v27  ;;  %v4565_v26 = vpop.xlane.xlu0 %4564  ;;  %v3988_v63 = vpop.xlane.xlu1 %3987  ;;  %v12314_v18 = vld [vmem:[#allocation22_spill] sm:$0xff] }
 0x461   : > { %12311 = vst [vmem:[#allocation20_spill] sm:$0xff] %v11247_v56  ;;  %8892 = vrsqrt.f32 %v4927_v57  ;;  %v4798_v41 = vmul.f32 0.0078125, %v4565_v26  ;;  %v4185_v50 = vmul.f32 0.0078125, %v3988_v63  ;;  %v8653_v10 = vpop.f32.mrb[75].mxu0  ;;  %v4444_v0 = vmul.f32 %v11247_v56, %v11247_v56 }
 0x462   : > { %v5587_v61 = vmax.f32 %v5457_v20, 0.0  ;;  %v5321_v15 = vmul.f32 %v10980_v16, %v5184_v12 }
 0x463   : > { %v8889_v60 = vpop.eup %8888  ;;  %v4928_v36 = vadd.f32 1e-05, %v4798_v41  ;;  %v11258_v51 = vsub.f32 %v10832_v59, %v4185_v50 }
 0x464   : > { %v7303_v45 = vpack.c.bf16 %v5587_v61, %v5586_v30  ;;  %v5185_v25 = vmul.f32 %v8889_v60, %v12314_v18  ;;  %4636 = vadd.xlane.f32.xlu0 %v4444_v0  ;;  %4059 = vadd.xlane.f32.xlu1 %v11249_v17  ;;  %v4567_v57 = vpop.xlane.xlu1 %4566  ;;  %v3990_v26 = vpop.xlane.xlu0 %3989  ;;  %v5458_v59 = vadd.f32 %v10992_v62, %v5321_v15  ;;  %v12315_v60 = vld [vmem:[#allocation23_spill] sm:$0xff] }
 0x465   : > { %12313 = vst [vmem:[#allocation21_spill] sm:$0xff] %v11258_v51  ;;  %8894 = vrsqrt.f32 %v4928_v36  ;;  %v4799_v63 = vmul.f32 0.0078125, %v4567_v57  ;;  %v4186_v21 = vmul.f32 0.0078125, %v3990_v26  ;;  %v11262_v20 = vpop.f32.mrb[76].mxu0  ;;  %v4445_v12 = vmul.f32 %v11258_v51, %v11258_v51 }
 0x466   : > { %7648 = vst [vmem:[%s11030_s21 + $0x50] sm:$0xff] %v7303_v45   ;;  %v5322_v41 = vmul.f32 %v10980_v16, %v5185_v25  ;;  %v8656_v50 = vpop.f32.mrb[77].mxu0 }
 0x467   : > { %v8891_v10 = vpop.eup %8890  ;;  %v4929_v0 = vadd.f32 1e-05, %v4799_v63  ;;  %v11270_v30 = vsub.f32 %v10846_v48, %v4186_v21  ;;  %v11272_v61 = vpop.f32.mrb[78].mxu0  ;;  %v5588_v48 = vmax.f32 %v5458_v59, 0.0 }
 0x468   : > { %v5459_v36 = vadd.f32 %v10992_v62, %v5322_v41  ;;  %v5186_v18 = vmul.f32 %v8891_v10, %v12315_v60  ;;  %4638 = vadd.xlane.f32.xlu1 %v4445_v12  ;;  %4061 = vadd.xlane.f32.xlu0 %v11262_v20  ;;  %v4569_v45 = vpop.xlane.xlu0 %4568  ;;  %v3992_v57 = vpop.xlane.xlu1 %3991  ;;  %v12317_v60 = vld [vmem:[#allocation24_spill] sm:$0xff] }
 0x469   : > { %8896 = vrsqrt.f32 %v4929_v0  ;;  %v4800_v15 = vmul.f32 0.0078125, %v4569_v45  ;;  %v4187_v25 = vmul.f32 0.0078125, %v3992_v57  ;;  %v8657_v26 = vpop.f32.mrb[79].mxu0  ;;  %v4446_v63 = vmul.f32 %v11270_v30, %v11270_v30 }
 0x46a   : > { %v5589_v21 = vmax.f32 %v5459_v36, 0.0  ;;  %v5323_v50 = vmul.f32 %v10980_v16, %v5186_v18 }
 0x46b   : > { %v8893_v41 = vpop.eup %8892  ;;  %v4930_v51 = vadd.f32 1e-05, %v4800_v15  ;;  %v11281_v12 = vsub.f32 %v10854_v55, %v4187_v25 }
 0x46c   : > { %v7308_v10 = vpack.c.bf16 %v5589_v21, %v5588_v48  ;;  %v5187_v56 = vmul.f32 %v8893_v41, %v12317_v60  ;;  %4640 = vadd.xlane.f32.xlu0 %v4446_v63  ;;  %4063 = vadd.xlane.f32.xlu1 %v11272_v61  ;;  %v4571_v0 = vpop.xlane.xlu1 %4570  ;;  %v3994_v45 = vpop.xlane.xlu0 %3993  ;;  %v5460_v55 = vadd.f32 %v10992_v62, %v5323_v50  ;;  %v12319_v41 = vld [vmem:[#allocation25_spill] sm:$0xff] }
 0x46d   : > { %12316 = vst [vmem:[#allocation22_spill] sm:$0xff] %v11281_v12  ;;  %8898 = vrsqrt.f32 %v4930_v51  ;;  %v4801_v57 = vmul.f32 0.0078125, %v4571_v0  ;;  %v4188_v59 = vmul.f32 0.0078125, %v3994_v45  ;;  %v11285_v36 = vpop.f32.mrb[80].mxu0  ;;  %v4447_v18 = vmul.f32 %v11281_v12, %v11281_v12 }
 0x46e   : > { %7649 = vst [vmem:[%s11030_s21 + $0x58] sm:$0xff] %v7308_v10   ;;  %v5324_v15 = vmul.f32 %v10980_v16, %v5187_v56  ;;  %v8660_v25 = vpop.f32.mrb[81].mxu0 }
 0x46f   : > { %v8895_v26 = vpop.eup %8894  ;;  %v4931_v63 = vadd.f32 1e-05, %v4801_v57  ;;  %v11293_v48 = vsub.f32 %v10868_v39, %v4188_v59  ;;  %v11295_v21 = vpop.f32.mrb[82].mxu0  ;;  %v5590_v39 = vmax.f32 %v5460_v55, 0.0 }
 0x470   : > { %v5461_v51 = vadd.f32 %v10992_v62, %v5324_v15  ;;  %v5188_v60 = vmul.f32 %v8895_v26, %v12319_v41  ;;  %4642 = vadd.xlane.f32.xlu1 %v4447_v18  ;;  %4065 = vadd.xlane.f32.xlu0 %v11285_v36  ;;  %v4573_v10 = vpop.xlane.xlu0 %4572  ;;  %v3996_v0 = vpop.xlane.xlu1 %3995 }
 0x471   : > { %12318 = vst [vmem:[#allocation23_spill] sm:$0xff] %v11293_v48  ;;  %8900 = vrsqrt.f32 %v4931_v63  ;;  %v4802_v50 = vmul.f32 0.0078125, %v4573_v10  ;;  %v4189_v56 = vmul.f32 0.0078125, %v3996_v0  ;;  %v8661_v45 = vpop.f32.mrb[83].mxu0  ;;  %v4448_v57 = vmul.f32 %v11293_v48, %v11293_v48  ;;  %v12330_v48 = vld [vmem:[#allocation29_spill] sm:$0xff] }
 0x472   : > { %v5591_v59 = vmax.f32 %v5461_v51, 0.0  ;;  %v5325_v25 = vmul.f32 %v10980_v16, %v5188_v60 }
 0x473   : > { %v8897_v15 = vpop.eup %8896  ;;  %v4932_v12 = vadd.f32 1e-05, %v4802_v50  ;;  %v11304_v18 = vsub.f32 %v10876_v9, %v4189_v56 }
 0x474   : > { %v7313_v26 = vpack.c.bf16 %v5591_v59, %v5590_v39  ;;  %v5189_v41 = vmul.f32 %v8897_v15, %v10838_v11  ;;  %4644 = vadd.xlane.f32.xlu0 %v4448_v57  ;;  %4067 = vadd.xlane.f32.xlu1 %v11295_v21  ;;  %v4575_v63 = vpop.xlane.xlu1 %4574  ;;  %v3998_v10 = vpop.xlane.xlu0 %3997  ;;  %v5462_v9 = vadd.f32 %v10992_v62, %v5325_v25  ;;  %v12322_v59 = vld [vmem:[#allocation26_spill] sm:$0xff] }
 0x475   : > { %12320 = vst [vmem:[#allocation24_spill] sm:$0xff] %v11304_v18  ;;  %8902 = vrsqrt.f32 %v4932_v12  ;;  %v4803_v0 = vmul.f32 0.0078125, %v4575_v63  ;;  %v4190_v55 = vmul.f32 0.0078125, %v3998_v10  ;;  %v11308_v51 = vpop.f32.mrb[84].mxu0  ;;  %v4449_v60 = vmul.f32 %v11304_v18, %v11304_v18 }
 0x476   : > { %7650 = vst [vmem:[%s11030_s21 + $0x60] sm:$0xff] %v7313_v26   ;;  %v5326_v50 = vmul.f32 %v10980_v16, %v5189_v41  ;;  %v8664_v56 = vpop.f32.mrb[85].mxu0 }
 0x477   : > { %v8899_v11 = vpop.eup %8898  ;;  %v4933_v45 = vadd.f32 1e-05, %v4803_v0  ;;  %v11316_v57 = vsub.f32 %v10890_v24, %v4190_v55  ;;  %v11318_v39 = vpop.f32.mrb[86].mxu0  ;;  %v5592_v24 = vmax.f32 %v5462_v9, 0.0 }
 0x478   : > { %v5463_v12 = vadd.f32 %v10992_v62, %v5326_v50  ;;  %v5190_v15 = vmul.f32 %v8899_v11, %v12322_v59  ;;  %4646 = vadd.xlane.f32.xlu1 %v4449_v60  ;;  %4069 = vadd.xlane.f32.xlu0 %v11308_v51  ;;  %v4577_v26 = vpop.xlane.xlu0 %4576  ;;  %v4000_v63 = vpop.xlane.xlu1 %3999  ;;  %v11328_v62 = vld [vmem:[%s12160_s7] ss:$0 sm:$0xff] }
 0x479   : > { %12321 = vst [vmem:[#allocation25_spill] sm:$0xff] %v11316_v57  ;;  %8904 = vrsqrt.f32 %v4933_v45  ;;  %v4804_v25 = vmul.f32 0.0078125, %v4577_v26  ;;  %v4191_v16 = vmul.f32 0.0078125, %v4000_v63  ;;  %v8665_v41 = vpop.f32.mrb[87].mxu0  ;;  %v4450_v10 = vmul.f32 %v11316_v57, %v11316_v57  ;;  %v12324_v45 = vld [vmem:[#allocation27_spill] sm:$0xff] }
 0x47a   : > { %v5593_v0 = vmax.f32 %v5463_v12, 0.0  ;;  %v5327_v55 = vmul.f32 %v11328_v62, %v5190_v15 }
 0x47b   : > { %v8901_v60 = vpop.eup %8900  ;;  %v4934_v50 = vadd.f32 1e-05, %v4804_v25  ;;  %v11332_v56 = vsub.f32 %v10898_v29, %v4191_v16  ;;  %v11344_v29 = vld [vmem:[%s12161_s8] ss:$0 sm:$0xff] }
 0x47c   : > { %v7318_v11 = vpack.c.bf16 %v5593_v0, %v5592_v24  ;;  %v5191_v59 = vmul.f32 %v8901_v60, %v12324_v45  ;;  %4648 = vadd.xlane.f32.xlu0 %v4450_v10  ;;  %4071 = vadd.xlane.f32.xlu1 %v11318_v39  ;;  %v4579_v9 = vpop.xlane.xlu1 %4578  ;;  %v4002_v12 = vpop.xlane.xlu0 %4001  ;;  %v5464_v25 = vadd.f32 %v11344_v29, %v5327_v55 }
 0x47d   : > { %12323 = vst [vmem:[#allocation26_spill] sm:$0xff] %v11332_v56  ;;  %8906 = vrsqrt.f32 %v4934_v50  ;;  %v4805_v26 = vmul.f32 0.0078125, %v4579_v9  ;;  %v4192_v63 = vmul.f32 0.0078125, %v4002_v12  ;;  %v11336_v41 = vpop.f32.mrb[88].mxu0  ;;  %v4451_v15 = vmul.f32 %v11332_v56, %v11332_v56 }
 0x47e   : > { %12325 = vst [vmem:[#allocation27_spill] sm:$0xff] %v11336_v41  ;;  %7651 = vst [vmem:[%s11030_s21 + $0x68] sm:$0xff] %v7318_v11   ;;  %v5328_v16 = vmul.f32 %v11328_v62, %v5191_v59  ;;  %v8668_v10 = vpop.f32.mrb[89].mxu0  ;;  %v12327_v11 = vld [vmem:[#allocation28_spill] sm:$0xff] }
 0x47f   : > { %v8903_v24 = vpop.eup %8902  ;;  %v4935_v0 = vadd.f32 1e-05, %v4805_v26  ;;  %v11349_v60 = vsub.f32 %v10912_v58, %v4192_v63  ;;  %v11351_v50 = vpop.f32.mrb[90].mxu0  ;;  %v5594_v58 = vmax.f32 %v5464_v25, 0.0 }
 0x480   : > { %v5465_v45 = vadd.f32 %v11344_v29, %v5328_v16  ;;  %v5192_v9 = vmul.f32 %v8903_v24, %v12327_v11  ;;  %4650 = vadd.xlane.f32.xlu1 %v4451_v15  ;;  %4073 = vadd.xlane.f32.xlu0 %v11336_v41  ;;  %v4581_v12 = vpop.xlane.xlu0 %4580  ;;  %v4004_v56 = vpop.xlane.xlu1 %4003  ;;  %v12328_v24 = vld [vmem:[#allocation33_spill] sm:$0xff] }
 0x481   : > { %12326 = vst [vmem:[#allocation41_spill] sm:$0xff] %v11349_v60  ;;  %8908 = vrsqrt.f32 %v4935_v0  ;;  %v4806_v55 = vmul.f32 0.0078125, %v4581_v12  ;;  %v4193_v59 = vmul.f32 0.0078125, %v4004_v56  ;;  %v8669_v10 = vpop.f32.mrb[91].mxu0  ;;  %v4452_v26 = vmul.f32 %v11349_v60, %v11349_v60 }
 0x482   : > { %v5595_v63 = vmax.f32 %v5465_v45, 0.0  ;;  %v5329_v57 = vmul.f32 %v11328_v62, %v5192_v9 }
 0x483   : > { %v8905_v16 = vpop.eup %8904  ;;  %v4936_v18 = vadd.f32 1e-05, %v4806_v55  ;;  %v11360_v15 = vsub.f32 %v12328_v24, %v4193_v59 }
 0x484   : > { %v7323_v11 = vpack.c.bf16 %v5595_v63, %v5594_v58  ;;  %v5193_v41 = vmul.f32 %v8905_v16, %v12330_v48  ;;  %4652 = vadd.xlane.f32.xlu0 %v4452_v26  ;;  %4075 = vadd.xlane.f32.xlu1 %v11351_v50  ;;  %v4583_v56 = vpop.xlane.xlu1 %4582  ;;  %v4006_v0 = vpop.xlane.xlu0 %4005  ;;  %v5466_v55 = vadd.f32 %v11344_v29, %v5329_v57  ;;  %v12332_v16 = vld [vmem:[#allocation30_spill] sm:$0xff] }
 0x485   : > { %12329 = vst [vmem:[#allocation28_spill] sm:$0xff] %v11360_v15  ;;  %8910 = vrsqrt.f32 %v4936_v18  ;;  %v4807_v12 = vmul.f32 0.0078125, %v4583_v56  ;;  %v4194_v25 = vmul.f32 0.0078125, %v4006_v0  ;;  %v11364_v45 = vpop.f32.mrb[92].mxu0  ;;  %v4453_v9 = vmul.f32 %v11360_v15, %v11360_v15 }
 0x486   : > { %7652 = vst [vmem:[%s11030_s21 + $0x70] sm:$0xff] %v7323_v11   ;;  %v5330_v59 = vmul.f32 %v11328_v62, %v5193_v41  ;;  %v8672_v10 = vpop.f32.mrb[93].mxu0 }
 0x487   : > { %v8907_v48 = vpop.eup %8906  ;;  %v4937_v26 = vadd.f32 1e-05, %v4807_v12  ;;  %v11372_v58 = vsub.f32 %v10934_v19, %v4194_v25  ;;  %v11374_v63 = vpop.f32.mrb[94].mxu0  ;;  %v5596_v19 = vmax.f32 %v5466_v55, 0.0 }
 0x488   : > { %v5467_v18 = vadd.f32 %v11344_v29, %v5330_v59  ;;  %v5194_v24 = vmul.f32 %v8907_v48, %v12332_v16  ;;  %4654 = vadd.xlane.f32.xlu1 %v4453_v9  ;;  %4077 = vadd.xlane.f32.xlu0 %v11364_v45  ;;  %v4585_v11 = vpop.xlane.xlu0 %4584  ;;  %v4008_v56 = vpop.xlane.xlu1 %4007  ;;  %v12334_v16 = vld [vmem:[#allocation31_spill] sm:$0xff] }
 0x489   : > { %12331 = vst [vmem:[#allocation33_spill] sm:$0xff] %v11372_v58  ;;  %8912 = vrsqrt.f32 %v4937_v26  ;;  %v4808_v57 = vmul.f32 0.0078125, %v4585_v11  ;;  %v4195_v41 = vmul.f32 0.0078125, %v4008_v56  ;;  %v8673_v0 = vpop.f32.mrb[95].mxu0  ;;  %v4454_v12 = vmul.f32 %v11372_v58, %v11372_v58 }
 0x48a   : > { %v5597_v25 = vmax.f32 %v5467_v18, 0.0  ;;  %v5331_v10 = vmul.f32 %v11328_v62, %v5194_v24 }
 0x48b   : > { %v8909_v59 = vpop.eup %8908  ;;  %v4938_v15 = vadd.f32 1e-05, %v4808_v57  ;;  %v11383_v9 = vsub.f32 %v10942_v1, %v4195_v41 }
 0x48c   : > { %v7328_v48 = vpack.c.bf16 %v5597_v25, %v5596_v19  ;;  %v5195_v60 = vmul.f32 %v8909_v59, %v12334_v16  ;;  %4656 = vadd.xlane.f32.xlu0 %v4454_v12  ;;  %4079 = vadd.xlane.f32.xlu1 %v11374_v63  ;;  %v4587_v26 = vpop.xlane.xlu1 %4586  ;;  %v4010_v11 = vpop.xlane.xlu0 %4009  ;;  %v5468_v1 = vadd.f32 %v11344_v29, %v5331_v10  ;;  %v12335_v59 = vld [vmem:[#allocation32_spill] sm:$0xff] }
 0x48d   : > { %12333 = vst [vmem:[#allocation29_spill] sm:$0xff] %v11383_v9  ;;  %8914 = vrsqrt.f32 %v4938_v15  ;;  %v4809_v56 = vmul.f32 0.0078125, %v4587_v26  ;;  %v4196_v55 = vmul.f32 0.0078125, %v4010_v11  ;;  %v11387_v18 = vpop.f32.mrb[96].mxu0  ;;  %v4455_v24 = vmul.f32 %v11383_v9, %v11383_v9 }
 0x48e   : > { %7653 = vst [vmem:[%s11030_s21 + $0x78] sm:$0xff] %v7328_v48   ;;  %v5332_v57 = vmul.f32 %v11328_v62, %v5195_v60  ;;  %v8676_v41 = vpop.f32.mrb[97].mxu0 }
 0x48f   : > { %v8911_v0 = vpop.eup %8910  ;;  %v4939_v12 = vadd.f32 1e-05, %v4809_v56  ;;  %v11395_v19 = vsub.f32 %v10956_v32, %v4196_v55  ;;  %v11397_v25 = vpop.f32.mrb[98].mxu0  ;;  %v5598_v32 = vmax.f32 %v5468_v1, 0.0 }
 0x490   : > { %v5469_v15 = vadd.f32 %v11344_v29, %v5332_v57  ;;  %v5196_v16 = vmul.f32 %v8911_v0, %v12335_v59  ;;  %4658 = vadd.xlane.f32.xlu1 %v4455_v24  ;;  %4081 = vadd.xlane.f32.xlu0 %v11387_v18  ;;  %v4589_v48 = vpop.xlane.xlu0 %4588  ;;  %v4012_v26 = vpop.xlane.xlu1 %4011  ;;  %v12336_v59 = vld [vmem:[#allocation34_spill] sm:$0xff] }
 0x491   : > { %8916 = vrsqrt.f32 %v4939_v12  ;;  %v4810_v10 = vmul.f32 0.0078125, %v4589_v48  ;;  %v4197_v60 = vmul.f32 0.0078125, %v4012_v26  ;;  %v8677_v11 = vpop.f32.mrb[99].mxu0  ;;  %v4456_v56 = vmul.f32 %v11395_v19, %v11395_v19 }
 0x492   : > { %v5599_v55 = vmax.f32 %v5469_v15, 0.0  ;;  %v5333_v41 = vmul.f32 %v11328_v62, %v5196_v16 }
 0x493   : > { %v8913_v57 = vpop.eup %8912  ;;  %v4940_v9 = vadd.f32 1e-05, %v4810_v10  ;;  %v11406_v24 = vsub.f32 %v10964_v38, %v4197_v60 }
 0x494   : > { %v7333_v0 = vpack.c.bf16 %v5599_v55, %v5598_v32  ;;  %v5197_v58 = vmul.f32 %v8913_v57, %v12336_v59  ;;  %4660 = vadd.xlane.f32.xlu0 %v4456_v56  ;;  %4083 = vadd.xlane.f32.xlu1 %v11397_v25  ;;  %v4591_v12 = vpop.xlane.xlu1 %4590  ;;  %v4014_v48 = vpop.xlane.xlu0 %4013  ;;  %v5470_v38 = vadd.f32 %v11344_v29, %v5333_v41 }
 0x495   : > { %8918 = vrsqrt.f32 %v4940_v9  ;;  %v4811_v26 = vmul.f32 0.0078125, %v4591_v12  ;;  %v4198_v1 = vmul.f32 0.0078125, %v4014_v48  ;;  %v11410_v15 = vpop.f32.mrb[100].mxu0  ;;  %v4457_v16 = vmul.f32 %v11406_v24, %v11406_v24 }
 0x496   : > { %7654 = vst [vmem:[%s11030_s21 + $0x80] sm:$0xff] %v7333_v0   ;;  %v5334_v10 = vmul.f32 %v11328_v62, %v5197_v58  ;;  %v8680_v60 = vpop.f32.mrb[101].mxu0 }
 0x497   : > { %v8915_v11 = vpop.eup %8914  ;;  %v4941_v56 = vadd.f32 1e-05, %v4811_v26  ;;  %v11418_v32 = vsub.f32 %v10973_v35, %v4198_v1  ;;  %v11420_v55 = vpop.f32.mrb[102].mxu0  ;;  %v5600_v35 = vmax.f32 %v5470_v38, 0.0 }
 0x498   : > { %v5471_v9 = vadd.f32 %v11344_v29, %v5334_v10  ;;  %v5198_v57 = vmul.f32 %v8915_v11, %v10939_v49  ;;  %4662 = vadd.xlane.f32.xlu1 %v4457_v16  ;;  %4085 = vadd.xlane.f32.xlu0 %v11410_v15  ;;  %v4016_v0 = vpop.xlane.xlu1 %4015  ;;  %v8681_v59 = vpop.f32.mrb[103].mxu0 }
 0x499   : > { %8920 = vrsqrt.f32 %v4941_v56  ;;  %v4593_v41 = vpop.xlane.xlu0 %4592  ;;  %v4199_v58 = vmul.f32 0.0078125, %v4016_v0  ;;  %v4458_v12 = vmul.f32 %v11418_v32, %v11418_v32 }
 0x49a   : > { %v5601_v48 = vmax.f32 %v5471_v9, 0.0  ;;  %v5335_v26 = vmul.f32 %v11328_v62, %v5198_v57  ;;  %v4812_v1 = vmul.f32 0.0078125, %v4593_v41 }
 0x49b   : > { %v8917_v10 = vpop.eup %8916  ;;  %v11429_v49 = vsub.f32 %v10987_v5, %v4199_v58 }
 0x49c   : > { %v7338_v16 = vpack.c.bf16 %v5601_v48, %v5600_v35  ;;  %v5199_v60 = vmul.f32 %v8917_v10, %v10948_v31  ;;  %v4942_v11 = vadd.f32 1e-05, %v4812_v1  ;;  %4664 = vadd.xlane.f32.xlu0 %v4458_v12  ;;  %4087 = vadd.xlane.f32.xlu1 %v11420_v55  ;;  %v5472_v56 = vadd.f32 %v11344_v29, %v5335_v26 }
 0x49d   : > { %v4595_v0 = vpop.xlane.xlu1 %4594  ;;  %v4018_v59 = vpop.xlane.xlu0 %4017  ;;  %v4459_v38 = vmul.f32 %v11429_v49, %v11429_v49 }
 0x49e   : > { %7655 = vst [vmem:[%s11030_s21 + $0x88] sm:$0xff] %v7338_v16   ;;  %v5336_v9 = vmul.f32 %v11328_v62, %v5199_v60  ;;  %8922 = vrsqrt.f32 %v4942_v11  ;;  %v4813_v5 = vmul.f32 0.0078125, %v4595_v0  ;;  %v11438_v57 = vpop.f32.mrb[104].mxu0  ;;  %v4200_v31 = vmul.f32 0.0078125, %v4018_v59 }
 0x49f   : > { %v8919_v41 = vpop.eup %8918  ;;  %v8684_v58 = vpop.f32.mrb[105].mxu0  ;;  %v5602_v1 = vmax.f32 %v5472_v56, 0.0 }
 0x4a0   : > { %v5473_v12 = vadd.f32 %v11344_v29, %v5336_v9  ;;  %v5200_v35 = vmul.f32 %v8919_v41, %v10962_v47  ;;  %v4943_v48 = vadd.f32 1e-05, %v4813_v5  ;;  %4666 = vadd.xlane.f32.xlu1 %v4459_v38  ;;  %4089 = vadd.xlane.f32.xlu0 %v11438_v57  ;;  %v11443_v26 = vpop.f32.mrb[106].mxu0  ;;  %v11446_v10 = vsub.f32 %v11005_v46, %v4200_v31 }
 0x4a1   : > { %v4597_v16 = vpop.xlane.xlu0 %4596  ;;  %v4020_v60 = vpop.xlane.xlu1 %4019 }
 0x4a2   : > { %v5603_v11 = vmax.f32 %v5473_v12, 0.0  ;;  %v5337_v0 = vmul.f32 %v11328_v62, %v5200_v35  ;;  %8924 = vrsqrt.f32 %v4943_v48  ;;  %v4814_v59 = vmul.f32 0.0078125, %v4597_v16  ;;  %v8685_v9 = vpop.f32.mrb[107].mxu0 }
 0x4a3   : > { %v8921_v47 = vpop.eup %8920  ;;  %v4201_v5 = vmul.f32 0.0078125, %v4020_v60  ;;  %v4460_v38 = vmul.f32 %v11446_v10, %v11446_v10 }
 0x4a4   : > { %v7343_v41 = vpack.c.bf16 %v5603_v11, %v5602_v1  ;;  %v5201_v56 = vmul.f32 %v8921_v47, %v10970_v8  ;;  %v4944_v58 = vadd.f32 1e-05, %v4814_v59  ;;  %4091 = vadd.xlane.f32.xlu1 %v11443_v26  ;;  %v5474_v46 = vadd.f32 %v11344_v29, %v5337_v0 }
 0x4a5   : > { %v11455_v31 = vsub.f32 %v11014_v3, %v4201_v5  ;;  %4668 = vadd.xlane.f32.xlu0 %v4460_v38  ;;  %v4599_v12 = vpop.xlane.xlu1 %4598  ;;  %v4022_v35 = vpop.xlane.xlu0 %4021  ;;  %v12338_v5 = vld [vmem:[#allocation35_spill] sm:$0xff] }
 0x4a6   : > { %7656 = vst [vmem:[%s11030_s21 + $0x90] sm:$0xff] %v7343_v41   ;;  %v5338_v48 = vmul.f32 %v11328_v62, %v5201_v56  ;;  %8926 = vrsqrt.f32 %v4944_v58  ;;  %v4815_v16 = vmul.f32 0.0078125, %v4599_v12  ;;  %v11459_v60 = vpop.f32.mrb[108].mxu0  ;;  %v4202_v1 = vmul.f32 0.0078125, %v4022_v35 }
 0x4a7   : > { %12337 = vst [vmem:[#allocation30_spill] sm:$0xff] %v11455_v31  ;;  %v4461_v8 = vmul.f32 %v11455_v31, %v11455_v31  ;;  %v8688_v11 = vpop.f32.mrb[109].mxu0  ;;  %v5604_v47 = vmax.f32 %v5474_v46, 0.0 }
 0x4a8   : > { %v8923_v59 = vpop.eup %8922  ;;  %v5475_v0 = vadd.f32 %v11344_v29, %v5338_v48  ;;  %v4945_v3 = vadd.f32 1e-05, %v4815_v16  ;;  %v11464_v9 = vpop.f32.mrb[110].mxu0  ;;  %v11468_v41 = vsub.f32 %v11033_v22, %v4202_v1 }
 0x4a9   : > { %v5202_v38 = vmul.f32 %v8923_v59, %v12338_v5  ;;  %4670 = vadd.xlane.f32.xlu1 %v4461_v8  ;;  %4093 = vadd.xlane.f32.xlu0 %v11459_v60  ;;  %v4601_v56 = vpop.xlane.xlu0 %4600  ;;  %v4024_v58 = vpop.xlane.xlu1 %4023  ;;  %v12341_v8 = vld [vmem:[#allocation36_spill] sm:$0xff] }
 0x4aa   : > { %12339 = vst [vmem:[#allocation31_spill] sm:$0xff] %v11468_v41  ;;  %v5605_v12 = vmax.f32 %v5475_v0, 0.0  ;;  %8928 = vrsqrt.f32 %v4945_v3  ;;  %v4816_v35 = vmul.f32 0.0078125, %v4601_v56  ;;  %v4203_v11 = vmul.f32 0.0078125, %v4024_v58  ;;  %v8689_v48 = vpop.f32.mrb[111].mxu0 }
 0x4ab   : > { %v5339_v16 = vmul.f32 %v11328_v62, %v5202_v38  ;;  %v4462_v46 = vmul.f32 %v11468_v41, %v11468_v41 }
 0x4ac   : > { %v8925_v59 = vpop.eup %8924  ;;  %v7348_v5 = vpack.c.bf16 %v5605_v12, %v5604_v47  ;;  %v4946_v22 = vadd.f32 1e-05, %v4816_v35  ;;  %v11475_v1 = vsub.f32 %v11042_v54, %v4203_v11 }
 0x4ad   : > { %v5203_v31 = vmul.f32 %v8925_v59, %v12341_v8  ;;  %4672 = vadd.xlane.f32.xlu0 %v4462_v46  ;;  %4095 = vadd.xlane.f32.xlu1 %v11464_v9  ;;  %v4603_v0 = vpop.xlane.xlu1 %4602  ;;  %v4026_v3 = vpop.xlane.xlu0 %4025  ;;  %v5476_v12 = vadd.f32 %v11344_v29, %v5339_v16 }
 0x4ae   : > { %12340 = vst [vmem:[#allocation32_spill] sm:$0xff] %v11475_v1  ;;  %7657 = vst [vmem:[%s11030_s21 + $0x98] sm:$0xff] %v7348_v5   ;;  %8930 = vrsqrt.f32 %v4946_v22  ;;  %v4817_v56 = vmul.f32 0.0078125, %v4603_v0  ;;  %v4204_v38 = vmul.f32 0.0078125, %v4026_v3  ;;  %v11480_v58 = vpop.f32.mrb[112].mxu0  ;;  %v4463_v47 = vmul.f32 %v11475_v1, %v11475_v1 }
 0x4af   : > { %v5340_v54 = vmul.f32 %v11328_v62, %v5203_v31  ;;  %v8692_v35 = vpop.f32.mrb[113].mxu0 }
 0x4b0   : > { %v8927_v11 = vpop.eup %8926  ;;  %v4947_v48 = vadd.f32 1e-05, %v4817_v56  ;;  %v11487_v46 = vsub.f32 %v11055_v7, %v4204_v38  ;;  %v11489_v59 = vpop.f32.mrb[114].mxu0  ;;  %v5606_v7 = vmax.f32 %v5476_v12, 0.0 }
 0x4b1   : > { %v5477_v5 = vadd.f32 %v11344_v29, %v5340_v54  ;;  %v5204_v22 = vmul.f32 %v8927_v11, %v11018_v42  ;;  %4674 = vadd.xlane.f32.xlu1 %v4463_v47  ;;  %4097 = vadd.xlane.f32.xlu0 %v11480_v58  ;;  %v4605_v8 = vpop.xlane.xlu0 %4604  ;;  %v4028_v0 = vpop.xlane.xlu1 %4027  ;;  %v12344_v11 = vld [vmem:[#allocation37_spill] sm:$0xff] }
 0x4b2   : > { %12342 = vst [vmem:[#allocation34_spill] sm:$0xff] %v11487_v46  ;;  %8932 = vrsqrt.f32 %v4947_v48  ;;  %v4818_v16 = vmul.f32 0.0078125, %v4605_v8  ;;  %v4205_v31 = vmul.f32 0.0078125, %v4028_v0  ;;  %v8693_v3 = vpop.f32.mrb[115].mxu0  ;;  %v4464_v56 = vmul.f32 %v11487_v46, %v11487_v46 }
 0x4b3   : > { %v5607_v38 = vmax.f32 %v5477_v5, 0.0  ;;  %v5341_v35 = vmul.f32 %v11328_v62, %v5204_v22 }
 0x4b4   : > { %v8929_v54 = vpop.eup %8928  ;;  %v4948_v1 = vadd.f32 1e-05, %v4818_v16  ;;  %v11498_v42 = vsub.f32 %v11065_v2, %v4205_v31 }
 0x4b5   : > { %v7353_v47 = vpack.c.bf16 %v5607_v38, %v5606_v7  ;;  %v5205_v41 = vmul.f32 %v8929_v54, %v12344_v11  ;;  %4676 = vadd.xlane.f32.xlu0 %v4464_v56  ;;  %4099 = vadd.xlane.f32.xlu1 %v11489_v59  ;;  %v4607_v48 = vpop.xlane.xlu1 %4606  ;;  %v4030_v8 = vpop.xlane.xlu0 %4029  ;;  %v5478_v2 = vadd.f32 %v11344_v29, %v5341_v35  ;;  %v12346_v54 = vld [vmem:[#allocation38_spill] sm:$0xff] }
 0x4b6   : > { %12343 = vst [vmem:[#allocation35_spill] sm:$0xff] %v11498_v42  ;;  %8934 = vrsqrt.f32 %v4948_v1  ;;  %v4819_v0 = vmul.f32 0.0078125, %v4607_v48  ;;  %v4206_v12 = vmul.f32 0.0078125, %v4030_v8  ;;  %v11502_v5 = vpop.f32.mrb[116].mxu0  ;;  %v4465_v22 = vmul.f32 %v11498_v42, %v11498_v42 }
 0x4b7   : > { %7658 = vst [vmem:[%s11030_s21 + $0xa0] sm:$0xff] %v7353_v47   ;;  %v5342_v16 = vmul.f32 %v11328_v62, %v5205_v41  ;;  %v8696_v31 = vpop.f32.mrb[117].mxu0 }
 0x4b8   : > { %v8931_v3 = vpop.eup %8930  ;;  %v4949_v56 = vadd.f32 1e-05, %v4819_v0  ;;  %v11510_v7 = vsub.f32 %v11078_v28, %v4206_v12  ;;  %v11512_v38 = vpop.f32.mrb[118].mxu0  ;;  %v5608_v28 = vmax.f32 %v5478_v2, 0.0 }
 0x4b9   : > { %v5479_v1 = vadd.f32 %v11344_v29, %v5342_v16  ;;  %v5206_v11 = vmul.f32 %v8931_v3, %v12346_v54  ;;  %4678 = vadd.xlane.f32.xlu1 %v4465_v22  ;;  %4101 = vadd.xlane.f32.xlu0 %v11502_v5  ;;  %v4609_v47 = vpop.xlane.xlu0 %4608  ;;  %v4032_v48 = vpop.xlane.xlu1 %4031  ;;  %v12348_v54 = vld [vmem:[#allocation39_spill] sm:$0xff] }
 0x4ba   : > { %12345 = vst [vmem:[#allocation36_spill] sm:$0xff] %v11510_v7  ;;  %8936 = vrsqrt.f32 %v4949_v56  ;;  %v4820_v35 = vmul.f32 0.0078125, %v4609_v47  ;;  %v4207_v41 = vmul.f32 0.0078125, %v4032_v48  ;;  %v8697_v8 = vpop.f32.mrb[119].mxu0  ;;  %v4466_v0 = vmul.f32 %v11510_v7, %v11510_v7 }
 0x4bb   : > { %v5609_v12 = vmax.f32 %v5479_v1, 0.0  ;;  %v5343_v31 = vmul.f32 %v11328_v62, %v5206_v11 }
 0x4bc   : > { %v8933_v16 = vpop.eup %8932  ;;  %v4950_v42 = vadd.f32 1e-05, %v4820_v35  ;;  %v11521_v22 = vsub.f32 %v11088_v14, %v4207_v41 }
 0x4bd   : > { %v7358_v3 = vpack.c.bf16 %v5609_v12, %v5608_v28  ;;  %v5207_v46 = vmul.f32 %v8933_v16, %v12348_v54  ;;  %4680 = vadd.xlane.f32.xlu0 %v4466_v0  ;;  %4103 = vadd.xlane.f32.xlu1 %v11512_v38  ;;  %v4611_v56 = vpop.xlane.xlu1 %4610  ;;  %v4034_v47 = vpop.xlane.xlu0 %4033  ;;  %v5480_v14 = vadd.f32 %v11344_v29, %v5343_v31  ;;  %v12350_v16 = vld [vmem:[#allocation40_spill] sm:$0xff] }
 0x4be   : > { %12347 = vst [vmem:[#allocation37_spill] sm:$0xff] %v11521_v22  ;;  %8938 = vrsqrt.f32 %v4950_v42  ;;  %v4821_v48 = vmul.f32 0.0078125, %v4611_v56  ;;  %v4208_v2 = vmul.f32 0.0078125, %v4034_v47  ;;  %v11525_v1 = vpop.f32.mrb[120].mxu0  ;;  %v4467_v11 = vmul.f32 %v11521_v22, %v11521_v22 }
 0x4bf   : > { %7659 = vst [vmem:[%s11030_s21 + $0xa8] sm:$0xff] %v7358_v3   ;;  %v5344_v35 = vmul.f32 %v11328_v62, %v5207_v46  ;;  %v8700_v41 = vpop.f32.mrb[121].mxu0 }
 0x4c0   : > { %v8935_v8 = vpop.eup %8934  ;;  %v4951_v0 = vadd.f32 1e-05, %v4821_v48  ;;  %v11533_v28 = vsub.f32 %v11101_v37, %v4208_v2  ;;  %v11535_v12 = vpop.f32.mrb[122].mxu0  ;;  %v5610_v37 = vmax.f32 %v5480_v14, 0.0 }
 0x4c1   : > { %v5481_v42 = vadd.f32 %v11344_v29, %v5344_v35  ;;  %v5208_v54 = vmul.f32 %v8935_v8, %v12350_v16  ;;  %4682 = vadd.xlane.f32.xlu1 %v4467_v11  ;;  %4105 = vadd.xlane.f32.xlu0 %v11525_v1  ;;  %v4613_v3 = vpop.xlane.xlu0 %4612  ;;  %v4036_v56 = vpop.xlane.xlu1 %4035  ;;  %v12352_v16 = vld [vmem:[#allocation5_spill] sm:$0xff] }
 0x4c2   : > { %12349 = vst [vmem:[#allocation38_spill] sm:$0xff] %v11533_v28  ;;  %8940 = vrsqrt.f32 %v4951_v0  ;;  %v4822_v31 = vmul.f32 0.0078125, %v4613_v3  ;;  %v4209_v46 = vmul.f32 0.0078125, %v4036_v56  ;;  %v8701_v47 = vpop.f32.mrb[123].mxu0  ;;  %v4468_v48 = vmul.f32 %v11533_v28, %v11533_v28 }
 0x4c3   : > { %v5611_v2 = vmax.f32 %v5481_v42, 0.0  ;;  %v5345_v41 = vmul.f32 %v11328_v62, %v5208_v54 }
 0x4c4   : > { %v8937_v35 = vpop.eup %8936  ;;  %v4952_v22 = vadd.f32 1e-05, %v4822_v31  ;;  %v11544_v11 = vsub.f32 %v11111_v44, %v4209_v46 }
 0x4c5   : > { %v7363_v8 = vpack.c.bf16 %v5611_v2, %v5610_v37  ;;  %v5209_v7 = vmul.f32 %v8937_v35, %v12352_v16  ;;  %4684 = vadd.xlane.f32.xlu0 %v4468_v48  ;;  %4107 = vadd.xlane.f32.xlu1 %v11535_v12  ;;  %v4615_v0 = vpop.xlane.xlu1 %4614  ;;  %v4038_v3 = vpop.xlane.xlu0 %4037  ;;  %v5482_v44 = vadd.f32 %v11344_v29, %v5345_v41  ;;  %v12356_v35 = vld [vmem:[#allocation6_spill] sm:$0xff] }
 0x4c6   : > { %12351 = vst [vmem:[#allocation39_spill] sm:$0xff] %v11544_v11  ;;  %8942 = vrsqrt.f32 %v4952_v22  ;;  %v4823_v56 = vmul.f32 0.0078125, %v4615_v0  ;;  %v4210_v14 = vmul.f32 0.0078125, %v4038_v3  ;;  %v11548_v42 = vpop.f32.mrb[124].mxu0  ;;  %v4469_v54 = vmul.f32 %v11544_v11, %v11544_v11 }
 0x4c7   : > { %12353 = vst [vmem:[#allocation40_spill] sm:$0xff] %v11548_v42  ;;  %7660 = vst [vmem:[%s11030_s21 + $0xb0] sm:$0xff] %v7363_v8   ;;  %v5346_v31 = vmul.f32 %v11328_v62, %v5209_v7  ;;  %v8704_v46 = vpop.f32.mrb[125].mxu0 }
 0x4c8   : > { %v8939_v47 = vpop.eup %8938  ;;  %v4953_v48 = vadd.f32 1e-05, %v4823_v56  ;;  %v11556_v37 = vsub.f32 %v11124_v52, %v4210_v14  ;;  %v11558_v2 = vpop.f32.mrb[126].mxu0  ;;  %v5612_v52 = vmax.f32 %v5482_v44, 0.0 }
 0x4c9   : > { %12355 = vst [vmem:[#allocation42_spill] sm:$0xff] %v11558_v2  ;;  %v5483_v22 = vadd.f32 %v11344_v29, %v5346_v31  ;;  %v5210_v16 = vmul.f32 %v8939_v47, %v12356_v35  ;;  %4686 = vadd.xlane.f32.xlu1 %v4469_v54  ;;  %4109 = vadd.xlane.f32.xlu0 %v11548_v42  ;;  %v4617_v8 = vpop.xlane.xlu0 %4616  ;;  %v4040_v0 = vpop.xlane.xlu1 %4039  ;;  %v12358_v35 = vld [vmem:[#allocation7_spill] sm:$0xff]  ;;  %v12360_v42 = vld [vmem:[#allocation9_spill] sm:$0xff] }
 0x4ca   : > { %12354 = vst [vmem:[#allocation5_spill] sm:$0xff] %v11556_v37  ;;  %8944 = vrsqrt.f32 %v4953_v48  ;;  %v4824_v41 = vmul.f32 0.0078125, %v4617_v8  ;;  %v4211_v7 = vmul.f32 0.0078125, %v4040_v0  ;;  %v8705_v3 = vpop.f32.mrb[127].mxu0  ;;  %v4470_v56 = vmul.f32 %v11556_v37, %v11556_v37 }
 0x4cb   : > { %v5613_v14 = vmax.f32 %v5483_v22, 0.0  ;;  %v5347_v46 = vmul.f32 %v11328_v62, %v5210_v16 }
 0x4cc   : > { %v8941_v31 = vpop.eup %8940  ;;  %v4954_v11 = vadd.f32 1e-05, %v4824_v41  ;;  %v11567_v54 = vsub.f32 %v11134_v6, %v4211_v7 }
 0x4cd   : > { %v7368_v47 = vpack.c.bf16 %v5613_v14, %v5612_v52  ;;  %v5211_v28 = vmul.f32 %v8941_v31, %v12358_v35  ;;  %4688 = vadd.xlane.f32.xlu0 %v4470_v56  ;;  %4111 = vadd.xlane.f32.xlu1 %v11558_v2  ;;  %v4619_v48 = vpop.xlane.xlu1 %4618  ;;  %v4042_v8 = vpop.xlane.xlu0 %4041  ;;  %v5484_v16 = vadd.f32 %v11344_v29, %v5347_v46  ;;  %v12359_v14 = vld [vmem:[#allocation8_spill] sm:$0xff] }
 0x4ce   : > { %12357 = vst [vmem:[#allocation6_spill] sm:$0xff] %v11567_v54  ;;  %8946 = vrsqrt.f32 %v4954_v11  ;;  %v4825_v0 = vmul.f32 0.0078125, %v4619_v48  ;;  %v11571_v44 = vpop.f32.mrb[128].mxu0  ;;  %v4471_v22 = vmul.f32 %v11567_v54, %v11567_v54  ;;  %v4212_v31 = vmul.f32 0.0078125, %v4042_v8 }
 0x4cf   : > { %7661 = vst [vmem:[%s11030_s21 + $0xb8] sm:$0xff] %v7368_v47   ;;  %v5348_v6 = vmul.f32 %v11328_v62, %v5211_v28  ;;  %v8708_v41 = vpop.f32.mrb[129].mxu0  ;;  %v5614_v54 = vmax.f32 %v5484_v16, 0.0 }
 0x4d0   : > { %v8943_v7 = vpop.eup %8942  ;;  %v4955_v3 = vadd.f32 1e-05, %v4825_v0  ;;  %v11578_v56 = vpop.f32.mrb[130].mxu0  ;;  %v11586_v8 = vsub.f32 %v11147_v40, %v4212_v31 }
 0x4d1   : > { %v5485_v52 = vadd.f32 %v11344_v29, %v5348_v6  ;;  %v5212_v11 = vmul.f32 %v8943_v7, %v12359_v14  ;;  %4690 = vadd.xlane.f32.xlu1 %v4471_v22  ;;  %4113 = vadd.xlane.f32.xlu0 %v11571_v44  ;;  %v4621_v35 = vpop.xlane.xlu0 %4620  ;;  %v4044_v48 = vpop.xlane.xlu1 %4043 }
 0x4d2   : > { %8948 = vrsqrt.f32 %v4955_v3  ;;  %v4826_v47 = vmul.f32 0.0078125, %v4621_v35  ;;  %v8709_v46 = vpop.f32.mrb[131].mxu0  ;;  %v4213_v41 = vmul.f32 0.0078125, %v4044_v48  ;;  %v12361_v48 = vld [vmem:[#allocation10_spill] sm:$0xff] }
 0x4d3   : > { %v5615_v28 = vmax.f32 %v5485_v52, 0.0  ;;  %v5349_v0 = vmul.f32 %v11328_v62, %v5212_v11 }
 0x4d4   : > { %v8945_v37 = vpop.eup %8944  ;;  %v4956_v2 = vadd.f32 1e-05, %v4826_v47 }
 0x4d5   : > { %v7373_v6 = vpack.c.bf16 %v5615_v28, %v5614_v54  ;;  %v5213_v7 = vmul.f32 %v8945_v37, %v12360_v42  ;;  %4115 = vadd.xlane.f32.xlu1 %v11578_v56  ;;  %v4623_v22 = vpop.xlane.xlu1 %4622  ;;  %v4046_v3 = vpop.xlane.xlu0 %4045  ;;  %v5486_v52 = vadd.f32 %v11344_v29, %v5349_v0  ;;  %v11595_v54 = vsub.f32 %v11157_v53, %v4213_v41 }
 0x4d6   : > { %8950 = vrsqrt.f32 %v4956_v2  ;;  %v4827_v14 = vmul.f32 0.0078125, %v4623_v22  ;;  %v4214_v16 = vmul.f32 0.0078125, %v4046_v3  ;;  %v11589_v35 = vpop.f32.mrb[132].mxu0  ;;  %v4472_v53 = vmul.f32 %v11586_v8, %v11586_v8 }
 0x4d7   : > { %7662 = vst [vmem:[%s11030_s21 + $0xc0] sm:$0xff] %v7373_v6   ;;  %v5350_v11 = vmul.f32 %v11328_v62, %v5213_v7  ;;  %4117 = vadd.xlane.f32.xlu0 %v11589_v35  ;;  %v8712_v40 = vpop.f32.mrb[133].mxu0  ;;  %v5616_v22 = vmax.f32 %v5486_v52, 0.0 }
 0x4d8   : > { %v8947_v42 = vpop.eup %8946  ;;  %v4957_v37 = vadd.f32 1e-05, %v4827_v14  ;;  %v11598_v31 = vpop.f32.mrb[134].mxu0  ;;  %v11603_v46 = vsub.f32 %v11170_v23, %v4214_v16  ;;  %v4473_v23 = vmul.f32 %v11595_v54, %v11595_v54 }
 0x4d9   : > { %v5487_v2 = vadd.f32 %v11344_v29, %v5350_v11  ;;  %v5214_v47 = vmul.f32 %v8947_v42, %v12361_v48  ;;  %v4625_v28 = vpop.xlane.xlu0 %4624  ;;  %v4048_v0 = vpop.xlane.xlu1 %4047  ;;  %4119 = vadd.xlane.f32.xlu1 %v11598_v31  ;;  %v12362_v48 = vld [vmem:[#allocation11_spill] sm:$0xff] }
 0x4da   : > { %8952 = vrsqrt.f32 %v4957_v37  ;;  %v4828_v41 = vmul.f32 0.0078125, %v4625_v28  ;;  %v4215_v6 = vmul.f32 0.0078125, %v4048_v0  ;;  %v8713_v7 = vpop.f32.mrb[135].mxu0  ;;  %v4474_v52 = vmul.f32 %v11603_v46, %v11603_v46 }
 0x4db   : > { %v5617_v3 = vmax.f32 %v5487_v2, 0.0  ;;  %v5351_v14 = vmul.f32 %v11328_v62, %v5214_v47  ;;  %4692 = vadd.xlane.f32.xlu0 %v4472_v53 }
 0x4dc   : > { %v8949_v16 = vpop.eup %8948  ;;  %v4958_v11 = vadd.f32 1e-05, %v4828_v41  ;;  %v11612_v40 = vsub.f32 %v11180_v34, %v4215_v6 }
 0x4dd   : > { %v7378_v42 = vpack.c.bf16 %v5617_v3, %v5616_v22  ;;  %v5215_v37 = vmul.f32 %v8949_v16, %v12362_v48  ;;  %v4627_v28 = vpop.xlane.xlu1 %4626  ;;  %v4050_v0 = vpop.xlane.xlu0 %4049  ;;  %4694 = vadd.xlane.f32.xlu1 %v4473_v23  ;;  %v5488_v53 = vadd.f32 %v11344_v29, %v5351_v14  ;;  %v12363_v23 = vld [vmem:[#allocation12_spill] sm:$0xff] }
 0x4de   : > { %8954 = vrsqrt.f32 %v4958_v11  ;;  %v4829_v2 = vmul.f32 0.0078125, %v4627_v28  ;;  %v4216_v47 = vmul.f32 0.0078125, %v4050_v0  ;;  %v4475_v34 = vmul.f32 %v11612_v40, %v11612_v40 }
 0x4df   : > { %7663 = vst [vmem:[%s11030_s21 + $0xc8] sm:$0xff] %v7378_v42   ;;  %v5352_v41 = vmul.f32 %v11328_v62, %v5215_v37  ;;  %4696 = vadd.xlane.f32.xlu0 %v4474_v52  ;;  %v5618_v28 = vmax.f32 %v5488_v53, 0.0 }
 0x4e0   : > { %v8951_v6 = vpop.eup %8950  ;;  %v4959_v7 = vadd.f32 1e-05, %v4829_v2  ;;  %v11623_v22 = vsub.f32 %v11193_v13, %v4216_v47 }
 0x4e1   : > { %v5489_v3 = vadd.f32 %v11344_v29, %v5352_v41  ;;  %v5216_v16 = vmul.f32 %v8951_v6, %v12363_v23  ;;  %v4629_v11 = vpop.xlane.xlu0 %4628  ;;  %v4052_v48 = vpop.xlane.xlu1 %4051  ;;  %4698 = vadd.xlane.f32.xlu1 %v4475_v34  ;;  %v12364_v6 = vld [vmem:[#allocation13_spill] sm:$0xff] }
 0x4e2   : > { %8956 = vrsqrt.f32 %v4959_v7  ;;  %v4830_v14 = vmul.f32 0.0078125, %v4629_v11  ;;  %v4217_v42 = vmul.f32 0.0078125, %v4052_v48  ;;  %v4476_v37 = vmul.f32 %v11623_v22, %v11623_v22 }
 0x4e3   : > { %v5619_v0 = vmax.f32 %v5489_v3, 0.0  ;;  %v5353_v52 = vmul.f32 %v11328_v62, %v5216_v16 }
 0x4e4   : > { %v8953_v13 = vpop.eup %8952  ;;  %v4960_v2 = vadd.f32 1e-05, %v4830_v14  ;;  %v11631_v47 = vsub.f32 %v11203_v4, %v4217_v42  ;;  %4700 = vadd.xlane.f32.xlu0 %v4476_v37 }
 0x4e5   : > { %v7383_v41 = vpack.c.bf16 %v5619_v0, %v5618_v28  ;;  %v5217_v34 = vmul.f32 %v8953_v13, %v12364_v6  ;;  %v4631_v7 = vpop.xlane.xlu1 %4630  ;;  %v4054_v23 = vpop.xlane.xlu0 %4053  ;;  %v5490_v3 = vadd.f32 %v11344_v29, %v5353_v52  ;;  %v12365_v28 = vld [vmem:[#allocation14_spill] sm:$0xff] }
 0x4e6   : > { %8958 = vrsqrt.f32 %v4960_v2  ;;  %v4831_v11 = vmul.f32 0.0078125, %v4631_v7  ;;  %v4218_v48 = vmul.f32 0.0078125, %v4054_v23  ;;  %v4477_v53 = vmul.f32 %v11631_v47, %v11631_v47 }
 0x4e7   : > { %7664 = vst [vmem:[%s11030_s21 + $0xd0] sm:$0xff] %v7383_v41   ;;  %v5354_v16 = vmul.f32 %v11328_v62, %v5217_v34  ;;  %v5620_v41 = vmax.f32 %v5490_v3, 0.0 }
 0x4e8   : > { %v8955_v14 = vpop.eup %8954  ;;  %v4961_v4 = vadd.f32 1e-05, %v4831_v11  ;;  %v11640_v42 = vsub.f32 %v11216_v33, %v4218_v48  ;;  %4702 = vadd.xlane.f32.xlu1 %v4477_v53 }
 0x4e9   : > { %v5491_v37 = vadd.f32 %v11344_v29, %v5354_v16  ;;  %v5218_v0 = vmul.f32 %v8955_v14, %v12365_v28  ;;  %v4633_v13 = vpop.xlane.xlu0 %4632  ;;  %v4056_v2 = vpop.xlane.xlu1 %4055  ;;  %v12366_v16 = vld [vmem:[#allocation15_spill] sm:$0xff] }
 0x4ea   : > { %8960 = vrsqrt.f32 %v4961_v4  ;;  %v4832_v6 = vmul.f32 0.0078125, %v4633_v13  ;;  %v4219_v7 = vmul.f32 0.0078125, %v4056_v2  ;;  %v4478_v52 = vmul.f32 %v11640_v42, %v11640_v42 }
 0x4eb   : > { %v5621_v34 = vmax.f32 %v5491_v37, 0.0  ;;  %v5355_v23 = vmul.f32 %v11328_v62, %v5218_v0 }
 0x4ec   : > { %v8957_v33 = vpop.eup %8956  ;;  %v4962_v11 = vadd.f32 1e-05, %v4832_v6  ;;  %v11648_v48 = vsub.f32 %v11226_v43, %v4219_v7  ;;  %4704 = vadd.xlane.f32.xlu0 %v4478_v52 }
 0x4ed   : > { %v7388_v53 = vpack.c.bf16 %v5621_v34, %v5620_v41  ;;  %v5219_v14 = vmul.f32 %v8957_v33, %v12366_v16  ;;  %v4635_v4 = vpop.xlane.xlu1 %4634  ;;  %v4058_v28 = vpop.xlane.xlu0 %4057  ;;  %v5492_v37 = vadd.f32 %v11344_v29, %v5355_v23  ;;  %v12367_v41 = vld [vmem:[#allocation16_spill] sm:$0xff] }
 0x4ee   : > { %8962 = vrsqrt.f32 %v4962_v11  ;;  %v4833_v13 = vmul.f32 0.0078125, %v4635_v4  ;;  %v4220_v2 = vmul.f32 0.0078125, %v4058_v28  ;;  %v4479_v3 = vmul.f32 %v11648_v48, %v11648_v48 }
 0x4ef   : > { %7665 = vst [vmem:[%s11030_s21 + $0xd8] sm:$0xff] %v7388_v53   ;;  %v5356_v0 = vmul.f32 %v11328_v62, %v5219_v14  ;;  %v5622_v53 = vmax.f32 %v5492_v37, 0.0 }
 0x4f0   : > { %v8959_v6 = vpop.eup %8958  ;;  %v4963_v43 = vadd.f32 1e-05, %v4833_v13  ;;  %v11657_v7 = vsub.f32 %v11239_v27, %v4220_v2  ;;  %4706 = vadd.xlane.f32.xlu1 %v4479_v3  ;;  %v11666_v27 = vld [vmem:[%s12160_s7] ss:$0 sm:$0xff]  ;;  %v12368_v3 = vld [vmem:[#allocation17_spill] sm:$0xff] }
 0x4f1   : > { %v5493_v52 = vadd.f32 %v11344_v29, %v5356_v0  ;;  %v5220_v34 = vmul.f32 %v8959_v6, %v12367_v41  ;;  %v4637_v33 = vpop.xlane.xlu0 %4636  ;;  %v4060_v11 = vpop.xlane.xlu1 %4059 }
 0x4f2   : > { %8964 = vrsqrt.f32 %v4963_v43  ;;  %v4834_v16 = vmul.f32 0.0078125, %v4637_v33  ;;  %v4221_v4 = vmul.f32 0.0078125, %v4060_v11  ;;  %v4480_v23 = vmul.f32 %v11657_v7, %v11657_v7 }
 0x4f3   : > { %v5623_v62 = vmax.f32 %v5493_v52, 0.0  ;;  %v5357_v29 = vmul.f32 %v11666_v27, %v5220_v34  ;;  %v11679_v34 = vld [vmem:[%s12161_s8] ss:$0 sm:$0xff] }
 0x4f4   : > { %v8961_v14 = vpop.eup %8960  ;;  %v4964_v28 = vadd.f32 1e-05, %v4834_v16  ;;  %v11670_v13 = vsub.f32 %v11249_v17, %v4221_v4  ;;  %4708 = vadd.xlane.f32.xlu0 %v4480_v23 }
 0x4f5   : > { %v7393_v2 = vpack.c.bf16 %v5623_v62, %v5622_v53  ;;  %v5221_v0 = vmul.f32 %v8961_v14, %v12368_v3  ;;  %v4639_v6 = vpop.xlane.xlu1 %4638  ;;  %v4062_v37 = vpop.xlane.xlu0 %4061  ;;  %v5494_v17 = vadd.f32 %v11679_v34, %v5357_v29  ;;  %v12369_v53 = vld [vmem:[#allocation18_spill] sm:$0xff] }
 0x4f6   : > { %8966 = vrsqrt.f32 %v4964_v28  ;;  %v4835_v43 = vmul.f32 0.0078125, %v4639_v6  ;;  %v4222_v52 = vmul.f32 0.0078125, %v4062_v37  ;;  %v4481_v41 = vmul.f32 %v11670_v13, %v11670_v13 }
 0x4f7   : > { %7666 = vst [vmem:[%s11030_s21 + $0xe0] sm:$0xff] %v7393_v2   ;;  %v5358_v33 = vmul.f32 %v11666_v27, %v5221_v0  ;;  %v5624_v0 = vmax.f32 %v5494_v17, 0.0 }
 0x4f8   : > { %v8963_v11 = vpop.eup %8962  ;;  %v4965_v16 = vadd.f32 1e-05, %v4835_v43  ;;  %v11684_v4 = vsub.f32 %v11262_v20, %v4222_v52  ;;  %4710 = vadd.xlane.f32.xlu1 %v4481_v41 }
 0x4f9   : > { %v5495_v23 = vadd.f32 %v11679_v34, %v5358_v33  ;;  %v5222_v62 = vmul.f32 %v8963_v11, %v12369_v53  ;;  %v4641_v14 = vpop.xlane.xlu0 %4640  ;;  %v4064_v28 = vpop.xlane.xlu1 %4063  ;;  %v12370_v33 = vld [vmem:[#allocation19_spill] sm:$0xff] }
 0x4fa   : > { %8968 = vrsqrt.f32 %v4965_v16  ;;  %v4836_v2 = vmul.f32 0.0078125, %v4641_v14  ;;  %v4223_v3 = vmul.f32 0.0078125, %v4064_v28  ;;  %v4482_v29 = vmul.f32 %v11684_v4, %v11684_v4 }
 0x4fb   : > { %v5625_v6 = vmax.f32 %v5495_v23, 0.0  ;;  %v5359_v37 = vmul.f32 %v11666_v27, %v5222_v62 }
 0x4fc   : > { %v8965_v20 = vpop.eup %8964  ;;  %v4966_v43 = vadd.f32 1e-05, %v4836_v2  ;;  %v11692_v52 = vsub.f32 %v11272_v61, %v4223_v3  ;;  %4712 = vadd.xlane.f32.xlu0 %v4482_v29 }
 0x4fd   : > { %v7398_v41 = vpack.c.bf16 %v5625_v6, %v5624_v0  ;;  %v5223_v11 = vmul.f32 %v8965_v20, %v12370_v33  ;;  %v4643_v16 = vpop.xlane.xlu1 %4642  ;;  %v4066_v53 = vpop.xlane.xlu0 %4065  ;;  %v5496_v23 = vadd.f32 %v11679_v34, %v5359_v37  ;;  %v12371_v0 = vld [vmem:[#allocation20_spill] sm:$0xff] }
 0x4fe   : > { %8970 = vrsqrt.f32 %v4966_v43  ;;  %v4837_v14 = vmul.f32 0.0078125, %v4643_v16  ;;  %v4224_v28 = vmul.f32 0.0078125, %v4066_v53  ;;  %v4483_v17 = vmul.f32 %v11692_v52, %v11692_v52 }
 0x4ff   : > { %7667 = vst [vmem:[%s11030_s21 + $0xe8] sm:$0xff] %v7398_v41   ;;  %v5360_v62 = vmul.f32 %v11666_v27, %v5223_v11  ;;  %v5626_v41 = vmax.f32 %v5496_v23, 0.0 }
 0x500   : > { %v8967_v2 = vpop.eup %8966  ;;  %v4967_v61 = vadd.f32 1e-05, %v4837_v14  ;;  %v11701_v3 = vsub.f32 %v11285_v36, %v4224_v28  ;;  %4714 = vadd.xlane.f32.xlu1 %v4483_v17 }
 0x501   : > { %v5497_v29 = vadd.f32 %v11679_v34, %v5360_v62  ;;  %v5224_v6 = vmul.f32 %v8967_v2, %v12371_v0  ;;  %v4645_v20 = vpop.xlane.xlu0 %4644  ;;  %v4068_v43 = vpop.xlane.xlu1 %4067  ;;  %v12372_v62 = vld [vmem:[#allocation21_spill] sm:$0xff] }
 0x502   : > { %8972 = vrsqrt.f32 %v4967_v61  ;;  %v4838_v33 = vmul.f32 0.0078125, %v4645_v20  ;;  %v4225_v16 = vmul.f32 0.0078125, %v4068_v43  ;;  %v4484_v37 = vmul.f32 %v11701_v3, %v11701_v3 }
 0x503   : > { %v5627_v11 = vmax.f32 %v5497_v29, 0.0  ;;  %v5361_v53 = vmul.f32 %v11666_v27, %v5224_v6 }
 0x504   : > { %v8969_v36 = vpop.eup %8968  ;;  %v4968_v14 = vadd.f32 1e-05, %v4838_v33  ;;  %v11709_v28 = vsub.f32 %v11295_v21, %v4225_v16  ;;  %4716 = vadd.xlane.f32.xlu0 %v4484_v37 }
 0x505   : > { %v7403_v17 = vpack.c.bf16 %v5627_v11, %v5626_v41  ;;  %v5225_v2 = vmul.f32 %v8969_v36, %v12372_v62  ;;  %v4647_v61 = vpop.xlane.xlu1 %4646  ;;  %v4070_v0 = vpop.xlane.xlu0 %4069  ;;  %v5498_v29 = vadd.f32 %v11679_v34, %v5361_v53 }
 0x506   : > { %8974 = vrsqrt.f32 %v4968_v14  ;;  %v4839_v20 = vmul.f32 0.0078125, %v4647_v61  ;;  %v4226_v43 = vmul.f32 0.0078125, %v4070_v0  ;;  %v4485_v23 = vmul.f32 %v11709_v28, %v11709_v28 }
 0x507   : > { %7668 = vst [vmem:[%s11030_s21 + $0xf0] sm:$0xff] %v7403_v17   ;;  %v5362_v6 = vmul.f32 %v11666_v27, %v5225_v2  ;;  %v5628_v17 = vmax.f32 %v5498_v29, 0.0 }
 0x508   : > { %v8971_v33 = vpop.eup %8970  ;;  %v4969_v21 = vadd.f32 1e-05, %v4839_v20  ;;  %v11718_v16 = vsub.f32 %v11308_v51, %v4226_v43  ;;  %4718 = vadd.xlane.f32.xlu1 %v4485_v23  ;;  %v12373_v43 = vld [vmem:[#allocation22_spill] sm:$0xff] }
 0x509   : > { %v5499_v37 = vadd.f32 %v11679_v34, %v5362_v6  ;;  %v5226_v41 = vmul.f32 %v8971_v33, %v11270_v30  ;;  %v4649_v11 = vpop.xlane.xlu0 %4648  ;;  %v4072_v36 = vpop.xlane.xlu1 %4071 }
 0x50a   : > { %8976 = vrsqrt.f32 %v4969_v21  ;;  %v4840_v14 = vmul.f32 0.0078125, %v4649_v11  ;;  %v4227_v62 = vmul.f32 0.0078125, %v4072_v36  ;;  %v4486_v53 = vmul.f32 %v11718_v16, %v11718_v16 }
 0x50b   : > { %v5629_v2 = vmax.f32 %v5499_v37, 0.0  ;;  %v5363_v61 = vmul.f32 %v11666_v27, %v5226_v41 }
 0x50c   : > { %v8973_v51 = vpop.eup %8972  ;;  %v4970_v0 = vadd.f32 1e-05, %v4840_v14  ;;  %v11726_v20 = vsub.f32 %v11318_v39, %v4227_v62  ;;  %4720 = vadd.xlane.f32.xlu0 %v4486_v53  ;;  %v12374_v14 = vld [vmem:[#allocation27_spill] sm:$0xff] }
 0x50d   : > { %v7408_v30 = vpack.c.bf16 %v5629_v2, %v5628_v17  ;;  %v5227_v23 = vmul.f32 %v8973_v51, %v12373_v43  ;;  %v4651_v6 = vpop.xlane.xlu1 %4650  ;;  %v4074_v33 = vpop.xlane.xlu0 %4073  ;;  %v5500_v37 = vadd.f32 %v11679_v34, %v5363_v61  ;;  %v12375_v17 = vld [vmem:[#allocation23_spill] sm:$0xff] }
 0x50e   : > { %8978 = vrsqrt.f32 %v4970_v0  ;;  %v4841_v21 = vmul.f32 0.0078125, %v4651_v6  ;;  %v4228_v11 = vmul.f32 0.0078125, %v4074_v33  ;;  %v4487_v29 = vmul.f32 %v11726_v20, %v11726_v20 }
 0x50f   : > { %7669 = vst [vmem:[%s11030_s21 + $0xf8] sm:$0xff] %v7408_v30   ;;  %v5364_v41 = vmul.f32 %v11666_v27, %v5227_v23  ;;  %v5630_v30 = vmax.f32 %v5500_v37, 0.0 }
 0x510   : > { %v8975_v36 = vpop.eup %8974  ;;  %v4971_v39 = vadd.f32 1e-05, %v4841_v21  ;;  %v11735_v62 = vsub.f32 %v12374_v14, %v4228_v11  ;;  %4722 = vadd.xlane.f32.xlu1 %v4487_v29 }
 0x511   : > { %v5501_v53 = vadd.f32 %v11679_v34, %v5364_v41  ;;  %v5228_v2 = vmul.f32 %v8975_v36, %v12375_v17  ;;  %v4653_v51 = vpop.xlane.xlu0 %4652  ;;  %v4076_v0 = vpop.xlane.xlu1 %4075  ;;  %v12376_v36 = vld [vmem:[#allocation24_spill] sm:$0xff] }
 0x512   : > { %8980 = vrsqrt.f32 %v4971_v39  ;;  %v4842_v43 = vmul.f32 0.0078125, %v4653_v51  ;;  %v4229_v6 = vmul.f32 0.0078125, %v4076_v0  ;;  %v4488_v61 = vmul.f32 %v11735_v62, %v11735_v62 }
 0x513   : > { %v5631_v23 = vmax.f32 %v5501_v53, 0.0  ;;  %v5365_v33 = vmul.f32 %v11666_v27, %v5228_v2 }
 0x514   : > { %v8977_v21 = vpop.eup %8976  ;;  %v4972_v11 = vadd.f32 1e-05, %v4842_v43  ;;  %v11743_v29 = vsub.f32 %v11351_v50, %v4229_v6  ;;  %4724 = vadd.xlane.f32.xlu0 %v4488_v61 }
 0x515   : > { %v7413_v41 = vpack.c.bf16 %v5631_v23, %v5630_v30  ;;  %v5229_v14 = vmul.f32 %v8977_v21, %v12376_v36  ;;  %v4655_v39 = vpop.xlane.xlu1 %4654  ;;  %v4078_v17 = vpop.xlane.xlu0 %4077  ;;  %v5502_v53 = vadd.f32 %v11679_v34, %v5365_v33  ;;  %v12377_v30 = vld [vmem:[#allocation25_spill] sm:$0xff] }
 0x516   : > { %8982 = vrsqrt.f32 %v4972_v11  ;;  %v4843_v51 = vmul.f32 0.0078125, %v4655_v39  ;;  %v4230_v0 = vmul.f32 0.0078125, %v4078_v17  ;;  %v4489_v37 = vmul.f32 %v11743_v29, %v11743_v29 }
 0x517   : > { %7670 = vst [vmem:[%s11030_s21 + $0x100] sm:$0xff] %v7413_v41   ;;  %v5366_v2 = vmul.f32 %v11666_v27, %v5229_v14  ;;  %v5632_v41 = vmax.f32 %v5502_v53, 0.0 }
 0x518   : > { %v8979_v43 = vpop.eup %8978  ;;  %v4973_v50 = vadd.f32 1e-05, %v4843_v51  ;;  %v11752_v6 = vsub.f32 %v11364_v45, %v4230_v0  ;;  %4726 = vadd.xlane.f32.xlu1 %v4489_v37 }
 0x519   : > { %v5503_v61 = vadd.f32 %v11679_v34, %v5366_v2  ;;  %v5230_v23 = vmul.f32 %v8979_v43, %v12377_v30  ;;  %v4657_v21 = vpop.xlane.xlu0 %4656  ;;  %v4080_v11 = vpop.xlane.xlu1 %4079  ;;  %v12378_v2 = vld [vmem:[#allocation26_spill] sm:$0xff] }
 0x51a   : > { %8984 = vrsqrt.f32 %v4973_v50  ;;  %v4844_v36 = vmul.f32 0.0078125, %v4657_v21  ;;  %v4231_v39 = vmul.f32 0.0078125, %v4080_v11  ;;  %v4490_v33 = vmul.f32 %v11752_v6, %v11752_v6 }
 0x51b   : > { %v5633_v14 = vmax.f32 %v5503_v61, 0.0  ;;  %v5367_v17 = vmul.f32 %v11666_v27, %v5230_v23 }
 0x51c   : > { %v8981_v45 = vpop.eup %8980  ;;  %v4974_v51 = vadd.f32 1e-05, %v4844_v36  ;;  %v11760_v0 = vsub.f32 %v11374_v63, %v4231_v39  ;;  %4728 = vadd.xlane.f32.xlu0 %v4490_v33 }
 0x51d   : > { %v7418_v37 = vpack.c.bf16 %v5633_v14, %v5632_v41  ;;  %v5231_v43 = vmul.f32 %v8981_v45, %v12378_v2  ;;  %v4659_v50 = vpop.xlane.xlu1 %4658  ;;  %v4082_v30 = vpop.xlane.xlu0 %4081  ;;  %v5504_v61 = vadd.f32 %v11679_v34, %v5367_v17  ;;  %v12379_v41 = vld [vmem:[#allocation41_spill] sm:$0xff] }
 0x51e   : > { %8986 = vrsqrt.f32 %v4974_v51  ;;  %v4845_v21 = vmul.f32 0.0078125, %v4659_v50  ;;  %v4232_v11 = vmul.f32 0.0078125, %v4082_v30  ;;  %v4491_v53 = vmul.f32 %v11760_v0, %v11760_v0 }
 0x51f   : > { %7671 = vst [vmem:[%s11030_s21 + $0x108] sm:$0xff] %v7418_v37   ;;  %v5368_v23 = vmul.f32 %v11666_v27, %v5231_v43  ;;  %v5634_v37 = vmax.f32 %v5504_v61, 0.0 }
 0x520   : > { %v8983_v36 = vpop.eup %8982  ;;  %v4975_v63 = vadd.f32 1e-05, %v4845_v21  ;;  %v11769_v39 = vsub.f32 %v11387_v18, %v4232_v11  ;;  %4730 = vadd.xlane.f32.xlu1 %v4491_v53 }
 0x521   : > { %v5505_v33 = vadd.f32 %v11679_v34, %v5368_v23  ;;  %v5232_v14 = vmul.f32 %v8983_v36, %v12379_v41  ;;  %v4661_v45 = vpop.xlane.xlu0 %4660  ;;  %v4084_v51 = vpop.xlane.xlu1 %4083  ;;  %v12380_v23 = vld [vmem:[#allocation28_spill] sm:$0xff] }
 0x522   : > { %8988 = vrsqrt.f32 %v4975_v63  ;;  %v4846_v2 = vmul.f32 0.0078125, %v4661_v45  ;;  %v4233_v50 = vmul.f32 0.0078125, %v4084_v51  ;;  %v4492_v17 = vmul.f32 %v11769_v39, %v11769_v39 }
 0x523   : > { %v5635_v43 = vmax.f32 %v5505_v33, 0.0  ;;  %v5369_v30 = vmul.f32 %v11666_v27, %v5232_v14 }
 0x524   : > { %v8985_v18 = vpop.eup %8984  ;;  %v4976_v21 = vadd.f32 1e-05, %v4846_v2  ;;  %v11777_v11 = vsub.f32 %v11397_v25, %v4233_v50  ;;  %4732 = vadd.xlane.f32.xlu0 %v4492_v17 }
 0x525   : > { %v7423_v53 = vpack.c.bf16 %v5635_v43, %v5634_v37  ;;  %v5233_v36 = vmul.f32 %v8985_v18, %v12380_v23  ;;  %v4663_v63 = vpop.xlane.xlu1 %4662  ;;  %v4086_v41 = vpop.xlane.xlu0 %4085  ;;  %v5506_v33 = vadd.f32 %v11679_v34, %v5369_v30  ;;  %v12381_v37 = vld [vmem:[#allocation33_spill] sm:$0xff] }
 0x526   : > { %8990 = vrsqrt.f32 %v4976_v21  ;;  %v4847_v45 = vmul.f32 0.0078125, %v4663_v63  ;;  %v4234_v51 = vmul.f32 0.0078125, %v4086_v41  ;;  %v4493_v61 = vmul.f32 %v11777_v11, %v11777_v11 }
 0x527   : > { %7672 = vst [vmem:[%s11030_s21 + $0x110] sm:$0xff] %v7423_v53   ;;  %v5370_v14 = vmul.f32 %v11666_v27, %v5233_v36  ;;  %v5636_v53 = vmax.f32 %v5506_v33, 0.0 }
 0x528   : > { %v8987_v2 = vpop.eup %8986  ;;  %v4977_v25 = vadd.f32 1e-05, %v4847_v45  ;;  %v11786_v50 = vsub.f32 %v11410_v15, %v4234_v51  ;;  %4734 = vadd.xlane.f32.xlu1 %v4493_v61 }
 0x529   : > { %v5507_v17 = vadd.f32 %v11679_v34, %v5370_v14  ;;  %v5234_v43 = vmul.f32 %v8987_v2, %v12381_v37  ;;  %v4665_v18 = vpop.xlane.xlu0 %4664  ;;  %v4088_v21 = vpop.xlane.xlu1 %4087  ;;  %v12382_v14 = vld [vmem:[#allocation29_spill] sm:$0xff] }
 0x52a   : > { %8992 = vrsqrt.f32 %v4977_v25  ;;  %v4848_v23 = vmul.f32 0.0078125, %v4665_v18  ;;  %v4235_v63 = vmul.f32 0.0078125, %v4088_v21  ;;  %v4494_v30 = vmul.f32 %v11786_v50, %v11786_v50 }
 0x52b   : > { %v5637_v36 = vmax.f32 %v5507_v17, 0.0  ;;  %v5371_v41 = vmul.f32 %v11666_v27, %v5234_v43 }
 0x52c   : > { %v8989_v15 = vpop.eup %8988  ;;  %v4978_v45 = vadd.f32 1e-05, %v4848_v23  ;;  %v11794_v51 = vsub.f32 %v11420_v55, %v4235_v63  ;;  %4736 = vadd.xlane.f32.xlu0 %v4494_v30 }
 0x52d   : > { %v7428_v61 = vpack.c.bf16 %v5637_v36, %v5636_v53  ;;  %v5235_v2 = vmul.f32 %v8989_v15, %v12382_v14  ;;  %v4667_v25 = vpop.xlane.xlu1 %4666  ;;  %v4090_v37 = vpop.xlane.xlu0 %4089  ;;  %v5508_v17 = vadd.f32 %v11679_v34, %v5371_v41 }
 0x52e   : > { %8994 = vrsqrt.f32 %v4978_v45  ;;  %v4849_v18 = vmul.f32 0.0078125, %v4667_v25  ;;  %v4236_v21 = vmul.f32 0.0078125, %v4090_v37  ;;  %v4495_v33 = vmul.f32 %v11794_v51, %v11794_v51 }
 0x52f   : > { %7673 = vst [vmem:[%s11030_s21 + $0x118] sm:$0xff] %v7428_v61   ;;  %v5372_v43 = vmul.f32 %v11666_v27, %v5235_v2  ;;  %v5638_v61 = vmax.f32 %v5508_v17, 0.0 }
 0x530   : > { %v8991_v23 = vpop.eup %8990  ;;  %v4979_v55 = vadd.f32 1e-05, %v4849_v18  ;;  %v11803_v63 = vsub.f32 %v11438_v57, %v4236_v21  ;;  %4738 = vadd.xlane.f32.xlu1 %v4495_v33 }
 0x531   : > { %v5509_v30 = vadd.f32 %v11679_v34, %v5372_v43  ;;  %v5236_v53 = vmul.f32 %v8991_v23, %v11395_v19  ;;  %v4092_v36 = vpop.xlane.xlu1 %4091 }
 0x532   : > { %8996 = vrsqrt.f32 %v4979_v55  ;;  %v4669_v15 = vpop.xlane.xlu0 %4668  ;;  %v4237_v45 = vmul.f32 0.0078125, %v4092_v36  ;;  %v4496_v41 = vmul.f32 %v11803_v63, %v11803_v63 }
 0x533   : > { %v5639_v14 = vmax.f32 %v5509_v30, 0.0  ;;  %v5373_v2 = vmul.f32 %v11666_v27, %v5236_v53  ;;  %v4850_v25 = vmul.f32 0.0078125, %v4669_v15 }
 0x534   : > { %v8993_v57 = vpop.eup %8992  ;;  %v11811_v37 = vsub.f32 %v11443_v26, %v4237_v45  ;;  %4740 = vadd.xlane.f32.xlu0 %v4496_v41 }
 0x535   : > { %v7433_v18 = vpack.c.bf16 %v5639_v14, %v5638_v61  ;;  %v5237_v19 = vmul.f32 %v8993_v57, %v11406_v24  ;;  %v4980_v21 = vadd.f32 1e-05, %v4850_v25  ;;  %v5510_v33 = vadd.f32 %v11679_v34, %v5373_v2 }
 0x536   : > { %v4671_v43 = vpop.xlane.xlu1 %4670  ;;  %v4094_v23 = vpop.xlane.xlu0 %4093  ;;  %v4497_v17 = vmul.f32 %v11811_v37, %v11811_v37 }
 0x537   : > { %7674 = vst [vmem:[%s11030_s21 + $0x120] sm:$0xff] %v7433_v18   ;;  %v5374_v55 = vmul.f32 %v11666_v27, %v5237_v19  ;;  %8998 = vrsqrt.f32 %v4980_v21  ;;  %v4851_v30 = vmul.f32 0.0078125, %v4671_v43  ;;  %v4238_v26 = vmul.f32 0.0078125, %v4094_v23 }
 0x538   : > { %v8995_v53 = vpop.eup %8994  ;;  %4742 = vadd.xlane.f32.xlu1 %v4497_v17  ;;  %v5640_v45 = vmax.f32 %v5510_v33, 0.0 }
 0x539   : > { %v5511_v36 = vadd.f32 %v11679_v34, %v5374_v55  ;;  %v5238_v24 = vmul.f32 %v8995_v53, %v11418_v32  ;;  %v4981_v15 = vadd.f32 1e-05, %v4851_v30  ;;  %v11822_v41 = vsub.f32 %v11459_v60, %v4238_v26 }
 0x53a   : > { %v4673_v61 = vpop.xlane.xlu0 %4672  ;;  %v4096_v14 = vpop.xlane.xlu1 %4095 }
 0x53b   : > { %v5641_v2 = vmax.f32 %v5511_v36, 0.0  ;;  %v5375_v25 = vmul.f32 %v11666_v27, %v5238_v24  ;;  %9000 = vrsqrt.f32 %v4981_v15  ;;  %v4852_v57 = vmul.f32 0.0078125, %v4673_v61 }
 0x53c   : > { %v8997_v18 = vpop.eup %8996  ;;  %v4239_v19 = vmul.f32 0.0078125, %v4096_v14  ;;  %v4498_v21 = vmul.f32 %v11822_v41, %v11822_v41 }
 0x53d   : > { %v7438_v43 = vpack.c.bf16 %v5641_v2, %v5640_v45  ;;  %v5239_v32 = vmul.f32 %v8997_v18, %v11429_v49  ;;  %v4982_v33 = vadd.f32 1e-05, %v4852_v57  ;;  %v5512_v60 = vadd.f32 %v11679_v34, %v5375_v25 }
 0x53e   : > { %v11830_v23 = vsub.f32 %v11464_v9, %v4239_v19  ;;  %4744 = vadd.xlane.f32.xlu0 %v4498_v21  ;;  %v4675_v17 = vpop.xlane.xlu1 %4674  ;;  %v4098_v55 = vpop.xlane.xlu0 %4097 }
 0x53f   : > { %7675 = vst [vmem:[%s11030_s21 + $0x128] sm:$0xff] %v7438_v43   ;;  %v5376_v30 = vmul.f32 %v11666_v27, %v5239_v32  ;;  %9002 = vrsqrt.f32 %v4982_v33  ;;  %v4853_v53 = vmul.f32 0.0078125, %v4675_v17  ;;  %v4240_v26 = vmul.f32 0.0078125, %v4098_v55 }
 0x540   : > { %v4499_v36 = vmul.f32 %v11830_v23, %v11830_v23  ;;  %v5642_v45 = vmax.f32 %v5512_v60, 0.0 }
 0x541   : > { %v8999_v24 = vpop.eup %8998  ;;  %v5513_v49 = vadd.f32 %v11679_v34, %v5376_v30  ;;  %v4983_v15 = vadd.f32 1e-05, %v4853_v53  ;;  %v11839_v61 = vsub.f32 %v11480_v58, %v4240_v26  ;;  %v12383_v58 = vld [vmem:[#allocation30_spill] sm:$0xff] }
 0x542   : > { %v5240_v9 = vmul.f32 %v8999_v24, %v11446_v10  ;;  %4746 = vadd.xlane.f32.xlu1 %v4499_v36  ;;  %v4677_v14 = vpop.xlane.xlu0 %4676  ;;  %v4100_v2 = vpop.xlane.xlu1 %4099 }
 0x543   : > { %v5643_v25 = vmax.f32 %v5513_v49, 0.0  ;;  %9004 = vrsqrt.f32 %v4983_v15  ;;  %v4854_v57 = vmul.f32 0.0078125, %v4677_v14  ;;  %v4241_v18 = vmul.f32 0.0078125, %v4100_v2 }
 0x544   : > { %v5377_v19 = vmul.f32 %v11666_v27, %v5240_v9  ;;  %v4500_v21 = vmul.f32 %v11839_v61, %v11839_v61  ;;  %v12384_v9 = vld [vmem:[#allocation31_spill] sm:$0xff] }
 0x545   : > { %v9001_v43 = vpop.eup %9000  ;;  %v7443_v32 = vpack.c.bf16 %v5643_v25, %v5642_v45  ;;  %v4984_v33 = vadd.f32 1e-05, %v4854_v57  ;;  %v11845_v10 = vsub.f32 %v11489_v59, %v4241_v18 }
 0x546   : > { %v5241_v60 = vmul.f32 %v9001_v43, %v12383_v58  ;;  %4748 = vadd.xlane.f32.xlu0 %v4500_v21  ;;  %v4679_v17 = vpop.xlane.xlu1 %4678  ;;  %v4102_v55 = vpop.xlane.xlu0 %4101  ;;  %v5514_v36 = vadd.f32 %v11679_v34, %v5377_v19 }
 0x547   : > { %7676 = vst [vmem:[%s11030_s21 + $0x130] sm:$0xff] %v7443_v32   ;;  %9006 = vrsqrt.f32 %v4984_v33  ;;  %v4855_v30 = vmul.f32 0.0078125, %v4679_v17  ;;  %v4242_v53 = vmul.f32 0.0078125, %v4102_v55  ;;  %v4501_v26 = vmul.f32 %v11845_v10, %v11845_v10  ;;  %v12385_v17 = vld [vmem:[#allocation32_spill] sm:$0xff] }
 0x548   : > { %v5378_v24 = vmul.f32 %v11666_v27, %v5241_v60  ;;  %v5644_v21 = vmax.f32 %v5514_v36, 0.0 }
 0x549   : > { %v9003_v49 = vpop.eup %9002  ;;  %v4985_v15 = vadd.f32 1e-05, %v4855_v30  ;;  %v11854_v59 = vsub.f32 %v11502_v5, %v4242_v53  ;;  %4750 = vadd.xlane.f32.xlu1 %v4501_v26 }
 0x54a   : > { %v5515_v45 = vadd.f32 %v11679_v34, %v5378_v24  ;;  %v5242_v14 = vmul.f32 %v9003_v49, %v12384_v9  ;;  %v4681_v2 = vpop.xlane.xlu0 %4680  ;;  %v4104_v25 = vpop.xlane.xlu1 %4103 }
 0x54b   : > { %9008 = vrsqrt.f32 %v4985_v15  ;;  %v4856_v57 = vmul.f32 0.0078125, %v4681_v2  ;;  %v4243_v18 = vmul.f32 0.0078125, %v4104_v25  ;;  %v4502_v19 = vmul.f32 %v11854_v59, %v11854_v59  ;;  %v12386_v2 = vld [vmem:[#allocation34_spill] sm:$0xff] }
 0x54c   : > { %v5645_v43 = vmax.f32 %v5515_v45, 0.0  ;;  %v5379_v32 = vmul.f32 %v11666_v27, %v5242_v14 }
 0x54d   : > { %v9005_v5 = vpop.eup %9004  ;;  %v4986_v33 = vadd.f32 1e-05, %v4856_v57  ;;  %v11862_v58 = vsub.f32 %v11512_v38, %v4243_v18  ;;  %4752 = vadd.xlane.f32.xlu0 %v4502_v19 }
 0x54e   : > { %v7448_v60 = vpack.c.bf16 %v5645_v43, %v5644_v21  ;;  %v5243_v55 = vmul.f32 %v9005_v5, %v12385_v17  ;;  %v4683_v30 = vpop.xlane.xlu1 %4682  ;;  %v4106_v53 = vpop.xlane.xlu0 %4105  ;;  %v5516_v49 = vadd.f32 %v11679_v34, %v5379_v32 }
 0x54f   : > { %9010 = vrsqrt.f32 %v4986_v33  ;;  %v4857_v26 = vmul.f32 0.0078125, %v4683_v30  ;;  %v4244_v24 = vmul.f32 0.0078125, %v4106_v53  ;;  %v4503_v36 = vmul.f32 %v11862_v58, %v11862_v58  ;;  %v12387_v30 = vld [vmem:[#allocation35_spill] sm:$0xff] }
 0x550   : > { %7677 = vst [vmem:[%s11030_s21 + $0x138] sm:$0xff] %v7448_v60   ;;  %v5380_v15 = vmul.f32 %v11666_v27, %v5243_v55  ;;  %v5646_v32 = vmax.f32 %v5516_v49, 0.0 }
 0x551   : > { %v9007_v45 = vpop.eup %9006  ;;  %v4987_v38 = vadd.f32 1e-05, %v4857_v26  ;;  %v11871_v9 = vsub.f32 %v11525_v1, %v4244_v24  ;;  %4754 = vadd.xlane.f32.xlu1 %v4503_v36 }
 0x552   : > { %v5517_v14 = vadd.f32 %v11679_v34, %v5380_v15  ;;  %v5244_v25 = vmul.f32 %v9007_v45, %v12386_v2  ;;  %v4685_v57 = vpop.xlane.xlu0 %4684  ;;  %v4108_v18 = vpop.xlane.xlu1 %4107  ;;  %v12388_v2 = vld [vmem:[#allocation40_spill] sm:$0xff] }
 0x553   : > { %9012 = vrsqrt.f32 %v4987_v38  ;;  %v4858_v19 = vmul.f32 0.0078125, %v4685_v57  ;;  %v4245_v21 = vmul.f32 0.0078125, %v4108_v18  ;;  %v4504_v43 = vmul.f32 %v11871_v9, %v11871_v9  ;;  %v12389_v18 = vld [vmem:[#allocation36_spill] sm:$0xff] }
 0x554   : > { %v5647_v5 = vmax.f32 %v5517_v14, 0.0  ;;  %v5381_v33 = vmul.f32 %v11666_v27, %v5244_v25 }
 0x555   : > { %v9009_v1 = vpop.eup %9008  ;;  %v4988_v60 = vadd.f32 1e-05, %v4858_v19  ;;  %v11879_v17 = vsub.f32 %v11535_v12, %v4245_v21  ;;  %4756 = vadd.xlane.f32.xlu0 %v4504_v43 }
 0x556   : > { %v7453_v55 = vpack.c.bf16 %v5647_v5, %v5646_v32  ;;  %v5245_v53 = vmul.f32 %v9009_v1, %v12387_v30  ;;  %v4687_v26 = vpop.xlane.xlu1 %4686  ;;  %v4110_v24 = vpop.xlane.xlu0 %4109  ;;  %v5518_v45 = vadd.f32 %v11679_v34, %v5381_v33 }
 0x557   : > { %9014 = vrsqrt.f32 %v4988_v60  ;;  %v4859_v36 = vmul.f32 0.0078125, %v4687_v26  ;;  %v4246_v15 = vmul.f32 0.0078125, %v4110_v24  ;;  %v4505_v49 = vmul.f32 %v11879_v17, %v11879_v17  ;;  %v12390_v26 = vld [vmem:[#allocation42_spill] sm:$0xff] }
 0x558   : > { %7678 = vst [vmem:[%s11030_s21 + $0x140] sm:$0xff] %v7453_v55   ;;  %v5382_v38 = vmul.f32 %v11666_v27, %v5245_v53  ;;  %v5648_v1 = vmax.f32 %v5518_v45, 0.0 }
 0x559   : > { %v9011_v14 = vpop.eup %9010  ;;  %v4989_v12 = vadd.f32 1e-05, %v4859_v36  ;;  %v11888_v25 = vsub.f32 %v12388_v2, %v4246_v15  ;;  %4758 = vadd.xlane.f32.xlu1 %v4505_v49  ;;  %v12391_v15 = vld [vmem:[#allocation37_spill] sm:$0xff] }
 0x55a   : > { %v5519_v57 = vadd.f32 %v11679_v34, %v5382_v38  ;;  %v5246_v19 = vmul.f32 %v9011_v14, %v12389_v18  ;;  %v4689_v21 = vpop.xlane.xlu0 %4688  ;;  %v4112_v43 = vpop.xlane.xlu1 %4111 }
 0x55b   : > { %9016 = vrsqrt.f32 %v4989_v12  ;;  %v4860_v32 = vmul.f32 0.0078125, %v4689_v21  ;;  %v4247_v5 = vmul.f32 0.0078125, %v4112_v43  ;;  %v4506_v33 = vmul.f32 %v11888_v25, %v11888_v25 }
 0x55c   : > { %v5649_v60 = vmax.f32 %v5519_v57, 0.0  ;;  %v5383_v55 = vmul.f32 %v11666_v27, %v5246_v19 }
 0x55d   : > { %v9013_v30 = vpop.eup %9012  ;;  %v4990_v53 = vadd.f32 1e-05, %v4860_v32  ;;  %v11896_v24 = vsub.f32 %v12390_v26, %v4247_v5  ;;  %4760 = vadd.xlane.f32.xlu0 %v4506_v33  ;;  %v12392_v5 = vld [vmem:[#allocation38_spill] sm:$0xff] }
 0x55e   : > { %v7458_v36 = vpack.c.bf16 %v5649_v60, %v5648_v1  ;;  %v5247_v49 = vmul.f32 %v9013_v30, %v12391_v15  ;;  %v4691_v38 = vpop.xlane.xlu1 %4690  ;;  %v4114_v14 = vpop.xlane.xlu0 %4113  ;;  %v5520_v57 = vadd.f32 %v11679_v34, %v5383_v55 }
 0x55f   : > { %9018 = vrsqrt.f32 %v4990_v53  ;;  %v4861_v12 = vmul.f32 0.0078125, %v4691_v38  ;;  %v4248_v2 = vmul.f32 0.0078125, %v4114_v14  ;;  %v4507_v45 = vmul.f32 %v11896_v24, %v11896_v24  ;;  %v12393_v14 = vld [vmem:[#allocation39_spill] sm:$0xff] }
 0x560   : > { %7679 = vst [vmem:[%s11030_s21 + $0x148] sm:$0xff] %v7458_v36   ;;  %v5384_v18 = vmul.f32 %v11666_v27, %v5247_v49  ;;  %v5650_v55 = vmax.f32 %v5520_v57, 0.0 }
 0x561   : > { %v9015_v19 = vpop.eup %9014  ;;  %v4991_v21 = vadd.f32 1e-05, %v4861_v12  ;;  %v11905_v43 = vsub.f32 %v11571_v44, %v4248_v2  ;;  %4762 = vadd.xlane.f32.xlu1 %v4507_v45 }
 0x562   : > { %v5521_v32 = vadd.f32 %v11679_v34, %v5384_v18  ;;  %v5248_v33 = vmul.f32 %v9015_v19, %v12392_v5  ;;  %v4116_v1 = vpop.xlane.xlu1 %4115 }
 0x563   : > { %9020 = vrsqrt.f32 %v4991_v21  ;;  %v4249_v60 = vmul.f32 0.0078125, %v4116_v1  ;;  %v4508_v30 = vmul.f32 %v11905_v43, %v11905_v43 }
 0x564   : > { %v5651_v53 = vmax.f32 %v5521_v32, 0.0  ;;  %v5385_v26 = vmul.f32 %v11666_v27, %v5248_v33  ;;  %v4118_v36 = vpop.xlane.xlu0 %4117 }
 0x565   : > { %v9017_v15 = vpop.eup %9016  ;;  %v11913_v44 = vsub.f32 %v11578_v56, %v4249_v60  ;;  %4764 = vadd.xlane.f32.xlu0 %v4508_v30  ;;  %v4250_v49 = vmul.f32 0.0078125, %v4118_v36  ;;  %v12394_v60 = vld [vmem:[#allocation5_spill] sm:$0xff] }
 0x566   : > { %v7463_v38 = vpack.c.bf16 %v5651_v53, %v5650_v55  ;;  %v5249_v12 = vmul.f32 %v9017_v15, %v12393_v14  ;;  %v4120_v2 = vpop.xlane.xlu1 %4119  ;;  %v5522_v19 = vadd.f32 %v11679_v34, %v5385_v26 }
 0x567   : > { %v11917_v45 = vsub.f32 %v11589_v35, %v4250_v49  ;;  %v4251_v18 = vmul.f32 0.0078125, %v4120_v2  ;;  %v4509_v57 = vmul.f32 %v11913_v44, %v11913_v44 }
 0x568   : > { %7680 = vst [vmem:[%s11030_s21 + $0x150] sm:$0xff] %v7463_v38   ;;  %v5386_v21 = vmul.f32 %v11666_v27, %v5249_v12  ;;  %v4693_v56 = vpop.xlane.xlu0 %4692  ;;  %v5652_v15 = vmax.f32 %v5522_v19, 0.0 }
 0x569   : > { %v9019_v32 = vpop.eup %9018  ;;  %v11925_v5 = vsub.f32 %v11598_v31, %v4251_v18  ;;  %4766 = vadd.xlane.f32.xlu1 %v4509_v57  ;;  %v4862_v33 = vmul.f32 0.0078125, %v4693_v56  ;;  %v4510_v35 = vmul.f32 %v11917_v45, %v11917_v45  ;;  %v12395_v57 = vld [vmem:[#allocation6_spill] sm:$0xff] }
 0x56a   : > { %v5523_v1 = vadd.f32 %v11679_v34, %v5386_v21  ;;  %v5250_v30 = vmul.f32 %v9019_v32, %v12394_v60  ;;  %v4695_v55 = vpop.xlane.xlu1 %4694 }
 0x56b   : > { %v4992_v53 = vadd.f32 1e-05, %v4862_v33  ;;  %v4863_v36 = vmul.f32 0.0078125, %v4695_v55  ;;  %4768 = vadd.xlane.f32.xlu0 %v4510_v35  ;;  %v4511_v26 = vmul.f32 %v11925_v5, %v11925_v5 }
 0x56c   : > { %v5653_v31 = vmax.f32 %v5523_v1, 0.0  ;;  %v5387_v49 = vmul.f32 %v11666_v27, %v5250_v30  ;;  %v4697_v38 = vpop.xlane.xlu0 %4696 }
 0x56d   : > { %v9021_v14 = vpop.eup %9020  ;;  %9022 = vrsqrt.f32 %v4992_v53  ;;  %v4993_v12 = vadd.f32 1e-05, %v4863_v36  ;;  %v4864_v2 = vmul.f32 0.0078125, %v4697_v38  ;;  %4770 = vadd.xlane.f32.xlu1 %v4511_v26 }
 0x56e   : > { %v7468_v18 = vpack.c.bf16 %v5653_v31, %v5652_v15  ;;  %v5251_v21 = vmul.f32 %v9021_v14, %v12395_v57  ;;  %v4699_v56 = vpop.xlane.xlu1 %4698  ;;  %v5524_v35 = vadd.f32 %v11679_v34, %v5387_v49 }
 0x56f   : > { %9024 = vrsqrt.f32 %v4993_v12  ;;  %v4994_v32 = vadd.f32 1e-05, %v4864_v2  ;;  %v4865_v33 = vmul.f32 0.0078125, %v4699_v56 }
 0x570   : > { %7681 = vst [vmem:[%s11030_s21 + $0x158] sm:$0xff] %v7468_v18   ;;  %v5388_v19 = vmul.f32 %v11666_v27, %v5251_v21  ;;  %v5654_v53 = vmax.f32 %v5524_v35, 0.0 }
 0x571   : > { %9026 = vrsqrt.f32 %v4994_v32  ;;  %v4995_v1 = vadd.f32 1e-05, %v4865_v33  ;;  %v4701_v60 = vpop.xlane.xlu0 %4700 }
 0x572   : > { %v5525_v30 = vadd.f32 %v11679_v34, %v5388_v19  ;;  %v4866_v55 = vmul.f32 0.0078125, %v4701_v60 }
 0x573   : > { %9028 = vrsqrt.f32 %v4995_v1 }
 0x574   : > { %v5655_v36 = vmax.f32 %v5525_v30, 0.0  ;;  %v4996_v26 = vadd.f32 1e-05, %v4866_v55 }
 0x575   : > { %v4703_v15 = vpop.xlane.xlu1 %4702 }
 0x576   : > { %v7473_v31 = vpack.c.bf16 %v5655_v36, %v5654_v53  ;;  %9030 = vrsqrt.f32 %v4996_v26  ;;  %v4867_v38 = vmul.f32 0.0078125, %v4703_v15 }
 0x577   : > { %v9023_v14 = vpop.eup %9022 }
 0x578   : > { %7682 = vst [vmem:[%s11030_s21 + $0x160] sm:$0xff] %v7473_v31   ;;  %v5252_v49 = vmul.f32 %v9023_v14, %v11586_v8  ;;  %v4997_v12 = vadd.f32 1e-05, %v4867_v38 }
 0x579   : > { %v9025_v2 = vpop.eup %9024  ;;  %v4705_v18 = vpop.xlane.xlu0 %4704 }
 0x57a   : > { %v5389_v57 = vmul.f32 %v11666_v27, %v5252_v49  ;;  %v5253_v21 = vmul.f32 %v9025_v2, %v11595_v54  ;;  %9032 = vrsqrt.f32 %v4997_v12  ;;  %v4868_v56 = vmul.f32 0.0078125, %v4705_v18 }
 0x57b   : > { %v9027_v32 = vpop.eup %9026 }
 0x57c   : > { %v5526_v33 = vadd.f32 %v11679_v34, %v5389_v57  ;;  %v5390_v35 = vmul.f32 %v11666_v27, %v5253_v21  ;;  %v5254_v19 = vmul.f32 %v9027_v32, %v11603_v46  ;;  %v4998_v1 = vadd.f32 1e-05, %v4868_v56 }
 0x57d   : > { %v9029_v60 = vpop.eup %9028  ;;  %v4707_v30 = vpop.xlane.xlu1 %4706 }
 0x57e   : > { %v5527_v8 = vadd.f32 %v11679_v34, %v5390_v35  ;;  %v5391_v55 = vmul.f32 %v11666_v27, %v5254_v19  ;;  %v5255_v53 = vmul.f32 %v9029_v60, %v11612_v40  ;;  %9034 = vrsqrt.f32 %v4998_v1  ;;  %v11960_v60 = vld [vmem:[%s12160_s7] ss:$0 sm:$0xff] }
 0x57f   : > { %v4869_v54 = vmul.f32 0.0078125, %v4707_v30  ;;  %v5656_v26 = vmax.f32 %v5526_v33, 0.0 }
 0x580   : > { %v9031_v36 = vpop.eup %9030  ;;  %v5657_v15 = vmax.f32 %v5527_v8, 0.0  ;;  %v5528_v31 = vadd.f32 %v11679_v34, %v5391_v55  ;;  %v5392_v38 = vmul.f32 %v11666_v27, %v5255_v53 }
 0x581   : > { %v5256_v46 = vmul.f32 %v9031_v36, %v11623_v22  ;;  %v4999_v14 = vadd.f32 1e-05, %v4869_v54  ;;  %v4709_v49 = vpop.xlane.xlu0 %4708 }
 0x582   : > { %v7478_v12 = vpack.c.bf16 %v5657_v15, %v5656_v26  ;;  %v5529_v2 = vadd.f32 %v11679_v34, %v5392_v38  ;;  %v4870_v18 = vmul.f32 0.0078125, %v4709_v49  ;;  %v5658_v21 = vmax.f32 %v5528_v31, 0.0 }
 0x583   : > { %v5393_v40 = vmul.f32 %v11666_v27, %v5256_v46  ;;  %9036 = vrsqrt.f32 %v4999_v14 }
 0x584   : > { %v9033_v57 = vpop.eup %9032  ;;  %7683 = vst [vmem:[%s11030_s21 + $0x168] sm:$0xff] %v7478_v12   ;;  %v5659_v56 = vmax.f32 %v5529_v2, 0.0  ;;  %v5000_v32 = vadd.f32 1e-05, %v4870_v18 }
 0x585   : > { %v5257_v33 = vmul.f32 %v9033_v57, %v11631_v47  ;;  %v4711_v35 = vpop.xlane.xlu1 %4710  ;;  %v5530_v1 = vadd.f32 %v11679_v34, %v5393_v40  ;;  %v11967_v47 = vld [vmem:[%s12161_s8] ss:$0 sm:$0xff] }
 0x586   : > { %v7483_v19 = vpack.c.bf16 %v5659_v56, %v5658_v21  ;;  %9038 = vrsqrt.f32 %v5000_v32  ;;  %v4871_v22 = vmul.f32 0.0078125, %v4711_v35 }
 0x587   : > { %v5394_v27 = vmul.f32 %v11960_v60, %v5257_v33  ;;  %v5660_v36 = vmax.f32 %v5530_v1, 0.0 }
 0x588   : > { %7684 = vst [vmem:[%s11030_s21 + $0x170] sm:$0xff] %v7483_v19   ;;  %v5001_v30 = vadd.f32 1e-05, %v4871_v22  ;;  %v9035_v8 = vpop.eup %9034 }
 0x589   : > { %v5531_v55 = vadd.f32 %v11967_v47, %v5394_v27  ;;  %v4713_v53 = vpop.xlane.xlu0 %4712  ;;  %v5258_v34 = vmul.f32 %v9035_v8, %v11640_v42 }
 0x58a   : > { %9040 = vrsqrt.f32 %v5001_v30  ;;  %v4872_v54 = vmul.f32 0.0078125, %v4713_v53 }
 0x58b   : > { %v5661_v26 = vmax.f32 %v5531_v55, 0.0  ;;  %v5395_v15 = vmul.f32 %v11960_v60, %v5258_v34 }
 0x58c   : > { %v5002_v31 = vadd.f32 1e-05, %v4872_v54 }
 0x58d   : > { %v9037_v38 = vpop.eup %9036  ;;  %v7488_v46 = vpack.c.bf16 %v5661_v26, %v5660_v36  ;;  %v4715_v14 = vpop.xlane.xlu1 %4714  ;;  %v5532_v18 = vadd.f32 %v11967_v47, %v5395_v15 }
 0x58e   : > { %v5259_v49 = vmul.f32 %v9037_v38, %v11648_v48  ;;  %9042 = vrsqrt.f32 %v5002_v31  ;;  %v4873_v12 = vmul.f32 0.0078125, %v4715_v14 }
 0x58f   : > { %7685 = vst [vmem:[%s11030_s21 + $0x178] sm:$0xff] %v7488_v46   ;;  %v5662_v35 = vmax.f32 %v5532_v18, 0.0 }
 0x590   : > { %v9039_v2 = vpop.eup %9038  ;;  %v5396_v42 = vmul.f32 %v11960_v60, %v5259_v49  ;;  %v5003_v40 = vadd.f32 1e-05, %v4873_v12 }
 0x591   : > { %v5260_v57 = vmul.f32 %v9039_v2, %v11657_v7  ;;  %v4717_v21 = vpop.xlane.xlu0 %4716 }
 0x592   : > { %v5533_v56 = vadd.f32 %v11967_v47, %v5396_v42  ;;  %9044 = vrsqrt.f32 %v5003_v40  ;;  %v4874_v32 = vmul.f32 0.0078125, %v4717_v21 }
 0x593   : > { %v5397_v33 = vmul.f32 %v11960_v60, %v5260_v57 }
 0x594   : > { %v9041_v48 = vpop.eup %9040  ;;  %v5663_v19 = vmax.f32 %v5533_v56, 0.0  ;;  %v5004_v22 = vadd.f32 1e-05, %v4874_v32 }
 0x595   : > { %v5261_v1 = vmul.f32 %v9041_v48, %v11670_v13  ;;  %v4719_v27 = vpop.xlane.xlu1 %4718  ;;  %v5534_v7 = vadd.f32 %v11967_v47, %v5397_v33 }
 0x596   : > { %v7493_v30 = vpack.c.bf16 %v5663_v19, %v5662_v35  ;;  %9046 = vrsqrt.f32 %v5004_v22  ;;  %v4875_v8 = vmul.f32 0.0078125, %v4719_v27 }
 0x597   : > { %v5398_v55 = vmul.f32 %v11960_v60, %v5261_v1  ;;  %v5664_v13 = vmax.f32 %v5534_v7, 0.0 }
 0x598   : > { %v9043_v53 = vpop.eup %9042  ;;  %7686 = vst [vmem:[%s11030_s21 + $0x180] sm:$0xff] %v7493_v30   ;;  %v5005_v34 = vadd.f32 1e-05, %v4875_v8 }
 0x599   : > { %v5535_v54 = vadd.f32 %v11967_v47, %v5398_v55  ;;  %v5262_v36 = vmul.f32 %v9043_v53, %v11684_v4  ;;  %v4721_v26 = vpop.xlane.xlu0 %4720 }
 0x59a   : > { %9048 = vrsqrt.f32 %v5005_v34  ;;  %v4876_v15 = vmul.f32 0.0078125, %v4721_v26 }
 0x59b   : > { %v5665_v31 = vmax.f32 %v5535_v54, 0.0  ;;  %v5399_v38 = vmul.f32 %v11960_v60, %v5262_v36 }
 0x59c   : > { %v9045_v46 = vpop.eup %9044  ;;  %v5006_v14 = vadd.f32 1e-05, %v4876_v15 }
 0x59d   : > { %v7498_v49 = vpack.c.bf16 %v5665_v31, %v5664_v13  ;;  %v5263_v12 = vmul.f32 %v9045_v46, %v11692_v52  ;;  %v4723_v2 = vpop.xlane.xlu1 %4722  ;;  %v5536_v42 = vadd.f32 %v11967_v47, %v5399_v38 }
 0x59e   : > { %9050 = vrsqrt.f32 %v5006_v14  ;;  %v4877_v18 = vmul.f32 0.0078125, %v4723_v2 }
 0x59f   : > { %7687 = vst [vmem:[%s11030_s21 + $0x188] sm:$0xff] %v7498_v49   ;;  %v5400_v4 = vmul.f32 %v11960_v60, %v5263_v12  ;;  %v5666_v48 = vmax.f32 %v5536_v42, 0.0 }
 0x5a0   : > { %v9047_v40 = vpop.eup %9046  ;;  %v5007_v57 = vadd.f32 1e-05, %v4877_v18 }
 0x5a1   : > { %v5537_v21 = vadd.f32 %v11967_v47, %v5400_v4  ;;  %v5264_v56 = vmul.f32 %v9047_v40, %v11701_v3  ;;  %v4725_v32 = vpop.xlane.xlu0 %4724 }
 0x5a2   : > { %9052 = vrsqrt.f32 %v5007_v57  ;;  %v4878_v33 = vmul.f32 0.0078125, %v4725_v32 }
 0x5a3   : > { %v5667_v52 = vmax.f32 %v5537_v21, 0.0  ;;  %v5401_v35 = vmul.f32 %v11960_v60, %v5264_v56 }
 0x5a4   : > { %v9049_v19 = vpop.eup %9048  ;;  %v5008_v22 = vadd.f32 1e-05, %v4878_v33 }
 0x5a5   : > { %v7503_v1 = vpack.c.bf16 %v5667_v52, %v5666_v48  ;;  %v5265_v27 = vmul.f32 %v9049_v19, %v11709_v28  ;;  %v4727_v30 = vpop.xlane.xlu1 %4726  ;;  %v5538_v7 = vadd.f32 %v11967_v47, %v5401_v35 }
 0x5a6   : > { %9054 = vrsqrt.f32 %v5008_v22  ;;  %v4879_v8 = vmul.f32 0.0078125, %v4727_v30 }
 0x5a7   : > { %7688 = vst [vmem:[%s11030_s21 + $0x190] sm:$0xff] %v7503_v1   ;;  %v5402_v3 = vmul.f32 %v11960_v60, %v5265_v27  ;;  %v5668_v15 = vmax.f32 %v5538_v7, 0.0 }
 0x5a8   : > { %v9051_v55 = vpop.eup %9050  ;;  %v5009_v53 = vadd.f32 1e-05, %v4879_v8 }
 0x5a9   : > { %v5539_v34 = vadd.f32 %v11967_v47, %v5402_v3  ;;  %v5266_v54 = vmul.f32 %v9051_v55, %v11718_v16  ;;  %v4729_v36 = vpop.xlane.xlu0 %4728 }
 0x5aa   : > { %9056 = vrsqrt.f32 %v5009_v53  ;;  %v4880_v26 = vmul.f32 0.0078125, %v4729_v36 }
 0x5ab   : > { %v5669_v28 = vmax.f32 %v5539_v34, 0.0  ;;  %v5403_v13 = vmul.f32 %v11960_v60, %v5266_v54 }
 0x5ac   : > { %v9053_v31 = vpop.eup %9052  ;;  %v5010_v38 = vadd.f32 1e-05, %v4880_v26 }
 0x5ad   : > { %v7508_v46 = vpack.c.bf16 %v5669_v28, %v5668_v15  ;;  %v5267_v14 = vmul.f32 %v9053_v31, %v11726_v20  ;;  %v4731_v49 = vpop.xlane.xlu1 %4730  ;;  %v5540_v2 = vadd.f32 %v11967_v47, %v5403_v13 }
 0x5ae   : > { %9058 = vrsqrt.f32 %v5010_v38  ;;  %v4881_v12 = vmul.f32 0.0078125, %v4731_v49 }
 0x5af   : > { %7689 = vst [vmem:[%s11030_s21 + $0x198] sm:$0xff] %v7508_v46   ;;  %v5404_v16 = vmul.f32 %v11960_v60, %v5267_v14  ;;  %v5670_v56 = vmax.f32 %v5540_v2, 0.0 }
 0x5b0   : > { %v9055_v18 = vpop.eup %9054  ;;  %v5011_v42 = vadd.f32 1e-05, %v4881_v12 }
 0x5b1   : > { %v5541_v4 = vadd.f32 %v11967_v47, %v5404_v16  ;;  %v5268_v40 = vmul.f32 %v9055_v18, %v11735_v62  ;;  %v4733_v57 = vpop.xlane.xlu0 %4732 }
 0x5b2   : > { %9060 = vrsqrt.f32 %v5011_v42  ;;  %v4882_v21 = vmul.f32 0.0078125, %v4733_v57 }
 0x5b3   : > { %v5671_v20 = vmax.f32 %v5541_v4, 0.0  ;;  %v5405_v32 = vmul.f32 %v11960_v60, %v5268_v40 }
 0x5b4   : > { %v9057_v33 = vpop.eup %9056  ;;  %v5012_v48 = vadd.f32 1e-05, %v4882_v21 }
 0x5b5   : > { %v7513_v52 = vpack.c.bf16 %v5671_v20, %v5670_v56  ;;  %v5269_v35 = vmul.f32 %v9057_v33, %v11743_v29  ;;  %v4735_v19 = vpop.xlane.xlu1 %4734  ;;  %v5542_v1 = vadd.f32 %v11967_v47, %v5405_v32 }
 0x5b6   : > { %9062 = vrsqrt.f32 %v5012_v48  ;;  %v4883_v22 = vmul.f32 0.0078125, %v4735_v19 }
 0x5b7   : > { %7690 = vst [vmem:[%s11030_s21 + $0x1a0] sm:$0xff] %v7513_v52   ;;  %v5406_v62 = vmul.f32 %v11960_v60, %v5269_v35  ;;  %v5672_v53 = vmax.f32 %v5542_v1, 0.0 }
 0x5b8   : > { %v9059_v27 = vpop.eup %9058  ;;  %v5013_v30 = vadd.f32 1e-05, %v4883_v22 }
 0x5b9   : > { %v5543_v8 = vadd.f32 %v11967_v47, %v5406_v62  ;;  %v5270_v7 = vmul.f32 %v9059_v27, %v11752_v6  ;;  %v4737_v3 = vpop.xlane.xlu0 %4736 }
 0x5ba   : > { %9064 = vrsqrt.f32 %v5013_v30  ;;  %v4884_v55 = vmul.f32 0.0078125, %v4737_v3 }
 0x5bb   : > { %v5673_v29 = vmax.f32 %v5543_v8, 0.0  ;;  %v5407_v34 = vmul.f32 %v11960_v60, %v5270_v7 }
 0x5bc   : > { %v9061_v54 = vpop.eup %9060  ;;  %v5014_v36 = vadd.f32 1e-05, %v4884_v55 }
 0x5bd   : > { %v7518_v26 = vpack.c.bf16 %v5673_v29, %v5672_v53  ;;  %v5271_v15 = vmul.f32 %v9061_v54, %v11760_v0  ;;  %v4739_v28 = vpop.xlane.xlu1 %4738  ;;  %v5544_v31 = vadd.f32 %v11967_v47, %v5407_v34 }
 0x5be   : > { %9066 = vrsqrt.f32 %v5014_v36  ;;  %v4885_v13 = vmul.f32 0.0078125, %v4739_v28 }
 0x5bf   : > { %7691 = vst [vmem:[%s11030_s21 + $0x1a8] sm:$0xff] %v7518_v26   ;;  %v5408_v6 = vmul.f32 %v11960_v60, %v5271_v15  ;;  %v5674_v16 = vmax.f32 %v5544_v31, 0.0 }
 0x5c0   : > { %v9063_v38 = vpop.eup %9062  ;;  %v5015_v46 = vadd.f32 1e-05, %v4885_v13 }
 0x5c1   : > { %v5545_v14 = vadd.f32 %v11967_v47, %v5408_v6  ;;  %v5272_v49 = vmul.f32 %v9063_v38, %v11769_v39  ;;  %v4741_v12 = vpop.xlane.xlu0 %4740 }
 0x5c2   : > { %9068 = vrsqrt.f32 %v5015_v46  ;;  %v4886_v2 = vmul.f32 0.0078125, %v4741_v12 }
 0x5c3   : > { %v5675_v0 = vmax.f32 %v5545_v14, 0.0  ;;  %v5409_v18 = vmul.f32 %v11960_v60, %v5272_v49 }
 0x5c4   : > { %v9065_v42 = vpop.eup %9064  ;;  %v5016_v4 = vadd.f32 1e-05, %v4886_v2 }
 0x5c5   : > { %v7523_v40 = vpack.c.bf16 %v5675_v0, %v5674_v16  ;;  %v5273_v57 = vmul.f32 %v9065_v42, %v11777_v11  ;;  %v4743_v21 = vpop.xlane.xlu1 %4742  ;;  %v5546_v20 = vadd.f32 %v11967_v47, %v5409_v18 }
 0x5c6   : > { %9070 = vrsqrt.f32 %v5016_v4  ;;  %v4887_v56 = vmul.f32 0.0078125, %v4743_v21 }
 0x5c7   : > { %7692 = vst [vmem:[%s11030_s21 + $0x1b0] sm:$0xff] %v7523_v40   ;;  %v5410_v39 = vmul.f32 %v11960_v60, %v5273_v57  ;;  %v5676_v35 = vmax.f32 %v5546_v20, 0.0 }
 0x5c8   : > { %v9067_v32 = vpop.eup %9066  ;;  %v5017_v33 = vadd.f32 1e-05, %v4887_v56 }
 0x5c9   : > { %v5547_v48 = vadd.f32 %v11967_v47, %v5410_v39  ;;  %v5274_v52 = vmul.f32 %v9067_v32, %v11786_v50 }
 0x5ca   : > { %9072 = vrsqrt.f32 %v5017_v33 }
 0x5cb   : > { %v5677_v19 = vmax.f32 %v5547_v48, 0.0  ;;  %v5411_v11 = vmul.f32 %v11960_v60, %v5274_v52  ;;  %v4745_v22 = vpop.xlane.xlu0 %4744 }
 0x5cc   : > { %v9069_v1 = vpop.eup %9068  ;;  %v4888_v62 = vmul.f32 0.0078125, %v4745_v22 }
 0x5cd   : > { %v7528_v27 = vpack.c.bf16 %v5677_v19, %v5676_v35  ;;  %v5275_v30 = vmul.f32 %v9069_v1, %v11794_v51  ;;  %v5548_v7 = vadd.f32 %v11967_v47, %v5411_v11 }
 0x5ce   : > { %v5018_v8 = vadd.f32 1e-05, %v4888_v62 }
 0x5cf   : > { %7693 = vst [vmem:[%s11030_s21 + $0x1b8] sm:$0xff] %v7528_v27   ;;  %v5412_v3 = vmul.f32 %v11960_v60, %v5275_v30  ;;  %v4747_v55 = vpop.xlane.xlu1 %4746  ;;  %v5678_v36 = vmax.f32 %v5548_v7, 0.0 }
 0x5d0   : > { %v9071_v53 = vpop.eup %9070  ;;  %9074 = vrsqrt.f32 %v5018_v8  ;;  %v4889_v50 = vmul.f32 0.0078125, %v4747_v55 }
 0x5d1   : > { %v5549_v29 = vadd.f32 %v11967_v47, %v5412_v3  ;;  %v5276_v34 = vmul.f32 %v9071_v53, %v11803_v63 }
 0x5d2   : > { %v5019_v54 = vadd.f32 1e-05, %v4889_v50 }
 0x5d3   : > { %v5679_v26 = vmax.f32 %v5549_v29, 0.0  ;;  %v5413_v51 = vmul.f32 %v11960_v60, %v5276_v34  ;;  %v4749_v15 = vpop.xlane.xlu0 %4748 }
 0x5d4   : > { %v9073_v28 = vpop.eup %9072  ;;  %9076 = vrsqrt.f32 %v5019_v54  ;;  %v4890_v13 = vmul.f32 0.0078125, %v4749_v15 }
 0x5d5   : > { %v7533_v31 = vpack.c.bf16 %v5679_v26, %v5678_v36  ;;  %v5277_v6 = vmul.f32 %v9073_v28, %v11811_v37  ;;  %v5550_v38 = vadd.f32 %v11967_v47, %v5413_v51 }
 0x5d6   : > { %v5020_v46 = vadd.f32 1e-05, %v4890_v13  ;;  %v4751_v14 = vpop.xlane.xlu1 %4750 }
 0x5d7   : > { %7694 = vst [vmem:[%s11030_s21 + $0x1c0] sm:$0xff] %v7533_v31   ;;  %v5414_v49 = vmul.f32 %v11960_v60, %v5277_v6  ;;  %v4891_v63 = vmul.f32 0.0078125, %v4751_v14  ;;  %v5680_v0 = vmax.f32 %v5550_v38, 0.0 }
 0x5d8   : > { %9078 = vrsqrt.f32 %v5020_v46 }
 0x5d9   : > { %v5551_v12 = vadd.f32 %v11967_v47, %v5414_v49  ;;  %v5021_v2 = vadd.f32 1e-05, %v4891_v63 }
 0x5da   : > { %v9075_v16 = vpop.eup %9074  ;;  %v4753_v18 = vpop.xlane.xlu0 %4752 }
 0x5db   : > { %v5681_v42 = vmax.f32 %v5551_v12, 0.0  ;;  %v5278_v4 = vmul.f32 %v9075_v16, %v11822_v41  ;;  %9080 = vrsqrt.f32 %v5021_v2  ;;  %v4892_v37 = vmul.f32 0.0078125, %v4753_v18 }
 0x5dd   : > { %v7538_v40 = vpack.c.bf16 %v5681_v42, %v5680_v0  ;;  %v5415_v57 = vmul.f32 %v11960_v60, %v5278_v4  ;;  %v5022_v21 = vadd.f32 1e-05, %v4892_v37 }
 0x5de   : > { %v9077_v56 = vpop.eup %9076  ;;  %v4755_v20 = vpop.xlane.xlu1 %4754 }
 0x5df   : > { %7695 = vst [vmem:[%s11030_s21 + $0x1c8] sm:$0xff] %v7538_v40   ;;  %v5279_v39 = vmul.f32 %v9077_v56, %v11830_v23  ;;  %9082 = vrsqrt.f32 %v5022_v21  ;;  %v4893_v32 = vmul.f32 0.0078125, %v4755_v20  ;;  %v5552_v33 = vadd.f32 %v11967_v47, %v5415_v57 }
 0x5e1   : > { %v5416_v48 = vmul.f32 %v11960_v60, %v5279_v39  ;;  %v5023_v52 = vadd.f32 1e-05, %v4893_v32  ;;  %v5682_v62 = vmax.f32 %v5552_v33, 0.0 }
 0x5e2   : > { %v9079_v35 = vpop.eup %9078  ;;  %v4757_v41 = vpop.xlane.xlu0 %4756 }
 0x5e3   : > { %v5553_v19 = vadd.f32 %v11967_v47, %v5416_v48  ;;  %v5280_v11 = vmul.f32 %v9079_v35, %v11839_v61  ;;  %9084 = vrsqrt.f32 %v5023_v52  ;;  %v4894_v22 = vmul.f32 0.0078125, %v4757_v41 }
 0x5e5   : > { %v9081_v1 = vpop.eup %9080  ;;  %v5683_v27 = vmax.f32 %v5553_v19, 0.0  ;;  %v5417_v23 = vmul.f32 %v11960_v60, %v5280_v11  ;;  %v5024_v30 = vadd.f32 1e-05, %v4894_v22 }
 0x5e6   : > { %v5281_v8 = vmul.f32 %v9081_v1, %v11845_v10  ;;  %v4759_v7 = vpop.xlane.xlu1 %4758 }
 0x5e7   : > { %v7543_v3 = vpack.c.bf16 %v5683_v27, %v5682_v62  ;;  %9086 = vrsqrt.f32 %v5024_v30  ;;  %v4895_v55 = vmul.f32 0.0078125, %v4759_v7  ;;  %v5554_v53 = vadd.f32 %v11967_v47, %v5417_v23 }
 0x5e8   : > { %v5418_v50 = vmul.f32 %v11960_v60, %v5281_v8 }
 0x5e9   : > { %v9083_v61 = vpop.eup %9082  ;;  %7696 = vst [vmem:[%s11030_s21 + $0x1d0] sm:$0xff] %v7543_v3   ;;  %v5025_v29 = vadd.f32 1e-05, %v4895_v55  ;;  %v5684_v10 = vmax.f32 %v5554_v53, 0.0 }
 0x5ea   : > { %v5555_v34 = vadd.f32 %v11967_v47, %v5418_v50  ;;  %v5282_v54 = vmul.f32 %v9083_v61, %v11854_v59  ;;  %v4761_v36 = vpop.xlane.xlu0 %4760 }
 0x5eb   : > { %9088 = vrsqrt.f32 %v5025_v29  ;;  %v4896_v26 = vmul.f32 0.0078125, %v4761_v36 }
 0x5ec   : > { %v5685_v51 = vmax.f32 %v5555_v34, 0.0  ;;  %v5419_v15 = vmul.f32 %v11960_v60, %v5282_v54 }
 0x5ed   : > { %v9085_v28 = vpop.eup %9084  ;;  %v5026_v13 = vadd.f32 1e-05, %v4896_v26 }
 0x5ee   : > { %v7548_v31 = vpack.c.bf16 %v5685_v51, %v5684_v10  ;;  %v5283_v6 = vmul.f32 %v9085_v28, %v11862_v58  ;;  %v4763_v38 = vpop.xlane.xlu1 %4762  ;;  %v5556_v14 = vadd.f32 %v11967_v47, %v5419_v15 }
 0x5ef   : > { %9090 = vrsqrt.f32 %v5026_v13  ;;  %v4897_v46 = vmul.f32 0.0078125, %v4763_v38 }
 0x5f0   : > { %7697 = vst [vmem:[%s11030_s21 + $0x1d8] sm:$0xff] %v7548_v31   ;;  %v5420_v59 = vmul.f32 %v11960_v60, %v5283_v6  ;;  %v5686_v18 = vmax.f32 %v5556_v14, 0.0 }
 0x5f1   : > { %v9087_v49 = vpop.eup %9086  ;;  %v5027_v63 = vadd.f32 1e-05, %v4897_v46 }
 0x5f2   : > { %v5557_v12 = vadd.f32 %v11967_v47, %v5420_v59  ;;  %v5284_v2 = vmul.f32 %v9087_v49, %v11871_v9  ;;  %v4765_v16 = vpop.xlane.xlu0 %4764 }
 0x5f3   : > { %9092 = vrsqrt.f32 %v5027_v63  ;;  %v4898_v0 = vmul.f32 0.0078125, %v4765_v16 }
 0x5f4   : > { %v5687_v58 = vmax.f32 %v5557_v12, 0.0  ;;  %v5421_v42 = vmul.f32 %v11960_v60, %v5284_v2 }
 0x5f5   : > { %v9089_v4 = vpop.eup %9088  ;;  %v5028_v37 = vadd.f32 1e-05, %v4898_v0 }
 0x5f6   : > { %v7553_v40 = vpack.c.bf16 %v5687_v58, %v5686_v18  ;;  %v5285_v57 = vmul.f32 %v9089_v4, %v11879_v17  ;;  %v4767_v21 = vpop.xlane.xlu1 %4766  ;;  %v5558_v20 = vadd.f32 %v11967_v47, %v5421_v42 }
 0x5f7   : > { %9094 = vrsqrt.f32 %v5028_v37  ;;  %v4899_v56 = vmul.f32 0.0078125, %v4767_v21 }
 0x5f8   : > { %7698 = vst [vmem:[%s11030_s21 + $0x1e0] sm:$0xff] %v7553_v40   ;;  %v5422_v9 = vmul.f32 %v11960_v60, %v5285_v57  ;;  %v4769_v39 = vpop.xlane.xlu0 %4768  ;;  %v5688_v11 = vmax.f32 %v5558_v20, 0.0 }
 0x5f9   : > { %v9091_v32 = vpop.eup %9090  ;;  %v5029_v33 = vadd.f32 1e-05, %v4899_v56  ;;  %v4900_v48 = vmul.f32 0.0078125, %v4769_v39 }
 0x5fa   : > { %v5559_v52 = vadd.f32 %v11967_v47, %v5422_v9  ;;  %v5286_v35 = vmul.f32 %v9091_v32, %v11888_v25  ;;  %v4771_v41 = vpop.xlane.xlu1 %4770 }
 0x5fb   : > { %9096 = vrsqrt.f32 %v5029_v33  ;;  %v5030_v17 = vadd.f32 1e-05, %v4900_v48  ;;  %v4901_v19 = vmul.f32 0.0078125, %v4771_v41 }
 0x5fc   : > { %v5689_v22 = vmax.f32 %v5559_v52, 0.0  ;;  %v5423_v1 = vmul.f32 %v11960_v60, %v5286_v35 }
 0x5fd   : > { %v9093_v62 = vpop.eup %9092  ;;  %9098 = vrsqrt.f32 %v5030_v17  ;;  %v5031_v27 = vadd.f32 1e-05, %v4901_v19 }
 0x5fe   : > { %v7558_v23 = vpack.c.bf16 %v5689_v22, %v5688_v11  ;;  %v5287_v30 = vmul.f32 %v9093_v62, %v11896_v24  ;;  %v5560_v8 = vadd.f32 %v11967_v47, %v5423_v1 }
 0x5ff   : > { %9100 = vrsqrt.f32 %v5031_v27 }
 0x600   : > { %7699 = vst [vmem:[%s11030_s21 + $0x1e8] sm:$0xff] %v7558_v23   ;;  %v5424_v25 = vmul.f32 %v11960_v60, %v5287_v30  ;;  %v5690_v53 = vmax.f32 %v5560_v8, 0.0 }
 0x601   : > { %v9095_v7 = vpop.eup %9094 }
 0x602   : > { %v5561_v3 = vadd.f32 %v11967_v47, %v5424_v25  ;;  %v5288_v55 = vmul.f32 %v9095_v7, %v11905_v43 }
 0x604   : > { %v5691_v50 = vmax.f32 %v5561_v3, 0.0  ;;  %v5425_v61 = vmul.f32 %v11960_v60, %v5288_v55 }
 0x605   : > { %v9097_v29 = vpop.eup %9096 }
 0x606   : > { %v7563_v34 = vpack.c.bf16 %v5691_v50, %v5690_v53  ;;  %v5289_v54 = vmul.f32 %v9097_v29, %v11913_v44  ;;  %v5562_v36 = vadd.f32 %v11967_v47, %v5425_v61 }
 0x607   : > { %v9099_v24 = vpop.eup %9098 }
 0x608   : > { %7700 = vst [vmem:[%s11030_s21 + $0x1f0] sm:$0xff] %v7563_v34   ;;  %v5426_v26 = vmul.f32 %v11960_v60, %v5289_v54  ;;  %v5290_v10 = vmul.f32 %v9099_v24, %v11917_v45  ;;  %v5692_v13 = vmax.f32 %v5562_v36, 0.0 }
 0x609   : > { %v9101_v43 = vpop.eup %9100 }
 0x60a   : > { %v5563_v51 = vadd.f32 %v11967_v47, %v5426_v26  ;;  %v5427_v15 = vmul.f32 %v11960_v60, %v5290_v10  ;;  %v5291_v28 = vmul.f32 %v9101_v43, %v11925_v5 }
 0x60c   : > { %v5693_v44 = vmax.f32 %v5563_v51, 0.0  ;;  %v5564_v31 = vadd.f32 %v11967_v47, %v5427_v15  ;;  %v5428_v6 = vmul.f32 %v11960_v60, %v5291_v28 }
 0x60e   : > { %v7568_v38 = vpack.c.bf16 %v5693_v44, %v5692_v13  ;;  %v5565_v46 = vadd.f32 %v11967_v47, %v5428_v6  ;;  %v5694_v14 = vmax.f32 %v5564_v31, 0.0  ;;  %6353 = sbr.rel (!%p9268_p5) target bundleno = 1585 (0x631), region = 60 }
 0x610   : > { %7701 = vst [vmem:[%s11030_s21 + $0x1f8] sm:$0xff] %v7568_v38   ;;  %v5695_v45 = vmax.f32 %v5565_v46, 0.0 }
 0x612   : > { %v7573_v59 = vpack.c.bf16 %v5695_v45, %v5694_v14 }
 0x614   : > { %7702 = vst [vmem:[%s11030_s21 + $0x200] sm:$0xff] %v7573_v59  }
 0x615   : > { %s12401_s24 = smov (!%p6356_p11, %s6355_s24), 130 }
 0x616   : > { %s12097_s26 = sshll.u32 %s12401_s24, 6 }
 0x617   : > { %s6360_s27 = ssub.s32 8320, %s12097_s26 }
 0x618   : > { %6361 = vsyncadd %s12092_s23, %s6360_s27  ;;  %p6853_p12 = scmp.ne.s32.totalorder %s12097_s26, 0  ;;  %s6989_s16 = smul.u32 8320, %s9251_s13 }
 0x619   : > { %s6366_s14 = sshll.u32 %s11030_s21, 4  ;;  %s9177_s22 = smov [#allocation2]   ;;  %s12109_s14 = int_to_ptr.vmem [resolvable:$true] %s6366_s14 }
 0x61a   : > { %s12107_s29 = scalar_lea.hbm %s12162_s9, %s6989_s16  ;;  %s9111_s25 = scalar_lea.vmem %s12109_s14, %s12097_s26 }
 0x61b   : > { %p9112_p13 = scmp.ne.s32.totalorder %s12109_s14, %s9111_s25  ;;  %s9115_s17 = sshll.u32 %s9177_s22, 4  ;;  %s9116_s17 = int_to_ptr.vmem [resolvable:$false] %s9115_s17 }
 0x61c   : > { %s9117_s13 = scalar_lea.vmem %s9116_s17, 16640  ;;  %p9118_p2 = scmp.lt.s32.totalorder %s12109_s14, %s9116_s17 }
 0x61d   : > { %p9113_p0 = pnand %p9112_p13, %p6853_p12  ;;  %p9119_p3 = scmp.lt.s32.totalorder %s9117_s13, %s9111_s25 }
 0x61f   : > { %p9114_p1 = pneg %p9113_p0  ;;  %p9120_p4 = por %p9119_p3, %p9118_p2 }
 0x621   : > { %p9121_p5 = pnand %p9120_p4, %p9114_p1 }
 0x623   : > { %9124 = shalt.err (!%p9121_p5)
}
 0x624   : > { %s9125_s21 = scalar_lea.hbm %s12107_s29, %s12097_s26  ;;  %s9129_s16 = scalar_lea.hbm %s12162_s9, 33088 }
 0x625   : > { %p9126_p7 = scmp.ne.s32.totalorder %s12107_s29, %s9125_s21  ;;  %p9130_p10 = scmp.lt.u32.totalorder %s12107_s29, %s12162_s9 }
 0x626   : > { %p9131_p11 = scmp.lt.u32.totalorder %s9129_s16, %s9125_s21  ;;  %p9133_p0 = scmp.lt.u32.totalorder %s9125_s21, %s12107_s29 }
 0x627   : > { %p9127_p8 = pnand %p9126_p7, %p6853_p12 }
 0x628   : > { %p9132_p13 = por %p9131_p11, %p9130_p10 }
 0x629   : > { %p9128_p9 = pneg %p9127_p8 }
 0x62a   : > { %p9134_p1 = por %p9133_p0, %p9132_p13 }
 0x62c   : > { %p9135_p2 = pnand %p9134_p1, %p9128_p9 }
 0x62e   : > { %9138 = shalt.err (!%p9135_p2)
}
 0x62f   : > { %s9178_s25 = smov 64   ;;  %s9179_s22 = smov 4  }
 0x630   : > { %6372 = dma.vmem_to_hbm [thread:$0]  (%p6853_p12), %s12109_s14, %s12097_s26, %s12107_s29, %s12092_s23, %s9178_s25, %s9178_s25, %s9179_s22  }
 0x631 PF: > { %p8728_p3 = scmp.ge.s32.totalorder %s9173_s12, 2  ;;  %s6381_s17 = sand.u32 1, %s9161_s30  }
 0x632   : > { %s6382_s13 = scalar_lea.sflag [#allocation3], %s6381_s17 }
 0x633   : > { %p8725_p4 = pnand %p8728_p3, %p9272_p6 }
 0x635   : > { %9156 = dma.done.wait (!%p8725_p4), %s6382_s13, 8320  }
 0x636   : > { %9158 = vsyncadd (!%p8725_p4), %s6382_s13, 4294958976  ;;  %p19_p5 = scmp.ge.s32.totalorder %s9255_s15, 6   ;;  %s12396_s30 = smov %s9165_s10 }
 0x637   : > { %s12397_s10 = smov %s9169_s11  ;;  %s12398_s11 = smov %s9266_s18 }
 0x638   : > { %s12399_s12 = smov %s9255_s15  ;;  %21 = sbr.rel (!%p19_p5) target bundleno = 3 (0x3), region = 94 }
 0x63f   :  { %6387 = vsyncpa [#allocation3], 1 }
 0x640   :  { %6389 = vsyncpa [#allocation3 + $0x1], 1 }

</bundles_post_ra>
